<compile_context>
chip_gen: v7x
topology: tpu7x:2x2x1
jax: 0.10.0
libtpu: 0.0.40
codegen_flags: <defaults>
</compile_context>

<pallas_src>
import functools

import jax
import jax.numpy as jnp
from jax.experimental import pallas as pl
from jax.experimental.pallas import tpu as pltpu

EPS = 1e-5


def _round_up(x, m):
    return (x + m - 1) // m * m


def _pick_vmem_limit():
    """Generation-aware scoped-VMEM limit (v5e/v6e: ~80 MiB, v7x: ~40 MiB)."""
    cap = 128 * 1024 * 1024
    try:
        cap = int(getattr(pltpu.get_tpu_info(), "vmem_capacity_bytes", cap))
    except Exception:
        pass
    return int(min(96 * 1024 * 1024, max(32 * 1024 * 1024, (cap * 5) // 8)))


# --------------------------------------------------------------------------------------
# in-kernel helpers
# --------------------------------------------------------------------------------------
def _stage_padded(pad_ref, interior, H, W, C):
    """Zero the (H+2, Wa, Cp) staging buffer (halo + extra cols + padded lanes) and write the
    real (H, W, C) data at rows 1..H, cols 1..W, lanes 0..C-1."""
    pad_ref[...] = jnp.zeros_like(pad_ref)
    pad_ref[1:1 + H, 1:1 + W, :C] = interior


def _conv3x3_accumulate(pad_ref, acc_ref, w_ref, H, Wa, Cp):
    """acc[h*Wa + w, :] = sum_{a,b} pad[h+a, w+b, :] @ w[a, b]   (valid for w < Wa-2).

    3 row slabs (leading-dim slices are free), 9 bf16 MXU matmuls, kw-shift applied to the
    f32 result with pltpu.roll (wrap-around only lands in discarded columns >= W).
    """
    M = H * Wa
    for a in range(3):
        slab = pad_ref[a:a + H, :, :].reshape(M, Cp).astype(jnp.bfloat16)
        part = jnp.dot(slab, w_ref[a, 0], preferred_element_type=jnp.float32)
        for b in (1, 2):
            p = jnp.dot(slab, w_ref[a, b], preferred_element_type=jnp.float32)
            part = part + pltpu.roll(p, shift=M - b, axis=0)   # result[k] = p[k + b]
        if a == 0:
            acc_ref[...] = part
        else:
            acc_ref[...] += part


def _emit_conv_outputs(acc_ref, y_ref, stats_ref, H, W, Wa, C, Cp):
    """Slice the valid (H, W) window, write bf16 C-channel output + f32 BN partial sums."""
    y = acc_ref[...].reshape(H, Wa, Cp)[:, :W, :]          # (H, W, Cp) f32, valid pixels only
    y_ref[0] = y[:, :, :C].astype(y_ref.dtype)
    yf = y.reshape(H * W, Cp)
    stats_ref[0, 0:1, :] = jnp.sum(yf, axis=0, keepdims=True)
    stats_ref[0, 1:2, :] = jnp.sum(yf * yf, axis=0, keepdims=True)


# --------------------------------------------------------------------------------------
# kernels (grid over the batch dim N, "parallel")
# --------------------------------------------------------------------------------------
def conv1_stats_kernel(H, W, Wa, C, Cp, x_ref, w_ref, y_ref, stats_ref, pad_ref, acc_ref):
    """conv3x3(x) of one image + per-image BN1 partial sums (halo built in-kernel)."""
    _stage_padded(pad_ref, x_ref[0], H, W, C)
    _conv3x3_accumulate(pad_ref, acc_ref, w_ref, H, Wa, Cp)
    _emit_conv_outputs(acc_ref, y_ref, stats_ref, H, W, Wa, C, Cp)


def bn_relu_conv_stats_kernel(H, W, Wa, C, Cp, y1_ref, scale_ref, shift_ref, w_ref,
                              y2_ref, stats_ref, pad_ref, acc_ref):
    """BN1 (folded scale/shift) + ReLU -> conv3x3 + per-image BN2 partial sums."""
    yn = jnp.maximum(y1_ref[0].astype(jnp.float32) * scale_ref[...] + shift_ref[...], 0.0)
    _stage_padded(pad_ref, yn, H, W, C)
    _conv3x3_accumulate(pad_ref, acc_ref, w_ref, H, Wa, Cp)
    _emit_conv_outputs(acc_ref, y2_ref, stats_ref, H, W, Wa, C, Cp)


def bn_residual_relu_kernel(y2_ref, scale_ref, shift_ref, x_ref, out_ref):
    """out = relu(BN2(conv2_out) + identity); only the real C channels touch HBM."""
    y2 = y2_ref[...].astype(jnp.float32)
    out_ref[...] = jnp.maximum(y2 * scale_ref[...] + shift_ref[...] + x_ref[...], 0.0)


# --------------------------------------------------------------------------------------
# wrapper
# --------------------------------------------------------------------------------------
def _prep_w(w_oihw, C, Cp):
    """OIHW -> (kh, kw, Cin, Cout), channel-pad to Cp, cast bf16 for the MXU."""
    w = jnp.transpose(w_oihw, (2, 3, 1, 0)).astype(jnp.float32)
    w = jnp.pad(w, ((0, 0), (0, 0), (0, Cp - C), (0, Cp - C)))
    return w.astype(jnp.bfloat16)


def _bn_scale_shift(stats, gamma, beta, m, C):
    """Fold global batch statistics into per-channel scale/shift (training-mode BN)."""
    s = jnp.sum(stats, axis=0)                              # (2, Cp) sum over images
    mean = s[0, :C] / m
    var = s[1, :C] / m - mean * mean                        # biased variance
    # TODO(synk): E[x^2]-E[x]^2 can lose precision if conv-output mean >> std.
    scale = gamma.astype(jnp.float32) * jax.lax.rsqrt(var + EPS)
    shift = beta.astype(jnp.float32) - mean * scale
    return scale.reshape(1, C), shift.reshape(1, C)


@jax.jit
def resblock_forward(x_nchw, w1_oihw, w2_oihw, g1, b1, g2, b2):
    """PyTorch-equivalent forward. x_nchw: (N, C, H, W); conv weights: (Cout, Cin, 3, 3)."""
    N, C, H, W = x_nchw.shape
    Cp = _round_up(C, 128)                                  # lane/MXU-aligned compute width
    Wa = _round_up(W + 2, 8)                                # sublane-aligned staged width
    Mpix = N * H * W

    x_nhwc = jnp.transpose(x_nchw, (0, 2, 3, 1)).astype(jnp.float32)   # (N, H, W, C)
    w1m = _prep_w(w1_oihw, C, Cp)
    w2m = _prep_w(w2_oihw, C, Cp)

    cparams = pltpu.CompilerParams(
        dimension_semantics=("parallel",),                  # split images across TensorCores
        vmem_limit_bytes=_pick_vmem_limit())
    conv_cost = pl.CostEstimate(
        flops=2 * N * 9 * H * Wa * Cp * Cp,
        transcendentals=0,
        bytes_accessed=6 * N * H * W * C + 2 * 9 * Cp * Cp + 8 * N * Cp)

    # TODO(synk): for very large H*W (e.g. 112x112) add a second, row-tiled grid axis with a
    # halo'd input window; per-image tiles keep VMEM < ~25 MB up to 112x112 so this suffices.
    act_f32_spec = pl.BlockSpec((1, H, W, C), lambda i: (i, 0, 0, 0))
    act_bf16_spec = pl.BlockSpec((1, H, W, C), lambda i: (i, 0, 0, 0))
    vec_spec = pl.BlockSpec((1, C), lambda i: (0, 0))
    w_spec = pl.BlockSpec((3, 3, Cp, Cp), lambda i: (0, 0, 0, 0))
    stats_spec = pl.BlockSpec((1, 2, Cp), lambda i: (i, 0, 0))

    scratch = [pltpu.VMEM((H + 2, Wa, Cp), jnp.float32),    # zero-halo staging buffer
               pltpu.VMEM((H * Wa, Cp), jnp.float32)]       # f32 conv accumulator

    # ---- pass 1: conv1 + BN1 batch-stat partial sums ----
    y1, s1 = pl.pallas_call(
        functools.partial(conv1_stats_kernel, H, W, Wa, C, Cp),
        grid=(N,),
        in_specs=[act_f32_spec, w_spec],
        out_specs=[act_bf16_spec, stats_spec],
        out_shape=[jax.ShapeDtypeStruct((N, H, W, C), jnp.bfloat16),
                   jax.ShapeDtypeStruct((N, 2, Cp), jnp.float32)],
        scratch_shapes=scratch,
        compiler_params=cparams,
        cost_estimate=conv_cost,
    )(x_nhwc, w1m)

    scale1, shift1 = _bn_scale_shift(s1, g1, b1, Mpix, C)

    # ---- pass 2: BN1 + ReLU -> conv2 + BN2 batch-stat partial sums ----
    y2, s2 = pl.pallas_call(
        functools.partial(bn_relu_conv_stats_kernel, H, W, Wa, C, Cp),
        grid=(N,),
        in_specs=[act_bf16_spec, vec_spec, vec_spec, w_spec],
        out_specs=[act_bf16_spec, stats_spec],
        out_shape=[jax.ShapeDtypeStruct((N, H, W, C), jnp.bfloat16),
                   jax.ShapeDtypeStruct((N, 2, Cp), jnp.float32)],
        scratch_shapes=scratch,
        compiler_params=cparams,
        cost_estimate=conv_cost,
    )(y1, scale1, shift1, w2m)

    scale2, shift2 = _bn_scale_shift(s2, g2, b2, Mpix, C)

    # ---- pass 3: BN2 + residual add + ReLU (C-channel output, no padded HBM tensor) ----
    out_nhwc = pl.pallas_call(
        bn_residual_relu_kernel,
        grid=(N,),
        in_specs=[act_bf16_spec, vec_spec, vec_spec, act_f32_spec],
        out_specs=act_f32_spec,
        out_shape=jax.ShapeDtypeStruct((N, H, W, C), jnp.float32),
        compiler_params=cparams,
    )(y2, scale2, shift2, x_nhwc)

    return jnp.transpose(out_nhwc, (0, 3, 1, 2))            # back to NCHW


# ---------------- pure-JAX f32 reference (for verification only) ----------------
def _bn_ref(y, gamma, beta):
    mean = jnp.mean(y, axis=(0, 1, 2), keepdims=True)
    var = jnp.mean((y - mean) ** 2, axis=(0, 1, 2), keepdims=True)
    return (y - mean) / jnp.sqrt(var + EPS) * gamma + beta


def _resblock_ref(x_nhwc, w1_hwio, w2_hwio, g1, b1, g2, b2):
    conv = lambda x, w: jax.lax.conv_general_dilated(
        x, w, window_strides=(1, 1), padding="SAME",
        dimension_numbers=("NHWC", "HWIO", "NHWC"))
    y = jnp.maximum(_bn_ref(conv(x_nhwc, w1_hwio), g1, b1), 0.0)
    y2 = _bn_ref(conv(y, w2_hwio), g2, b2)
    return jnp.maximum(y2 + x_nhwc, 0.0)


if __name__ == "__main__":
    key = jax.random.PRNGKey(0)
    ks = jax.random.split(key, 7)
    N, C, H, W = 2, 4, 16, 16   # in_planes = out_planes = 4, stride = 1, no downsample

    x = jax.random.normal(ks[0], (N, C, H, W), jnp.float32)
    w1 = 0.2 * jax.random.normal(ks[1], (C, C, 3, 3), jnp.float32)   # conv1 weight (OIHW)
    w2 = 0.2 * jax.random.normal(ks[2], (C, C, 3, 3), jnp.float32)   # conv2 weight (OIHW)
    g1 = 1.0 + 0.1 * jax.random.normal(ks[3], (C,), jnp.float32)
    b1 = 0.1 * jax.random.normal(ks[4], (C,), jnp.float32)
    g2 = 1.0 + 0.1 * jax.random.normal(ks[5], (C,), jnp.float32)
    b2 = 0.1 * jax.random.normal(ks[6], (C,), jnp.float32)

    out = jax.block_until_ready(resblock_forward(x, w1, w2, g1, b1, g2, b2))

    # verify against a plain-JAX f32 reference (kernel uses bf16 MXU inputs and bf16
    # inter-pass activations, so the tolerance is correspondingly loosened)
    x_nhwc = jnp.transpose(x, (0, 2, 3, 1))
    ref = _resblock_ref(x_nhwc,
                        jnp.transpose(w1, (2, 3, 1, 0)),
                        jnp.transpose(w2, (2, 3, 1, 0)),
                        g1, b1, g2, b2)
    ref = jnp.transpose(ref, (0, 3, 1, 2))
    max_err = float(jnp.max(jnp.abs(out - ref)))
    assert jnp.allclose(out, ref, atol=6e-2, rtol=6e-2), f"max abs err = {max_err}"

    # TODO(synk): BatchNorm running_mean/running_var updates (training-time side effect that
    # does not affect the forward output) are not modeled.
    print("KERNEL_OK")
</pallas_src>

<mosaic_0001>
module attributes {stable_mosaic.version = 11 : i64} {
  func.func @conv1_stats_kernel(%arg0: i32, %arg1: memref<1x16x16x4xf32, #tpu.memory_space<vmem>>, %arg2: memref<3x3x128x128xbf16, #tpu.memory_space<vmem>>, %arg3: memref<1x16x16x4xbf16, #tpu.memory_space<vmem>>, %arg4: memref<1x2x128xf32, #tpu.memory_space<vmem>>, %arg5: memref<18x24x128xf32, #tpu.memory_space<vmem>>, %arg6: memref<384x128xf32, #tpu.memory_space<vmem>>) attributes {dimension_semantics = [#tpu.dimension_semantics<parallel>], iteration_bounds = array<i64: 2>, scalar_prefetch = 0 : i64, scratch_operands = 2 : i64, tpu.core_type = #tpu.core_type<tc>, window_params = [{transform_indices = @transform_0, window_bounds = array<i64: 1, 16, 16, 4>}, {pipeline_mode = #tpu.pipeline_mode<synchronous>, transform_indices = @transform_1, window_bounds = array<i64: 3, 3, 128, 128>}, {transform_indices = @transform_2, window_bounds = array<i64: 1, 16, 16, 4>}, {transform_indices = @transform_3, window_bounds = array<i64: 1, 2, 128>}]} {
    %c0 = arith.constant 0 : index
    %c0_0 = arith.constant 0 : index
    %c0_1 = arith.constant 0 : index
    %c0_2 = arith.constant 0 : index
    %0 = vector.load %arg1[%c0, %c0_0, %c0_1, %c0_2] : memref<1x16x16x4xf32, #tpu.memory_space<vmem>>, vector<1x16x16x4xf32>
    %1 = vector.shape_cast %0 : vector<1x16x16x4xf32> to vector<16x16x4xf32>
    %cst = arith.constant 0.000000e+00 : f32
    %2 = vector.broadcast %cst : f32 to vector<18x24x128xf32>
    %c0_3 = arith.constant 0 : index
    %c0_4 = arith.constant 0 : index
    %c0_5 = arith.constant 0 : index
    %3 = vector.load %arg5[%c0_3, %c0_4, %c0_5] : memref<18x24x128xf32, #tpu.memory_space<vmem>>, vector<18x24x128xf32>
    tpu.vector_store %arg5[%c0_3, %c0_4, %c0_5], %2 {strides = array<i32>} : memref<18x24x128xf32, #tpu.memory_space<vmem>>, vector<18x24x128xf32>,
    %c1 = arith.constant 1 : index
    %c1_6 = arith.constant 1 : index
    %c0_7 = arith.constant 0 : index
    %4 = vector.load %arg5[%c1, %c1_6, %c0_7] : memref<18x24x128xf32, #tpu.memory_space<vmem>>, vector<16x16x4xf32>
    tpu.vector_store %arg5[%c1, %c1_6, %c0_7], %1 {strides = array<i32>} : memref<18x24x128xf32, #tpu.memory_space<vmem>>, vector<16x16x4xf32>,
    %c0_8 = arith.constant 0 : index
    %c0_9 = arith.constant 0 : index
    %c0_10 = arith.constant 0 : index
    %5 = vector.load %arg5[%c0_8, %c0_9, %c0_10] : memref<18x24x128xf32, #tpu.memory_space<vmem>>, vector<16x24x128xf32>
    %6 = vector.shape_cast %5 : vector<16x24x128xf32> to vector<384x128xf32>
    %7 = arith.truncf %6 : vector<384x128xf32> to vector<384x128xbf16>
    %c0_11 = arith.constant 0 : index
    %c0_12 = arith.constant 0 : index
    %c0_13 = arith.constant 0 : index
    %c0_14 = arith.constant 0 : index
    %8 = vector.load %arg2[%c0_11, %c0_12, %c0_13, %c0_14] : memref<3x3x128x128xbf16, #tpu.memory_space<vmem>>, vector<1x1x128x128xbf16>
    %9 = vector.shape_cast %8 : vector<1x1x128x128xbf16> to vector<128x128xbf16>
    %cst_15 = arith.constant dense<0.000000e+00> : vector<384x128xf32>
    %10 = tpu.matmul %7, %9, %cst_15 {dimension_numbers = #tpu.dot_dimension_numbers<[1], [0], [0], [1], [0, 0, 1, 1], [], []>} : vector<384x128xbf16>, vector<128x128xbf16>, vector<384x128xf32> -> vector<384x128xf32>
    %c0_16 = arith.constant 0 : index
    %c1_17 = arith.constant 1 : index
    %c0_18 = arith.constant 0 : index
    %c0_19 = arith.constant 0 : index
    %11 = vector.load %arg2[%c0_16, %c1_17, %c0_18, %c0_19] : memref<3x3x128x128xbf16, #tpu.memory_space<vmem>>, vector<1x1x128x128xbf16>
    %12 = vector.shape_cast %11 : vector<1x1x128x128xbf16> to vector<128x128xbf16>
    %cst_20 = arith.constant dense<0.000000e+00> : vector<384x128xf32>
    %13 = tpu.matmul %7, %12, %cst_20 {dimension_numbers = #tpu.dot_dimension_numbers<[1], [0], [0], [1], [0, 0, 1, 1], [], []>} : vector<384x128xbf16>, vector<128x128xbf16>, vector<384x128xf32> -> vector<384x128xf32>
    %c383_i32 = arith.constant 383 : i32
    %14 = tpu.dynamic_rotate %13 by %c383_i32 dim 0 : vector<384x128xf32>, i32 -> vector<384x128xf32>
    %15 = arith.addf %10, %14 : vector<384x128xf32>
    %c0_21 = arith.constant 0 : index
    %c2 = arith.constant 2 : index
    %c0_22 = arith.constant 0 : index
    %c0_23 = arith.constant 0 : index
    %16 = vector.load %arg2[%c0_21, %c2, %c0_22, %c0_23] : memref<3x3x128x128xbf16, #tpu.memory_space<vmem>>, vector<1x1x128x128xbf16>
    %17 = vector.shape_cast %16 : vector<1x1x128x128xbf16> to vector<128x128xbf16>
    %cst_24 = arith.constant dense<0.000000e+00> : vector<384x128xf32>
    %18 = tpu.matmul %7, %17, %cst_24 {dimension_numbers = #tpu.dot_dimension_numbers<[1], [0], [0], [1], [0, 0, 1, 1], [], []>} : vector<384x128xbf16>, vector<128x128xbf16>, vector<384x128xf32> -> vector<384x128xf32>
    %c382_i32 = arith.constant 382 : i32
    %19 = tpu.dynamic_rotate %18 by %c382_i32 dim 0 : vector<384x128xf32>, i32 -> vector<384x128xf32>
    %20 = arith.addf %15, %19 : vector<384x128xf32>
    %c0_25 = arith.constant 0 : index
    %c0_26 = arith.constant 0 : index
    %21 = vector.load %arg6[%c0_25, %c0_26] : memref<384x128xf32, #tpu.memory_space<vmem>>, vector<384x128xf32>
    tpu.vector_store %arg6[%c0_25, %c0_26], %20 {strides = array<i32>} : memref<384x128xf32, #tpu.memory_space<vmem>>, vector<384x128xf32>,
    %c1_27 = arith.constant 1 : index
    %c0_28 = arith.constant 0 : index
    %c0_29 = arith.constant 0 : index
    %22 = vector.load %arg5[%c1_27, %c0_28, %c0_29] : memref<18x24x128xf32, #tpu.memory_space<vmem>>, vector<16x24x128xf32>
    %23 = vector.shape_cast %22 : vector<16x24x128xf32> to vector<384x128xf32>
    %24 = arith.truncf %23 : vector<384x128xf32> to vector<384x128xbf16>
    %c1_30 = arith.constant 1 : index
    %c0_31 = arith.constant 0 : index
    %c0_32 = arith.constant 0 : index
    %c0_33 = arith.constant 0 : index
    %25 = vector.load %arg2[%c1_30, %c0_31, %c0_32, %c0_33] : memref<3x3x128x128xbf16, #tpu.memory_space<vmem>>, vector<1x1x128x128xbf16>
    %26 = vector.shape_cast %25 : vector<1x1x128x128xbf16> to vector<128x128xbf16>
    %cst_34 = arith.constant dense<0.000000e+00> : vector<384x128xf32>
    %27 = tpu.matmul %24, %26, %cst_34 {dimension_numbers = #tpu.dot_dimension_numbers<[1], [0], [0], [1], [0, 0, 1, 1], [], []>} : vector<384x128xbf16>, vector<128x128xbf16>, vector<384x128xf32> -> vector<384x128xf32>
    %c1_35 = arith.constant 1 : index
    %c1_36 = arith.constant 1 : index
    %c0_37 = arith.constant 0 : index
    %c0_38 = arith.constant 0 : index
    %28 = vector.load %arg2[%c1_35, %c1_36, %c0_37, %c0_38] : memref<3x3x128x128xbf16, #tpu.memory_space<vmem>>, vector<1x1x128x128xbf16>
    %29 = vector.shape_cast %28 : vector<1x1x128x128xbf16> to vector<128x128xbf16>
    %cst_39 = arith.constant dense<0.000000e+00> : vector<384x128xf32>
    %30 = tpu.matmul %24, %29, %cst_39 {dimension_numbers = #tpu.dot_dimension_numbers<[1], [0], [0], [1], [0, 0, 1, 1], [], []>} : vector<384x128xbf16>, vector<128x128xbf16>, vector<384x128xf32> -> vector<384x128xf32>
    %c383_i32_40 = arith.constant 383 : i32
    %31 = tpu.dynamic_rotate %30 by %c383_i32_40 dim 0 : vector<384x128xf32>, i32 -> vector<384x128xf32>
    %32 = arith.addf %27, %31 : vector<384x128xf32>
    %c1_41 = arith.constant 1 : index
    %c2_42 = arith.constant 2 : index
    %c0_43 = arith.constant 0 : index
    %c0_44 = arith.constant 0 : index
    %33 = vector.load %arg2[%c1_41, %c2_42, %c0_43, %c0_44] : memref<3x3x128x128xbf16, #tpu.memory_space<vmem>>, vector<1x1x128x128xbf16>
    %34 = vector.shape_cast %33 : vector<1x1x128x128xbf16> to vector<128x128xbf16>
    %cst_45 = arith.constant dense<0.000000e+00> : vector<384x128xf32>
    %35 = tpu.matmul %24, %34, %cst_45 {dimension_numbers = #tpu.dot_dimension_numbers<[1], [0], [0], [1], [0, 0, 1, 1], [], []>} : vector<384x128xbf16>, vector<128x128xbf16>, vector<384x128xf32> -> vector<384x128xf32>
    %c382_i32_46 = arith.constant 382 : i32
    %36 = tpu.dynamic_rotate %35 by %c382_i32_46 dim 0 : vector<384x128xf32>, i32 -> vector<384x128xf32>
    %37 = arith.addf %32, %36 : vector<384x128xf32>
    %c0_47 = arith.constant 0 : index
    %c0_48 = arith.constant 0 : index
    %38 = vector.load %arg6[%c0_47, %c0_48] : memref<384x128xf32, #tpu.memory_space<vmem>>, vector<384x128xf32>
    %39 = arith.addf %38, %37 : vector<384x128xf32>
    %c0_49 = arith.constant 0 : index
    %c0_50 = arith.constant 0 : index
    %40 = vector.load %arg6[%c0_49, %c0_50] : memref<384x128xf32, #tpu.memory_space<vmem>>, vector<384x128xf32>
    tpu.vector_store %arg6[%c0_49, %c0_50], %39 {strides = array<i32>} : memref<384x128xf32, #tpu.memory_space<vmem>>, vector<384x128xf32>,
    %c2_51 = arith.constant 2 : index
    %c0_52 = arith.constant 0 : index
    %c0_53 = arith.constant 0 : index
    %41 = vector.load %arg5[%c2_51, %c0_52, %c0_53] : memref<18x24x128xf32, #tpu.memory_space<vmem>>, vector<16x24x128xf32>
    %42 = vector.shape_cast %41 : vector<16x24x128xf32> to vector<384x128xf32>
    %43 = arith.truncf %42 : vector<384x128xf32> to vector<384x128xbf16>
    %c2_54 = arith.constant 2 : index
    %c0_55 = arith.constant 0 : index
    %c0_56 = arith.constant 0 : index
    %c0_57 = arith.constant 0 : index
    %44 = vector.load %arg2[%c2_54, %c0_55, %c0_56, %c0_57] : memref<3x3x128x128xbf16, #tpu.memory_space<vmem>>, vector<1x1x128x128xbf16>
    %45 = vector.shape_cast %44 : vector<1x1x128x128xbf16> to vector<128x128xbf16>
    %cst_58 = arith.constant dense<0.000000e+00> : vector<384x128xf32>
    %46 = tpu.matmul %43, %45, %cst_58 {dimension_numbers = #tpu.dot_dimension_numbers<[1], [0], [0], [1], [0, 0, 1, 1], [], []>} : vector<384x128xbf16>, vector<128x128xbf16>, vector<384x128xf32> -> vector<384x128xf32>
    %c2_59 = arith.constant 2 : index
    %c1_60 = arith.constant 1 : index
    %c0_61 = arith.constant 0 : index
    %c0_62 = arith.constant 0 : index
    %47 = vector.load %arg2[%c2_59, %c1_60, %c0_61, %c0_62] : memref<3x3x128x128xbf16, #tpu.memory_space<vmem>>, vector<1x1x128x128xbf16>
    %48 = vector.shape_cast %47 : vector<1x1x128x128xbf16> to vector<128x128xbf16>
    %cst_63 = arith.constant dense<0.000000e+00> : vector<384x128xf32>
    %49 = tpu.matmul %43, %48, %cst_63 {dimension_numbers = #tpu.dot_dimension_numbers<[1], [0], [0], [1], [0, 0, 1, 1], [], []>} : vector<384x128xbf16>, vector<128x128xbf16>, vector<384x128xf32> -> vector<384x128xf32>
    %c383_i32_64 = arith.constant 383 : i32
    %50 = tpu.dynamic_rotate %49 by %c383_i32_64 dim 0 : vector<384x128xf32>, i32 -> vector<384x128xf32>
    %51 = arith.addf %46, %50 : vector<384x128xf32>
    %c2_65 = arith.constant 2 : index
    %c2_66 = arith.constant 2 : index
    %c0_67 = arith.constant 0 : index
    %c0_68 = arith.constant 0 : index
    %52 = vector.load %arg2[%c2_65, %c2_66, %c0_67, %c0_68] : memref<3x3x128x128xbf16, #tpu.memory_space<vmem>>, vector<1x1x128x128xbf16>
    %53 = vector.shape_cast %52 : vector<1x1x128x128xbf16> to vector<128x128xbf16>
    %cst_69 = arith.constant dense<0.000000e+00> : vector<384x128xf32>
    %54 = tpu.matmul %43, %53, %cst_69 {dimension_numbers = #tpu.dot_dimension_numbers<[1], [0], [0], [1], [0, 0, 1, 1], [], []>} : vector<384x128xbf16>, vector<128x128xbf16>, vector<384x128xf32> -> vector<384x128xf32>
    %c382_i32_70 = arith.constant 382 : i32
    %55 = tpu.dynamic_rotate %54 by %c382_i32_70 dim 0 : vector<384x128xf32>, i32 -> vector<384x128xf32>
    %56 = arith.addf %51, %55 : vector<384x128xf32>
    %c0_71 = arith.constant 0 : index
    %c0_72 = arith.constant 0 : index
    %57 = vector.load %arg6[%c0_71, %c0_72] : memref<384x128xf32, #tpu.memory_space<vmem>>, vector<384x128xf32>
    %58 = arith.addf %57, %56 : vector<384x128xf32>
    %c0_73 = arith.constant 0 : index
    %c0_74 = arith.constant 0 : index
    %59 = vector.load %arg6[%c0_73, %c0_74] : memref<384x128xf32, #tpu.memory_space<vmem>>, vector<384x128xf32>
    tpu.vector_store %arg6[%c0_73, %c0_74], %58 {strides = array<i32>} : memref<384x128xf32, #tpu.memory_space<vmem>>, vector<384x128xf32>,
    %c0_75 = arith.constant 0 : index
    %c0_76 = arith.constant 0 : index
    %60 = vector.load %arg6[%c0_75, %c0_76] : memref<384x128xf32, #tpu.memory_space<vmem>>, vector<384x128xf32>
    %61 = vector.shape_cast %60 : vector<384x128xf32> to vector<16x24x128xf32>
    %62 = vector.extract_strided_slice %61 {offsets = [0, 0, 0], sizes = [16, 16, 128], strides = [1, 1, 1]} : vector<16x24x128xf32> to vector<16x16x128xf32>
    %63 = vector.extract_strided_slice %62 {offsets = [0, 0, 0], sizes = [16, 16, 4], strides = [1, 1, 1]} : vector<16x16x128xf32> to vector<16x16x4xf32>
    %64 = arith.truncf %63 : vector<16x16x4xf32> to vector<16x16x4xbf16>
    %c0_77 = arith.constant 0 : index
    %c0_78 = arith.constant 0 : index
    %c0_79 = arith.constant 0 : index
    %c0_80 = arith.constant 0 : index
    %65 = vector.load %arg3[%c0_77, %c0_78, %c0_79, %c0_80] : memref<1x16x16x4xbf16, #tpu.memory_space<vmem>>, vector<1x16x16x4xbf16>
    %66 = vector.shape_cast %65 : vector<1x16x16x4xbf16> to vector<16x16x4xbf16>
    %67 = vector.shape_cast %64 : vector<16x16x4xbf16> to vector<1x16x16x4xbf16>
    tpu.vector_store %arg3[%c0_77, %c0_78, %c0_79, %c0_80], %67 {strides = array<i32>} : memref<1x16x16x4xbf16, #tpu.memory_space<vmem>>, vector<1x16x16x4xbf16>,
    %68 = vector.shape_cast %62 : vector<16x16x128xf32> to vector<256x128xf32>
    %cst_81 = arith.constant dense<0.000000e+00> : vector<128xf32>
    %69 = vector.multi_reduction <add>, %68, %cst_81 [0] : vector<256x128xf32> to vector<128xf32>
    %70 = vector.shape_cast %69 : vector<128xf32> to vector<1x128xf32>
    %c0_82 = arith.constant 0 : index
    %c0_83 = arith.constant 0 : index
    %c0_84 = arith.constant 0 : index
    %71 = vector.load %arg4[%c0_82, %c0_83, %c0_84] : memref<1x2x128xf32, #tpu.memory_space<vmem>>, vector<1x1x128xf32>
    %72 = vector.shape_cast %71 : vector<1x1x128xf32> to vector<1x128xf32>
    %73 = vector.shape_cast %70 : vector<1x128xf32> to vector<1x1x128xf32>
    tpu.vector_store %arg4[%c0_82, %c0_83, %c0_84], %73 {strides = array<i32>} : memref<1x2x128xf32, #tpu.memory_space<vmem>>, vector<1x1x128xf32>,
    %74 = arith.mulf %68, %68 : vector<256x128xf32>
    %cst_85 = arith.constant dense<0.000000e+00> : vector<128xf32>
    %75 = vector.multi_reduction <add>, %74, %cst_85 [0] : vector<256x128xf32> to vector<128xf32>
    %76 = vector.shape_cast %75 : vector<128xf32> to vector<1x128xf32>
    %c0_86 = arith.constant 0 : index
    %c1_87 = arith.constant 1 : index
    %c0_88 = arith.constant 0 : index
    %77 = vector.load %arg4[%c0_86, %c1_87, %c0_88] : memref<1x2x128xf32, #tpu.memory_space<vmem>>, vector<1x1x128xf32>
    %78 = vector.shape_cast %77 : vector<1x1x128xf32> to vector<1x128xf32>
    %79 = vector.shape_cast %76 : vector<1x128xf32> to vector<1x1x128xf32>
    tpu.vector_store %arg4[%c0_86, %c1_87, %c0_88], %79 {strides = array<i32>} : memref<1x2x128xf32, #tpu.memory_space<vmem>>, vector<1x1x128xf32>,
    return
  }
  func.func @transform_0(%arg0: i32) -> (i32, i32, i32, i32) {
    %c0_i32 = arith.constant 0 : i32
    %c0_i32_0 = arith.constant 0 : i32
    %c0_i32_1 = arith.constant 0 : i32
    %c0_i32_2 = arith.constant 0 : i32
    return %arg0, %c0_i32, %c0_i32_0, %c0_i32_1 : i32, i32, i32, i32
  }
  func.func @transform_1(%arg0: i32) -> (i32, i32, i32, i32) {
    %c0_i32 = arith.constant 0 : i32
    %c0_i32_0 = arith.constant 0 : i32
    %c0_i32_1 = arith.constant 0 : i32
    %c0_i32_2 = arith.constant 0 : i32
    %c0_i32_3 = arith.constant 0 : i32
    return %c0_i32, %c0_i32_0, %c0_i32_1, %c0_i32_2 : i32, i32, i32, i32
  }
  func.func @transform_2(%arg0: i32) -> (i32, i32, i32, i32) {
    %c0_i32 = arith.constant 0 : i32
    %c0_i32_0 = arith.constant 0 : i32
    %c0_i32_1 = arith.constant 0 : i32
    %c0_i32_2 = arith.constant 0 : i32
    return %arg0, %c0_i32, %c0_i32_0, %c0_i32_1 : i32, i32, i32, i32
  }
  func.func @transform_3(%arg0: i32) -> (i32, i32, i32) {
    %c0_i32 = arith.constant 0 : i32
    %c0_i32_0 = arith.constant 0 : i32
    %c0_i32_1 = arith.constant 0 : i32
    return %arg0, %c0_i32, %c0_i32_0 : i32, i32, i32
  }
}

module attributes {stable_mosaic.version = 11 : i64} {
  func.func @bn_residual_relu_kernel(%arg0: i32, %arg1: memref<1x16x16x4xbf16, #tpu.memory_space<vmem>>, %arg2: memref<1x4xf32, #tpu.memory_space<vmem>>, %arg3: memref<1x4xf32, #tpu.memory_space<vmem>>, %arg4: memref<1x16x16x4xf32, #tpu.memory_space<vmem>>, %arg5: memref<1x16x16x4xf32, #tpu.memory_space<vmem>>) attributes {dimension_semantics = [#tpu.dimension_semantics<parallel>], iteration_bounds = array<i64: 2>, scalar_prefetch = 0 : i64, scratch_operands = 0 : i64, tpu.core_type = #tpu.core_type<tc>, window_params = [{transform_indices = @transform_0, window_bounds = array<i64: 1, 16, 16, 4>}, {pipeline_mode = #tpu.pipeline_mode<synchronous>, transform_indices = @transform_1, window_bounds = array<i64: 1, 4>}, {pipeline_mode = #tpu.pipeline_mode<synchronous>, transform_indices = @transform_2, window_bounds = array<i64: 1, 4>}, {transform_indices = @transform_3, window_bounds = array<i64: 1, 16, 16, 4>}, {transform_indices = @transform_4, window_bounds = array<i64: 1, 16, 16, 4>}]} {
    %c0 = arith.constant 0 : index
    %c0_0 = arith.constant 0 : index
    %c0_1 = arith.constant 0 : index
    %c0_2 = arith.constant 0 : index
    %0 = vector.load %arg1[%c0, %c0_0, %c0_1, %c0_2] : memref<1x16x16x4xbf16, #tpu.memory_space<vmem>>, vector<1x16x16x4xbf16>
    %1 = arith.extf %0 : vector<1x16x16x4xbf16> to vector<1x16x16x4xf32>
    %c0_3 = arith.constant 0 : index
    %c0_4 = arith.constant 0 : index
    %2 = vector.load %arg2[%c0_3, %c0_4] : memref<1x4xf32, #tpu.memory_space<vmem>>, vector<1x4xf32>
    %3 = vector.shape_cast %2 : vector<1x4xf32> to vector<1x1x1x4xf32>
    %4 = vector.broadcast %3 : vector<1x1x1x4xf32> to vector<1x16x16x4xf32>
    %5 = arith.mulf %1, %4 : vector<1x16x16x4xf32>
    %c0_5 = arith.constant 0 : index
    %c0_6 = arith.constant 0 : index
    %6 = vector.load %arg3[%c0_5, %c0_6] : memref<1x4xf32, #tpu.memory_space<vmem>>, vector<1x4xf32>
    %7 = vector.shape_cast %6 : vector<1x4xf32> to vector<1x1x1x4xf32>
    %8 = vector.broadcast %7 : vector<1x1x1x4xf32> to vector<1x16x16x4xf32>
    %9 = arith.addf %5, %8 : vector<1x16x16x4xf32>
    %c0_7 = arith.constant 0 : index
    %c0_8 = arith.constant 0 : index
    %c0_9 = arith.constant 0 : index
    %c0_10 = arith.constant 0 : index
    %10 = vector.load %arg4[%c0_7, %c0_8, %c0_9, %c0_10] : memref<1x16x16x4xf32, #tpu.memory_space<vmem>>, vector<1x16x16x4xf32>
    %11 = arith.addf %9, %10 : vector<1x16x16x4xf32>
    %cst = arith.constant 0.000000e+00 : f32
    %12 = vector.broadcast %cst : f32 to vector<1x16x16x4xf32>
    %13 = arith.maximumf %11, %12 : vector<1x16x16x4xf32>
    %c0_11 = arith.constant 0 : index
    %c0_12 = arith.constant 0 : index
    %c0_13 = arith.constant 0 : index
    %c0_14 = arith.constant 0 : index
    %14 = vector.load %arg5[%c0_11, %c0_12, %c0_13, %c0_14] : memref<1x16x16x4xf32, #tpu.memory_space<vmem>>, vector<1x16x16x4xf32>
    tpu.vector_store %arg5[%c0_11, %c0_12, %c0_13, %c0_14], %13 {strides = array<i32>} : memref<1x16x16x4xf32, #tpu.memory_space<vmem>>, vector<1x16x16x4xf32>,
    return
  }
  func.func @transform_0(%arg0: i32) -> (i32, i32, i32, i32) {
    %c0_i32 = arith.constant 0 : i32
    %c0_i32_0 = arith.constant 0 : i32
    %c0_i32_1 = arith.constant 0 : i32
    %c0_i32_2 = arith.constant 0 : i32
    return %arg0, %c0_i32, %c0_i32_0, %c0_i32_1 : i32, i32, i32, i32
  }
  func.func @transform_1(%arg0: i32) -> (i32, i32) {
    %c0_i32 = arith.constant 0 : i32
    %c0_i32_0 = arith.constant 0 : i32
    %c0_i32_1 = arith.constant 0 : i32
    return %c0_i32, %c0_i32_0 : i32, i32
  }
  func.func @transform_2(%arg0: i32) -> (i32, i32) {
    %c0_i32 = arith.constant 0 : i32
    %c0_i32_0 = arith.constant 0 : i32
    %c0_i32_1 = arith.constant 0 : i32
    return %c0_i32, %c0_i32_0 : i32, i32
  }
  func.func @transform_3(%arg0: i32) -> (i32, i32, i32, i32) {
    %c0_i32 = arith.constant 0 : i32
    %c0_i32_0 = arith.constant 0 : i32
    %c0_i32_1 = arith.constant 0 : i32
    %c0_i32_2 = arith.constant 0 : i32
    return %arg0, %c0_i32, %c0_i32_0, %c0_i32_1 : i32, i32, i32, i32
  }
  func.func @transform_4(%arg0: i32) -> (i32, i32, i32, i32) {
    %c0_i32 = arith.constant 0 : i32
    %c0_i32_0 = arith.constant 0 : i32
    %c0_i32_1 = arith.constant 0 : i32
    %c0_i32_2 = arith.constant 0 : i32
    return %arg0, %c0_i32, %c0_i32_0, %c0_i32_1 : i32, i32, i32, i32
  }
}

module attributes {stable_mosaic.version = 11 : i64} {
  func.func @bn_relu_conv_stats_kernel(%arg0: i32, %arg1: memref<1x16x16x4xbf16, #tpu.memory_space<vmem>>, %arg2: memref<1x4xf32, #tpu.memory_space<vmem>>, %arg3: memref<1x4xf32, #tpu.memory_space<vmem>>, %arg4: memref<3x3x128x128xbf16, #tpu.memory_space<vmem>>, %arg5: memref<1x16x16x4xbf16, #tpu.memory_space<vmem>>, %arg6: memref<1x2x128xf32, #tpu.memory_space<vmem>>, %arg7: memref<18x24x128xf32, #tpu.memory_space<vmem>>, %arg8: memref<384x128xf32, #tpu.memory_space<vmem>>) attributes {dimension_semantics = [#tpu.dimension_semantics<parallel>], iteration_bounds = array<i64: 2>, scalar_prefetch = 0 : i64, scratch_operands = 2 : i64, tpu.core_type = #tpu.core_type<tc>, window_params = [{transform_indices = @transform_0, window_bounds = array<i64: 1, 16, 16, 4>}, {pipeline_mode = #tpu.pipeline_mode<synchronous>, transform_indices = @transform_1, window_bounds = array<i64: 1, 4>}, {pipeline_mode = #tpu.pipeline_mode<synchronous>, transform_indices = @transform_2, window_bounds = array<i64: 1, 4>}, {pipeline_mode = #tpu.pipeline_mode<synchronous>, transform_indices = @transform_3, window_bounds = array<i64: 3, 3, 128, 128>}, {transform_indices = @transform_4, window_bounds = array<i64: 1, 16, 16, 4>}, {transform_indices = @transform_5, window_bounds = array<i64: 1, 2, 128>}]} {
    %c0 = arith.constant 0 : index
    %c0_0 = arith.constant 0 : index
    %c0_1 = arith.constant 0 : index
    %c0_2 = arith.constant 0 : index
    %0 = vector.load %arg1[%c0, %c0_0, %c0_1, %c0_2] : memref<1x16x16x4xbf16, #tpu.memory_space<vmem>>, vector<1x16x16x4xbf16>
    %1 = vector.shape_cast %0 : vector<1x16x16x4xbf16> to vector<16x16x4xbf16>
    %2 = arith.extf %1 : vector<16x16x4xbf16> to vector<16x16x4xf32>
    %c0_3 = arith.constant 0 : index
    %c0_4 = arith.constant 0 : index
    %3 = vector.load %arg2[%c0_3, %c0_4] : memref<1x4xf32, #tpu.memory_space<vmem>>, vector<1x4xf32>
    %4 = vector.shape_cast %3 : vector<1x4xf32> to vector<1x1x4xf32>
    %5 = vector.broadcast %4 : vector<1x1x4xf32> to vector<16x16x4xf32>
    %6 = arith.mulf %2, %5 : vector<16x16x4xf32>
    %c0_5 = arith.constant 0 : index
    %c0_6 = arith.constant 0 : index
    %7 = vector.load %arg3[%c0_5, %c0_6] : memref<1x4xf32, #tpu.memory_space<vmem>>, vector<1x4xf32>
    %8 = vector.shape_cast %7 : vector<1x4xf32> to vector<1x1x4xf32>
    %9 = vector.broadcast %8 : vector<1x1x4xf32> to vector<16x16x4xf32>
    %10 = arith.addf %6, %9 : vector<16x16x4xf32>
    %cst = arith.constant 0.000000e+00 : f32
    %11 = vector.broadcast %cst : f32 to vector<16x16x4xf32>
    %12 = arith.maximumf %10, %11 : vector<16x16x4xf32>
    %cst_7 = arith.constant 0.000000e+00 : f32
    %13 = vector.broadcast %cst_7 : f32 to vector<18x24x128xf32>
    %c0_8 = arith.constant 0 : index
    %c0_9 = arith.constant 0 : index
    %c0_10 = arith.constant 0 : index
    %14 = vector.load %arg7[%c0_8, %c0_9, %c0_10] : memref<18x24x128xf32, #tpu.memory_space<vmem>>, vector<18x24x128xf32>
    tpu.vector_store %arg7[%c0_8, %c0_9, %c0_10], %13 {strides = array<i32>} : memref<18x24x128xf32, #tpu.memory_space<vmem>>, vector<18x24x128xf32>,
    %c1 = arith.constant 1 : index
    %c1_11 = arith.constant 1 : index
    %c0_12 = arith.constant 0 : index
    %15 = vector.load %arg7[%c1, %c1_11, %c0_12] : memref<18x24x128xf32, #tpu.memory_space<vmem>>, vector<16x16x4xf32>
    tpu.vector_store %arg7[%c1, %c1_11, %c0_12], %12 {strides = array<i32>} : memref<18x24x128xf32, #tpu.memory_space<vmem>>, vector<16x16x4xf32>,
    %c0_13 = arith.constant 0 : index
    %c0_14 = arith.constant 0 : index
    %c0_15 = arith.constant 0 : index
    %16 = vector.load %arg7[%c0_13, %c0_14, %c0_15] : memref<18x24x128xf32, #tpu.memory_space<vmem>>, vector<16x24x128xf32>
    %17 = vector.shape_cast %16 : vector<16x24x128xf32> to vector<384x128xf32>
    %18 = arith.truncf %17 : vector<384x128xf32> to vector<384x128xbf16>
    %c0_16 = arith.constant 0 : index
    %c0_17 = arith.constant 0 : index
    %c0_18 = arith.constant 0 : index
    %c0_19 = arith.constant 0 : index
    %19 = vector.load %arg4[%c0_16, %c0_17, %c0_18, %c0_19] : memref<3x3x128x128xbf16, #tpu.memory_space<vmem>>, vector<1x1x128x128xbf16>
    %20 = vector.shape_cast %19 : vector<1x1x128x128xbf16> to vector<128x128xbf16>
    %cst_20 = arith.constant dense<0.000000e+00> : vector<384x128xf32>
    %21 = tpu.matmul %18, %20, %cst_20 {dimension_numbers = #tpu.dot_dimension_numbers<[1], [0], [0], [1], [0, 0, 1, 1], [], []>} : vector<384x128xbf16>, vector<128x128xbf16>, vector<384x128xf32> -> vector<384x128xf32>
    %c0_21 = arith.constant 0 : index
    %c1_22 = arith.constant 1 : index
    %c0_23 = arith.constant 0 : index
    %c0_24 = arith.constant 0 : index
    %22 = vector.load %arg4[%c0_21, %c1_22, %c0_23, %c0_24] : memref<3x3x128x128xbf16, #tpu.memory_space<vmem>>, vector<1x1x128x128xbf16>
    %23 = vector.shape_cast %22 : vector<1x1x128x128xbf16> to vector<128x128xbf16>
    %cst_25 = arith.constant dense<0.000000e+00> : vector<384x128xf32>
    %24 = tpu.matmul %18, %23, %cst_25 {dimension_numbers = #tpu.dot_dimension_numbers<[1], [0], [0], [1], [0, 0, 1, 1], [], []>} : vector<384x128xbf16>, vector<128x128xbf16>, vector<384x128xf32> -> vector<384x128xf32>
    %c383_i32 = arith.constant 383 : i32
    %25 = tpu.dynamic_rotate %24 by %c383_i32 dim 0 : vector<384x128xf32>, i32 -> vector<384x128xf32>
    %26 = arith.addf %21, %25 : vector<384x128xf32>
    %c0_26 = arith.constant 0 : index
    %c2 = arith.constant 2 : index
    %c0_27 = arith.constant 0 : index
    %c0_28 = arith.constant 0 : index
    %27 = vector.load %arg4[%c0_26, %c2, %c0_27, %c0_28] : memref<3x3x128x128xbf16, #tpu.memory_space<vmem>>, vector<1x1x128x128xbf16>
    %28 = vector.shape_cast %27 : vector<1x1x128x128xbf16> to vector<128x128xbf16>
    %cst_29 = arith.constant dense<0.000000e+00> : vector<384x128xf32>
    %29 = tpu.matmul %18, %28, %cst_29 {dimension_numbers = #tpu.dot_dimension_numbers<[1], [0], [0], [1], [0, 0, 1, 1], [], []>} : vector<384x128xbf16>, vector<128x128xbf16>, vector<384x128xf32> -> vector<384x128xf32>
    %c382_i32 = arith.constant 382 : i32
    %30 = tpu.dynamic_rotate %29 by %c382_i32 dim 0 : vector<384x128xf32>, i32 -> vector<384x128xf32>
    %31 = arith.addf %26, %30 : vector<384x128xf32>
    %c0_30 = arith.constant 0 : index
    %c0_31 = arith.constant 0 : index
    %32 = vector.load %arg8[%c0_30, %c0_31] : memref<384x128xf32, #tpu.memory_space<vmem>>, vector<384x128xf32>
    tpu.vector_store %arg8[%c0_30, %c0_31], %31 {strides = array<i32>} : memref<384x128xf32, #tpu.memory_space<vmem>>, vector<384x128xf32>,
    %c1_32 = arith.constant 1 : index
    %c0_33 = arith.constant 0 : index
    %c0_34 = arith.constant 0 : index
    %33 = vector.load %arg7[%c1_32, %c0_33, %c0_34] : memref<18x24x128xf32, #tpu.memory_space<vmem>>, vector<16x24x128xf32>
    %34 = vector.shape_cast %33 : vector<16x24x128xf32> to vector<384x128xf32>
    %35 = arith.truncf %34 : vector<384x128xf32> to vector<384x128xbf16>
    %c1_35 = arith.constant 1 : index
    %c0_36 = arith.constant 0 : index
    %c0_37 = arith.constant 0 : index
    %c0_38 = arith.constant 0 : index
    %36 = vector.load %arg4[%c1_35, %c0_36, %c0_37, %c0_38] : memref<3x3x128x128xbf16, #tpu.memory_space<vmem>>, vector<1x1x128x128xbf16>
    %37 = vector.shape_cast %36 : vector<1x1x128x128xbf16> to vector<128x128xbf16>
    %cst_39 = arith.constant dense<0.000000e+00> : vector<384x128xf32>
    %38 = tpu.matmul %35, %37, %cst_39 {dimension_numbers = #tpu.dot_dimension_numbers<[1], [0], [0], [1], [0, 0, 1, 1], [], []>} : vector<384x128xbf16>, vector<128x128xbf16>, vector<384x128xf32> -> vector<384x128xf32>
    %c1_40 = arith.constant 1 : index
    %c1_41 = arith.constant 1 : index
    %c0_42 = arith.constant 0 : index
    %c0_43 = arith.constant 0 : index
    %39 = vector.load %arg4[%c1_40, %c1_41, %c0_42, %c0_43] : memref<3x3x128x128xbf16, #tpu.memory_space<vmem>>, vector<1x1x128x128xbf16>
    %40 = vector.shape_cast %39 : vector<1x1x128x128xbf16> to vector<128x128xbf16>
    %cst_44 = arith.constant dense<0.000000e+00> : vector<384x128xf32>
    %41 = tpu.matmul %35, %40, %cst_44 {dimension_numbers = #tpu.dot_dimension_numbers<[1], [0], [0], [1], [0, 0, 1, 1], [], []>} : vector<384x128xbf16>, vector<128x128xbf16>, vector<384x128xf32> -> vector<384x128xf32>
    %c383_i32_45 = arith.constant 383 : i32
    %42 = tpu.dynamic_rotate %41 by %c383_i32_45 dim 0 : vector<384x128xf32>, i32 -> vector<384x128xf32>
    %43 = arith.addf %38, %42 : vector<384x128xf32>
    %c1_46 = arith.constant 1 : index
    %c2_47 = arith.constant 2 : index
    %c0_48 = arith.constant 0 : index
    %c0_49 = arith.constant 0 : index
    %44 = vector.load %arg4[%c1_46, %c2_47, %c0_48, %c0_49] : memref<3x3x128x128xbf16, #tpu.memory_space<vmem>>, vector<1x1x128x128xbf16>
    %45 = vector.shape_cast %44 : vector<1x1x128x128xbf16> to vector<128x128xbf16>
    %cst_50 = arith.constant dense<0.000000e+00> : vector<384x128xf32>
    %46 = tpu.matmul %35, %45, %cst_50 {dimension_numbers = #tpu.dot_dimension_numbers<[1], [0], [0], [1], [0, 0, 1, 1], [], []>} : vector<384x128xbf16>, vector<128x128xbf16>, vector<384x128xf32> -> vector<384x128xf32>
    %c382_i32_51 = arith.constant 382 : i32
    %47 = tpu.dynamic_rotate %46 by %c382_i32_51 dim 0 : vector<384x128xf32>, i32 -> vector<384x128xf32>
    %48 = arith.addf %43, %47 : vector<384x128xf32>
    %c0_52 = arith.constant 0 : index
    %c0_53 = arith.constant 0 : index
    %49 = vector.load %arg8[%c0_52, %c0_53] : memref<384x128xf32, #tpu.memory_space<vmem>>, vector<384x128xf32>
    %50 = arith.addf %49, %48 : vector<384x128xf32>
    %c0_54 = arith.constant 0 : index
    %c0_55 = arith.constant 0 : index
    %51 = vector.load %arg8[%c0_54, %c0_55] : memref<384x128xf32, #tpu.memory_space<vmem>>, vector<384x128xf32>
    tpu.vector_store %arg8[%c0_54, %c0_55], %50 {strides = array<i32>} : memref<384x128xf32, #tpu.memory_space<vmem>>, vector<384x128xf32>,
    %c2_56 = arith.constant 2 : index
    %c0_57 = arith.constant 0 : index
    %c0_58 = arith.constant 0 : index
    %52 = vector.load %arg7[%c2_56, %c0_57, %c0_58] : memref<18x24x128xf32, #tpu.memory_space<vmem>>, vector<16x24x128xf32>
    %53 = vector.shape_cast %52 : vector<16x24x128xf32> to vector<384x128xf32>
    %54 = arith.truncf %53 : vector<384x128xf32> to vector<384x128xbf16>
    %c2_59 = arith.constant 2 : index
    %c0_60 = arith.constant 0 : index
    %c0_61 = arith.constant 0 : index
    %c0_62 = arith.constant 0 : index
    %55 = vector.load %arg4[%c2_59, %c0_60, %c0_61, %c0_62] : memref<3x3x128x128xbf16, #tpu.memory_space<vmem>>, vector<1x1x128x128xbf16>
    %56 = vector.shape_cast %55 : vector<1x1x128x128xbf16> to vector<128x128xbf16>
    %cst_63 = arith.constant dense<0.000000e+00> : vector<384x128xf32>
    %57 = tpu.matmul %54, %56, %cst_63 {dimension_numbers = #tpu.dot_dimension_numbers<[1], [0], [0], [1], [0, 0, 1, 1], [], []>} : vector<384x128xbf16>, vector<128x128xbf16>, vector<384x128xf32> -> vector<384x128xf32>
    %c2_64 = arith.constant 2 : index
    %c1_65 = arith.constant 1 : index
    %c0_66 = arith.constant 0 : index
    %c0_67 = arith.constant 0 : index
    %58 = vector.load %arg4[%c2_64, %c1_65, %c0_66, %c0_67] : memref<3x3x128x128xbf16, #tpu.memory_space<vmem>>, vector<1x1x128x128xbf16>
    %59 = vector.shape_cast %58 : vector<1x1x128x128xbf16> to vector<128x128xbf16>
    %cst_68 = arith.constant dense<0.000000e+00> : vector<384x128xf32>
    %60 = tpu.matmul %54, %59, %cst_68 {dimension_numbers = #tpu.dot_dimension_numbers<[1], [0], [0], [1], [0, 0, 1, 1], [], []>} : vector<384x128xbf16>, vector<128x128xbf16>, vector<384x128xf32> -> vector<384x128xf32>
    %c383_i32_69 = arith.constant 383 : i32
    %61 = tpu.dynamic_rotate %60 by %c383_i32_69 dim 0 : vector<384x128xf32>, i32 -> vector<384x128xf32>
    %62 = arith.addf %57, %61 : vector<384x128xf32>
    %c2_70 = arith.constant 2 : index
    %c2_71 = arith.constant 2 : index
    %c0_72 = arith.constant 0 : index
    %c0_73 = arith.constant 0 : index
    %63 = vector.load %arg4[%c2_70, %c2_71, %c0_72, %c0_73] : memref<3x3x128x128xbf16, #tpu.memory_space<vmem>>, vector<1x1x128x128xbf16>
    %64 = vector.shape_cast %63 : vector<1x1x128x128xbf16> to vector<128x128xbf16>
    %cst_74 = arith.constant dense<0.000000e+00> : vector<384x128xf32>
    %65 = tpu.matmul %54, %64, %cst_74 {dimension_numbers = #tpu.dot_dimension_numbers<[1], [0], [0], [1], [0, 0, 1, 1], [], []>} : vector<384x128xbf16>, vector<128x128xbf16>, vector<384x128xf32> -> vector<384x128xf32>
    %c382_i32_75 = arith.constant 382 : i32
    %66 = tpu.dynamic_rotate %65 by %c382_i32_75 dim 0 : vector<384x128xf32>, i32 -> vector<384x128xf32>
    %67 = arith.addf %62, %66 : vector<384x128xf32>
    %c0_76 = arith.constant 0 : index
    %c0_77 = arith.constant 0 : index
    %68 = vector.load %arg8[%c0_76, %c0_77] : memref<384x128xf32, #tpu.memory_space<vmem>>, vector<384x128xf32>
    %69 = arith.addf %68, %67 : vector<384x128xf32>
    %c0_78 = arith.constant 0 : index
    %c0_79 = arith.constant 0 : index
    %70 = vector.load %arg8[%c0_78, %c0_79] : memref<384x128xf32, #tpu.memory_space<vmem>>, vector<384x128xf32>
    tpu.vector_store %arg8[%c0_78, %c0_79], %69 {strides = array<i32>} : memref<384x128xf32, #tpu.memory_space<vmem>>, vector<384x128xf32>,
    %c0_80 = arith.constant 0 : index
    %c0_81 = arith.constant 0 : index
    %71 = vector.load %arg8[%c0_80, %c0_81] : memref<384x128xf32, #tpu.memory_space<vmem>>, vector<384x128xf32>
    %72 = vector.shape_cast %71 : vector<384x128xf32> to vector<16x24x128xf32>
    %73 = vector.extract_strided_slice %72 {offsets = [0, 0, 0], sizes = [16, 16, 128], strides = [1, 1, 1]} : vector<16x24x128xf32> to vector<16x16x128xf32>
    %74 = vector.extract_strided_slice %73 {offsets = [0, 0, 0], sizes = [16, 16, 4], strides = [1, 1, 1]} : vector<16x16x128xf32> to vector<16x16x4xf32>
    %75 = arith.truncf %74 : vector<16x16x4xf32> to vector<16x16x4xbf16>
    %c0_82 = arith.constant 0 : index
    %c0_83 = arith.constant 0 : index
    %c0_84 = arith.constant 0 : index
    %c0_85 = arith.constant 0 : index
    %76 = vector.load %arg5[%c0_82, %c0_83, %c0_84, %c0_85] : memref<1x16x16x4xbf16, #tpu.memory_space<vmem>>, vector<1x16x16x4xbf16>
    %77 = vector.shape_cast %76 : vector<1x16x16x4xbf16> to vector<16x16x4xbf16>
    %78 = vector.shape_cast %75 : vector<16x16x4xbf16> to vector<1x16x16x4xbf16>
    tpu.vector_store %arg5[%c0_82, %c0_83, %c0_84, %c0_85], %78 {strides = array<i32>} : memref<1x16x16x4xbf16, #tpu.memory_space<vmem>>, vector<1x16x16x4xbf16>,
    %79 = vector.shape_cast %73 : vector<16x16x128xf32> to vector<256x128xf32>
    %cst_86 = arith.constant dense<0.000000e+00> : vector<128xf32>
    %80 = vector.multi_reduction <add>, %79, %cst_86 [0] : vector<256x128xf32> to vector<128xf32>
    %81 = vector.shape_cast %80 : vector<128xf32> to vector<1x128xf32>
    %c0_87 = arith.constant 0 : index
    %c0_88 = arith.constant 0 : index
    %c0_89 = arith.constant 0 : index
    %82 = vector.load %arg6[%c0_87, %c0_88, %c0_89] : memref<1x2x128xf32, #tpu.memory_space<vmem>>, vector<1x1x128xf32>
    %83 = vector.shape_cast %82 : vector<1x1x128xf32> to vector<1x128xf32>
    %84 = vector.shape_cast %81 : vector<1x128xf32> to vector<1x1x128xf32>
    tpu.vector_store %arg6[%c0_87, %c0_88, %c0_89], %84 {strides = array<i32>} : memref<1x2x128xf32, #tpu.memory_space<vmem>>, vector<1x1x128xf32>,
    %85 = arith.mulf %79, %79 : vector<256x128xf32>
    %cst_90 = arith.constant dense<0.000000e+00> : vector<128xf32>
    %86 = vector.multi_reduction <add>, %85, %cst_90 [0] : vector<256x128xf32> to vector<128xf32>
    %87 = vector.shape_cast %86 : vector<128xf32> to vector<1x128xf32>
    %c0_91 = arith.constant 0 : index
    %c1_92 = arith.constant 1 : index
    %c0_93 = arith.constant 0 : index
    %88 = vector.load %arg6[%c0_91, %c1_92, %c0_93] : memref<1x2x128xf32, #tpu.memory_space<vmem>>, vector<1x1x128xf32>
    %89 = vector.shape_cast %88 : vector<1x1x128xf32> to vector<1x128xf32>
    %90 = vector.shape_cast %87 : vector<1x128xf32> to vector<1x1x128xf32>
    tpu.vector_store %arg6[%c0_91, %c1_92, %c0_93], %90 {strides = array<i32>} : memref<1x2x128xf32, #tpu.memory_space<vmem>>, vector<1x1x128xf32>,
    return
  }
  func.func @transform_0(%arg0: i32) -> (i32, i32, i32, i32) {
    %c0_i32 = arith.constant 0 : i32
    %c0_i32_0 = arith.constant 0 : i32
    %c0_i32_1 = arith.constant 0 : i32
    %c0_i32_2 = arith.constant 0 : i32
    return %arg0, %c0_i32, %c0_i32_0, %c0_i32_1 : i32, i32, i32, i32
  }
  func.func @transform_1(%arg0: i32) -> (i32, i32) {
    %c0_i32 = arith.constant 0 : i32
    %c0_i32_0 = arith.constant 0 : i32
    %c0_i32_1 = arith.constant 0 : i32
    return %c0_i32, %c0_i32_0 : i32, i32
  }
  func.func @transform_2(%arg0: i32) -> (i32, i32) {
    %c0_i32 = arith.constant 0 : i32
    %c0_i32_0 = arith.constant 0 : i32
    %c0_i32_1 = arith.constant 0 : i32
    return %c0_i32, %c0_i32_0 : i32, i32
  }
  func.func @transform_3(%arg0: i32) -> (i32, i32, i32, i32) {
    %c0_i32 = arith.constant 0 : i32
    %c0_i32_0 = arith.constant 0 : i32
    %c0_i32_1 = arith.constant 0 : i32
    %c0_i32_2 = arith.constant 0 : i32
    %c0_i32_3 = arith.constant 0 : i32
    return %c0_i32, %c0_i32_0, %c0_i32_1, %c0_i32_2 : i32, i32, i32, i32
  }
  func.func @transform_4(%arg0: i32) -> (i32, i32, i32, i32) {
    %c0_i32 = arith.constant 0 : i32
    %c0_i32_0 = arith.constant 0 : i32
    %c0_i32_1 = arith.constant 0 : i32
    %c0_i32_2 = arith.constant 0 : i32
    return %arg0, %c0_i32, %c0_i32_0, %c0_i32_1 : i32, i32, i32, i32
  }
  func.func @transform_5(%arg0: i32) -> (i32, i32, i32) {
    %c0_i32 = arith.constant 0 : i32
    %c0_i32_0 = arith.constant 0 : i32
    %c0_i32_1 = arith.constant 0 : i32
    return %arg0, %c0_i32, %c0_i32_0 : i32, i32, i32
  }
}

</mosaic_0001>

<bundles_post_ra>
// kernel: resblock_forward.5
= control target key start
LH: loop header
LB: loop body
LE: loop exit
PB: predicated region body
PF: predicated region fallthrough
CT: control target
= control target key end

     0   :  { %s1560_s0 = inlined_call_operand.hbm [shape: bf16[2,16,16,4], index: 0, kind: input, shape index: {}]   ;;  %s1561_s1 = inlined_call_operand.hbm [shape: f32[1,4], index: 1, kind: input, shape index: {}]   ;;  %s1562_s2 = inlined_call_operand.hbm [shape: f32[1,4], index: 2, kind: input, shape index: {}]   ;;  %s1563_s3 = inlined_call_operand.hbm [shape: f32[2,16,16,4], index: 3, kind: input, shape index: {}]   ;;  %s1564_s4 = inlined_call_operand.hbm [shape: f32[2,16,16,4], index: 4, kind: output, shape index: {}]  }
   0x1   :  { %1570 = sst [smem:[#allocation15_spill]] %s1560_s0 }
   0x2   :  { %9 = vsyncpa [#allocation3], 0 }
   0x3   :  { %11 = vsyncpa [#allocation3 + $0x1], 0 }
   0x4   :  { %12 = vsyncpa [#allocation6], 0 }
   0x5   :  { %13 = vsyncpa [#allocation9], 0 }
   0x6   :  { %15 = vsyncpa [#allocation9 + $0x1], 0 }
   0x7   :  { %16 = vsyncpa [#allocation4], 0 }
   0x8   :  { %18 = vsyncpa [#allocation4 + $0x1], 0  ;;  %s1093_s15 = smov 0   ;;  %s1095_s16 = smov 0  }
   0x9   :  { %s1097_s17 = smov 0   ;;  %s1099_s18 = smov 0  }
   0xa LB: > { %s1114_s19 = sadd.s32 4294967295, %s1055_s18   ;;  %s681_s20 = sadd.s32 4294967294, %s1055_s18   ;;  %s1055_s18 = sphi %s1099_s18, %s1591_s18   ;;  %s1051_s17 = sphi %s1097_s17, %s1590_s17   ;;  %s1047_s16 = sphi %s1095_s16, %s1589_s16   ;;  %s1043_s15 = sphi %s1093_s15, %s1588_s15  }
   0xb   : > { %s1118_s21 = sadd.s32 1, %s1055_s18   ;;  %s31_s22 = sadd.s32 1, %s1051_s17 }
   0xc   : > { %s28_s23 = ssub.s32 %s1055_s18, %s1118_s21  ;;  %p38_p0 = scmp.ne.s32.totalorder %s1051_s17, %s1047_s16 }
   0xd   : > { %p29_p1 = scmp.eq.s32.totalorder %s28_s23, 0  ;;  %p39_p2 = scmp.eq.s32.totalorder %s1055_s18, 0 }
   0xe   : > { %p44_p3 = scmp.ne.s32.totalorder %s1047_s16, %s1043_s15  ;;  %p1565_p4 = scmp.eq.s32.totalorder %s1114_s19, 0 }
   0xf   : > { %s1130_s24 = scalar_select %p29_p1, %s1051_s17, %s31_s22  }
  0x10   : > { %p1132_p5 = por %p39_p2, %p38_p0  ;;  %p1138_p6 = por %p1565_p4, %p44_p3 }
  0x11   : > { %p136_p7 = scmp.eq.s32.totalorder %s1114_s19, 1  ;;  %p142_p8 = scmp.eq.s32.totalorder %s681_s20, 1 }
  0x12   : > { %s1572_s26 = scalar_select %p1138_p6, 1, 0 }
  0x13   : > { %p682_p9 = scmp.ge.s32.totalorder %s1055_s18, 1  ;;  %p149_p10 = scmp.lt.s32.totalorder %s1055_s18, 3 }
  0x14   : > { %p1145_p11 = por %p136_p7, %p38_p0  ;;  %p1149_p12 = por %p142_p8, %p44_p3 }
  0x15   : > { %p1153_p13 = pnand %p682_p9, %p149_p10  ;;  %s1057_s30 = smov [#allocation5]  }
  0x16   : > { %s1573_s27 = scalar_select %p1145_p11, 1, 0 }
  0x17   : > { %s1574_s28 = scalar_select %p1149_p12, 1, 0 }
  0x18   : > { %s1575_s29 = scalar_select %p1153_p13, 1, 0 }
  0x19   : > { %p801_p2 = pneg %p1153_p13  ;;  %s162_s5 = sshll.u32 %s1057_s30, 4  ;;  %s163_s5 = int_to_ptr.vmem [resolvable:$true] %s162_s5 }
  0x1a   : > { %p821_p4 = scmp.lt.s32.totalorder %s1055_s18, 2  ;;  %p1576_p0 = scmp.eq.s32.totalorder %s1114_s19, 0 }
  0x1b   : > { %s1058_s8 = smov [#allocation7]   ;;  %s865_s12 = scalar_lea.hbm %s1561_s1, 16 }
  0x1c   : > { %p1163_p7 = pnand %p801_p2, %p1576_p0  ;;  %p1169_p3 = pnand %p821_p4, %p1132_p5 }
  0x1d   : > { %s173_s9 = sshll.u32 %s1058_s8, 4  ;;  %p866_p8 = scmp.ne.s32.totalorder %s1561_s1, %s865_s12  ;;  %s1173_s9 = int_to_ptr.vmem [resolvable:$true] %s173_s9 }
  0x1e   : > { %s1578_s7 = scalar_select %p1169_p3, 1, 0 }
  0x1f   : > { %p867_p9 = pneg %p1163_p7  ;;  %p872_p10 = scmp.lt.u32.totalorder %s865_s12, %s1561_s1 }
  0x21   : > { %p868_p4 = pnand %p867_p9, %p866_p8 }
  0x23   : > { %p869_p5 = pneg %p868_p4 }
  0x25   : > { %p874_p2 = pnand %p872_p10, %p869_p5 }
  0x27   : > { %877 = shalt.err (!%p874_p2)
}
  0x28   : > { %s878_s23 = scalar_lea.vmem %s163_s5, 16  ;;  %s885_s25 = scalar_lea.vmem %s163_s5, 32 }
  0x29   : > { %p879_p0 = scmp.ne.s32.totalorder %s163_s5, %s878_s23  ;;  %p886_p11 = scmp.lt.s32.totalorder %s163_s5, %s163_s5 }
  0x2a   : > { %p887_p6 = scmp.lt.s32.totalorder %s885_s25, %s878_s23 }
  0x2b   : > { %p881_p1 = pnand %p879_p0, %p867_p9 }
  0x2c   : > { %p888_p13 = por %p887_p6, %p886_p11 }
  0x2d   : > { %p882_p12 = pneg %p881_p1 }
  0x2f   : > { %p889_p3 = pnand %p888_p13, %p882_p12 }
  0x31   : > { %892 = shalt.err (!%p889_p3)
}
  0x32   : > { %804 = dma.hbm_to_vmem [thread:$0]  (!%p1163_p7), %s1561_s1, 16, %s163_s5, [#allocation6]  }
  0x33   : > { %s1198_s10 = sand.u32 1, %s1051_s17   ;;  %s893_s13 = scalar_lea.hbm %s1562_s2, 16 }
  0x34   : > { %p894_p6 = scmp.ne.s32.totalorder %s1562_s2, %s893_s13  ;;  %p900_p13 = scmp.lt.u32.totalorder %s893_s13, %s1562_s2 }
  0x36   : > { %p896_p11 = pnand %p894_p6, %p867_p9 }
  0x38   : > { %p897_p12 = pneg %p896_p11 }
  0x3a   : > { %p902_p1 = pnand %p900_p13, %p897_p12 }
  0x3c   : > { %905 = shalt.err (!%p902_p1)
}
  0x3d   : > { %s906_s5 = scalar_lea.vmem %s1173_s9, 16  ;;  %s913_s25 = scalar_lea.vmem %s1173_s9, 32 }
  0x3e   : > { %p907_p3 = scmp.ne.s32.totalorder %s1173_s9, %s906_s5  ;;  %p914_p5 = scmp.lt.s32.totalorder %s1173_s9, %s1173_s9 }
  0x3f   : > { %p915_p10 = scmp.lt.s32.totalorder %s913_s25, %s906_s5 }
  0x40   : > { %p909_p8 = pnand %p907_p3, %p867_p9 }
  0x41   : > { %p916_p2 = por %p915_p10, %p914_p5 }
  0x42   : > { %p910_p4 = pneg %p909_p8 }
  0x44   : > { %p917_p0 = pnand %p916_p2, %p910_p4 }
  0x46   : > { %920 = shalt.err (!%p917_p0)
}
  0x47   : > { %807 = dma.hbm_to_vmem [thread:$0]  (!%p1163_p7), %s1562_s2, 16, %s1173_s9, [#allocation6]  }
  0x48   : > { %s686_s11 = sshll.u32 %s1198_s10, 7  ;;  %s705_s12 = sshll.u32 %s1055_s18, 11 }
  0x49   : > { %s1579_s0 = sld [smem:[#allocation15_spill]]  ;;  %s188_s6 = scalar_lea.vmem [#allocation2], %s686_s11 }
  0x4a   : > { %s195_s22 = sshll.u32 %s188_s6, 4  ;;  %s185_s23 = scalar_lea.sflag [#allocation3], %s1198_s10  ;;  %s1233_s22 = int_to_ptr.vmem [resolvable:$true] %s195_s22 }
  0x4b   : > { %p1580_p6 = scmp.ne.s32.totalorder %s1578_s7, 0 }
  0x4d   : > { %p923_p7 = pneg %p1580_p6 }
  0x4f   : > { %s1231_s20 = scalar_lea.hbm %s1579_s0, %s705_s12  ;;  %s926_s30 = scalar_lea.hbm %s1579_s0, 4096 }
  0x50   : > { %s921_s5 = scalar_lea.hbm %s1231_s20, 2048  ;;  %p927_p13 = scmp.lt.u32.totalorder %s1231_s20, %s1579_s0 }
  0x51   : > { %p922_p9 = scmp.ne.s32.totalorder %s1231_s20, %s921_s5  ;;  %p928_p1 = scmp.lt.u32.totalorder %s926_s30, %s921_s5 }
  0x52   : > { %p930_p8 = scmp.lt.u32.totalorder %s921_s5, %s1231_s20 }
  0x53   : > { %p924_p11 = pnand %p923_p7, %p922_p9  ;;  %p929_p3 = por %p928_p1, %p927_p13 }
  0x55   : > { %p925_p12 = pneg %p924_p11  ;;  %p931_p4 = por %p930_p8, %p929_p3 }
  0x57   : > { %p932_p5 = pnand %p931_p4, %p925_p12 }
  0x59   : > { %935 = shalt.err (!%p932_p5)
}
  0x5a   : > { %s936_s11 = scalar_lea.vmem %s1233_s22, 2048  ;;  %s1059_s13 = smov [#allocation2]  }
  0x5b   : > { %p937_p10 = scmp.ne.s32.totalorder %s1233_s22, %s936_s11  ;;  %s941_s14 = sshll.u32 %s1059_s13, 4  ;;  %s942_s14 = int_to_ptr.vmem [resolvable:$false] %s941_s14 }
  0x5c   : > { %s943_s6 = scalar_lea.vmem %s942_s14, 4096  ;;  %p944_p9 = scmp.lt.s32.totalorder %s1233_s22, %s942_s14 }
  0x5d   : > { %p939_p2 = pnand %p937_p10, %p923_p7  ;;  %p945_p11 = scmp.lt.s32.totalorder %s943_s6, %s936_s11 }
  0x5f   : > { %p940_p0 = pneg %p939_p2  ;;  %p946_p13 = por %p945_p11, %p944_p9 }
  0x61   : > { %p947_p1 = pnand %p946_p13, %p940_p0 }
  0x63   : > { %950 = shalt.err (!%p947_p1)
}
  0x64   : > { %s1060_s5 = smov 64   ;;  %s1061_s9 = smov 4  }
  0x65   : > { %811 = dma.hbm_to_vmem [thread:$0]  (!%p1580_p6), %s1231_s20, 2048, %s1233_s22, %s185_s23, %s1060_s5, %s1060_s5, %s1061_s9  }
  0x66   : > { %s689_s25 = sshll.u32 %s1198_s10, 8  ;;  %s706_s30 = sshll.u32 %s1055_s18, 12 }
  0x67   : > { %s1268_s11 = scalar_lea.hbm %s1563_s3, %s706_s30  ;;  %s209_s13 = scalar_lea.vmem [#allocation8], %s689_s25 }
  0x68   : > { %s216_s14 = sshll.u32 %s209_s13, 4  ;;  %s206_s6 = scalar_lea.sflag [#allocation9], %s1198_s10  ;;  %s1270_s14 = int_to_ptr.vmem [resolvable:$true] %s216_s14 }
  0x69   : > { %s951_s0 = scalar_lea.hbm %s1268_s11, 4096  ;;  %s956_s23 = scalar_lea.hbm %s1563_s3, 8192 }
  0x6a   : > { %p952_p12 = scmp.ne.s32.totalorder %s1268_s11, %s951_s0  ;;  %p957_p4 = scmp.lt.u32.totalorder %s1268_s11, %s1563_s3 }
  0x6b   : > { %p958_p5 = scmp.lt.u32.totalorder %s956_s23, %s951_s0  ;;  %p960_p2 = scmp.lt.u32.totalorder %s951_s0, %s1268_s11 }
  0x6c   : > { %p954_p3 = pnand %p952_p12, %p923_p7 }
  0x6d   : > { %p959_p10 = por %p958_p5, %p957_p4 }
  0x6e   : > { %p955_p8 = pneg %p954_p3 }
  0x6f   : > { %p961_p0 = por %p960_p2, %p959_p10 }
  0x71   : > { %p962_p9 = pnand %p961_p0, %p955_p8 }
  0x73   : > { %965 = shalt.err (!%p962_p9)
}
  0x74   : > { %s966_s25 = scalar_lea.vmem %s1270_s14, 4096  ;;  %s1062_s30 = smov [#allocation8]  }
  0x75   : > { %p967_p11 = scmp.ne.s32.totalorder %s1270_s14, %s966_s25  ;;  %s971_s8 = sshll.u32 %s1062_s30, 4  ;;  %s972_s8 = int_to_ptr.vmem [resolvable:$false] %s971_s8 }
  0x76   : > { %s973_s12 = scalar_lea.vmem %s972_s8, 8192  ;;  %p974_p12 = scmp.lt.s32.totalorder %s1270_s14, %s972_s8 }
  0x77   : > { %p969_p13 = pnand %p967_p11, %p923_p7  ;;  %p975_p3 = scmp.lt.s32.totalorder %s973_s12, %s966_s25 }
  0x79   : > { %p970_p1 = pneg %p969_p13  ;;  %p976_p4 = por %p975_p3, %p974_p12 }
  0x7b   : > { %p977_p5 = pnand %p976_p4, %p970_p1 }
  0x7d   : > { %980 = shalt.err (!%p977_p5)
}
  0x7e   : > { %s1063_s0 = smov 128   ;;  %s1064_s13 = smov 8  }
  0x7f   : > { %814 = dma.hbm_to_vmem [thread:$0]  (!%p1580_p6), %s1268_s11, 4096, %s1270_s14, %s206_s6, %s1063_s0, %s1063_s0, %s1064_s13  }
  0x80   : > { %p1581_p7 = scmp.ne.s32.totalorder %s1575_s29, 0 }
  0x81   : > { %s1301_s20 = sand.u32 (!%p1581_p7), 1, %s1047_s16   ;;  %p1582_p8 = scmp.ne.s32.totalorder (!%p1581_p7), %s1572_s26, 0 }
  0x82   : > { %228 = sbr.rel (%p1581_p7) target bundleno = 203 (0xcb), region = 36  ;;  %s693_s22 = sshll.u32 (!%p1581_p7), %s1301_s20, 7 }
  0x83   : > { %s231_s23 = scalar_lea.sflag (!%p1581_p7), [#allocation3], %s1301_s20  ;;  %s1305_s5 = scalar_lea.vmem (!%p1581_p7), [#allocation2], %s693_s22 }
  0x89   : > { %1026 = dma.done.wait (%p1582_p8), %s231_s23, 2048  }
  0x8a   : > { %1028 = vsyncadd (%p1582_p8), %s231_s23, 4294965248  ;;  %p1583_p6 = scmp.eq.s32.totalorder %s1114_s19, 0 }
  0x8c   : > { %1030 = dma.done.wait (%p1583_p6), [#allocation6], 32   ;;  %p1584_p10 = pmov %p1583_p6 }
  0x8d   : > { %s696_s29 = sshll.u32 %s1301_s20, 8  ;;  %s248_s7 = scalar_lea.sflag [#allocation9], %s1301_s20 }
  0x8e   : > { %1032 = vsyncadd (%p1584_p10), [#allocation6], 4294967264  ;;  %s1319_s10 = scalar_lea.vmem [#allocation8], %s696_s29 }
  0x8f   : > { %1034 = dma.done.wait (%p1582_p8), %s248_s7, 4096  }
  0x90   : > { %1036 = vsyncadd (%p1582_p8), %s248_s7, 4294963200  ;;  %v709_v0 = vld [vmem:[%s1305_s5] sm:$0xff]   ;;  %v772_v4 = vld [vmem:[%s1305_s5 + $0x8] sm:$0xff]   ;;  %vm519_vm0 = vcmask 31744   ;;  %s1362_s26 = scalar_lea.vmem [#allocation10], %s696_s29  ;;  %s707_s11 = sshll.u32 %s1114_s19, 12 }
  0x91   : > { %v1326_v1 = vld [vmem:[#allocation5] ss:$0 sm:$0xff]  ;;  %v710_v2 = vunpack.c.l.bf16 %v709_v0  ;;  %v711_v3 = vunpack.c.h.bf16 %v709_v0  ;;  %v1329_v5 = vld [vmem:[#allocation7] ss:$0 sm:$0xff]  ;;  %v714_v6 = vunpack.c.l.bf16 %v772_v4  ;;  %v715_v7 = vunpack.c.h.bf16 %v772_v4  ;;  %v773_v8 = vld [vmem:[%s1305_s5 + $0x10] sm:$0xff]   ;;  %s566_s14 = sshll.u32 %s1362_s26, 4  ;;  %s1502_s9 = scalar_lea.hbm %s1564_s4, %s707_s11  ;;  %s1504_s14 = int_to_ptr.vmem [resolvable:$true] %s566_s14 }
  0x92   : > { %v718_v11 = vunpack.c.l.bf16 %v773_v8  ;;  %v719_v12 = vunpack.c.h.bf16 %v773_v8  ;;  %v774_v13 = vld [vmem:[%s1305_s5 + $0x18] sm:$0xff]   ;;  %v423_v14 = vld [vmem:[%s1319_s10] sm:$0xff]  ;;  %v424_v15 = vld [vmem:[%s1319_s10 + $0x8] sm:$0xff]  ;;  %s553_s25 = scalar_lea.sflag [#allocation4], %s1301_s20  ;;  %s981_s30 = scalar_lea.vmem %s1504_s14, 4096 }
  0x93   : > { %v352_v9 = vmul.f32 %v710_v2, %v1326_v1  ;;  %v353_v10 = vmul.f32 %v711_v3, %v1326_v1  ;;  %v354_v16 = vmul.f32 %v714_v6, %v1326_v1  ;;  %v355_v17 = vmul.f32 %v715_v7, %v1326_v1  ;;  %v425_v22 = vld [vmem:[%s1319_s10 + $0x10] sm:$0xff]  ;;  %v426_v23 = vld [vmem:[%s1319_s10 + $0x18] sm:$0xff]  ;;  %v427_v28 = vld [vmem:[%s1319_s10 + $0x20] sm:$0xff]  ;;  %p982_p2 = scmp.ne.s32.totalorder %s1504_s14, %s981_s30  ;;  %p1585_p0 = scmp.ne.s32.totalorder %s1573_s27, 0 }
  0x94   : > { %v722_v18 = vunpack.c.l.bf16 %v774_v13  ;;  %v723_v19 = vunpack.c.h.bf16 %v774_v13  ;;  %v356_v24 = vmul.f32 %v718_v11, %v1326_v1  ;;  %v357_v25 = vmul.f32 %v719_v12, %v1326_v1  ;;  %v428_v29 = vld [vmem:[%s1319_s10 + $0x28] sm:$0xff]  ;;  %v429_v36 = vld [vmem:[%s1319_s10 + $0x30] sm:$0xff]  ;;  %v430_v37 = vld [vmem:[%s1319_s10 + $0x38] sm:$0xff]  ;;  %s1065_s8 = smov [#allocation10]  }
  0x95   : > { %v391_v20 = vadd.f32 %v1329_v5, %v352_v9  ;;  %v392_v21 = vadd.f32 %v1329_v5, %v353_v10  ;;  %v393_v26 = vadd.f32 %v1329_v5, %v354_v16  ;;  %v394_v27 = vadd.f32 %v1329_v5, %v355_v17  ;;  %v775_v42 = vld [vmem:[%s1305_s5 + $0x20] sm:$0xff]   ;;  %v776_v47 = vld [vmem:[%s1305_s5 + $0x28] sm:$0xff]   ;;  %v777_v52 = vld [vmem:[%s1305_s5 + $0x30] sm:$0xff]   ;;  %p983_p9 = pnand %p982_p2, %p1585_p0  ;;  %s985_s12 = sshll.u32 %s1065_s8, 4  ;;  %s986_s12 = int_to_ptr.vmem [resolvable:$false] %s985_s12 }
  0x96   : > { %v358_v30 = vmul.f32 %v722_v18, %v1326_v1  ;;  %v359_v31 = vmul.f32 %v723_v19, %v1326_v1  ;;  %v395_v34 = vadd.f32 %v1329_v5, %v356_v24  ;;  %v396_v35 = vadd.f32 %v1329_v5, %v357_v25  ;;  %v778_v57 = vld [vmem:[%s1305_s5 + $0x38] sm:$0xff]   ;;  %v431_v3 = vld [vmem:[%s1319_s10 + $0x40] sm:$0xff]  ;;  %v432_v4 = vld [vmem:[%s1319_s10 + $0x48] sm:$0xff]  ;;  %s987_s0 = scalar_lea.vmem %s986_s12, 8192  ;;  %p988_p13 = scmp.lt.s32.totalorder %s1504_s14, %s986_s12 }
  0x97   : > { %v455_v32 = vadd.f32 %v423_v14, %v391_v20  ;;  %v456_v33 = vadd.f32 %v424_v15, %v392_v21  ;;  %v457_v38 = vadd.f32 %v425_v22, %v393_v26  ;;  %v458_v39 = vadd.f32 %v426_v23, %v394_v27  ;;  %v433_v12 = vld [vmem:[%s1319_s10 + $0x50] sm:$0xff]  ;;  %v434_v13 = vld [vmem:[%s1319_s10 + $0x58] sm:$0xff]  ;;  %v435_v18 = vld [vmem:[%s1319_s10 + $0x60] sm:$0xff]  ;;  %p984_p11 = pneg %p983_p9  ;;  %p989_p1 = scmp.lt.s32.totalorder %s987_s0, %s981_s30 }
  0x98   : > { %v397_v40 = vadd.f32 %v1329_v5, %v358_v30  ;;  %v398_v41 = vadd.f32 %v1329_v5, %v359_v31  ;;  %v459_v45 = vadd.f32 %v427_v28, %v395_v34  ;;  %v460_v46 = vadd.f32 %v428_v29, %v396_v35  ;;  %v436_v19 = vld [vmem:[%s1319_s10 + $0x68] sm:$0xff]  ;;  %v437_v26 = vld [vmem:[%s1319_s10 + $0x70] sm:$0xff]  ;;  %v438_v27 = vld [vmem:[%s1319_s10 + $0x78] sm:$0xff] }
  0x99   : > { %v487_v43 = vmax.f32 %v455_v32, 0.0  ;;  %v488_v44 = vmax.f32 %v456_v33, 0.0  ;;  %v489_v48 = vmax.f32 %v457_v38, 0.0  ;;  %v490_v49 = vmax.f32 %v458_v39, 0.0  ;;  %v779_v32 = vld [vmem:[%s1305_s5 + $0x40] sm:$0xff]   ;;  %p990_p12 = por %p989_p1, %p988_p13 }
  0x9a   : > { %v461_v50 = vadd.f32 %v429_v36, %v397_v40  ;;  %v462_v51 = vadd.f32 %v430_v37, %v398_v41  ;;  %v491_v53 = vmax.f32 %v459_v45, 0.0  ;;  %v492_v54 = vmax.f32 %v460_v46, 0.0  ;;  %v780_v37 = vld [vmem:[%s1305_s5 + $0x48] sm:$0xff]  }
  0x9b   : > { %520 = vst.msk [vmem:[%s1362_s26] sm:$0xff] %vm519_vm0, %v487_v43  ;;  %521 = vst.msk [vmem:[%s1362_s26 + $0x8] sm:$0xff] %vm519_vm0, %v488_v44  ;;  %v726_v55 = vunpack.c.l.bf16 %v775_v42  ;;  %v727_v56 = vunpack.c.h.bf16 %v775_v42  ;;  %v730_v60 = vunpack.c.l.bf16 %v776_v47  ;;  %v731_v61 = vunpack.c.h.bf16 %v776_v47  ;;  %v781_v42 = vld [vmem:[%s1305_s5 + $0x50] sm:$0xff]   ;;  %v782_v47 = vld [vmem:[%s1305_s5 + $0x58] sm:$0xff]   ;;  %p991_p3 = pnand %p990_p12, %p984_p11 }
  0x9c   : > { %522 = vst.msk [vmem:[%s1362_s26 + $0x10] sm:$0xff] %vm519_vm0, %v489_v48  ;;  %523 = vst.msk [vmem:[%s1362_s26 + $0x18] sm:$0xff] %vm519_vm0, %v490_v49  ;;  %v493_v58 = vmax.f32 %v461_v50, 0.0  ;;  %v494_v59 = vmax.f32 %v462_v51, 0.0  ;;  %v734_v0 = vunpack.c.l.bf16 %v777_v52  ;;  %v735_v2 = vunpack.c.h.bf16 %v777_v52 }
  0x9d   : > { %524 = vst.msk [vmem:[%s1362_s26 + $0x20] sm:$0xff] %vm519_vm0, %v491_v53  ;;  %525 = vst.msk [vmem:[%s1362_s26 + $0x28] sm:$0xff] %vm519_vm0, %v492_v54  ;;  %v360_v62 = vmul.f32 %v726_v55, %v1326_v1  ;;  %v361_v63 = vmul.f32 %v727_v56, %v1326_v1  ;;  %v362_v6 = vmul.f32 %v730_v60, %v1326_v1  ;;  %v738_v8 = vunpack.c.l.bf16 %v778_v57  ;;  %v439_v56 = vld [vmem:[%s1319_s10 + $0x80] sm:$0xff] }
  0x9e   : > { %526 = vst.msk [vmem:[%s1362_s26 + $0x30] sm:$0xff] %vm519_vm0, %v493_v58  ;;  %527 = vst.msk [vmem:[%s1362_s26 + $0x38] sm:$0xff] %vm519_vm0, %v494_v59  ;;  %v363_v7 = vmul.f32 %v731_v61, %v1326_v1  ;;  %v739_v9 = vunpack.c.h.bf16 %v778_v57  ;;  %v364_v14 = vmul.f32 %v734_v0, %v1326_v1  ;;  %v365_v15 = vmul.f32 %v735_v2, %v1326_v1  ;;  %v440_v57 = vld [vmem:[%s1319_s10 + $0x88] sm:$0xff]  ;;  %v441_v0 = vld [vmem:[%s1319_s10 + $0x90] sm:$0xff] }
  0x9f   : > { %v399_v10 = vadd.f32 %v1329_v5, %v360_v62  ;;  %v400_v11 = vadd.f32 %v1329_v5, %v361_v63  ;;  %v401_v16 = vadd.f32 %v1329_v5, %v362_v6  ;;  %v366_v20 = vmul.f32 %v738_v8, %v1326_v1  ;;  %v442_v2 = vld [vmem:[%s1319_s10 + $0x98] sm:$0xff]  ;;  %v443_v8 = vld [vmem:[%s1319_s10 + $0xa0] sm:$0xff] }
  0xa0   : > { %v402_v17 = vadd.f32 %v1329_v5, %v363_v7  ;;  %v367_v21 = vmul.f32 %v739_v9, %v1326_v1  ;;  %v403_v24 = vadd.f32 %v1329_v5, %v364_v14  ;;  %v404_v25 = vadd.f32 %v1329_v5, %v365_v15  ;;  %v444_v9 = vld [vmem:[%s1319_s10 + $0xa8] sm:$0xff] }
  0xa1   : > { %v463_v22 = vadd.f32 %v431_v3, %v399_v10  ;;  %v464_v23 = vadd.f32 %v432_v4, %v400_v11  ;;  %v465_v28 = vadd.f32 %v433_v12, %v401_v16  ;;  %v405_v30 = vadd.f32 %v1329_v5, %v366_v20  ;;  %v445_v16 = vld [vmem:[%s1319_s10 + $0xb0] sm:$0xff] }
  0xa2   : > { %v466_v29 = vadd.f32 %v434_v13, %v402_v17  ;;  %v406_v31 = vadd.f32 %v1329_v5, %v367_v21  ;;  %v467_v35 = vadd.f32 %v435_v18, %v403_v24  ;;  %v468_v36 = vadd.f32 %v436_v19, %v404_v25  ;;  %v446_v17 = vld [vmem:[%s1319_s10 + $0xb8] sm:$0xff] }
  0xa3   : > { %v495_v33 = vmax.f32 %v463_v22, 0.0  ;;  %v496_v34 = vmax.f32 %v464_v23, 0.0  ;;  %v497_v38 = vmax.f32 %v465_v28, 0.0  ;;  %v469_v40 = vadd.f32 %v437_v26, %v405_v30  ;;  %v783_v22 = vld [vmem:[%s1305_s5 + $0x60] sm:$0xff]  }
  0xa4   : > { %v498_v39 = vmax.f32 %v466_v29, 0.0  ;;  %v470_v41 = vadd.f32 %v438_v27, %v406_v31  ;;  %v499_v43 = vmax.f32 %v467_v35, 0.0  ;;  %v500_v44 = vmax.f32 %v468_v36, 0.0  ;;  %v784_v27 = vld [vmem:[%s1305_s5 + $0x68] sm:$0xff]  }
  0xa5   : > { %528 = vst.msk [vmem:[%s1362_s26 + $0x40] sm:$0xff] %vm519_vm0, %v495_v33  ;;  %529 = vst.msk [vmem:[%s1362_s26 + $0x48] sm:$0xff] %vm519_vm0, %v496_v34  ;;  %v742_v45 = vunpack.c.l.bf16 %v779_v32  ;;  %v743_v46 = vunpack.c.h.bf16 %v779_v32  ;;  %v501_v48 = vmax.f32 %v469_v40, 0.0  ;;  %v746_v50 = vunpack.c.l.bf16 %v780_v37  ;;  %v785_v32 = vld [vmem:[%s1305_s5 + $0x70] sm:$0xff]  }
  0xa6   : > { %530 = vst.msk [vmem:[%s1362_s26 + $0x50] sm:$0xff] %vm519_vm0, %v497_v38  ;;  %531 = vst.msk [vmem:[%s1362_s26 + $0x58] sm:$0xff] %vm519_vm0, %v498_v39  ;;  %v502_v49 = vmax.f32 %v470_v41, 0.0  ;;  %v747_v51 = vunpack.c.h.bf16 %v780_v37  ;;  %v750_v54 = vunpack.c.l.bf16 %v781_v42  ;;  %v751_v55 = vunpack.c.h.bf16 %v781_v42  ;;  %v786_v37 = vld [vmem:[%s1305_s5 + $0x78] sm:$0xff]  }
  0xa7   : > { %532 = vst.msk [vmem:[%s1362_s26 + $0x60] sm:$0xff] %vm519_vm0, %v499_v43  ;;  %533 = vst.msk [vmem:[%s1362_s26 + $0x68] sm:$0xff] %vm519_vm0, %v500_v44  ;;  %v368_v52 = vmul.f32 %v742_v45, %v1326_v1  ;;  %v369_v53 = vmul.f32 %v743_v46, %v1326_v1  ;;  %v370_v58 = vmul.f32 %v746_v50, %v1326_v1  ;;  %v754_v60 = vunpack.c.l.bf16 %v782_v47  ;;  %v447_v46 = vld [vmem:[%s1319_s10 + $0xc0] sm:$0xff] }
  0xa8   : > { %534 = vst.msk [vmem:[%s1362_s26 + $0x70] sm:$0xff] %vm519_vm0, %v501_v48  ;;  %535 = vst.msk [vmem:[%s1362_s26 + $0x78] sm:$0xff] %vm519_vm0, %v502_v49  ;;  %v371_v59 = vmul.f32 %v747_v51, %v1326_v1  ;;  %v755_v61 = vunpack.c.h.bf16 %v782_v47  ;;  %v372_v3 = vmul.f32 %v750_v54, %v1326_v1  ;;  %v373_v4 = vmul.f32 %v751_v55, %v1326_v1  ;;  %v448_v47 = vld [vmem:[%s1319_s10 + $0xc8] sm:$0xff]  ;;  %v449_v54 = vld [vmem:[%s1319_s10 + $0xd0] sm:$0xff] }
  0xa9   : > { %v407_v62 = vadd.f32 %v1329_v5, %v368_v52  ;;  %v408_v63 = vadd.f32 %v1329_v5, %v369_v53  ;;  %v409_v6 = vadd.f32 %v1329_v5, %v370_v58  ;;  %v374_v10 = vmul.f32 %v754_v60, %v1326_v1  ;;  %v450_v55 = vld [vmem:[%s1319_s10 + $0xd8] sm:$0xff]  ;;  %v451_v60 = vld [vmem:[%s1319_s10 + $0xe0] sm:$0xff] }
  0xaa   : > { %v410_v7 = vadd.f32 %v1329_v5, %v371_v59  ;;  %v375_v11 = vmul.f32 %v755_v61, %v1326_v1  ;;  %v411_v14 = vadd.f32 %v1329_v5, %v372_v3  ;;  %v412_v15 = vadd.f32 %v1329_v5, %v373_v4  ;;  %v452_v61 = vld [vmem:[%s1319_s10 + $0xe8] sm:$0xff] }
  0xab   : > { %v471_v12 = vadd.f32 %v439_v56, %v407_v62  ;;  %v472_v13 = vadd.f32 %v440_v57, %v408_v63  ;;  %v473_v18 = vadd.f32 %v441_v0, %v409_v6  ;;  %v413_v20 = vadd.f32 %v1329_v5, %v374_v10  ;;  %v453_v6 = vld [vmem:[%s1319_s10 + $0xf0] sm:$0xff] }
  0xac   : > { %v474_v19 = vadd.f32 %v442_v2, %v410_v7  ;;  %v414_v21 = vadd.f32 %v1329_v5, %v375_v11  ;;  %v475_v25 = vadd.f32 %v443_v8, %v411_v14  ;;  %v476_v26 = vadd.f32 %v444_v9, %v412_v15  ;;  %v454_v7 = vld [vmem:[%s1319_s10 + $0xf8] sm:$0xff] }
  0xad   : > { %v503_v23 = vmax.f32 %v471_v12, 0.0  ;;  %v504_v24 = vmax.f32 %v472_v13, 0.0  ;;  %v505_v28 = vmax.f32 %v473_v18, 0.0  ;;  %v477_v30 = vadd.f32 %v445_v16, %v413_v20 }
  0xae   : > { %v506_v29 = vmax.f32 %v474_v19, 0.0  ;;  %v478_v31 = vadd.f32 %v446_v17, %v414_v21  ;;  %v507_v33 = vmax.f32 %v475_v25, 0.0  ;;  %v508_v34 = vmax.f32 %v476_v26, 0.0 }
  0xaf   : > { %536 = vst.msk [vmem:[%s1362_s26 + $0x80] sm:$0xff] %vm519_vm0, %v503_v23  ;;  %537 = vst.msk [vmem:[%s1362_s26 + $0x88] sm:$0xff] %vm519_vm0, %v504_v24  ;;  %v758_v35 = vunpack.c.l.bf16 %v783_v22  ;;  %v759_v36 = vunpack.c.h.bf16 %v783_v22  ;;  %v509_v38 = vmax.f32 %v477_v30, 0.0  ;;  %v762_v40 = vunpack.c.l.bf16 %v784_v27 }
  0xb0   : > { %538 = vst.msk [vmem:[%s1362_s26 + $0x90] sm:$0xff] %vm519_vm0, %v505_v28  ;;  %539 = vst.msk [vmem:[%s1362_s26 + $0x98] sm:$0xff] %vm519_vm0, %v506_v29  ;;  %v510_v39 = vmax.f32 %v478_v31, 0.0  ;;  %v763_v41 = vunpack.c.h.bf16 %v784_v27  ;;  %v766_v44 = vunpack.c.l.bf16 %v785_v32  ;;  %v767_v45 = vunpack.c.h.bf16 %v785_v32 }
  0xb1   : > { %540 = vst.msk [vmem:[%s1362_s26 + $0xa0] sm:$0xff] %vm519_vm0, %v507_v33  ;;  %541 = vst.msk [vmem:[%s1362_s26 + $0xa8] sm:$0xff] %vm519_vm0, %v508_v34  ;;  %v376_v42 = vmul.f32 %v758_v35, %v1326_v1  ;;  %v377_v43 = vmul.f32 %v759_v36, %v1326_v1  ;;  %v378_v48 = vmul.f32 %v762_v40, %v1326_v1  ;;  %v770_v50 = vunpack.c.l.bf16 %v786_v37 }
  0xb2   : > { %542 = vst.msk [vmem:[%s1362_s26 + $0xb0] sm:$0xff] %vm519_vm0, %v509_v38  ;;  %543 = vst.msk [vmem:[%s1362_s26 + $0xb8] sm:$0xff] %vm519_vm0, %v510_v39  ;;  %v379_v49 = vmul.f32 %v763_v41, %v1326_v1  ;;  %v771_v51 = vunpack.c.h.bf16 %v786_v37  ;;  %v380_v56 = vmul.f32 %v766_v44, %v1326_v1  ;;  %v381_v57 = vmul.f32 %v767_v45, %v1326_v1 }
  0xb3   : > { %v415_v52 = vadd.f32 %v1329_v5, %v376_v42  ;;  %v416_v53 = vadd.f32 %v1329_v5, %v377_v43  ;;  %v417_v58 = vadd.f32 %v1329_v5, %v378_v48  ;;  %v382_v62 = vmul.f32 %v770_v50, %v1326_v1 }
  0xb4   : > { %v418_v59 = vadd.f32 %v1329_v5, %v379_v49  ;;  %v383_v63 = vmul.f32 %v771_v51, %v1326_v1  ;;  %v419_v3 = vadd.f32 %v1329_v5, %v380_v56  ;;  %v420_v4 = vadd.f32 %v1329_v5, %v381_v57 }
  0xb5   : > { %v479_v0 = vadd.f32 %v447_v46, %v415_v52  ;;  %v480_v2 = vadd.f32 %v448_v47, %v416_v53  ;;  %v481_v8 = vadd.f32 %v449_v54, %v417_v58  ;;  %v421_v10 = vadd.f32 %v1329_v5, %v382_v62 }
  0xb6   : > { %v482_v9 = vadd.f32 %v450_v55, %v418_v59  ;;  %v422_v11 = vadd.f32 %v1329_v5, %v383_v63  ;;  %v483_v13 = vadd.f32 %v451_v60, %v419_v3  ;;  %v484_v14 = vadd.f32 %v452_v61, %v420_v4 }
  0xb7   : > { %v511_v1 = vmax.f32 %v479_v0, 0.0  ;;  %v512_v12 = vmax.f32 %v480_v2, 0.0  ;;  %v513_v15 = vmax.f32 %v481_v8, 0.0  ;;  %v485_v17 = vadd.f32 %v453_v6, %v421_v10 }
  0xb8   : > { %v514_v16 = vmax.f32 %v482_v9, 0.0  ;;  %v486_v18 = vadd.f32 %v454_v7, %v422_v11  ;;  %v515_v5 = vmax.f32 %v483_v13, 0.0  ;;  %v516_v19 = vmax.f32 %v484_v14, 0.0 }
  0xb9   : > { %544 = vst.msk [vmem:[%s1362_s26 + $0xc0] sm:$0xff] %vm519_vm0, %v511_v1  ;;  %545 = vst.msk [vmem:[%s1362_s26 + $0xc8] sm:$0xff] %vm519_vm0, %v512_v12  ;;  %v517_v20 = vmax.f32 %v485_v17, 0.0 }
  0xba   : > { %546 = vst.msk [vmem:[%s1362_s26 + $0xd0] sm:$0xff] %vm519_vm0, %v513_v15  ;;  %547 = vst.msk [vmem:[%s1362_s26 + $0xd8] sm:$0xff] %vm519_vm0, %v514_v16  ;;  %v518_v21 = vmax.f32 %v486_v18, 0.0 }
  0xbb   : > { %548 = vst.msk [vmem:[%s1362_s26 + $0xe0] sm:$0xff] %vm519_vm0, %v515_v5  ;;  %549 = vst.msk [vmem:[%s1362_s26 + $0xe8] sm:$0xff] %vm519_vm0, %v516_v19 }
  0xbc   : > { %550 = vst.msk [vmem:[%s1362_s26 + $0xf0] sm:$0xff] %vm519_vm0, %v517_v20  ;;  %551 = vst.msk [vmem:[%s1362_s26 + $0xf8] sm:$0xff] %vm519_vm0, %v518_v21 }
  0xbd   : > { %994 = shalt.err (!%p991_p3)
}
  0xbe   : > { %s995_s13 = scalar_lea.hbm %s1502_s9, 4096  ;;  %s999_s5 = scalar_lea.hbm %s1564_s4, 8192 }
  0xbf   : > { %p996_p4 = scmp.ne.s32.totalorder %s1502_s9, %s995_s13  ;;  %p1000_p8 = scmp.lt.u32.totalorder %s1502_s9, %s1564_s4 }
  0xc0   : > { %p1001_p6 = scmp.lt.u32.totalorder %s999_s5, %s995_s13  ;;  %p1003_p2 = scmp.lt.u32.totalorder %s995_s13, %s1502_s9 }
  0xc1   : > { %p997_p5 = pnand %p996_p4, %p1585_p0 }
  0xc2   : > { %p1002_p10 = por %p1001_p6, %p1000_p8 }
  0xc3   : > { %p998_p7 = pneg %p997_p5 }
  0xc4   : > { %p1004_p9 = por %p1003_p2, %p1002_p10 }
  0xc6   : > { %p1005_p11 = pnand %p1004_p9, %p998_p7 }
  0xc8   : > { %1008 = shalt.err (!%p1005_p11)
}
  0xc9   : > { %s1066_s10 = smov 128   ;;  %s1067_s26 = smov 8  }
  0xca   : > { %799 = dma.vmem_to_hbm [thread:$0]  (%p1585_p0), %s1504_s14, 4096, %s1502_s9, %s553_s25, %s1066_s10, %s1066_s10, %s1067_s26  }
  0xcb PF: > { %s581_s11 = sand.u32 1, %s1043_s15   ;;  %p1586_p13 = scmp.ne.s32.totalorder %s1574_s28, 0 }
  0xcc   : > { %p1587_p1 = scmp.ge.s32.totalorder %s1055_s18, 2  ;;  %s582_s19 = scalar_lea.sflag [#allocation4], %s581_s11 }
  0xce   : > { %p816_p12 = pnand %p1587_p1, %p1586_p13 }
  0xd0   : > { %1038 = dma.done.wait (!%p816_p12), %s582_s19, 4096  }
  0xd1   : > { %1040 = vsyncadd (!%p816_p12), %s582_s19, 4294963200  ;;  %p21_p3 = scmp.ge.s32.totalorder %s1118_s21, 4   ;;  %s1588_s15 = smov %s1047_s16 }
  0xd2   : > { %s1589_s16 = smov %s1051_s17  ;;  %s1590_s17 = smov %s1130_s24 }
  0xd3   : > { %s1591_s18 = smov %s1118_s21  ;;  %23 = sbr.rel (!%p21_p3) target bundleno = 10 (0xa), region = 102 }
  0xda   :  { %587 = vsyncpa [#allocation3], 1 }
  0xdb   :  { %589 = vsyncpa [#allocation3 + $0x1], 1 }
  0xdc   :  { %590 = vsyncpa [#allocation6], 1 }
  0xdd   :  { %591 = vsyncpa [#allocation9], 1 }
  0xde   :  { %593 = vsyncpa [#allocation9 + $0x1], 1 }
  0xdf   :  { %594 = vsyncpa [#allocation4], 1 }
  0xe0   :  { %596 = vsyncpa [#allocation4 + $0x1], 1 }

// kernel: resblock_forward.3
= control target key start
LH: loop header
LB: loop body
LE: loop exit
PB: predicated region body
PF: predicated region fallthrough
CT: control target
= control target key end

     0   :  { %9 = vsyncpa [#allocation5], 0  ;;  %s8033_s0 = inlined_call_operand.hbm [shape: f32[2,16,16,4], index: 0, kind: input, shape index: {}]   ;;  %s8034_s1 = inlined_call_operand.hbm [shape: bf16[3,3,128,128], index: 1, kind: input, shape index: {}]   ;;  %s8035_s2 = inlined_call_operand.hbm [shape: bf16[2,16,16,4], index: 2, kind: output, shape index: {0}]   ;;  %s8036_s3 = inlined_call_operand.hbm [shape: f32[2,2,128], index: 3, kind: output, shape index: {1}]  }
   0x1   :  { %11 = vsyncpa [#allocation5 + $0x1], 0 }
   0x2   :  { %12 = vsyncpa [#allocation8], 0 }
   0x3   :  { %13 = vsyncpa [#allocation6], 0 }
   0x4   :  { %15 = vsyncpa [#allocation6 + $0x1], 0 }
   0x5   :  { %16 = vsyncpa [#allocation11], 0 }
   0x6   :  { %18 = vsyncpa [#allocation11 + $0x1], 0  ;;  %s6331_s12 = smov 0   ;;  %s6333_s13 = smov 0  }
   0x7   :  { %s6335_s14 = smov 0   ;;  %s6337_s15 = smov 0  }
   0x8 LB: > { %s6352_s16 = sadd.s32 4294967295, %s6297_s15   ;;  %s4670_s17 = sadd.s32 4294967294, %s6297_s15   ;;  %s6297_s15 = sphi %s6337_s15, %s8132_s15   ;;  %s6293_s14 = sphi %s6335_s14, %s8131_s14   ;;  %s6289_s13 = sphi %s6333_s13, %s8130_s13   ;;  %s6285_s12 = sphi %s6331_s12, %s8129_s12  }
   0x9   : > { %p44_p0 = scmp.ne.s32.totalorder %s6289_s13, %s6285_s12  ;;  %p8037_p1 = scmp.eq.s32.totalorder %s6352_s16, 0 }
   0xa   : > { %p95_p3 = scmp.eq.s32.totalorder %s4670_s17, 1  ;;  %p4671_p5 = scmp.ge.s32.totalorder %s6297_s15, 1 }
   0xb   : > { %p6361_p4 = por %p8037_p1, %p44_p0  ;;  %p128_p7 = scmp.lt.s32.totalorder %s6297_s15, 3 }
   0xc   : > { %p6366_p6 = por %p95_p3, %p44_p0  ;;  %s6299_s21 = smov [#allocation7]  }
   0xd   : > { %s8059_s18 = scalar_select %p6361_p4, 1, 0 }
   0xe   : > { %s8060_s19 = scalar_select %p6366_p6, 1, 0 }
   0xf   : > { %p6371_p8 = pnand %p4671_p5, %p128_p7  ;;  %s140_s22 = sshll.u32 %s6299_s21, 4  ;;  %s6375_s22 = int_to_ptr.vmem [resolvable:$true] %s140_s22 }
  0x10   : > { %s6387_s24 = sadd.s32 1, %s6297_s15   ;;  %s31_s25 = sadd.s32 1, %s6293_s14 }
  0x11   : > { %s8061_s20 = scalar_select %p6371_p8, 1, 0 }
  0x12   : > { %p6005_p9 = pneg %p6371_p8  ;;  %s28_s26 = ssub.s32 %s6297_s15, %s6387_s24 }
  0x13   : > { %s6137_s29 = scalar_lea.hbm %s8034_s1, 9216 }
  0x14   : > { %p6382_p11 = pnand %p6005_p9, %p8037_p1  ;;  %p6138_p12 = scmp.ne.s32.totalorder %s8034_s1, %s6137_s29 }
  0x15   : > { %p6144_p5 = scmp.lt.u32.totalorder %s6137_s29, %s8034_s1 }
  0x16   : > { %p6139_p13 = pneg %p6382_p11 }
  0x18   : > { %p6140_p0 = pnand %p6139_p13, %p6138_p12 }
  0x1a   : > { %p6141_p3 = pneg %p6140_p0 }
  0x1c   : > { %p6146_p7 = pnand %p6144_p5, %p6141_p3 }
  0x1e   : > { %6149 = shalt.err (!%p6146_p7)
}
  0x1f   : > { %s6150_s7 = scalar_lea.vmem %s6375_s22, 9216  ;;  %p6158_p2 = scmp.lt.s32.totalorder %s6375_s22, %s6375_s22 }
  0x20   : > { %p6151_p9 = scmp.ne.s32.totalorder %s6375_s22, %s6150_s7  ;;  %p6159_p6 = scmp.lt.s32.totalorder %s6150_s7, %s6150_s7 }
  0x22   : > { %p6153_p10 = pnand %p6151_p9, %p6139_p13  ;;  %p6160_p4 = por %p6159_p6, %p6158_p2 }
  0x24   : > { %p6154_p1 = pneg %p6153_p10 }
  0x26   : > { %p6161_p8 = pnand %p6160_p4, %p6154_p1 }
  0x28   : > { %6164 = shalt.err (!%p6161_p8)
}
  0x29   : > { %s6300_s8 = smov 64   ;;  %s6301_s9 = smov 4  }
  0x2a   : > { %6008 = dma.hbm_to_vmem [thread:$0]  (!%p6382_p11), %s8034_s1, 9216, %s6375_s22, [#allocation8], %s6300_s8, %s6300_s8, %s6301_s9  }
  0x2b   : > { %p29_p2 = scmp.eq.s32.totalorder %s28_s26, 0  ;;  %p38_p1 = scmp.ne.s32.totalorder %s6293_s14, %s6289_s13 }
  0x2c   : > { %p39_p4 = scmp.eq.s32.totalorder %s6297_s15, 0  ;;  %p6021_p6 = scmp.lt.s32.totalorder %s6297_s15, 2 }
  0x2d   : > { %s6418_s17 = scalar_select %p29_p2, %s6293_s14, %s31_s25  }
  0x2e   : > { %p40_p8 = por %p39_p4, %p38_p1  ;;  %p8063_p10 = scmp.eq.s32.totalorder %s6352_s16, 1 }
  0x2f   : > { %s154_s27 = sand.u32 1, %s6293_s14   ;;  %s4793_s28 = sshll.u32 %s6297_s15, 12 }
  0x30   : > { %p6422_p12 = por %p8063_p10, %p38_p1  ;;  %s4674_s29 = sshll.u32 %s154_s27, 8 }
  0x31   : > { %s6431_s4 = scalar_lea.hbm %s8033_s0, %s4793_s28  ;;  %s158_s22 = scalar_lea.vmem [#allocation4], %s4674_s29 }
  0x32   : > { %s165_s25 = sshll.u32 %s158_s22, 4  ;;  %p6433_p11 = pnand %p6021_p6, %p40_p8  ;;  %s6437_s25 = int_to_ptr.vmem [resolvable:$true] %s165_s25 }
  0x33   : > { %s6439_s5 = scalar_lea.sflag [#allocation5], %s154_s27  ;;  %s6165_s6 = scalar_lea.hbm %s6431_s4, 4096 }
  0x34   : > { %p6166_p13 = scmp.ne.s32.totalorder %s6431_s4, %s6165_s6  ;;  %p6167_p0 = pneg %p6433_p11 }
  0x35   : > { %s6170_s9 = scalar_lea.hbm %s8033_s0, 8192  ;;  %p6171_p7 = scmp.lt.u32.totalorder %s6431_s4, %s8033_s0 }
  0x36   : > { %p6168_p3 = pnand %p6167_p0, %p6166_p13  ;;  %p6172_p9 = scmp.lt.u32.totalorder %s6170_s9, %s6165_s6 }
  0x37   : > { %p6174_p1 = scmp.lt.u32.totalorder %s6165_s6, %s6431_s4 }
  0x38   : > { %p6169_p5 = pneg %p6168_p3  ;;  %p6173_p2 = por %p6172_p9, %p6171_p7 }
  0x3a   : > { %p6175_p4 = por %p6174_p1, %p6173_p2 }
  0x3c   : > { %p6176_p6 = pnand %p6175_p4, %p6169_p5 }
  0x3e   : > { %6179 = shalt.err (!%p6176_p6)
}
  0x3f   : > { %s6180_s27 = scalar_lea.vmem %s6437_s25, 4096  ;;  %s6302_s28 = smov [#allocation4]  }
  0x40   : > { %p6181_p8 = scmp.ne.s32.totalorder %s6437_s25, %s6180_s27  ;;  %s6185_s29 = sshll.u32 %s6302_s28, 4  ;;  %s6186_s29 = int_to_ptr.vmem [resolvable:$false] %s6185_s29 }
  0x41   : > { %s6187_s23 = scalar_lea.vmem %s6186_s29, 8192  ;;  %p6188_p3 = scmp.lt.s32.totalorder %s6437_s25, %s6186_s29 }
  0x42   : > { %p6183_p10 = pnand %p6181_p8, %p6167_p0  ;;  %p6189_p7 = scmp.lt.s32.totalorder %s6187_s23, %s6180_s27 }
  0x44   : > { %p6184_p13 = pneg %p6183_p10  ;;  %p6190_p9 = por %p6189_p7, %p6188_p3 }
  0x46   : > { %p6191_p2 = pnand %p6190_p9, %p6184_p13 }
  0x48   : > { %6194 = shalt.err (!%p6191_p2)
}
  0x49   : > { %s6303_s30 = smov 128   ;;  %s6304_s22 = smov 8  }
  0x4a   : > { %6012 = dma.hbm_to_vmem [thread:$0]  (!%p6433_p11), %s6431_s4, 4096, %s6437_s25, %s6439_s5, %s6303_s30, %s6303_s30, %s6304_s22  }
  0x4b   : > { %p8066_p0 = scmp.ne.s32.totalorder %s8061_s20, 0 }
  0x4d   : > { %177 = sbr.rel (%p8066_p0) target bundleno = 816 (0x330), region = 28 }
  0x54   : > { %s6470_s6 = sand.u32 1, %s6289_s13   ;;  %p8067_p5 = scmp.ne.s32.totalorder %s8059_s18, 0 }
  0x55   : > { %s4678_s7 = sshll.u32 %s6470_s6, 8  ;;  %s180_s8 = scalar_lea.sflag [#allocation5], %s6470_s6 }
  0x56   : > { %s6474_s9 = scalar_lea.vmem [#allocation4], %s4678_s7 }
  0x57   : > { %6268 = dma.done.wait (%p8067_p5), %s180_s8, 4096  }
  0x58   : > { %6270 = vsyncadd (%p8067_p5), %s180_s8, 4294963200  ;;  %p8068_p11 = scmp.eq.s32.totalorder %s6352_s16, 0 }
  0x5a   : > { %6272 = dma.done.wait (%p8068_p11), [#allocation8], 9216   ;;  %p8069_p1 = pmov %p8068_p11 }
  0x5b   : > { %v6305_v0 = vmov 0.0   ;;  %v8040_v1 = vmov 0.0|0.0   ;;  %v6064_v2 = vld [vmem:[#allocation7 + $0x40] sm:$0xff]   ;;  %v6065_v3 = vld [vmem:[#allocation7 + $0x48] sm:$0xff]   ;;  %v6066_v4 = vld [vmem:[#allocation7 + $0x50] sm:$0xff]   ;;  %vm303_vm0 = vcmask 31744  }
  0x5c   : > { %6274 = vsyncadd (%p8069_p1), [#allocation8], 4294958080  ;;  %248 = vst [vmem:[#allocation2] sm:$0xff] %v6305_v0  ;;  %5131 = vmatprep.mubr.bf16.mxu0 %v8040_v1  ;;  %5115 = vmatprep.subr.bf16.mxu0 %v6064_v2  ;;  %v6067_v5 = vld [vmem:[#allocation7 + $0x58] sm:$0xff]   ;;  %v230_v6 = vld [vmem:[%s6474_s9 + $0x70] sm:$0xff]  ;;  %s4680_s18 = sshll.u32 %s6470_s6, 7 }
  0x5d   : > { %251 = vst [vmem:[#allocation2 + $0x18] sm:$0xff] %v6305_v0  ;;  %252 = vst [vmem:[#allocation2 + $0x20] sm:$0xff] %v6305_v0  ;;  %5691 = vmatprep.subr.bf16.mxu1 %v6064_v2  ;;  %5116 = vmatpush3.bf16.msra.mxu0 %v6064_v2  ;;  %v231_v7 = vld [vmem:[%s6474_s9 + $0x78] sm:$0xff]  ;;  %v216_v8 = vld [vmem:[%s6474_s9] sm:$0xff]  ;;  %vm4382_vm3 = vcmask 27648   ;;  %s7798_s20 = scalar_lea.vmem [#allocation9], %s4680_s18 }
  0x5e   : > { %253 = vst [vmem:[#allocation2 + $0x28] sm:$0xff] %v6305_v0  ;;  %254 = vst [vmem:[#allocation2 + $0x30] sm:$0xff] %v6305_v0  ;;  %5699 = vmatpush3.bf16.msra.mxu1 %v6064_v2  ;;  %5117 = vmatprep.subr.bf16.mxu0 %v6065_v3  ;;  %v232_v9 = vld [vmem:[%s6474_s9 + $0x80] sm:$0xff]  ;;  %v217_v11 = vld [vmem:[%s6474_s9 + $0x8] sm:$0xff]  ;;  %s4826_s4 = sshll.u32 %s6352_s16, 11  ;;  %s4542_s25 = sshll.u32 %s7798_s20, 4  ;;  %s7952_s25 = int_to_ptr.vmem [resolvable:$true] %s4542_s25 }
  0x5f   : > { %255 = vst [vmem:[#allocation2 + $0x38] sm:$0xff] %v6305_v0  ;;  %256 = vst [vmem:[#allocation2 + $0x40] sm:$0xff] %v6305_v0  ;;  %5692 = vmatprep.subr.bf16.mxu1 %v6065_v3  ;;  %v6068_v10 = vld [vmem:[#allocation7 + $0x60] sm:$0xff]   ;;  %v233_v12 = vld [vmem:[%s6474_s9 + $0x88] sm:$0xff]  ;;  %s7950_s10 = scalar_lea.hbm %s8035_s2, %s4826_s4  ;;  %s4524_s11 = scalar_lea.sflag [#allocation6], %s6470_s6 }
  0x60   : > { %257 = vst [vmem:[#allocation2 + $0x48] sm:$0xff] %v6305_v0  ;;  %258 = vst [vmem:[#allocation2 + $0x50] sm:$0xff] %v6305_v0  ;;  %v218_v13 = vld [vmem:[%s6474_s9 + $0x10] sm:$0xff]  ;;  %v219_v14 = vld [vmem:[%s6474_s9 + $0x18] sm:$0xff]  ;;  %s6195_s27 = scalar_lea.vmem %s7952_s25, 2048  ;;  %s6307_s28 = smov [#allocation9]  }
  0x61   : > { %259 = vst [vmem:[#allocation2 + $0x58] sm:$0xff] %v6305_v0  ;;  %260 = vst [vmem:[#allocation2 + $0x60] sm:$0xff] %v6305_v0  ;;  %5118 = vmatpush3.bf16.msra.mxu0 %v6065_v3  ;;  %v234_v15 = vld [vmem:[%s6474_s9 + $0x90] sm:$0xff]  ;;  %v235_v16 = vld [vmem:[%s6474_s9 + $0x98] sm:$0xff]  ;;  %p6196_p4 = scmp.ne.s32.totalorder %s7952_s25, %s6195_s27  ;;  %s6199_s29 = sshll.u32 %s6307_s28, 4  ;;  %s6200_s29 = int_to_ptr.vmem [resolvable:$false] %s6199_s29 }
  0x62   : > { %261 = vst [vmem:[#allocation2 + $0x68] sm:$0xff] %v6305_v0  ;;  %262 = vst [vmem:[#allocation2 + $0x70] sm:$0xff] %v6305_v0  ;;  %5700 = vmatpush3.bf16.msra.mxu1 %v6065_v3  ;;  %5119 = vmatprep.subr.bf16.mxu0 %v6066_v4  ;;  %v6069_v17 = vld [vmem:[#allocation7 + $0x68] sm:$0xff]   ;;  %v220_v21 = vld [vmem:[%s6474_s9 + $0x20] sm:$0xff]  ;;  %s6201_s23 = scalar_lea.vmem %s6200_s29, 4096  ;;  %p6202_p10 = scmp.lt.s32.totalorder %s7952_s25, %s6200_s29 }
  0x63   : > { %263 = vst [vmem:[#allocation2 + $0x78] sm:$0xff] %v6305_v0  ;;  %264 = vst [vmem:[#allocation2 + $0x80] sm:$0xff] %v6305_v0  ;;  %5693 = vmatprep.subr.bf16.mxu1 %v6066_v4  ;;  %v236_v22 = vld [vmem:[%s6474_s9 + $0xa0] sm:$0xff]  ;;  %v221_v23 = vld [vmem:[%s6474_s9 + $0x28] sm:$0xff]  ;;  %p6197_p6 = pnand %p6196_p4, %p6422_p12  ;;  %p6203_p13 = scmp.lt.s32.totalorder %s6201_s23, %s6195_s27 }
  0x64   : > { %265 = vst [vmem:[#allocation2 + $0x88] sm:$0xff] %v6305_v0  ;;  %266 = vst [vmem:[#allocation2 + $0x90] sm:$0xff] %v6305_v0  ;;  %v6070_v24 = vld [vmem:[#allocation7 + $0x70] sm:$0xff]   ;;  %v237_v25 = vld [vmem:[%s6474_s9 + $0xa8] sm:$0xff] }
  0x65   : > { %267 = vst [vmem:[#allocation2 + $0x98] sm:$0xff] %v6305_v0  ;;  %268 = vst [vmem:[#allocation2 + $0xa0] sm:$0xff] %v6305_v0  ;;  %5120 = vmatpush3.bf16.msra.mxu0 %v6066_v4  ;;  %v6071_v26 = vld [vmem:[#allocation7 + $0x78] sm:$0xff]   ;;  %v222_v27 = vld [vmem:[%s6474_s9 + $0x30] sm:$0xff]  ;;  %p6198_p8 = pneg %p6197_p6  ;;  %p6204_p3 = por %p6203_p13, %p6202_p10 }
  0x66   : > { %269 = vst [vmem:[#allocation2 + $0xa8] sm:$0xff] %v6305_v0  ;;  %270 = vst [vmem:[#allocation2 + $0xb0] sm:$0xff] %v6305_v0  ;;  %5701 = vmatpush3.bf16.msra.mxu1 %v6066_v4  ;;  %5121 = vmatprep.subr.bf16.mxu0 %v6067_v5  ;;  %v6072_v28 = vld [vmem:[#allocation7 + $0x80] sm:$0xff]   ;;  %v223_v30 = vld [vmem:[%s6474_s9 + $0x38] sm:$0xff] }
  0x67   : > { %271 = vst [vmem:[#allocation2 + $0xb8] sm:$0xff] %v6305_v0  ;;  %272 = vst [vmem:[#allocation2 + $0xc0] sm:$0xff] %v6305_v0  ;;  %5694 = vmatprep.subr.bf16.mxu1 %v6067_v5  ;;  %v6073_v29 = vld [vmem:[#allocation7] sm:$0xff]   ;;  %v238_v31 = vld [vmem:[%s6474_s9 + $0xb0] sm:$0xff]  ;;  %p6205_p7 = pnand %p6204_p3, %p6198_p8 }
  0x68   : > { %273 = vst [vmem:[#allocation2 + $0xc8] sm:$0xff] %v6305_v0  ;;  %274 = vst [vmem:[#allocation2 + $0xd0] sm:$0xff] %v6305_v0  ;;  %v239_v32 = vld [vmem:[%s6474_s9 + $0xb8] sm:$0xff]  ;;  %v224_v37 = vld [vmem:[%s6474_s9 + $0x40] sm:$0xff] }
  0x69   : > { %275 = vst [vmem:[#allocation2 + $0xd8] sm:$0xff] %v6305_v0  ;;  %276 = vst [vmem:[#allocation2 + $0xe0] sm:$0xff] %v6305_v0  ;;  %5122 = vmatpush3.bf16.msra.mxu0 %v6067_v5  ;;  %v240_v38 = vld [vmem:[%s6474_s9 + $0xc0] sm:$0xff]  ;;  %v6074_v44 = vld [vmem:[#allocation7 + $0x88] sm:$0xff]  }
  0x6a   : > { %277 = vst [vmem:[#allocation2 + $0xe8] sm:$0xff] %v6305_v0  ;;  %278 = vst [vmem:[#allocation2 + $0xf0] sm:$0xff] %v6305_v0  ;;  %5702 = vmatpush3.bf16.msra.mxu1 %v6067_v5  ;;  %5123 = vmatprep.subr.bf16.mxu0 %v6068_v10  ;;  %v225_v46 = vld [vmem:[%s6474_s9 + $0x48] sm:$0xff]  ;;  %v6076_v53 = vld [vmem:[#allocation7 + $0x90] sm:$0xff]  }
  0x6b   : > { %279 = vst [vmem:[#allocation2 + $0xf8] sm:$0xff] %v6305_v0  ;;  %280 = vst [vmem:[#allocation2 + $0x100] sm:$0xff] %v6305_v0  ;;  %5695 = vmatprep.subr.bf16.mxu1 %v6068_v10  ;;  %v6075_v48 = vld [vmem:[#allocation7 + $0x8] sm:$0xff]   ;;  %v6077_v54 = vld [vmem:[#allocation7 + $0x10] sm:$0xff]  }
  0x6c   : > { %281 = vst [vmem:[#allocation2 + $0x108] sm:$0xff] %v6305_v0  ;;  %282 = vst [vmem:[#allocation2 + $0x110] sm:$0xff] %v6305_v0  ;;  %v241_v49 = vld [vmem:[%s6474_s9 + $0xc8] sm:$0xff]  ;;  %v226_v60 = vld [vmem:[%s6474_s9 + $0x50] sm:$0xff] }
  0x6d   : > { %283 = vst [vmem:[#allocation2 + $0x118] sm:$0xff] %v6305_v0  ;;  %284 = vst [vmem:[#allocation2 + $0x120] sm:$0xff] %v6305_v0  ;;  %5124 = vmatpush3.bf16.msra.mxu0 %v6068_v10  ;;  %v227_v61 = vld [vmem:[%s6474_s9 + $0x58] sm:$0xff]  ;;  %v242_v62 = vld [vmem:[%s6474_s9 + $0xd0] sm:$0xff] }
  0x6e   : > { %285 = vst [vmem:[#allocation2 + $0x128] sm:$0xff] %v6305_v0  ;;  %286 = vst [vmem:[#allocation2 + $0x130] sm:$0xff] %v6305_v0  ;;  %5703 = vmatpush3.bf16.msra.mxu1 %v6068_v10  ;;  %5125 = vmatprep.subr.bf16.mxu0 %v6069_v17  ;;  %v243_v2 = vld [vmem:[%s6474_s9 + $0xd8] sm:$0xff] }
  0x6f   : > { %287 = vst [vmem:[#allocation2 + $0x138] sm:$0xff] %v6305_v0  ;;  %288 = vst [vmem:[#allocation2 + $0x140] sm:$0xff] %v6305_v0  ;;  %5696 = vmatprep.subr.bf16.mxu1 %v6069_v17  ;;  %v6078_v5 = vld [vmem:[#allocation7 + $0x98] sm:$0xff]  }
  0x70   : > { %289 = vst [vmem:[#allocation2 + $0x148] sm:$0xff] %v6305_v0  ;;  %290 = vst [vmem:[#allocation2 + $0x150] sm:$0xff] %v6305_v0 }
  0x71   : > { %291 = vst [vmem:[#allocation2 + $0x158] sm:$0xff] %v6305_v0  ;;  %292 = vst [vmem:[#allocation2 + $0x160] sm:$0xff] %v6305_v0  ;;  %5126 = vmatpush3.bf16.msra.mxu0 %v6069_v17 }
  0x72   : > { %293 = vst [vmem:[#allocation2 + $0x168] sm:$0xff] %v6305_v0  ;;  %294 = vst [vmem:[#allocation2 + $0x170] sm:$0xff] %v6305_v0  ;;  %5704 = vmatpush3.bf16.msra.mxu1 %v6069_v17  ;;  %5127 = vmatprep.subr.bf16.mxu0 %v6070_v24  ;;  %v229_v17 = vld [vmem:[%s6474_s9 + $0x68] sm:$0xff] }
  0x73   : > { %295 = vst [vmem:[#allocation2 + $0x178] sm:$0xff] %v6305_v0  ;;  %296 = vst [vmem:[#allocation2 + $0x180] sm:$0xff] %v6305_v0  ;;  %5697 = vmatprep.subr.bf16.mxu1 %v6070_v24 }
  0x74   : > { %297 = vst [vmem:[#allocation2 + $0x188] sm:$0xff] %v6305_v0  ;;  %298 = vst [vmem:[#allocation2 + $0x190] sm:$0xff] %v6305_v0 }
  0x75   : > { %318 = vst.msk [vmem:[#allocation2 + $0xc1] sm:$0xff] %vm303_vm0, %v230_v6  ;;  %319 = vst.msk [vmem:[#allocation2 + $0xc9] sm:$0xff] %vm303_vm0, %v231_v7  ;;  %5128 = vmatpush3.bf16.msra.mxu0 %v6070_v24  ;;  %v6079_v6 = vld [vmem:[#allocation7 + $0x18] sm:$0xff]  }
  0x76   : > { %304 = vst.msk [vmem:[#allocation2 + $0x19] sm:$0xff] %vm303_vm0, %v216_v8  ;;  %320 = vst.msk [vmem:[#allocation2 + $0xd9] sm:$0xff] %vm303_vm0, %v232_v9  ;;  %5705 = vmatpush3.bf16.msra.mxu1 %v6070_v24  ;;  %5129 = vmatprep.subr.bf16.mxu0 %v6071_v26 }
  0x77   : > { %305 = vst.msk [vmem:[#allocation2 + $0x21] sm:$0xff] %vm303_vm0, %v217_v11  ;;  %321 = vst.msk [vmem:[#allocation2 + $0xe1] sm:$0xff] %vm303_vm0, %v233_v12  ;;  %5698 = vmatprep.subr.bf16.mxu1 %v6071_v26  ;;  %v228_v11 = vld [vmem:[%s6474_s9 + $0x60] sm:$0xff] }
  0x78   : > { %306 = vst.msk [vmem:[#allocation2 + $0x31] sm:$0xff] %vm303_vm0, %v218_v13  ;;  %307 = vst.msk [vmem:[#allocation2 + $0x39] sm:$0xff] %vm303_vm0, %v219_v14  ;;  %v6080_v14 = vld [vmem:[#allocation7 + $0xa0] sm:$0xff]  }
  0x79   : > { %322 = vst.msk [vmem:[#allocation2 + $0xf1] sm:$0xff] %vm303_vm0, %v234_v15  ;;  %323 = vst.msk [vmem:[#allocation2 + $0xf9] sm:$0xff] %vm303_vm0, %v235_v16  ;;  %5130 = vmatpush3.bf16.msra.mxu0 %v6071_v26  ;;  %v6081_v15 = vld [vmem:[#allocation7 + $0x20] sm:$0xff]  }
  0x7a   : > { %308 = vst.msk [vmem:[#allocation2 + $0x49] sm:$0xff] %vm303_vm0, %v220_v21  ;;  %324 = vst.msk [vmem:[#allocation2 + $0x109] sm:$0xff] %vm303_vm0, %v236_v22  ;;  %5706 = vmatpush3.bf16.msra.mxu1 %v6071_v26  ;;  %5243 = vmatprep.subr.bf16.mxu0 %v6072_v28  ;;  %v244_v16 = vld [vmem:[%s6474_s9 + $0xe0] sm:$0xff]  ;;  %v245_v21 = vld [vmem:[%s6474_s9 + $0xe8] sm:$0xff] }
  0x7b   : > { %309 = vst.msk [vmem:[#allocation2 + $0x51] sm:$0xff] %vm303_vm0, %v221_v23  ;;  %325 = vst.msk [vmem:[#allocation2 + $0x111] sm:$0xff] %vm303_vm0, %v237_v25  ;;  %5179 = vmatprep.subr.bf16.mxu1 %v6073_v29 }
  0x7c   : > { %v6553_v18 = vld [vmem:[#allocation2 + $0xc0] sm:$0xff]  ;;  %v6555_v19 = vld [vmem:[#allocation2 + $0xc8] sm:$0xff]  ;;  %310 = vst.msk [vmem:[#allocation2 + $0x61] sm:$0xff] %vm303_vm0, %v222_v27  ;;  %v6578_v34 = vld [vmem:[#allocation2 + $0xd0] sm:$0xff] }
  0x7d   : > { %v6560_v20 = vpack.c.bf16 %v6555_v19, %v6553_v18  ;;  %v6576_v33 = vld [vmem:[#allocation2 + $0x18] sm:$0xff]  ;;  %311 = vst.msk [vmem:[#allocation2 + $0x69] sm:$0xff] %vm303_vm0, %v223_v30  ;;  %326 = vst.msk [vmem:[#allocation2 + $0x121] sm:$0xff] %vm303_vm0, %v238_v31 }
  0x7e   : > { %v6580_v35 = vld [vmem:[#allocation2 + $0xd8] sm:$0xff]  ;;  %327 = vst.msk [vmem:[#allocation2 + $0x129] sm:$0xff] %vm303_vm0, %v239_v32  ;;  %v6585_v36 = vld [vmem:[#allocation2 + $0x20] sm:$0xff]  ;;  %v6589_v39 = vld [vmem:[#allocation2 + $0x28] sm:$0xff]  ;;  %v6597_v41 = vpack.c.bf16 %v6576_v33, %v6305_v0 }
  0x7f   : > { %5155 = vmatprep.mubr.bf16.mxu1 %v6560_v20  ;;  %v6591_v40 = vld [vmem:[#allocation2 + $0xe0] sm:$0xff]  ;;  %312 = vst.msk [vmem:[#allocation2 + $0x79] sm:$0xff] %vm303_vm0, %v224_v37  ;;  %328 = vst.msk [vmem:[#allocation2 + $0x139] sm:$0xff] %vm303_vm0, %v240_v38  ;;  %v6601_v42 = vpack.c.bf16 %v6580_v35, %v6578_v34  ;;  %v6603_v43 = vld [vmem:[#allocation2 + $0xe8] sm:$0xff]  ;;  %v6607_v45 = vpack.c.bf16 %v6589_v39, %v6585_v36  ;;  %v6677_v22 = vpack.c.bf16 %v6585_v36, %v6576_v33 }
  0x80   : > { %v6612_v47 = vpack.c.bf16 %v6603_v43, %v6591_v40  ;;  %313 = vst.msk [vmem:[#allocation2 + $0x81] sm:$0xff] %vm303_vm0, %v225_v46  ;;  %5132 = vmatmul.mubr.bf16.vlgmr.msra.gmra.mrb[0].mxu0 %v6597_v41  ;;  %v342_v50 = vld [vmem:[#allocation2 + $0x30] sm:$0xff]  ;;  %v6618_v51 = vld [vmem:[#allocation2 + $0x38] sm:$0xff]  ;;  %329 = vst.msk [vmem:[#allocation2 + $0x141] sm:$0xff] %vm303_vm0, %v241_v49 }
  0x81   : > { %5156 = vmatmul.mubr.bf16.vlgmr.msra.gmra.mrb[0].mxu1 %v6601_v42  ;;  %v6620_v52 = vld [vmem:[#allocation2 + $0xf0] sm:$0xff]  ;;  %5244 = vmatpush3.bf16.msra.mxu0 %v6072_v28  ;;  %v6623_v55 = vld [vmem:[#allocation2 + $0xf8] sm:$0xff]  ;;  %v6625_v56 = vld [vmem:[#allocation2 + $0x40] sm:$0xff]  ;;  %v6639_v63 = vpack.c.bf16 %v6618_v51, %v342_v50  ;;  %314 = vst.msk [vmem:[#allocation2 + $0x91] sm:$0xff] %vm303_vm0, %v226_v60  ;;  %v6685_v24 = vpack.c.bf16 %v342_v50, %v6589_v39 }
  0x82   : > { %5180 = vmatpush3.bf16.msra.mxu1 %v6073_v29  ;;  %5245 = vmatprep.subr.bf16.mxu0 %v6074_v44  ;;  %v6628_v57 = vld [vmem:[#allocation2 + $0x48] sm:$0xff]  ;;  %v6630_v58 = vld [vmem:[#allocation2 + $0x100] sm:$0xff]  ;;  %v6643_v0 = vpack.c.bf16 %v6623_v55, %v6620_v52  ;;  %315 = vst.msk [vmem:[#allocation2 + $0x99] sm:$0xff] %vm303_vm0, %v227_v61  ;;  %330 = vst.msk [vmem:[#allocation2 + $0x151] sm:$0xff] %vm303_vm0, %v242_v62 }
  0x83   : > { %5135 = vmatprep.mubr.bf16.mxu0 %v6607_v45  ;;  %v6632_v59 = vld [vmem:[#allocation2 + $0x108] sm:$0xff]  ;;  %5159 = vmatprep.mubr.bf16.mxu1 %v6612_v47  ;;  %331 = vst.msk [vmem:[#allocation2 + $0x159] sm:$0xff] %vm303_vm0, %v243_v2  ;;  %v6652_v3 = vpack.c.bf16 %v6628_v57, %v6625_v56  ;;  %v346_v7 = vld [vmem:[#allocation2 + $0x50] sm:$0xff]  ;;  %v6658_v8 = vld [vmem:[#allocation2 + $0x58] sm:$0xff] }
  0x84   : > { %5181 = vmatprep.subr.bf16.mxu1 %v6075_v48  ;;  %v6656_v4 = vpack.c.bf16 %v6632_v59, %v6630_v58  ;;  %v6660_v9 = vld [vmem:[#allocation2 + $0x110] sm:$0xff]  ;;  %v6662_v10 = vld [vmem:[#allocation2 + $0x118] sm:$0xff]  ;;  %v6667_v12 = vld [vmem:[#allocation2 + $0x60] sm:$0xff]  ;;  %316 = vst.msk [vmem:[#allocation2 + $0xa9] sm:$0xff] %vm303_vm0, %v228_v11  ;;  %v6692_v26 = vpack.c.bf16 %v6658_v8, %v346_v7  ;;  %v6723_v50 = vpack.c.bf16 %v346_v7, %v6628_v57 }
  0x85   : > { %5246 = vmatpush3.bf16.msra.mxu0 %v6074_v44  ;;  %v6669_v13 = vld [vmem:[#allocation2 + $0x68] sm:$0xff]  ;;  %v6679_v23 = vld [vmem:[#allocation2 + $0x120] sm:$0xff]  ;;  %332 = vst.msk [vmem:[#allocation2 + $0x169] sm:$0xff] %vm303_vm0, %v244_v16  ;;  %317 = vst.msk [vmem:[#allocation2 + $0xb1] sm:$0xff] %vm303_vm0, %v229_v17  ;;  %v6696_v27 = vpack.c.bf16 %v6662_v10, %v6660_v9 }
  0x86   : > { %5182 = vmatpush3.bf16.msra.mxu1 %v6075_v48  ;;  %5247 = vmatprep.subr.bf16.mxu0 %v6076_v53  ;;  %333 = vst.msk [vmem:[#allocation2 + $0x171] sm:$0xff] %vm303_vm0, %v245_v21  ;;  %v6689_v25 = vld [vmem:[#allocation2 + $0x128] sm:$0xff]  ;;  %v6700_v28 = vpack.c.bf16 %v6669_v13, %v6667_v12  ;;  %v6082_v30 = vld [vmem:[#allocation7 + $0xa8] sm:$0xff]   ;;  %v350_v31 = vld [vmem:[#allocation2 + $0x70] sm:$0xff]  ;;  %v6718_v48 = vpack.c.bf16 %v6625_v56, %v6618_v51 }
  0x87   : > { %5183 = vmatprep.subr.bf16.mxu1 %v6077_v54  ;;  %v6704_v29 = vpack.c.bf16 %v6689_v25, %v6679_v23  ;;  %v6083_v32 = vld [vmem:[#allocation7 + $0x28] sm:$0xff]   ;;  %v6708_v36 = vld [vmem:[#allocation2 + $0x130] sm:$0xff]  ;;  %v352_v38 = vld [vmem:[#allocation2 + $0x80] sm:$0xff]  ;;  %v6752_v17 = vpack.c.bf16 %v350_v31, %v6669_v13 }
  0x88   : > { %5136 = vmatmul.mubr.bf16.gmra.mrb[4].mxu0 %v6639_v63  ;;  %v351_v33 = vld [vmem:[#allocation2 + $0x78] sm:$0xff]  ;;  %v353_v39 = vld [vmem:[#allocation2 + $0x88] sm:$0xff]  ;;  %v6714_v44 = vld [vmem:[#allocation2 + $0x140] sm:$0xff] }
  0x89   : > { %5160 = vmatmul.mubr.bf16.gmra.mrb[4].mxu1 %v6643_v0  ;;  %5248 = vmatpush3.bf16.msra.mxu0 %v6076_v53  ;;  %v6710_v37 = vld [vmem:[#allocation2 + $0x138] sm:$0xff]  ;;  %v6084_v46 = vld [vmem:[#allocation7 + $0xb0] sm:$0xff]   ;;  %v6720_v49 = vld [vmem:[#allocation2 + $0x148] sm:$0xff]  ;;  %v6731_v61 = vpack.c.bf16 %v353_v39, %v352_v38 }
  0x8a   : > { %5184 = vmatpush3.bf16.msra.mxu1 %v6077_v54  ;;  %5139 = vmatprep.mubr.bf16.mxu0 %v6652_v3  ;;  %v6085_v53 = vld [vmem:[#allocation7 + $0x30] sm:$0xff]   ;;  %v6725_v54 = vpack.c.bf16 %v351_v33, %v350_v31  ;;  %v6729_v60 = vpack.c.bf16 %v6710_v37, %v6708_v36  ;;  %v6735_v51 = vpack.c.bf16 %v6720_v49, %v6714_v44  ;;  %v6086_v56 = vld [vmem:[#allocation7 + $0xb8] sm:$0xff]   ;;  %v354_v62 = vld [vmem:[#allocation2 + $0x90] sm:$0xff] }
  0x8b   : > { %5163 = vmatprep.mubr.bf16.mxu1 %v6656_v4  ;;  %5249 = vmatprep.subr.bf16.mxu0 %v6078_v5  ;;  %v6087_v57 = vld [vmem:[#allocation7 + $0x38] sm:$0xff]   ;;  %v355_v2 = vld [vmem:[#allocation2 + $0x98] sm:$0xff]  ;;  %v356_v7 = vld [vmem:[#allocation2 + $0xa0] sm:$0xff] }
  0x8c   : > { %5185 = vmatprep.subr.bf16.mxu1 %v6079_v6  ;;  %v6743_v11 = vld [vmem:[#allocation2 + $0x160] sm:$0xff]  ;;  %v6088_v16 = vld [vmem:[#allocation7 + $0x140] sm:$0xff]   ;;  %v6754_v21 = vld [vmem:[#allocation2 + $0x168] sm:$0xff] }
  0x8d   : > { %5250 = vmatpush3.bf16.msra.mxu0 %v6078_v5  ;;  %v6737_v5 = vld [vmem:[#allocation2 + $0x150] sm:$0xff]  ;;  %8071 = vst [vmem:[#allocation17_spill] sm:$0xff] %v6743_v11  ;;  %8072 = vst [vmem:[#allocation18_spill] sm:$0xff] %v6754_v21  ;;  %v6766_v1 = vpack.c.bf16 %v6754_v21, %v6743_v11  ;;  %v6768_v31 = vld [vmem:[#allocation2 + $0xb8] sm:$0xff] }
  0x8e   : > { %5186 = vmatpush3.bf16.msra.mxu1 %v6079_v6  ;;  %5251 = vmatprep.subr.bf16.mxu0 %v6080_v14  ;;  %v6739_v6 = vld [vmem:[#allocation2 + $0x158] sm:$0xff]  ;;  %v358_v13 = vld [vmem:[#allocation2 + $0xb0] sm:$0xff] }
  0x8f   : > { %5187 = vmatprep.subr.bf16.mxu1 %v6081_v15  ;;  %8070 = vst [vmem:[#allocation16_spill] sm:$0xff] %v6739_v6  ;;  %v6778_v21 = vld [vmem:[#allocation2 + $0x178] sm:$0xff] }
  0x90   : > { %5140 = vmatmul.mubr.bf16.gmra.mrb[8].mxu0 %v6692_v26  ;;  %8074 = vst [vmem:[#allocation20_spill] sm:$0xff] %v6778_v21 }
  0x91   : > { %5164 = vmatmul.mubr.bf16.gmra.mrb[8].mxu1 %v6696_v27  ;;  %5143 = vmatprep.mubr.bf16.mxu0 %v6700_v28 }
  0x92   : > { %5167 = vmatprep.mubr.bf16.mxu1 %v6704_v29  ;;  %5252 = vmatpush3.bf16.msra.mxu0 %v6080_v14  ;;  %v6747_v14 = vpack.c.bf16 %v6667_v12, %v6658_v8  ;;  %v6760_v8 = vpack.c.bf16 %v6739_v6, %v6737_v5 }
  0x93   : > { %5188 = vmatpush3.bf16.msra.mxu1 %v6081_v15  ;;  %5253 = vmatprep.subr.bf16.mxu0 %v6082_v30  ;;  %v357_v15 = vld [vmem:[#allocation2 + $0xa8] sm:$0xff] }
  0x94   : > { %5189 = vmatprep.subr.bf16.mxu1 %v6083_v32  ;;  %v6762_v12 = vpack.c.bf16 %v357_v15, %v356_v7  ;;  %v6795_v6 = vpack.c.bf16 %v358_v13, %v357_v15  ;;  %v6098_v15 = vld [vmem:[#allocation7 + $0x168] sm:$0xff]  }
  0x96   : > { %5254 = vmatpush3.bf16.msra.mxu0 %v6082_v30  ;;  %v6089_v30 = vld [vmem:[#allocation7 + $0x100] sm:$0xff]  }
  0x97   : > { %5190 = vmatpush3.bf16.msra.mxu1 %v6083_v32  ;;  %5255 = vmatprep.subr.bf16.mxu0 %v6084_v46  ;;  %v6756_v32 = vpack.c.bf16 %v355_v2, %v354_v62 }
  0x98   : > { %5191 = vmatprep.subr.bf16.mxu1 %v6085_v53  ;;  %5144 = vmatmul.mubr.bf16.gmra.mrb[12].mxu0 %v6725_v54 }
  0x99   : > { %5168 = vmatmul.mubr.bf16.gmra.mrb[12].mxu1 %v6729_v60  ;;  %5147 = vmatprep.mubr.bf16.mxu0 %v6731_v61 }
  0x9a   : > { %5171 = vmatprep.mubr.bf16.mxu1 %v6735_v51  ;;  %5256 = vmatpush3.bf16.msra.mxu0 %v6084_v46  ;;  %v6772_v46 = vld [vmem:[#allocation2 + $0x170] sm:$0xff] }
  0x9b   : > { %5192 = vmatpush3.bf16.msra.mxu1 %v6085_v53  ;;  %5257 = vmatprep.subr.bf16.mxu0 %v6086_v56  ;;  %8073 = vst [vmem:[#allocation19_spill] sm:$0xff] %v6772_v46  ;;  %v6774_v53 = vpack.c.bf16 %v352_v38, %v351_v33  ;;  %v6787_v11 = vpack.c.bf16 %v6778_v21, %v6772_v46  ;;  %v8075_v38 = vmov 0.0|0.0   ;;  %v6092_v21 = vld [vmem:[#allocation7 + $0x150] sm:$0xff]  }
  0x9c   : > { %5193 = vmatprep.subr.bf16.mxu1 %v6087_v57  ;;  %v6791_v33 = vpack.c.bf16 %v356_v7, %v355_v2  ;;  %v6093_v46 = vld [vmem:[#allocation7 + $0x110] sm:$0xff]   ;;  %v6094_v2 = vld [vmem:[#allocation7 + $0x158] sm:$0xff]  }
  0x9d   : > { %v6095_v7 = vld [vmem:[#allocation7 + $0x118] sm:$0xff]  }
  0x9e   : > { %5258 = vmatpush3.bf16.msra.mxu0 %v6086_v56  ;;  %v6780_v56 = vpack.c.bf16 %v354_v62, %v353_v39  ;;  %v6090_v39 = vld [vmem:[#allocation7 + $0x148] sm:$0xff]  }
  0x9f   : > { %5194 = vmatpush3.bf16.msra.mxu1 %v6087_v57  ;;  %5435 = vmatprep.subr.bf16.mxu0 %v6088_v16  ;;  %v6783_v57 = vpack.c.bf16 %v6768_v31, %v358_v13  ;;  %v6091_v62 = vld [vmem:[#allocation7 + $0x108] sm:$0xff]   ;;  %v6865_v13 = vld [vmem:[#allocation7 + $0x200] sm:$0xff]  }
  0xa0   : > { %5307 = vmatprep.subr.bf16.mxu1 %v6089_v30  ;;  %5148 = vmatmul.mubr.bf16.gmra.mrb[16].mxu0 %v6756_v32 }
  0xa1   : > { %5172 = vmatmul.mubr.bf16.gmra.mrb[16].mxu1 %v6760_v8  ;;  %5151 = vmatprep.mubr.bf16.mxu0 %v6762_v12 }
  0xa2   : > { %5175 = vmatprep.mubr.bf16.mxu1 %v6766_v1 }
  0xa8   : > { %5152 = vmatmul.mubr.bf16.gmra.mrb[20].mxu0 %v6783_v57 }
  0xa9   : > { %5176 = vmatmul.mubr.bf16.gmra.mrb[20].mxu1 %v6787_v11  ;;  %5259 = vmatprep.mubr.bf16.mxu0 %v8075_v38 }
  0xaa   : > { %5195 = vmatprep.mubr.bf16.mxu1 %v8075_v38  ;;  %v6881_v38 = vpack.c.bf16 %v6578_v34, %v6555_v19  ;;  %v6897_v19 = vpack.c.bf16 %v6630_v58, %v6623_v55  ;;  %v6905_v34 = vpack.c.bf16 %v6660_v9, %v6632_v59 }
  0xb0   : > { %5260 = vmatmul.mubr.bf16.vlgmr.msra.gmra.mrb[24].mxu0 %v6597_v41 }
  0xb1   : > { %5196 = vmatmul.mubr.bf16.vlgmr.msra.gmra.mrb[24].mxu1 %v6597_v41  ;;  %5436 = vmatpush3.bf16.msra.mxu0 %v6088_v16  ;;  %v6096_v41 = vld [vmem:[#allocation7 + $0x160] sm:$0xff]   ;;  %v6099_v16 = vld [vmem:[#allocation7 + $0x128] sm:$0xff]  }
  0xb2   : > { %5308 = vmatpush3.bf16.msra.mxu1 %v6089_v30  ;;  %5199 = vmatprep.mubr.bf16.mxu1 %v6607_v45  ;;  %v6103_v30 = vld [vmem:[#allocation7 + $0x138] sm:$0xff]  }
  0xb3   : > { %5263 = vmatprep.mubr.bf16.mxu0 %v6607_v45  ;;  %5437 = vmatprep.subr.bf16.mxu0 %v6090_v39  ;;  %v6097_v45 = vld [vmem:[#allocation7 + $0x120] sm:$0xff]  }
  0xb4   : > { %5309 = vmatprep.subr.bf16.mxu1 %v6091_v62 }
  0xb5   : > { %5438 = vmatpush3.bf16.msra.mxu0 %v6090_v39 }
  0xb6   : > { %5310 = vmatpush3.bf16.msra.mxu1 %v6091_v62  ;;  %5439 = vmatprep.subr.bf16.mxu0 %v6092_v21 }
  0xb7   : > { %5311 = vmatprep.subr.bf16.mxu1 %v6093_v46 }
  0xb8   : > { %5264 = vmatmul.mubr.bf16.gmra.mrb[28].mxu0 %v6639_v63 }
  0xb9   : > { %5200 = vmatmul.mubr.bf16.gmra.mrb[28].mxu1 %v6639_v63  ;;  %5267 = vmatprep.mubr.bf16.mxu0 %v6652_v3  ;;  %v6100_v63 = vld [vmem:[#allocation7 + $0x170] sm:$0xff]  }
  0xba   : > { %5203 = vmatprep.mubr.bf16.mxu1 %v6652_v3  ;;  %5440 = vmatpush3.bf16.msra.mxu0 %v6092_v21  ;;  %v6101_v3 = vld [vmem:[#allocation7 + $0x130] sm:$0xff]   ;;  %v6102_v21 = vld [vmem:[#allocation7 + $0x178] sm:$0xff]  }
  0xbb   : > { %5312 = vmatpush3.bf16.msra.mxu1 %v6093_v46  ;;  %5441 = vmatprep.subr.bf16.mxu0 %v6094_v2  ;;  %v6867_v46 = vld [vmem:[#allocation7 + $0x180] sm:$0xff]  }
  0xbc   : > { %5313 = vmatprep.subr.bf16.mxu1 %v6095_v7 }
  0xbe   : > { %5442 = vmatpush3.bf16.msra.mxu0 %v6094_v2 }
  0xbf   : > { %5314 = vmatpush3.bf16.msra.mxu1 %v6095_v7  ;;  %5443 = vmatprep.subr.bf16.mxu0 %v6096_v41 }
  0xc0   : > { %5315 = vmatprep.subr.bf16.mxu1 %v6097_v45  ;;  %5268 = vmatmul.mubr.bf16.gmra.mrb[32].mxu0 %v6692_v26 }
  0xc1   : > { %5204 = vmatmul.mubr.bf16.gmra.mrb[32].mxu1 %v6692_v26  ;;  %5271 = vmatprep.mubr.bf16.mxu0 %v6700_v28  ;;  %v6104_v26 = vld [vmem:[#allocation7 + $0x1c0] sm:$0xff]  }
  0xc2   : > { %5207 = vmatprep.mubr.bf16.mxu1 %v6700_v28  ;;  %5444 = vmatpush3.bf16.msra.mxu0 %v6096_v41  ;;  %v6105_v28 = vld [vmem:[#allocation7 + $0xc0] sm:$0xff]  }
  0xc3   : > { %5316 = vmatpush3.bf16.msra.mxu1 %v6097_v45  ;;  %5445 = vmatprep.subr.bf16.mxu0 %v6098_v15 }
  0xc4   : > { %5317 = vmatprep.subr.bf16.mxu1 %v6099_v16 }
  0xc6   : > { %5446 = vmatpush3.bf16.msra.mxu0 %v6098_v15 }
  0xc7   : > { %5318 = vmatpush3.bf16.msra.mxu1 %v6099_v16  ;;  %5447 = vmatprep.subr.bf16.mxu0 %v6100_v63 }
  0xc8   : > { %5319 = vmatprep.subr.bf16.mxu1 %v6101_v3  ;;  %5272 = vmatmul.mubr.bf16.gmra.mrb[36].mxu0 %v6725_v54 }
  0xc9   : > { %5208 = vmatmul.mubr.bf16.gmra.mrb[36].mxu1 %v6725_v54  ;;  %5275 = vmatprep.mubr.bf16.mxu0 %v6731_v61  ;;  %v246_v54 = vld [vmem:[%s6474_s9 + $0xf0] sm:$0xff] }
  0xca   : > { %5211 = vmatprep.mubr.bf16.mxu1 %v6731_v61  ;;  %5448 = vmatpush3.bf16.msra.mxu0 %v6100_v63  ;;  %334 = vst.msk [vmem:[#allocation2 + $0x181] sm:$0xff] %vm303_vm0, %v246_v54  ;;  %v247_v61 = vld [vmem:[%s6474_s9 + $0xf8] sm:$0xff] }
  0xcb   : > { %5320 = vmatpush3.bf16.msra.mxu1 %v6101_v3  ;;  %5449 = vmatprep.subr.bf16.mxu0 %v6102_v21  ;;  %335 = vst.msk [vmem:[#allocation2 + $0x189] sm:$0xff] %vm303_vm0, %v247_v61 }
  0xcc   : > { %5321 = vmatprep.subr.bf16.mxu1 %v6103_v30 }
  0xce   : > { %5450 = vmatpush3.bf16.msra.mxu0 %v6102_v21 }
  0xcf   : > { %5322 = vmatpush3.bf16.msra.mxu1 %v6103_v30  ;;  %5499 = vmatprep.subr.bf16.mxu0 %v6104_v26 }
  0xd0   : > { %5371 = vmatprep.subr.bf16.mxu1 %v6105_v28  ;;  %5276 = vmatmul.mubr.bf16.gmra.mrb[40].mxu0 %v6756_v32 }
  0xd1   : > { %5212 = vmatmul.mubr.bf16.gmra.mrb[40].mxu1 %v6756_v32  ;;  %5279 = vmatprep.mubr.bf16.mxu0 %v6762_v12  ;;  %v6117_v32 = vld [vmem:[#allocation7 + $0xf0] sm:$0xff]  }
  0xd2   : > { %5215 = vmatprep.mubr.bf16.mxu1 %v6762_v12  ;;  %v6119_v12 = vld [vmem:[#allocation7 + $0xf8] sm:$0xff]   ;;  %v6957_v30 = vld [vmem:[#allocation2 + $0x180] sm:$0xff] }
  0xd8   : > { %5280 = vmatmul.mubr.bf16.gmra.mrb[44].mxu0 %v6783_v57 }
  0xd9   : > { %5216 = vmatmul.mubr.bf16.gmra.mrb[44].mxu1 %v6783_v57  ;;  %5283 = vmatprep.mubr.bf16.mxu0 %v6560_v20  ;;  %v6871_v57 = vpack.c.bf16 %v6553_v18, %v6768_v31  ;;  %v6885_v18 = vpack.c.bf16 %v6591_v40, %v6580_v35  ;;  %v6893_v31 = vpack.c.bf16 %v6620_v52, %v6603_v43  ;;  %v762_v52 = vlaneseq }
  0xda   : > { %5219 = vmatprep.mubr.bf16.mxu1 %v6560_v20  ;;  %v6106_v20 = vld [vmem:[#allocation7 + $0x1c8] sm:$0xff]   ;;  %v6909_v35 = vpack.c.bf16 %v6679_v23, %v6662_v10  ;;  %v6917_v40 = vpack.c.bf16 %v6708_v36, %v6689_v25  ;;  %v6921_v43 = vpack.c.bf16 %v6714_v44, %v6710_v37  ;;  %v6931_v23 = vpack.c.bf16 %v6737_v5, %v6720_v49 }
  0xdb   : > { %v6927_v55 = vshrl.u32 %v762_v52, 7  ;;  %v8076_v37 = vld [vmem:[#allocation16_spill] sm:$0xff]  ;;  %v8077_v44 = vld [vmem:[#allocation17_spill] sm:$0xff] }
  0xdc   : > { %v6935_v39 = vpack.c.bf16 %v8077_v44, %v8076_v37 }
  0xdd   : > { %vm764_vm1 = vcmp.lt.s32.totalorder %v6927_v55, 7  ;;  %vm1424_vm2 = vcmp.lt.s32.totalorder %v6927_v55, 6 }
  0xe0   : > { %5284 = vmatmul.mubr.bf16.gmra.mrb[48].mxu0 %v6601_v42 }
  0xe1   : > { %5220 = vmatmul.mubr.bf16.gmra.mrb[48].mxu1 %v6601_v42  ;;  %5287 = vmatprep.mubr.bf16.mxu0 %v6612_v47  ;;  %v6107_v42 = vld [vmem:[#allocation7 + $0xc8] sm:$0xff]  }
  0xe2   : > { %5223 = vmatprep.mubr.bf16.mxu1 %v6612_v47  ;;  %v6109_v47 = vld [vmem:[#allocation7 + $0xd0] sm:$0xff]  }
  0xe8   : > { %5288 = vmatmul.mubr.bf16.gmra.mrb[52].mxu0 %v6643_v0 }
  0xe9   : > { %5224 = vmatmul.mubr.bf16.gmra.mrb[52].mxu1 %v6643_v0  ;;  %5291 = vmatprep.mubr.bf16.mxu0 %v6656_v4  ;;  %v6110_v0 = vld [vmem:[#allocation7 + $0x1d8] sm:$0xff]  }
  0xea   : > { %5227 = vmatprep.mubr.bf16.mxu1 %v6656_v4  ;;  %v6111_v4 = vld [vmem:[#allocation7 + $0xd8] sm:$0xff]  }
  0xf0   : > { %5292 = vmatmul.mubr.bf16.gmra.mrb[56].mxu0 %v6696_v27 }
  0xf1   : > { %5228 = vmatmul.mubr.bf16.gmra.mrb[56].mxu1 %v6696_v27  ;;  %5295 = vmatprep.mubr.bf16.mxu0 %v6704_v29  ;;  %v6112_v27 = vld [vmem:[#allocation7 + $0x1e0] sm:$0xff]  }
  0xf2   : > { %5231 = vmatprep.mubr.bf16.mxu1 %v6704_v29  ;;  %v6113_v29 = vld [vmem:[#allocation7 + $0xe0] sm:$0xff]  }
  0xf8   : > { %5296 = vmatmul.mubr.bf16.gmra.mrb[60].mxu0 %v6729_v60 }
  0xf9   : > { %5232 = vmatmul.mubr.bf16.gmra.mrb[60].mxu1 %v6729_v60  ;;  %5299 = vmatprep.mubr.bf16.mxu0 %v6735_v51  ;;  %v6114_v60 = vld [vmem:[#allocation7 + $0x1e8] sm:$0xff]  }
  0xfa   : > { %5235 = vmatprep.mubr.bf16.mxu1 %v6735_v51  ;;  %v6115_v51 = vld [vmem:[#allocation7 + $0xe8] sm:$0xff]  }
 0x100   : > { %5300 = vmatmul.mubr.bf16.gmra.mrb[64].mxu0 %v6760_v8 }
 0x101   : > { %5236 = vmatmul.mubr.bf16.gmra.mrb[64].mxu1 %v6760_v8  ;;  %5303 = vmatprep.mubr.bf16.mxu0 %v6766_v1  ;;  %v6118_v8 = vld [vmem:[#allocation7 + $0x1f8] sm:$0xff]  }
 0x102   : > { %5239 = vmatprep.mubr.bf16.mxu1 %v6766_v1  ;;  %v6108_v1 = vld [vmem:[#allocation7 + $0x1d0] sm:$0xff]  }
 0x108   : > { %5304 = vmatmul.mubr.bf16.gmra.mrb[68].mxu0 %v6787_v11 }
 0x109   : > { %5240 = vmatmul.mubr.bf16.gmra.mrb[68].mxu1 %v6787_v11  ;;  %5451 = vmatprep.mubr.bf16.mxu0 %v6677_v22  ;;  %v6116_v11 = vld [vmem:[#allocation7 + $0x1f0] sm:$0xff]  }
 0x10a   : > { %5323 = vmatprep.mubr.bf16.mxu1 %v6677_v22 }
 0x110   : > { %5452 = vmatmul.mubr.bf16.vlgmr.msra.gmra.mrb[72].mxu0 %v6685_v24 }
 0x111   : > { %5324 = vmatmul.mubr.bf16.vlgmr.msra.gmra.mrb[72].mxu1 %v6685_v24  ;;  %5500 = vmatpush3.bf16.msra.mxu0 %v6104_v26 }
 0x112   : > { %5372 = vmatpush3.bf16.msra.mxu1 %v6105_v28  ;;  %5327 = vmatprep.mubr.bf16.mxu1 %v6718_v48 }
 0x113   : > { %5455 = vmatprep.mubr.bf16.mxu0 %v6718_v48  ;;  %5501 = vmatprep.subr.bf16.mxu0 %v6106_v20 }
 0x114   : > { %5373 = vmatprep.subr.bf16.mxu1 %v6107_v42 }
 0x115   : > { %5502 = vmatpush3.bf16.msra.mxu0 %v6106_v20 }
 0x116   : > { %5374 = vmatpush3.bf16.msra.mxu1 %v6107_v42  ;;  %5503 = vmatprep.subr.bf16.mxu0 %v6108_v1  ;;  %v8078_v42 = vld [vmem:[#allocation18_spill] sm:$0xff] }
 0x117   : > { %5375 = vmatprep.subr.bf16.mxu1 %v6109_v47 }
 0x118   : > { %5456 = vmatmul.mubr.bf16.gmra.mrb[76].mxu0 %v6723_v50 }
 0x119   : > { %5328 = vmatmul.mubr.bf16.gmra.mrb[76].mxu1 %v6723_v50  ;;  %5459 = vmatprep.mubr.bf16.mxu0 %v6747_v14 }
 0x11a   : > { %5331 = vmatprep.mubr.bf16.mxu1 %v6747_v14  ;;  %5504 = vmatpush3.bf16.msra.mxu0 %v6108_v1  ;;  %v8079_v1 = vld [vmem:[#allocation19_spill] sm:$0xff] }
 0x11b   : > { %5376 = vmatpush3.bf16.msra.mxu1 %v6109_v47  ;;  %5505 = vmatprep.subr.bf16.mxu0 %v6110_v0  ;;  %v6962_v47 = vpack.c.bf16 %v8079_v1, %v8078_v42 }
 0x11c   : > { %5377 = vmatprep.subr.bf16.mxu1 %v6111_v4 }
 0x11e   : > { %5506 = vmatpush3.bf16.msra.mxu0 %v6110_v0  ;;  %v8080_v0 = vld [vmem:[#allocation20_spill] sm:$0xff] }
 0x11f   : > { %5378 = vmatpush3.bf16.msra.mxu1 %v6111_v4  ;;  %5507 = vmatprep.subr.bf16.mxu0 %v6112_v27  ;;  %v6966_v4 = vpack.c.bf16 %v6957_v30, %v8080_v0 }
 0x120   : > { %5379 = vmatprep.subr.bf16.mxu1 %v6113_v29  ;;  %5460 = vmatmul.mubr.bf16.gmra.mrb[80].mxu0 %v6752_v17 }
 0x121   : > { %5332 = vmatmul.mubr.bf16.gmra.mrb[80].mxu1 %v6752_v17  ;;  %5463 = vmatprep.mubr.bf16.mxu0 %v6774_v53  ;;  %8081 = vst [vmem:[#allocation16_spill] sm:$0xff] %v6966_v4 }
 0x122   : > { %5335 = vmatprep.mubr.bf16.mxu1 %v6774_v53  ;;  %5508 = vmatpush3.bf16.msra.mxu0 %v6112_v27 }
 0x123   : > { %5380 = vmatpush3.bf16.msra.mxu1 %v6113_v29  ;;  %5509 = vmatprep.subr.bf16.mxu0 %v6114_v60 }
 0x124   : > { %5381 = vmatprep.subr.bf16.mxu1 %v6115_v51 }
 0x126   : > { %5510 = vmatpush3.bf16.msra.mxu0 %v6114_v60 }
 0x127   : > { %5382 = vmatpush3.bf16.msra.mxu1 %v6115_v51  ;;  %5511 = vmatprep.subr.bf16.mxu0 %v6116_v11 }
 0x128   : > { %5383 = vmatprep.subr.bf16.mxu1 %v6117_v32  ;;  %5464 = vmatmul.mubr.bf16.gmra.mrb[84].mxu0 %v6780_v56 }
 0x129   : > { %5336 = vmatmul.mubr.bf16.gmra.mrb[84].mxu1 %v6780_v56  ;;  %5467 = vmatprep.mubr.bf16.mxu0 %v6791_v33 }
 0x12a   : > { %5339 = vmatprep.mubr.bf16.mxu1 %v6791_v33  ;;  %5512 = vmatpush3.bf16.msra.mxu0 %v6116_v11 }
 0x12b   : > { %5384 = vmatpush3.bf16.msra.mxu1 %v6117_v32  ;;  %5513 = vmatprep.subr.bf16.mxu0 %v6118_v8 }
 0x12c   : > { %5385 = vmatprep.subr.bf16.mxu1 %v6119_v12 }
 0x12e   : > { %5514 = vmatpush3.bf16.msra.mxu0 %v6118_v8 }
 0x12f   : > { %5386 = vmatpush3.bf16.msra.mxu1 %v6119_v12  ;;  %5627 = vmatprep.subr.bf16.mxu0 %v6865_v13 }
 0x130   : > { %5563 = vmatprep.subr.bf16.mxu1 %v6867_v46  ;;  %5468 = vmatmul.mubr.bf16.gmra.mrb[88].mxu0 %v6795_v6 }
 0x131   : > { %5340 = vmatmul.mubr.bf16.gmra.mrb[88].mxu1 %v6795_v6  ;;  %5471 = vmatprep.mubr.bf16.mxu0 %v6871_v57 }
 0x132   : > { %5343 = vmatprep.mubr.bf16.mxu1 %v6871_v57 }
 0x138   : > { %5472 = vmatmul.mubr.bf16.gmra.mrb[92].mxu0 %v6881_v38 }
 0x139   : > { %5344 = vmatmul.mubr.bf16.gmra.mrb[92].mxu1 %v6881_v38  ;;  %5475 = vmatprep.mubr.bf16.mxu0 %v6885_v18 }
 0x13a   : > { %5347 = vmatprep.mubr.bf16.mxu1 %v6885_v18 }
 0x140   : > { %5476 = vmatmul.mubr.bf16.gmra.mrb[96].mxu0 %v6893_v31 }
 0x141   : > { %5348 = vmatmul.mubr.bf16.gmra.mrb[96].mxu1 %v6893_v31  ;;  %5479 = vmatprep.mubr.bf16.mxu0 %v6897_v19 }
 0x142   : > { %5351 = vmatprep.mubr.bf16.mxu1 %v6897_v19 }
 0x148   : > { %5480 = vmatmul.mubr.bf16.gmra.mrb[100].mxu0 %v6905_v34 }
 0x149   : > { %5352 = vmatmul.mubr.bf16.gmra.mrb[100].mxu1 %v6905_v34  ;;  %5483 = vmatprep.mubr.bf16.mxu0 %v6909_v35 }
 0x14a   : > { %5355 = vmatprep.mubr.bf16.mxu1 %v6909_v35 }
 0x150   : > { %5484 = vmatmul.mubr.bf16.gmra.mrb[104].mxu0 %v6917_v40 }
 0x151   : > { %5356 = vmatmul.mubr.bf16.gmra.mrb[104].mxu1 %v6917_v40  ;;  %5487 = vmatprep.mubr.bf16.mxu0 %v6921_v43 }
 0x152   : > { %5359 = vmatprep.mubr.bf16.mxu1 %v6921_v43 }
 0x153   : > { %v5133_v58 = vpop.f32.mrb[0].mxu0 }
 0x154   : > { %v5157_v59 = vpop.f32.mrb[0].mxu1  ;;  %v523_v9 = vpop.f32.mrb[1].mxu0  ;;  %v716_v62 = vrot.slane %v5133_v58, 1 }
 0x155   : > { %v619_v10 = vpop.f32.mrb[1].mxu1  ;;  %v5134_v25 = vpop.f32.mrb[2].mxu0  ;;  %v740_v2 = vrot.slane %v5157_v59, 1  ;;  %v714_v45 = vrot.slane %v523_v9, 1 }
 0x156   : > { %v5158_v36 = vpop.f32.mrb[2].mxu1  ;;  %v526_v7 = vpop.f32.mrb[3].mxu0  ;;  %v738_v15 = vrot.slane %v619_v10, 1  ;;  %v717_v27 = vrot.slane %v5134_v25, 1 }
 0x157   : > { %v622_v41 = vpop.f32.mrb[3].mxu1  ;;  %v715_v16 = vrot.slane %v526_v7, 1  ;;  %v741_v29 = vrot.slane %v5158_v36, 1  ;;  %v6996_v7 = vld [vmem:[#allocation2 + $0x188] sm:$0xff] }
 0x158   : > { %v739_v63 = vrot.slane %v622_v41, 1  ;;  %5488 = vmatmul.mubr.bf16.gmra.mrb[108].mxu0 %v6931_v23  ;;  %v6998_v41 = vld [vmem:[#allocation2 + $0x190] sm:$0xff] }
 0x159   : > { %5360 = vmatmul.mubr.bf16.gmra.mrb[108].mxu1 %v6931_v23  ;;  %v6942_v49 = vsel %vm764_vm1, %v715_v16, %v716_v62  ;;  %v6946_v5 = vsel %vm764_vm1, %v714_v45, %v715_v16  ;;  %5491 = vmatprep.mubr.bf16.mxu0 %v6935_v39  ;;  %v2896_v45 = vld [vmem:[#allocation2 + $0x30] sm:$0xff] }
 0x15a   : > { %v6950_v3 = vsel %vm764_vm1, %v739_v63, %v740_v2  ;;  %v6954_v21 = vsel %vm764_vm1, %v738_v15, %v739_v63  ;;  %5363 = vmatprep.mubr.bf16.mxu1 %v6935_v39  ;;  %v2897_v15 = vld [vmem:[#allocation2 + $0x38] sm:$0xff] }
 0x15b   : > { %v5137_v26 = vpop.f32.mrb[4].mxu0 }
 0x15c   : > { %v5161_v28 = vpop.f32.mrb[4].mxu1  ;;  %v539_v61 = vpop.f32.mrb[5].mxu0  ;;  %v720_v8 = vrot.slane %v5137_v26, 1 }
 0x15d   : > { %v744_v54 = vrot.slane %v5161_v28, 1  ;;  %v635_v20 = vpop.f32.mrb[5].mxu1  ;;  %v718_v60 = vrot.slane %v539_v61, 1  ;;  %v5138_v11 = vpop.f32.mrb[6].mxu0  ;;  %v7002_v61 = vpack.c.bf16 %v6998_v41, %v6996_v7 }
 0x15e   : > { %v742_v51 = vrot.slane %v635_v20, 1  ;;  %v5162_v32 = vpop.f32.mrb[6].mxu1  ;;  %v721_v12 = vrot.slane %v5138_v11, 1  ;;  %v542_v58 = vpop.f32.mrb[7].mxu0 }
 0x15f   : > { %v745_v52 = vrot.slane %v5162_v32, 1  ;;  %v638_v59 = vpop.f32.mrb[7].mxu1  ;;  %v6970_v9 = vsel %vm764_vm1, %v717_v27, %v718_v60  ;;  %v719_v37 = vrot.slane %v542_v58, 1  ;;  %8084 = vst [vmem:[#allocation19_spill] sm:$0xff] %v7002_v61  ;;  %v7004_v27 = vpack.c.bf16 %v2897_v15, %v2896_v45  ;;  %v2898_v15 = vld [vmem:[#allocation2 + $0x40] sm:$0xff] }
 0x160   : > { %v6974_v10 = vsel %vm764_vm1, %v741_v29, %v742_v51  ;;  %v743_v25 = vrot.slane %v638_v59, 1  ;;  %v6978_v36 = vsel %vm764_vm1, %v720_v8, %v721_v12  ;;  %5492 = vmatmul.mubr.bf16.gmra.mrb[112].mxu0 %v6962_v47 }
 0x161   : > { %v6982_v44 = vsel %vm764_vm1, %v744_v54, %v745_v52  ;;  %5364 = vmatmul.mubr.bf16.gmra.mrb[112].mxu1 %v6962_v47  ;;  %v6988_v62 = vsel %vm764_vm1, %v718_v60, %v719_v37  ;;  %5495 = vmatprep.mubr.bf16.mxu0 %v6966_v4  ;;  %8085 = vst [vmem:[#allocation20_spill] sm:$0xff] %v7004_v27 }
 0x162   : > { %8082 = vst [vmem:[#allocation17_spill] sm:$0xff] %v6982_v44  ;;  %v6992_v2 = vsel %vm764_vm1, %v742_v51, %v743_v25  ;;  %5367 = vmatprep.mubr.bf16.mxu1 %v6966_v4 }
 0x163   : > { %8083 = vst [vmem:[#allocation18_spill] sm:$0xff] %v6992_v2  ;;  %v5141_v16 = vpop.f32.mrb[8].mxu0 }
 0x164   : > { %v5165_v63 = vpop.f32.mrb[8].mxu1  ;;  %v555_v28 = vpop.f32.mrb[9].mxu0  ;;  %v724_v29 = vrot.slane %v5141_v16, 1  ;;  %v2899_v16 = vld [vmem:[#allocation2 + $0x48] sm:$0xff] }
 0x165   : > { %v748_v26 = vrot.slane %v5165_v63, 1  ;;  %v651_v54 = vpop.f32.mrb[9].mxu1  ;;  %v722_v20 = vrot.slane %v555_v28, 1  ;;  %v5142_v1 = vpop.f32.mrb[10].mxu0 }
 0x166   : > { %v746_v42 = vrot.slane %v651_v54, 1  ;;  %v5166_v0 = vpop.f32.mrb[10].mxu1  ;;  %v725_v60 = vrot.slane %v5142_v1, 1  ;;  %v558_v11 = vpop.f32.mrb[11].mxu0  ;;  %v2900_v54 = vld [vmem:[#allocation2 + $0x50] sm:$0xff] }
 0x167   : > { %v749_v51 = vrot.slane %v5166_v0, 1  ;;  %v654_v32 = vpop.f32.mrb[11].mxu1  ;;  %v7008_v8 = vsel %vm764_vm1, %v721_v12, %v722_v20  ;;  %v723_v59 = vrot.slane %v558_v11, 1  ;;  %v2901_v20 = vld [vmem:[#allocation2 + $0x58] sm:$0xff]  ;;  %v7034_v0 = vpack.c.bf16 %v2899_v16, %v2898_v15 }
 0x168   : > { %v7012_v58 = vsel %vm764_vm1, %v745_v52, %v746_v42  ;;  %v747_v37 = vrot.slane %v654_v32, 1  ;;  %v7016_v25 = vsel %vm764_vm1, %v724_v29, %v725_v60  ;;  %5496 = vmatmul.mubr.bf16.gmra.mrb[116].mxu0 %v7002_v61  ;;  %v6123_v15 = vld [vmem:[#allocation7 + $0x188] sm:$0xff]  }
 0x169   : > { %8086 = vst [vmem:[#allocation21_spill] sm:$0xff] %v7012_v58  ;;  %v7020_v45 = vsel %vm764_vm1, %v748_v26, %v749_v51  ;;  %5368 = vmatmul.mubr.bf16.gmra.mrb[116].mxu1 %v7002_v61  ;;  %v7026_v12 = vsel %vm764_vm1, %v723_v59, %v724_v29  ;;  %5515 = vmatprep.mubr.bf16.mxu0 %v7004_v27  ;;  %8089 = vst [vmem:[#allocation24_spill] sm:$0xff] %v7034_v0  ;;  %v2902_v61 = vld [vmem:[#allocation2 + $0x60] sm:$0xff] }
 0x16a   : > { %8087 = vst [vmem:[#allocation22_spill] sm:$0xff] %v7020_v45  ;;  %v7030_v52 = vsel %vm764_vm1, %v747_v37, %v748_v26  ;;  %5387 = vmatprep.mubr.bf16.mxu1 %v6677_v22  ;;  %v7036_v59 = vpack.c.bf16 %v2901_v20, %v2900_v54  ;;  %v6122_v45 = vld [vmem:[#allocation7 + $0x208] sm:$0xff]   ;;  %v2904_v20 = vld [vmem:[#allocation2 + $0x70] sm:$0xff] }
 0x16b   : > { %8088 = vst [vmem:[#allocation23_spill] sm:$0xff] %v7030_v52  ;;  %v5145_v63 = vpop.f32.mrb[12].mxu0 }
 0x16c   : > { %v5169_v28 = vpop.f32.mrb[12].mxu1  ;;  %v571_v42 = vpop.f32.mrb[13].mxu0  ;;  %v728_v51 = vrot.slane %v5145_v63, 1  ;;  %8090 = vst [vmem:[#allocation25_spill] sm:$0xff] %v7036_v59 }
 0x16d   : > { %v667_v1 = vpop.f32.mrb[13].mxu1  ;;  %v5146_v29 = vpop.f32.mrb[14].mxu0  ;;  %v752_v11 = vrot.slane %v5169_v28, 1  ;;  %v726_v22 = vrot.slane %v571_v42, 1  ;;  %v2905_v42 = vld [vmem:[#allocation2 + $0x78] sm:$0xff] }
 0x16e   : > { %v5170_v60 = vpop.f32.mrb[14].mxu1  ;;  %v574_v26 = vpop.f32.mrb[15].mxu0  ;;  %v750_v37 = vrot.slane %v667_v1, 1  ;;  %v6124_v1 = vld [vmem:[#allocation7 + $0x210] sm:$0xff]  }
 0x16f   : > { %v670_v32 = vpop.f32.mrb[15].mxu1  ;;  %v727_v52 = vrot.slane %v574_v26, 1 }
 0x170   : > { %v751_v27 = vrot.slane %v670_v32, 1  ;;  %5516 = vmatmul.mubr.bf16.vlgmr.msra.gmra.mrb[120].mxu0 %v7034_v0 }
 0x171   : > { %5388 = vmatmul.mubr.bf16.vlgmr.msra.gmra.mrb[24].mxu1 %v6685_v24  ;;  %v7042_v16 = vsel %vm764_vm1, %v727_v52, %v728_v51  ;;  %v7046_v63 = vsel %vm764_vm1, %v726_v22, %v727_v52  ;;  %5628 = vmatpush3.bf16.msra.mxu0 %v6865_v13  ;;  %v2903_v24 = vld [vmem:[#allocation2 + $0x68] sm:$0xff]  ;;  %v7062_v13 = vpack.c.bf16 %v2905_v42, %v2904_v20  ;;  %v2908_v42 = vld [vmem:[#allocation2 + $0x90] sm:$0xff] }
 0x172   : > { %v7050_v28 = vsel %vm764_vm1, %v751_v27, %v752_v11  ;;  %v7054_v54 = vsel %vm764_vm1, %v750_v37, %v751_v27  ;;  %5564 = vmatpush3.bf16.msra.mxu1 %v6867_v46  ;;  %5391 = vmatprep.mubr.bf16.mxu1 %v6718_v48  ;;  %v6125_v11 = vld [vmem:[#allocation7 + $0x190] sm:$0xff]   ;;  %v7060_v22 = vpack.c.bf16 %v2903_v24, %v2902_v61  ;;  %v729_v37 = vrot.slane %v5146_v29, 1  ;;  %v6126_v20 = vld [vmem:[#allocation7 + $0x218] sm:$0xff]  }
 0x173   : > { %8091 = vst [vmem:[#allocation26_spill] sm:$0xff] %v7050_v28  ;;  %8092 = vst [vmem:[#allocation27_spill] sm:$0xff] %v7054_v54  ;;  %v5149_v52 = vpop.f32.mrb[16].mxu0  ;;  %5519 = vmatprep.mubr.bf16.mxu0 %v7036_v59  ;;  %5629 = vmatprep.subr.bf16.mxu0 %v6122_v45  ;;  %v753_v28 = vrot.slane %v5170_v60, 1 }
 0x174   : > { %v5173_v51 = vpop.f32.mrb[16].mxu1  ;;  %v587_v32 = vpop.f32.mrb[17].mxu0  ;;  %8093 = vst [vmem:[#allocation28_spill] sm:$0xff] %v7060_v22  ;;  %5565 = vmatprep.subr.bf16.mxu1 %v6123_v15  ;;  %8094 = vst [vmem:[#allocation29_spill] sm:$0xff] %v7062_v13  ;;  %v732_v58 = vrot.slane %v5149_v52, 1  ;;  %v2909_v52 = vld [vmem:[#allocation2 + $0x98] sm:$0xff] }
 0x175   : > { %v756_v26 = vrot.slane %v5173_v51, 1  ;;  %v683_v27 = vpop.f32.mrb[17].mxu1  ;;  %v730_v46 = vrot.slane %v587_v32, 1  ;;  %v5150_v48 = vpop.f32.mrb[18].mxu0  ;;  %5630 = vmatpush3.bf16.msra.mxu0 %v6122_v45  ;;  %v6127_v45 = vld [vmem:[#allocation7 + $0x198] sm:$0xff]   ;;  %v6129_v32 = vld [vmem:[#allocation7 + $0x1a0] sm:$0xff]  }
 0x176   : > { %v754_v54 = vrot.slane %v683_v27, 1  ;;  %v5174_v0 = vpop.f32.mrb[18].mxu1  ;;  %v733_v2 = vrot.slane %v5150_v48, 1  ;;  %v590_v4 = vpop.f32.mrb[19].mxu0  ;;  %5566 = vmatpush3.bf16.msra.mxu1 %v6123_v15  ;;  %5631 = vmatprep.subr.bf16.mxu0 %v6124_v1 }
 0x177   : > { %v757_v59 = vrot.slane %v5174_v0, 1  ;;  %v686_v44 = vpop.f32.mrb[19].mxu1  ;;  %v7066_v61 = vsel %vm764_vm1, %v729_v37, %v730_v46  ;;  %v731_v60 = vrot.slane %v590_v4, 1  ;;  %5567 = vmatprep.subr.bf16.mxu1 %v6125_v11 }
 0x178   : > { %v7070_v29 = vsel %vm764_vm1, %v753_v28, %v754_v54  ;;  %v755_v24 = vrot.slane %v686_v44, 1  ;;  %v7074_v0 = vsel %vm764_vm1, %v732_v58, %v733_v2  ;;  %5520 = vmatmul.mubr.bf16.gmra.mrb[124].mxu0 %v7060_v22  ;;  %v2906_v44 = vld [vmem:[#allocation2 + $0x80] sm:$0xff]  ;;  %v2907_v58 = vld [vmem:[#allocation2 + $0x88] sm:$0xff] }
 0x179   : > { %v7078_v15 = vsel %vm764_vm1, %v756_v26, %v757_v59  ;;  %5392 = vmatmul.mubr.bf16.gmra.mrb[28].mxu1 %v6723_v50  ;;  %v7084_v28 = vsel %vm764_vm1, %v730_v46, %v731_v60  ;;  %5523 = vmatprep.mubr.bf16.mxu0 %v7062_v13  ;;  %v6128_v26 = vld [vmem:[#allocation7 + $0x220] sm:$0xff]   ;;  %v7092_v46 = vpack.c.bf16 %v2907_v58, %v2906_v44 }
 0x17a   : > { %8095 = vst [vmem:[#allocation30_spill] sm:$0xff] %v7078_v15  ;;  %v7088_v4 = vsel %vm764_vm1, %v754_v54, %v755_v24  ;;  %5395 = vmatprep.mubr.bf16.mxu1 %v6747_v14  ;;  %5632 = vmatpush3.bf16.msra.mxu0 %v6124_v1 }
 0x17b   : > { %8096 = vst [vmem:[#allocation31_spill] sm:$0xff] %v7088_v4  ;;  %5568 = vmatpush3.bf16.msra.mxu1 %v6125_v11  ;;  %v5153_v50 = vpop.f32.mrb[20].mxu0  ;;  %5633 = vmatprep.subr.bf16.mxu0 %v6126_v20  ;;  %v7094_v4 = vpack.c.bf16 %v2909_v52, %v2908_v42  ;;  %v6130_v42 = vld [vmem:[#allocation7 + $0x228] sm:$0xff]  }
 0x17c   : > { %v5177_v51 = vpop.f32.mrb[20].mxu1  ;;  %5569 = vmatprep.subr.bf16.mxu1 %v6127_v45  ;;  %v603_v37 = vpop.f32.mrb[21].mxu0  ;;  %v736_v13 = vrot.slane %v5153_v50, 1  ;;  %v6131_v52 = vld [vmem:[#allocation7 + $0x1a8] sm:$0xff]  }
 0x17d   : > { %v760_v27 = vrot.slane %v5177_v51, 1  ;;  %v699_v54 = vpop.f32.mrb[21].mxu1  ;;  %v734_v14 = vrot.slane %v603_v37, 1  ;;  %v5154_v60 = vpop.f32.mrb[22].mxu0 }
 0x17e   : > { %v758_v48 = vrot.slane %v699_v54, 1  ;;  %v5178_v24 = vpop.f32.mrb[22].mxu1  ;;  %v737_v1 = vrot.slane %v5154_v60, 1  ;;  %v606_v15 = vpop.f32.mrb[23].mxu0  ;;  %5634 = vmatpush3.bf16.msra.mxu0 %v6126_v20  ;;  %v2913_v54 = vld [vmem:[#allocation2 + $0xb8] sm:$0xff] }
 0x17f   : > { %v761_v11 = vrot.slane %v5178_v24, 1  ;;  %v702_v22 = vpop.f32.mrb[23].mxu1  ;;  %5570 = vmatpush3.bf16.msra.mxu1 %v6127_v45  ;;  %v7098_v51 = vsel %vm764_vm1, %v733_v2, %v734_v14  ;;  %v735_v58 = vrot.slane %v606_v15, 1  ;;  %5635 = vmatprep.subr.bf16.mxu0 %v6128_v26  ;;  %v2911_v45 = vld [vmem:[#allocation2 + $0xa8] sm:$0xff]  ;;  %v2912_v15 = vld [vmem:[#allocation2 + $0xb0] sm:$0xff]  ;;  %v6132_v14 = vld [vmem:[#allocation7 + $0x230] sm:$0xff]  }
 0x180   : > { %v7102_v44 = vsel %vm764_vm1, %v757_v59, %v758_v48  ;;  %v759_v37 = vrot.slane %v702_v22, 1  ;;  %5571 = vmatprep.subr.bf16.mxu1 %v6129_v32  ;;  %v7106_v50 = vsel %vm764_vm1, %v736_v13, %v737_v1  ;;  %5524 = vmatmul.mubr.bf16.gmra.mrb[128].mxu0 %v7092_v46  ;;  %v2910_v22 = vld [vmem:[#allocation2 + $0xa0] sm:$0xff]  ;;  %v7126_v24 = vpack.c.bf16 %v2913_v54, %v2912_v15  ;;  %v2917_v54 = vld [vmem:[#allocation2 + $0xd8] sm:$0xff] }
 0x181   : > { %v7110_v20 = vsel %vm764_vm1, %v760_v27, %v761_v11  ;;  %5396 = vmatmul.mubr.bf16.gmra.mrb[32].mxu1 %v6752_v17  ;;  %v7116_v2 = vsel %vm764_vm1, %v735_v58, %v736_v13  ;;  %5527 = vmatprep.mubr.bf16.mxu0 %v7094_v4  ;;  %v6133_v13 = vld [vmem:[#allocation7 + $0x1b0] sm:$0xff]   ;;  %v7124_v60 = vpack.c.bf16 %v2911_v45, %v2910_v22  ;;  %v6135_v58 = vld [vmem:[#allocation7 + $0x1b8] sm:$0xff]  }
 0x182   : > { %v7120_v59 = vsel %vm764_vm1, %v759_v37, %v760_v27  ;;  %5399 = vmatprep.mubr.bf16.mxu1 %v6774_v53  ;;  %5636 = vmatpush3.bf16.msra.mxu0 %v6128_v26 }
 0x183   : > { %5572 = vmatpush3.bf16.msra.mxu1 %v6129_v32  ;;  %v5261_v17 = vpop.f32.mrb[24].mxu0  ;;  %5637 = vmatprep.subr.bf16.mxu0 %v6130_v42  ;;  %v6134_v32 = vld [vmem:[#allocation7 + $0x238] sm:$0xff]  }
 0x184   : > { %5573 = vmatprep.subr.bf16.mxu1 %v6131_v52  ;;  %v1185_v48 = vpop.f32.mrb[25].mxu0  ;;  %v1378_v1 = vrot.slane %v5261_v17, 2 }
 0x185   : > { %v5262_v27 = vpop.f32.mrb[26].mxu0  ;;  %v1376_v11 = vrot.slane %v1185_v48, 2 }
 0x186   : > { %v1188_v53 = vpop.f32.mrb[27].mxu0  ;;  %5638 = vmatpush3.bf16.msra.mxu0 %v6130_v42  ;;  %v2914_v42 = vld [vmem:[#allocation2 + $0xc0] sm:$0xff] }
 0x187   : > { %5574 = vmatpush3.bf16.msra.mxu1 %v6131_v52  ;;  %v1377_v26 = vrot.slane %v1188_v53, 2  ;;  %5639 = vmatprep.subr.bf16.mxu0 %v6132_v14  ;;  %v2915_v52 = vld [vmem:[#allocation2 + $0xc8] sm:$0xff] }
 0x188   : > { %5575 = vmatprep.subr.bf16.mxu1 %v6133_v13  ;;  %5528 = vmatmul.mubr.bf16.gmra.mrb[132].mxu0 %v7124_v60  ;;  %v7143_v53 = vpack.c.bf16 %v2915_v52, %v2914_v42  ;;  %v2920_v52 = vld [vmem:[#allocation2 + $0xf0] sm:$0xff] }
 0x189   : > { %5400 = vmatmul.mubr.bf16.gmra.mrb[36].mxu1 %v6780_v56  ;;  %v1470_v37 = vsel %vm1424_vm2, %v1377_v26, %v1378_v1  ;;  %v1471_v22 = vsel %vm1424_vm2, %v1376_v11, %v1377_v26  ;;  %5531 = vmatprep.mubr.bf16.mxu0 %v7126_v24  ;;  %v2916_v56 = vld [vmem:[#allocation2 + $0xd0] sm:$0xff] }
 0x18a   : > { %5403 = vmatprep.mubr.bf16.mxu1 %v6791_v33  ;;  %v7138_v45 = vadd.f32 %v1471_v22, %v6946_v5  ;;  %v7141_v15 = vadd.f32 %v1470_v37, %v6942_v49  ;;  %5640 = vmatpush3.bf16.msra.mxu0 %v6132_v14  ;;  %v1379_v33 = vrot.slane %v5262_v27, 2  ;;  %v7145_v26 = vpack.c.bf16 %v2917_v54, %v2916_v56 }
 0x18b   : > { %5576 = vmatpush3.bf16.msra.mxu1 %v6133_v13  ;;  %v5265_v17 = vpop.f32.mrb[28].mxu0  ;;  %5641 = vmatprep.subr.bf16.mxu0 %v6134_v32 }
 0x18c   : > { %8097 = vst [vmem:[#allocation32_spill] sm:$0xff] %v7138_v45  ;;  %5577 = vmatprep.subr.bf16.mxu1 %v6135_v58  ;;  %v1201_v48 = vpop.f32.mrb[29].mxu0  ;;  %v1382_v5 = vrot.slane %v5265_v17, 2 }
 0x18d   : > { %v1380_v1 = vrot.slane %v1201_v48, 2  ;;  %v5266_v11 = vpop.f32.mrb[30].mxu0 }
 0x18e   : > { %v1383_v22 = vrot.slane %v5266_v11, 2  ;;  %v1204_v45 = vpop.f32.mrb[31].mxu0  ;;  %5642 = vmatpush3.bf16.msra.mxu0 %v6134_v32 }
 0x18f   : > { %5578 = vmatpush3.bf16.msra.mxu1 %v6135_v58  ;;  %v1468_v49 = vsel %vm1424_vm2, %v1379_v33, %v1380_v1  ;;  %v1381_v14 = vrot.slane %v1204_v45, 2  ;;  %v2918_v58 = vld [vmem:[#allocation2 + $0xe0] sm:$0xff]  ;;  %v2921_v45 = vld [vmem:[#allocation2 + $0xf8] sm:$0xff] }
 0x190   : > { %v7150_v13 = vadd.f32 %v1468_v49, %v6970_v9  ;;  %v1465_v37 = vsel %vm1424_vm2, %v1382_v5, %v1383_v22  ;;  %5532 = vmatmul.mubr.bf16.gmra.mrb[136].mxu0 %v7143_v53  ;;  %v2919_v9 = vld [vmem:[#allocation2 + $0xe8] sm:$0xff]  ;;  %v7168_v48 = vpack.c.bf16 %v2921_v45, %v2920_v52 }
 0x191   : > { %5404 = vmatmul.mubr.bf16.gmra.mrb[40].mxu1 %v6795_v6  ;;  %v7157_v27 = vadd.f32 %v1465_v37, %v6978_v36  ;;  %v1467_v32 = vsel %vm1424_vm2, %v1380_v1, %v1381_v14  ;;  %5535 = vmatprep.mubr.bf16.mxu0 %v7145_v26  ;;  %v7166_v54 = vpack.c.bf16 %v2919_v9, %v2918_v58  ;;  %v2924_v58 = vld [vmem:[#allocation2 + $0x110] sm:$0xff]  ;;  %v2925_v9 = vld [vmem:[#allocation2 + $0x118] sm:$0xff] }
 0x192   : > { %5407 = vmatprep.mubr.bf16.mxu1 %v6871_v57  ;;  %v7164_v42 = vadd.f32 %v1467_v32, %v6988_v62 }
 0x193   : > { %v5269_v6 = vpop.f32.mrb[32].mxu0 }
 0x194   : > { %v1217_v56 = vpop.f32.mrb[33].mxu0  ;;  %v1386_v33 = vrot.slane %v5269_v6, 2  ;;  %v7191_v6 = vpack.c.bf16 %v2925_v9, %v2924_v58 }
 0x195   : > { %v1384_v36 = vrot.slane %v1217_v56, 2  ;;  %v5270_v17 = vpop.f32.mrb[34].mxu0 }
 0x196   : > { %v1387_v1 = vrot.slane %v5270_v17, 2  ;;  %v1220_v57 = vpop.f32.mrb[35].mxu0 }
 0x197   : > { %v1464_v11 = vsel %vm1424_vm2, %v1383_v22, %v1384_v36  ;;  %v1385_v5 = vrot.slane %v1220_v57, 2  ;;  %v2922_v22 = vld [vmem:[#allocation2 + $0x100] sm:$0xff]  ;;  %v2927_v57 = vld [vmem:[#allocation2 + $0x128] sm:$0xff] }
 0x198   : > { %v7173_v62 = vadd.f32 %v1464_v11, %v7008_v8  ;;  %v1461_v49 = vsel %vm1424_vm2, %v1386_v33, %v1387_v1  ;;  %5536 = vmatmul.mubr.bf16.gmra.mrb[140].mxu0 %v7166_v54  ;;  %v2923_v8 = vld [vmem:[#allocation2 + $0x108] sm:$0xff]  ;;  %v2926_v1 = vld [vmem:[#allocation2 + $0x120] sm:$0xff] }
 0x199   : > { %5408 = vmatmul.mubr.bf16.gmra.mrb[44].mxu1 %v6881_v38  ;;  %v7180_v14 = vadd.f32 %v1461_v49, %v7016_v25  ;;  %v1462_v37 = vsel %vm1424_vm2, %v1385_v5, %v1386_v33  ;;  %5539 = vmatprep.mubr.bf16.mxu0 %v7168_v48  ;;  %v7189_v45 = vpack.c.bf16 %v2923_v8, %v2922_v22  ;;  %v2929_v49 = vld [vmem:[#allocation2 + $0x138] sm:$0xff] }
 0x19a   : > { %5411 = vmatprep.mubr.bf16.mxu1 %v6885_v18  ;;  %v7187_v32 = vadd.f32 %v1462_v37, %v7026_v12  ;;  %v7207_v8 = vpack.c.bf16 %v2927_v57, %v2926_v1  ;;  %v2932_v57 = vld [vmem:[#allocation2 + $0x150] sm:$0xff] }
 0x19b   : > { %v5273_v38 = vpop.f32.mrb[36].mxu0 }
 0x19c   : > { %v1233_v52 = vpop.f32.mrb[37].mxu0  ;;  %v1390_v36 = vrot.slane %v5273_v38, 2 }
 0x19d   : > { %v5274_v25 = vpop.f32.mrb[38].mxu0  ;;  %v1388_v17 = vrot.slane %v1233_v52, 2 }
 0x19e   : > { %v1236_v56 = vpop.f32.mrb[39].mxu0  ;;  %v1391_v58 = vrot.slane %v5274_v25, 2 }
 0x19f   : > { %v1389_v18 = vrot.slane %v1236_v56, 2 }
 0x1a0   : > { %5540 = vmatmul.mubr.bf16.gmra.mrb[144].mxu0 %v7189_v45 }
 0x1a1   : > { %5412 = vmatmul.mubr.bf16.gmra.mrb[48].mxu1 %v6893_v31  ;;  %v1458_v12 = vsel %vm1424_vm2, %v1389_v18, %v1390_v36  ;;  %v1459_v33 = vsel %vm1424_vm2, %v1388_v17, %v1389_v18  ;;  %5543 = vmatprep.mubr.bf16.mxu0 %v7191_v6  ;;  %v2928_v31 = vld [vmem:[#allocation2 + $0x130] sm:$0xff] }
 0x1a2   : > { %5415 = vmatprep.mubr.bf16.mxu1 %v6897_v19  ;;  %v7202_v11 = vadd.f32 %v1459_v33, %v7046_v63  ;;  %v7205_v5 = vadd.f32 %v1458_v12, %v7042_v16  ;;  %v7209_v19 = vpack.c.bf16 %v2929_v49, %v2928_v31  ;;  %v2930_v33 = vld [vmem:[#allocation2 + $0x140] sm:$0xff]  ;;  %v2933_v31 = vld [vmem:[#allocation2 + $0x158] sm:$0xff] }
 0x1a3   : > { %v5277_v37 = vpop.f32.mrb[40].mxu0 }
 0x1a4   : > { %v1249_v22 = vpop.f32.mrb[41].mxu0  ;;  %v1394_v52 = vrot.slane %v5277_v37, 2 }
 0x1a5   : > { %v1392_v9 = vrot.slane %v1249_v22, 2  ;;  %v5278_v38 = vpop.f32.mrb[42].mxu0 }
 0x1a6   : > { %v1395_v56 = vrot.slane %v5278_v38, 2  ;;  %v1252_v36 = vpop.f32.mrb[43].mxu0 }
 0x1a7   : > { %v1456_v63 = vsel %vm1424_vm2, %v1391_v58, %v1392_v9  ;;  %v1393_v17 = vrot.slane %v1252_v36, 2  ;;  %v7232_v58 = vpack.c.bf16 %v2933_v31, %v2932_v57 }
 0x1a8   : > { %v7214_v16 = vadd.f32 %v1456_v63, %v7066_v61  ;;  %v1453_v18 = vsel %vm1424_vm2, %v1394_v52, %v1395_v56  ;;  %5544 = vmatmul.mubr.bf16.gmra.mrb[148].mxu0 %v7207_v8  ;;  %v2931_v61 = vld [vmem:[#allocation2 + $0x148] sm:$0xff] }
 0x1a9   : > { %5416 = vmatmul.mubr.bf16.gmra.mrb[52].mxu1 %v6905_v34  ;;  %v7221_v25 = vadd.f32 %v1453_v18, %v7074_v0  ;;  %v1455_v12 = vsel %vm1424_vm2, %v1392_v9, %v1393_v17  ;;  %5547 = vmatprep.mubr.bf16.mxu0 %v7209_v19  ;;  %v7230_v37 = vpack.c.bf16 %v2931_v61, %v2930_v33  ;;  %v2936_v33 = vld [vmem:[#allocation2 + $0x170] sm:$0xff]  ;;  %v2937_v61 = vld [vmem:[#allocation2 + $0x178] sm:$0xff] }
 0x1aa   : > { %5419 = vmatprep.mubr.bf16.mxu1 %v6909_v35  ;;  %v7228_v1 = vadd.f32 %v1455_v12, %v7084_v28 }
 0x1ab   : > { %v5281_v34 = vpop.f32.mrb[44].mxu0 }
 0x1ac   : > { %v1265_v49 = vpop.f32.mrb[45].mxu0  ;;  %v1398_v9 = vrot.slane %v5281_v34, 2  ;;  %v7255_v34 = vpack.c.bf16 %v2937_v61, %v2936_v33 }
 0x1ad   : > { %v1396_v0 = vrot.slane %v1265_v49, 2  ;;  %v5282_v22 = vpop.f32.mrb[46].mxu0 }
 0x1ae   : > { %v1399_v38 = vrot.slane %v5282_v22, 2  ;;  %v1268_v35 = vpop.f32.mrb[47].mxu0 }
 0x1af   : > { %v1452_v52 = vsel %vm1424_vm2, %v1395_v56, %v1396_v0  ;;  %v1397_v36 = vrot.slane %v1268_v35, 2  ;;  %v2934_v56 = vld [vmem:[#allocation2 + $0x160] sm:$0xff] }
 0x1b0   : > { %v7237_v28 = vadd.f32 %v1452_v52, %v7098_v51  ;;  %v1449_v63 = vsel %vm1424_vm2, %v1398_v9, %v1399_v38  ;;  %5548 = vmatmul.mubr.bf16.gmra.mrb[152].mxu0 %v7230_v37  ;;  %v2935_v51 = vld [vmem:[#allocation2 + $0x168] sm:$0xff] }
 0x1b1   : > { %5420 = vmatmul.mubr.bf16.gmra.mrb[56].mxu1 %v6917_v40  ;;  %v7244_v17 = vadd.f32 %v1449_v63, %v7106_v50  ;;  %v1450_v18 = vsel %vm1424_vm2, %v1397_v36, %v1398_v9  ;;  %5551 = vmatprep.mubr.bf16.mxu0 %v7232_v58  ;;  %v7253_v31 = vpack.c.bf16 %v2935_v51, %v2934_v56  ;;  %v6136_v51 = vld [vmem:[#allocation2] sm:$0xff] }
 0x1b2   : > { %5423 = vmatprep.mubr.bf16.mxu1 %v6921_v43  ;;  %v7251_v12 = vadd.f32 %v1450_v18, %v7116_v2  ;;  %v7273_v36 = vpack.c.bf16 %v6996_v7, %v6957_v30  ;;  %v8098_v7 = vld [vmem:[#allocation17_spill] sm:$0xff] }
 0x1b3   : > { %v5285_v40 = vpop.f32.mrb[48].mxu0 }
 0x1b4   : > { %v1281_v57 = vpop.f32.mrb[49].mxu0  ;;  %v1402_v0 = vrot.slane %v5285_v40, 2 }
 0x1b5   : > { %v5286_v50 = vpop.f32.mrb[50].mxu0  ;;  %v1400_v22 = vrot.slane %v1281_v57, 2 }
 0x1b6   : > { %v1284_v49 = vpop.f32.mrb[51].mxu0  ;;  %v1403_v63 = vrot.slane %v5286_v50, 2 }
 0x1b7   : > { %v1401_v43 = vrot.slane %v1284_v49, 2  ;;  %v8099_v49 = vld [vmem:[#allocation16_spill] sm:$0xff] }
 0x1b8   : > { %5552 = vmatmul.mubr.bf16.gmra.mrb[156].mxu0 %v7253_v31 }
 0x1b9   : > { %5424 = vmatmul.mubr.bf16.gmra.mrb[60].mxu1 %v6931_v23  ;;  %v1446_v2 = vsel %vm1424_vm2, %v1401_v43, %v1402_v0  ;;  %v1447_v9 = vsel %vm1424_vm2, %v1400_v22, %v1401_v43  ;;  %5555 = vmatprep.mubr.bf16.mxu0 %v7255_v34  ;;  %v8100_v0 = vld [vmem:[#allocation18_spill] sm:$0xff] }
 0x1ba   : > { %5427 = vmatprep.mubr.bf16.mxu1 %v6935_v39  ;;  %v7266_v38 = vadd.f32 %v1447_v9, %v6954_v21  ;;  %v7269_v35 = vadd.f32 %v1446_v2, %v6950_v3  ;;  %v7276_v39 = vpack.c.bf16 %v6136_v51, %v6998_v41  ;;  %v7297_v2 = vpack.c.bf16 %v6136_v51, %v6136_v51  ;;  %v8103_v51 = vld [vmem:[#allocation22_spill] sm:$0xff] }
 0x1bb   : > { %v5289_v52 = vpop.f32.mrb[52].mxu0 }
 0x1bc   : > { %v1297_v23 = vpop.f32.mrb[53].mxu0  ;;  %v1406_v33 = vrot.slane %v5289_v52, 2 }
 0x1bd   : > { %v1404_v18 = vrot.slane %v1297_v23, 2  ;;  %v5290_v56 = vpop.f32.mrb[54].mxu0 }
 0x1be   : > { %v1407_v61 = vrot.slane %v5290_v56, 2  ;;  %v1300_v21 = vpop.f32.mrb[55].mxu0 }
 0x1bf   : > { %v1444_v3 = vsel %vm1424_vm2, %v1403_v63, %v1404_v18  ;;  %v1405_v40 = vrot.slane %v1300_v21, 2 }
 0x1c0   : > { %v7281_v57 = vadd.f32 %v1444_v3, %v6974_v10  ;;  %v1441_v30 = vsel %vm1424_vm2, %v1406_v33, %v1407_v61  ;;  %5556 = vmatmul.mubr.bf16.gmra.mrb[160].mxu0 %v7273_v36  ;;  %v8101_v33 = vld [vmem:[#allocation21_spill] sm:$0xff] }
 0x1c1   : > { %5428 = vmatmul.mubr.bf16.gmra.mrb[64].mxu1 %v6962_v47  ;;  %v7288_v41 = vadd.f32 %v1441_v30, %v8098_v7  ;;  %v1443_v50 = vsel %vm1424_vm2, %v1404_v18, %v1405_v40  ;;  %5559 = vmatprep.mubr.bf16.mxu0 %v7276_v39  ;;  %v8102_v40 = vld [vmem:[#allocation19_spill] sm:$0xff] }
 0x1c2   : > { %5431 = vmatprep.mubr.bf16.mxu1 %v8099_v49  ;;  %v7295_v10 = vadd.f32 %v1443_v50, %v8100_v0  ;;  %v8104_v50 = vld [vmem:[#allocation20_spill] sm:$0xff] }
 0x1c3   : > { %v5293_v22 = vpop.f32.mrb[56].mxu0 }
 0x1c4   : > { %v1313_v43 = vpop.f32.mrb[57].mxu0  ;;  %v1410_v52 = vrot.slane %v5293_v22, 2 }
 0x1c5   : > { %v1408_v47 = vrot.slane %v1313_v43, 2  ;;  %v5294_v9 = vpop.f32.mrb[58].mxu0 }
 0x1c6   : > { %v1411_v23 = vrot.slane %v5294_v9, 2  ;;  %v1316_v63 = vpop.f32.mrb[59].mxu0 }
 0x1c7   : > { %v1440_v56 = vsel %vm1424_vm2, %v1407_v61, %v1408_v47  ;;  %v1409_v18 = vrot.slane %v1316_v63, 2  ;;  %v8105_v61 = vld [vmem:[#allocation23_spill] sm:$0xff] }
 0x1c8   : > { %v7302_v21 = vadd.f32 %v1440_v56, %v8101_v33  ;;  %v1437_v3 = vsel %vm1424_vm2, %v1410_v52, %v1411_v23  ;;  %5560 = vmatmul.mubr.bf16.gmra.mrb[164].mxu0 %v7297_v2  ;;  %v8107_v56 = vld [vmem:[#allocation24_spill] sm:$0xff]  ;;  %v8108_v33 = vld [vmem:[#allocation25_spill] sm:$0xff] }
 0x1c9   : > { %5432 = vmatmul.mubr.bf16.gmra.mrb[68].mxu1 %v8102_v40  ;;  %v7309_v30 = vadd.f32 %v1437_v3, %v8103_v51  ;;  %v1438_v7 = vsel %vm1424_vm2, %v1409_v18, %v1410_v52  ;;  %5643 = vmatprep.mubr.bf16.mxu0 %v8104_v50  ;;  %v8109_v3 = vld [vmem:[#allocation27_spill] sm:$0xff]  ;;  %v8110_v51 = vld [vmem:[#allocation26_spill] sm:$0xff] }
 0x1ca   : > { %5579 = vmatprep.mubr.bf16.mxu1 %v8104_v50  ;;  %v7316_v49 = vadd.f32 %v1438_v7, %v8105_v61 }
 0x1cb   : > { %v5297_v0 = vpop.f32.mrb[60].mxu0 }
 0x1cc   : > { %8106 = vst [vmem:[#allocation17_spill] sm:$0xff] %v7316_v49  ;;  %v1329_v22 = vpop.f32.mrb[61].mxu0  ;;  %v1414_v9 = vrot.slane %v5297_v0, 2 }
 0x1cd   : > { %v5298_v43 = vpop.f32.mrb[62].mxu0  ;;  %v1412_v23 = vrot.slane %v1329_v22, 2 }
 0x1ce   : > { %v1332_v47 = vpop.f32.mrb[63].mxu0  ;;  %v1415_v0 = vrot.slane %v5298_v43, 2  ;;  %v8113_v43 = vld [vmem:[#allocation30_spill] sm:$0xff] }
 0x1cf   : > { %v1413_v63 = vrot.slane %v1332_v47, 2 }
 0x1d0   : > { %5644 = vmatmul.mubr.bf16.vlgmr.msra.gmra.mrb[168].mxu0 %v8107_v56 }
 0x1d1   : > { %5580 = vmatmul.mubr.bf16.vlgmr.msra.gmra.mrb[24].mxu1 %v8107_v56  ;;  %v1434_v52 = vsel %vm1424_vm2, %v1413_v63, %v1414_v9  ;;  %v1435_v18 = vsel %vm1424_vm2, %v1412_v23, %v1413_v63  ;;  %5647 = vmatprep.mubr.bf16.mxu0 %v8108_v33 }
 0x1d2   : > { %5583 = vmatprep.mubr.bf16.mxu1 %v8108_v33  ;;  %v7327_v40 = vadd.f32 %v1435_v18, %v8109_v3  ;;  %v7330_v7 = vadd.f32 %v1434_v52, %v8110_v51  ;;  %v8112_v52 = vld [vmem:[#allocation28_spill] sm:$0xff] }
 0x1d3   : > { %v5301_v50 = vpop.f32.mrb[64].mxu0 }
 0x1d4   : > { %v1345_v61 = vpop.f32.mrb[65].mxu0  ;;  %v1418_v56 = vrot.slane %v5301_v50, 2  ;;  %v8114_v50 = vld [vmem:[#allocation29_spill] sm:$0xff] }
 0x1d5   : > { %v1416_v22 = vrot.slane %v1345_v61, 2  ;;  %v5302_v47 = vpop.f32.mrb[66].mxu0 }
 0x1d6   : > { %v1419_v9 = vrot.slane %v5302_v47, 2  ;;  %v1348_v49 = vpop.f32.mrb[67].mxu0 }
 0x1d7   : > { %v1432_v23 = vsel %vm1424_vm2, %v1415_v0, %v1416_v22  ;;  %v1417_v63 = vrot.slane %v1348_v49, 2  ;;  %v8115_v49 = vld [vmem:[#allocation31_spill] sm:$0xff] }
 0x1d8   : > { %v7335_v33 = vadd.f32 %v1432_v23, %v7070_v29  ;;  %v1429_v18 = vsel %vm1424_vm2, %v1418_v56, %v1419_v9  ;;  %5648 = vmatmul.mubr.bf16.gmra.mrb[172].mxu0 %v8112_v52 }
 0x1d9   : > { %5584 = vmatmul.mubr.bf16.gmra.mrb[28].mxu1 %v8112_v52  ;;  %v7342_v3 = vadd.f32 %v1429_v18, %v8113_v43  ;;  %v1431_v51 = vsel %vm1424_vm2, %v1416_v22, %v1417_v63  ;;  %5651 = vmatprep.mubr.bf16.mxu0 %v8114_v50 }
 0x1da   : > { %8111 = vst [vmem:[#allocation16_spill] sm:$0xff] %v7335_v33  ;;  %5587 = vmatprep.mubr.bf16.mxu1 %v8114_v50  ;;  %v7349_v29 = vadd.f32 %v1431_v51, %v8115_v49 }
 0x1db   : > { %v5305_v61 = vpop.f32.mrb[68].mxu0 }
 0x1dc   : > { %8116 = vst [vmem:[#allocation18_spill] sm:$0xff] %v7349_v29  ;;  %v1361_v0 = vpop.f32.mrb[69].mxu0  ;;  %v1422_v23 = vrot.slane %v5305_v61, 2 }
 0x1dd   : > { %v1420_v47 = vrot.slane %v1361_v0, 2  ;;  %v5306_v56 = vpop.f32.mrb[70].mxu0 }
 0x1de   : > { %v1423_v33 = vrot.slane %v5306_v56, 2  ;;  %v1364_v52 = vpop.f32.mrb[71].mxu0 }
 0x1df   : > { %v1428_v18 = vsel %vm1424_vm2, %v1419_v9, %v1420_v47  ;;  %v1421_v43 = vrot.slane %v1364_v52, 2 }
 0x1e0   : > { %v7354_v22 = vadd.f32 %v1428_v18, %v7102_v44  ;;  %v1425_v63 = vsel %vm1424_vm2, %v1422_v23, %v1423_v33  ;;  %5652 = vmatmul.mubr.bf16.gmra.mrb[176].mxu0 %v7092_v46 }
 0x1e1   : > { %5588 = vmatmul.mubr.bf16.gmra.mrb[32].mxu1 %v7092_v46  ;;  %v7361_v51 = vadd.f32 %v1425_v63, %v7110_v20  ;;  %v1426_v50 = vsel %vm1424_vm2, %v1421_v43, %v1422_v23  ;;  %5655 = vmatprep.mubr.bf16.mxu0 %v7094_v4 }
 0x1e2   : > { %8117 = vst [vmem:[#allocation21_spill] sm:$0xff] %v7354_v22  ;;  %5591 = vmatprep.mubr.bf16.mxu1 %v7094_v4  ;;  %v7368_v44 = vadd.f32 %v1426_v50, %v7120_v59 }
 0x1e3   : > { %8118 = vst [vmem:[#allocation19_spill] sm:$0xff] %v7361_v51  ;;  %v5453_v49 = vpop.f32.mrb[72].mxu0 }
 0x1e4   : > { %8119 = vst [vmem:[#allocation22_spill] sm:$0xff] %v7368_v44  ;;  %v5325_v9 = vpop.f32.mrb[72].mxu1  ;;  %v2416_v61 = vpop.f32.mrb[73].mxu0  ;;  %v2609_v56 = vrot.slane %v5453_v49, 2  ;;  %v8120_v49 = vld [vmem:[#allocation32_spill] sm:$0xff] }
 0x1e5   : > { %v1757_v33 = vpop.f32.mrb[73].mxu1  ;;  %v5454_v47 = vpop.f32.mrb[74].mxu0  ;;  %v1950_v46 = vrot.slane %v5325_v9, 1  ;;  %v2607_v63 = vrot.slane %v2416_v61, 2 }
 0x1e6   : > { %v5326_v0 = vpop.f32.mrb[74].mxu1  ;;  %v2419_v52 = vpop.f32.mrb[75].mxu0  ;;  %v1948_v18 = vrot.slane %v1757_v33, 1  ;;  %v2610_v51 = vrot.slane %v5454_v47, 2 }
 0x1e7   : > { %v1760_v20 = vpop.f32.mrb[75].mxu1  ;;  %v2608_v43 = vrot.slane %v2419_v52, 2 }
 0x1e8   : > { %v1949_v23 = vrot.slane %v1760_v20, 1  ;;  %5656 = vmatmul.mubr.bf16.gmra.mrb[180].mxu0 %v7124_v60 }
 0x1e9   : > { %5592 = vmatmul.mubr.bf16.gmra.mrb[36].mxu1 %v7124_v60  ;;  %v2700_v50 = vsel %vm1424_vm2, %v2608_v43, %v2609_v56  ;;  %v2701_v9 = vsel %vm1424_vm2, %v2607_v63, %v2608_v43  ;;  %5659 = vmatprep.mubr.bf16.mxu0 %v7126_v24  ;;  %v1951_v56 = vrot.slane %v5326_v0, 1 }
 0x1ea   : > { %v2041_v4 = vsel %vm764_vm1, %v1949_v23, %v1950_v46  ;;  %v2042_v59 = vsel %vm764_vm1, %v1948_v18, %v1949_v23  ;;  %5595 = vmatprep.mubr.bf16.mxu1 %v7126_v24 }
 0x1eb   : > { %v5708_v33 = vadd.f32 %v8120_v49, %v2042_v59  ;;  %v5720_v61 = vadd.f32 %v7141_v15, %v2041_v4  ;;  %v5457_v20 = vpop.f32.mrb[76].mxu0 }
 0x1ec   : > { %v5329_v60 = vpop.f32.mrb[76].mxu1  ;;  %v2432_v44 = vpop.f32.mrb[77].mxu0  ;;  %v2613_v59 = vrot.slane %v5457_v20, 2 }
 0x1ed   : > { %v1954_v46 = vrot.slane %v5329_v60, 1  ;;  %v1773_v52 = vpop.f32.mrb[77].mxu1  ;;  %v7384_v18 = vadd.f32 %v5708_v33, %v2701_v9  ;;  %v7386_v23 = vadd.f32 %v5720_v61, %v2700_v50  ;;  %v2611_v43 = vrot.slane %v2432_v44, 2  ;;  %v5458_v29 = vpop.f32.mrb[78].mxu0 }
 0x1ee   : > { %v1952_v63 = vrot.slane %v1773_v52, 1  ;;  %v5330_v22 = vpop.f32.mrb[78].mxu1  ;;  %v2614_v15 = vrot.slane %v5458_v29, 2  ;;  %v2435_v24 = vpop.f32.mrb[79].mxu0 }
 0x1ef   : > { %v1955_v49 = vrot.slane %v5330_v22, 1  ;;  %v1776_v4 = vpop.f32.mrb[79].mxu1  ;;  %v2698_v9 = vsel %vm1424_vm2, %v2610_v51, %v2611_v43  ;;  %v2612_v50 = vrot.slane %v2435_v24, 2 }
 0x1f0   : > { %v2039_v60 = vsel %vm764_vm1, %v1951_v56, %v1952_v63  ;;  %v1953_v33 = vrot.slane %v1776_v4, 1  ;;  %v2695_v47 = vsel %vm1424_vm2, %v2613_v59, %v2614_v15  ;;  %5660 = vmatmul.mubr.bf16.gmra.mrb[184].mxu0 %v7143_v53 }
 0x1f1   : > { %v5714_v0 = vadd.f32 %v7150_v13, %v2039_v60  ;;  %v2036_v44 = vsel %vm764_vm1, %v1954_v46, %v1955_v49  ;;  %5596 = vmatmul.mubr.bf16.gmra.mrb[40].mxu1 %v7143_v53  ;;  %v2697_v51 = vsel %vm1424_vm2, %v2611_v43, %v2612_v50  ;;  %5663 = vmatprep.mubr.bf16.mxu0 %v7145_v26 }
 0x1f2   : > { %v5726_v29 = vadd.f32 %v7157_v27, %v2036_v44  ;;  %v2038_v22 = vsel %vm764_vm1, %v1952_v63, %v1953_v33  ;;  %5599 = vmatprep.mubr.bf16.mxu1 %v7145_v26 }
 0x1f3   : > { %v5732_v13 = vadd.f32 %v7164_v42, %v2038_v22  ;;  %v7407_v61 = vadd.f32 %v5714_v0, %v2698_v9  ;;  %v5461_v46 = vpop.f32.mrb[80].mxu0 }
 0x1f4   : > { %v5333_v20 = vpop.f32.mrb[80].mxu1  ;;  %v7409_v52 = vadd.f32 %v5726_v29, %v2695_v47  ;;  %v2448_v56 = vpop.f32.mrb[81].mxu0  ;;  %v2617_v60 = vrot.slane %v5461_v46, 2 }
 0x1f5   : > { %v1958_v53 = vrot.slane %v5333_v20, 1  ;;  %v1789_v27 = vpop.f32.mrb[81].mxu1  ;;  %v7411_v59 = vadd.f32 %v5732_v13, %v2697_v51  ;;  %v2615_v4 = vrot.slane %v2448_v56, 2  ;;  %v5462_v24 = vpop.f32.mrb[82].mxu0 }
 0x1f6   : > { %v1956_v63 = vrot.slane %v1789_v27, 1  ;;  %v5334_v43 = vpop.f32.mrb[82].mxu1  ;;  %v2618_v26 = vrot.slane %v5462_v24, 2  ;;  %v2451_v42 = vpop.f32.mrb[83].mxu0 }
 0x1f7   : > { %v1959_v33 = vrot.slane %v5334_v43, 1  ;;  %v1792_v50 = vpop.f32.mrb[83].mxu1  ;;  %v2694_v0 = vsel %vm1424_vm2, %v2614_v15, %v2615_v4  ;;  %v2616_v47 = vrot.slane %v2451_v42, 2 }
 0x1f8   : > { %v2035_v9 = vsel %vm764_vm1, %v1955_v49, %v1956_v63  ;;  %v1957_v44 = vrot.slane %v1792_v50, 1  ;;  %v2691_v51 = vsel %vm1424_vm2, %v2617_v60, %v2618_v26  ;;  %5664 = vmatmul.mubr.bf16.gmra.mrb[188].mxu0 %v7166_v54 }
 0x1f9   : > { %v5738_v29 = vadd.f32 %v7173_v62, %v2035_v9  ;;  %v2032_v22 = vsel %vm764_vm1, %v1958_v53, %v1959_v33  ;;  %5600 = vmatmul.mubr.bf16.gmra.mrb[44].mxu1 %v7166_v54  ;;  %v2692_v15 = vsel %vm1424_vm2, %v2616_v47, %v2617_v60  ;;  %5667 = vmatprep.mubr.bf16.mxu0 %v7168_v48 }
 0x1fa   : > { %v5744_v13 = vadd.f32 %v7180_v14, %v2032_v22  ;;  %v2033_v49 = vsel %vm764_vm1, %v1957_v44, %v1958_v53  ;;  %5603 = vmatprep.mubr.bf16.mxu1 %v7168_v48 }
 0x1fb   : > { %v5750_v62 = vadd.f32 %v7187_v32, %v2033_v49  ;;  %v7432_v20 = vadd.f32 %v5738_v29, %v2694_v0  ;;  %v5465_v27 = vpop.f32.mrb[84].mxu0 }
 0x1fc   : > { %v5337_v46 = vpop.f32.mrb[84].mxu1  ;;  %v7434_v56 = vadd.f32 %v5744_v13, %v2691_v51  ;;  %v2464_v14 = vpop.f32.mrb[85].mxu0  ;;  %v2621_v24 = vrot.slane %v5465_v27, 2 }
 0x1fd   : > { %v1805_v54 = vpop.f32.mrb[85].mxu1  ;;  %v7436_v63 = vadd.f32 %v5750_v62, %v2692_v15  ;;  %v5466_v4 = vpop.f32.mrb[86].mxu0  ;;  %v1962_v43 = vrot.slane %v5337_v46, 1  ;;  %v2619_v48 = vrot.slane %v2464_v14, 2 }
 0x1fe   : > { %v5338_v53 = vpop.f32.mrb[86].mxu1  ;;  %v2467_v33 = vpop.f32.mrb[87].mxu0  ;;  %v1960_v26 = vrot.slane %v1805_v54, 1  ;;  %v2622_v27 = vrot.slane %v5466_v4, 2 }
 0x1ff   : > { %v1808_v60 = vpop.f32.mrb[87].mxu1  ;;  %v2620_v32 = vrot.slane %v2467_v33, 2  ;;  %v1963_v46 = vrot.slane %v5338_v53, 1 }
 0x200   : > { %v1961_v50 = vrot.slane %v1808_v60, 1  ;;  %5668 = vmatmul.mubr.bf16.gmra.mrb[192].mxu0 %v7189_v45 }
 0x201   : > { %5604 = vmatmul.mubr.bf16.gmra.mrb[48].mxu1 %v7189_v45  ;;  %v2688_v0 = vsel %vm1424_vm2, %v2620_v32, %v2621_v24  ;;  %v2689_v44 = vsel %vm1424_vm2, %v2619_v48, %v2620_v32  ;;  %5671 = vmatprep.mubr.bf16.mxu0 %v7191_v6 }
 0x202   : > { %v2029_v42 = vsel %vm764_vm1, %v1961_v50, %v1962_v43  ;;  %v2030_v9 = vsel %vm764_vm1, %v1960_v26, %v1961_v50  ;;  %5607 = vmatprep.mubr.bf16.mxu1 %v7191_v6 }
 0x203   : > { %v5756_v47 = vadd.f32 %v7202_v11, %v2030_v9  ;;  %v5768_v29 = vadd.f32 %v7205_v5, %v2029_v42  ;;  %v5469_v22 = vpop.f32.mrb[88].mxu0 }
 0x204   : > { %v5341_v45 = vpop.f32.mrb[88].mxu1  ;;  %v2480_v49 = vpop.f32.mrb[89].mxu0  ;;  %v2625_v11 = vrot.slane %v5469_v22, 2 }
 0x205   : > { %v1966_v51 = vrot.slane %v5341_v45, 1  ;;  %v1821_v13 = vpop.f32.mrb[89].mxu1  ;;  %v7452_v15 = vadd.f32 %v5756_v47, %v2689_v44  ;;  %v7454_v62 = vadd.f32 %v5768_v29, %v2688_v0  ;;  %v2623_v14 = vrot.slane %v2480_v49, 2  ;;  %v5470_v24 = vpop.f32.mrb[90].mxu0 }
 0x206   : > { %v1964_v54 = vrot.slane %v1821_v13, 1  ;;  %v5342_v43 = vpop.f32.mrb[90].mxu1  ;;  %v2626_v5 = vrot.slane %v5470_v24, 2  ;;  %v2483_v6 = vpop.f32.mrb[91].mxu0 }
 0x207   : > { %v1967_v60 = vrot.slane %v5342_v43, 1  ;;  %v1824_v33 = vpop.f32.mrb[91].mxu1  ;;  %v2686_v48 = vsel %vm1424_vm2, %v2622_v27, %v2623_v14  ;;  %v2624_v32 = vrot.slane %v2483_v6, 2 }
 0x208   : > { %v2027_v26 = vsel %vm764_vm1, %v1963_v46, %v1964_v54  ;;  %v1965_v50 = vrot.slane %v1824_v33, 1  ;;  %v2683_v42 = vsel %vm1424_vm2, %v2625_v11, %v2626_v5  ;;  %5672 = vmatmul.mubr.bf16.gmra.mrb[196].mxu0 %v7207_v8 }
 0x209   : > { %v5762_v53 = vadd.f32 %v7214_v16, %v2027_v26  ;;  %v2024_v4 = vsel %vm764_vm1, %v1966_v51, %v1967_v60  ;;  %5608 = vmatmul.mubr.bf16.gmra.mrb[52].mxu1 %v7207_v8  ;;  %v2685_v44 = vsel %vm1424_vm2, %v2623_v14, %v2624_v32  ;;  %5675 = vmatprep.mubr.bf16.mxu0 %v7209_v19 }
 0x20a   : > { %v5774_v9 = vadd.f32 %v7221_v25, %v2024_v4  ;;  %v2026_v0 = vsel %vm764_vm1, %v1964_v54, %v1965_v50  ;;  %5611 = vmatprep.mubr.bf16.mxu1 %v7209_v19 }
 0x20b   : > { %v5780_v16 = vadd.f32 %v7228_v1, %v2026_v0  ;;  %v7475_v47 = vadd.f32 %v5762_v53, %v2686_v48  ;;  %v5473_v45 = vpop.f32.mrb[92].mxu0 }
 0x20c   : > { %v5345_v29 = vpop.f32.mrb[92].mxu1  ;;  %v7477_v22 = vadd.f32 %v5774_v9, %v2683_v42  ;;  %v2496_v51 = vpop.f32.mrb[93].mxu0  ;;  %v2629_v14 = vrot.slane %v5473_v45, 2 }
 0x20d   : > { %v1970_v8 = vrot.slane %v5345_v29, 1  ;;  %v1837_v25 = vpop.f32.mrb[93].mxu1  ;;  %v7479_v13 = vadd.f32 %v5780_v16, %v2685_v44  ;;  %v2627_v46 = vrot.slane %v2496_v51, 2  ;;  %v5474_v54 = vpop.f32.mrb[94].mxu0 }
 0x20e   : > { %v1968_v49 = vrot.slane %v1837_v25, 1  ;;  %v5346_v27 = vpop.f32.mrb[94].mxu1  ;;  %v2630_v19 = vrot.slane %v5474_v54, 2  ;;  %v2499_v1 = vpop.f32.mrb[95].mxu0 }
 0x20f   : > { %v1971_v43 = vrot.slane %v5346_v27, 1  ;;  %v1840_v24 = vpop.f32.mrb[95].mxu1  ;;  %v2682_v33 = vsel %vm1424_vm2, %v2626_v5, %v2627_v46  ;;  %v2628_v26 = vrot.slane %v2499_v1, 2 }
 0x210   : > { %v2023_v11 = vsel %vm764_vm1, %v1967_v60, %v1968_v49  ;;  %v1969_v6 = vrot.slane %v1840_v24, 1  ;;  %v2679_v32 = vsel %vm1424_vm2, %v2629_v14, %v2630_v19  ;;  %5676 = vmatmul.mubr.bf16.gmra.mrb[200].mxu0 %v7230_v37 }
 0x211   : > { %v5786_v48 = vadd.f32 %v7237_v28, %v2023_v11  ;;  %v2020_v50 = vsel %vm764_vm1, %v1970_v8, %v1971_v43  ;;  %5612 = vmatmul.mubr.bf16.gmra.mrb[56].mxu1 %v7230_v37  ;;  %v2680_v5 = vsel %vm1424_vm2, %v2628_v26, %v2629_v14  ;;  %5679 = vmatprep.mubr.bf16.mxu0 %v7232_v58 }
 0x212   : > { %v5792_v53 = vadd.f32 %v7244_v17, %v2020_v50  ;;  %v2021_v60 = vsel %vm764_vm1, %v1969_v6, %v1970_v8  ;;  %5615 = vmatprep.mubr.bf16.mxu1 %v7232_v58 }
 0x213   : > { %v5798_v28 = vadd.f32 %v7251_v12, %v2021_v60  ;;  %v7500_v4 = vadd.f32 %v5786_v48, %v2682_v33  ;;  %v5477_v9 = vpop.f32.mrb[96].mxu0 }
 0x214   : > { %v5349_v42 = vpop.f32.mrb[96].mxu1  ;;  %v7502_v0 = vadd.f32 %v5792_v53, %v2679_v32  ;;  %v2512_v17 = vpop.f32.mrb[97].mxu0  ;;  %v2633_v8 = vrot.slane %v5477_v9, 2 }
 0x215   : > { %v1853_v37 = vpop.f32.mrb[97].mxu1  ;;  %v7504_v44 = vadd.f32 %v5798_v28, %v2680_v5  ;;  %v5478_v29 = vpop.f32.mrb[98].mxu0  ;;  %v1974_v45 = vrot.slane %v5349_v42, 1  ;;  %v2631_v58 = vrot.slane %v2512_v17, 2 }
 0x216   : > { %v5350_v16 = vpop.f32.mrb[98].mxu1  ;;  %v2515_v51 = vpop.f32.mrb[99].mxu0  ;;  %v1972_v49 = vrot.slane %v1853_v37, 1  ;;  %v2634_v32 = vrot.slane %v5478_v29, 2 }
 0x217   : > { %v1856_v25 = vpop.f32.mrb[99].mxu1  ;;  %v2632_v12 = vrot.slane %v2515_v51, 2  ;;  %v1975_v50 = vrot.slane %v5350_v16, 1 }
 0x218   : > { %v1973_v46 = vrot.slane %v1856_v25, 1  ;;  %5680 = vmatmul.mubr.bf16.gmra.mrb[204].mxu0 %v7253_v31 }
 0x219   : > { %5616 = vmatmul.mubr.bf16.gmra.mrb[60].mxu1 %v7253_v31  ;;  %v2676_v14 = vsel %vm1424_vm2, %v2632_v12, %v2633_v8  ;;  %v2677_v43 = vsel %vm1424_vm2, %v2631_v58, %v2632_v12  ;;  %5683 = vmatprep.mubr.bf16.mxu0 %v7255_v34 }
 0x21a   : > { %v2017_v27 = vsel %vm764_vm1, %v1973_v46, %v1974_v45  ;;  %v2018_v54 = vsel %vm764_vm1, %v1972_v49, %v1973_v46  ;;  %5619 = vmatprep.mubr.bf16.mxu1 %v7255_v34 }
 0x21b   : > { %v5804_v19 = vadd.f32 %v7266_v38, %v2018_v54  ;;  %v5816_v24 = vadd.f32 %v7269_v35, %v2017_v27  ;;  %v5481_v1 = vpop.f32.mrb[100].mxu0 }
 0x21c   : > { %v5353_v31 = vpop.f32.mrb[100].mxu1  ;;  %v2528_v6 = vpop.f32.mrb[101].mxu0  ;;  %v2637_v38 = vrot.slane %v5481_v1, 2 }
 0x21d   : > { %v1978_v11 = vrot.slane %v5353_v31, 1  ;;  %v1869_v33 = vpop.f32.mrb[101].mxu1  ;;  %v7520_v26 = vadd.f32 %v5804_v19, %v2677_v43  ;;  %v7522_v48 = vadd.f32 %v5816_v24, %v2676_v14  ;;  %v2635_v60 = vrot.slane %v2528_v6, 2  ;;  %v5482_v28 = vpop.f32.mrb[102].mxu0 }
 0x21e   : > { %v1976_v53 = vrot.slane %v1869_v33, 1  ;;  %v5354_v5 = vpop.f32.mrb[102].mxu1  ;;  %v2638_v35 = vrot.slane %v5482_v28, 2  ;;  %v2531_v34 = vpop.f32.mrb[103].mxu0 }
 0x21f   : > { %v1979_v42 = vrot.slane %v5354_v5, 1  ;;  %v1872_v9 = vpop.f32.mrb[103].mxu1  ;;  %v2674_v17 = vsel %vm1424_vm2, %v2634_v32, %v2635_v60  ;;  %v2636_v8 = vrot.slane %v2531_v34, 2  ;;  %v8121_v34 = vld [vmem:[#allocation17_spill] sm:$0xff] }
 0x220   : > { %v2015_v37 = vsel %vm764_vm1, %v1975_v50, %v1976_v53  ;;  %v1977_v45 = vrot.slane %v1872_v9, 1  ;;  %v2671_v25 = vsel %vm1424_vm2, %v2637_v38, %v2638_v35  ;;  %5684 = vmatmul.mubr.bf16.gmra.mrb[208].mxu0 %v7273_v36 }
 0x221   : > { %v5810_v16 = vadd.f32 %v7281_v57, %v2015_v37  ;;  %v2012_v29 = vsel %vm764_vm1, %v1978_v11, %v1979_v42  ;;  %5620 = vmatmul.mubr.bf16.gmra.mrb[64].mxu1 %v7273_v36  ;;  %v2673_v58 = vsel %vm1424_vm2, %v2635_v60, %v2636_v8  ;;  %5687 = vmatprep.mubr.bf16.mxu0 %v7276_v39 }
 0x222   : > { %v5822_v51 = vadd.f32 %v7288_v41, %v2012_v29  ;;  %v2014_v49 = vsel %vm764_vm1, %v1976_v53, %v1977_v45  ;;  %5623 = vmatprep.mubr.bf16.mxu1 %v7276_v39 }
 0x223   : > { %v5828_v57 = vadd.f32 %v7295_v10, %v2014_v49  ;;  %v7543_v46 = vadd.f32 %v5810_v16, %v2674_v17  ;;  %v5485_v27 = vpop.f32.mrb[104].mxu0 }
 0x224   : > { %v5357_v12 = vpop.f32.mrb[104].mxu1  ;;  %v7545_v54 = vadd.f32 %v5822_v51, %v2671_v25  ;;  %v2544_v14 = vpop.f32.mrb[105].mxu0  ;;  %v2641_v11 = vrot.slane %v5485_v27, 2 }
 0x225   : > { %v1982_v36 = vrot.slane %v5357_v12, 1  ;;  %v1885_v41 = vpop.f32.mrb[105].mxu1  ;;  %v7547_v43 = vadd.f32 %v5828_v57, %v2673_v58  ;;  %v2639_v24 = vrot.slane %v2544_v14, 2  ;;  %v5486_v1 = vpop.f32.mrb[106].mxu0 }
 0x226   : > { %v1980_v19 = vrot.slane %v1885_v41, 1  ;;  %v5358_v31 = vpop.f32.mrb[106].mxu1  ;;  %v2642_v39 = vrot.slane %v5486_v1, 2  ;;  %v2547_v10 = vpop.f32.mrb[107].mxu0 }
 0x227   : > { %v1983_v33 = vrot.slane %v5358_v31, 1  ;;  %v1888_v6 = vpop.f32.mrb[107].mxu1  ;;  %v2670_v32 = vsel %vm1424_vm2, %v2638_v35, %v2639_v24  ;;  %v2640_v60 = vrot.slane %v2547_v10, 2 }
 0x228   : > { %v2011_v50 = vsel %vm764_vm1, %v1979_v42, %v1980_v19  ;;  %v1981_v53 = vrot.slane %v1888_v6, 1  ;;  %v2667_v38 = vsel %vm1424_vm2, %v2641_v11, %v2642_v39  ;;  %5688 = vmatmul.mubr.bf16.gmra.mrb[212].mxu0 %v7297_v2 }
 0x229   : > { %v5834_v5 = vadd.f32 %v7302_v21, %v2011_v50  ;;  %v2008_v28 = vsel %vm764_vm1, %v1982_v36, %v1983_v33  ;;  %5624 = vmatmul.mubr.bf16.gmra.mrb[68].mxu1 %v7297_v2  ;;  %v2668_v35 = vsel %vm1424_vm2, %v2640_v60, %v2641_v11 }
 0x22a   : > { %v5840_v9 = vadd.f32 %v7309_v30, %v2008_v28  ;;  %v2009_v42 = vsel %vm764_vm1, %v1981_v53, %v1982_v36 }
 0x22b   : > { %v5846_v21 = vadd.f32 %v8121_v34, %v2009_v42  ;;  %v7566_v37 = vadd.f32 %v5834_v5, %v2670_v32  ;;  %v5489_v45 = vpop.f32.mrb[108].mxu0 }
 0x22c   : > { %v5361_v17 = vpop.f32.mrb[108].mxu1  ;;  %v7568_v8 = vadd.f32 %v5840_v9, %v2667_v38  ;;  %v2560_v29 = vpop.f32.mrb[109].mxu0  ;;  %v2645_v49 = vrot.slane %v5489_v45, 2 }
 0x22d   : > { %v1901_v16 = vpop.f32.mrb[109].mxu1  ;;  %v7570_v25 = vadd.f32 %v5846_v21, %v2668_v35  ;;  %v5490_v30 = vpop.f32.mrb[110].mxu0  ;;  %v1986_v51 = vrot.slane %v5361_v17, 1  ;;  %v2643_v27 = vrot.slane %v2560_v29, 2 }
 0x22e   : > { %v5362_v2 = vpop.f32.mrb[110].mxu1  ;;  %v2563_v57 = vpop.f32.mrb[111].mxu0  ;;  %v1984_v12 = vrot.slane %v1901_v16, 1  ;;  %v2646_v5 = vrot.slane %v5490_v30, 2 }
 0x22f   : > { %v1904_v58 = vpop.f32.mrb[111].mxu1  ;;  %v2644_v41 = vrot.slane %v2563_v57, 2  ;;  %v1987_v60 = vrot.slane %v5362_v2, 1 }
 0x230   : > { %v1985_v36 = vrot.slane %v1904_v58, 1 }
 0x231   : > { %v2664_v24 = vsel %vm1424_vm2, %v2644_v41, %v2645_v49  ;;  %v2665_v31 = vsel %vm1424_vm2, %v2643_v27, %v2644_v41  ;;  %v8123_v27 = vld [vmem:[#allocation18_spill] sm:$0xff] }
 0x232   : > { %v2005_v14 = vsel %vm764_vm1, %v1985_v36, %v1986_v51  ;;  %v2006_v19 = vsel %vm764_vm1, %v1984_v12, %v1985_v36  ;;  %v8122_v51 = vld [vmem:[#allocation16_spill] sm:$0xff] }
 0x233   : > { %v5852_v1 = vadd.f32 %v7327_v40, %v2006_v19  ;;  %v5864_v11 = vadd.f32 %v7330_v7, %v2005_v14  ;;  %v5493_v39 = vpop.f32.mrb[112].mxu0 }
 0x234   : > { %v5365_v33 = vpop.f32.mrb[112].mxu1  ;;  %v2576_v50 = vpop.f32.mrb[113].mxu0  ;;  %v2649_v35 = vrot.slane %v5493_v39, 2 }
 0x235   : > { %v1990_v6 = vrot.slane %v5365_v33, 1  ;;  %v1917_v10 = vpop.f32.mrb[113].mxu1  ;;  %v7582_v32 = vadd.f32 %v5852_v1, %v2665_v31  ;;  %v7584_v53 = vadd.f32 %v5864_v11, %v2664_v24  ;;  %v2647_v38 = vrot.slane %v2576_v50, 2  ;;  %v5494_v42 = vpop.f32.mrb[114].mxu0 }
 0x236   : > { %v1988_v28 = vrot.slane %v1917_v10, 1  ;;  %v5366_v9 = vpop.f32.mrb[114].mxu1  ;;  %v2650_v40 = vrot.slane %v5494_v42, 2  ;;  %v2579_v7 = vpop.f32.mrb[115].mxu0 }
 0x237   : > { %v1991_v34 = vrot.slane %v5366_v9, 1  ;;  %v1920_v21 = vpop.f32.mrb[115].mxu1  ;;  %v2662_v45 = vsel %vm1424_vm2, %v2646_v5, %v2647_v38  ;;  %v2648_v29 = vrot.slane %v2579_v7, 2  ;;  %v8124_v7 = vld [vmem:[#allocation21_spill] sm:$0xff] }
 0x238   : > { %v2003_v17 = vsel %vm764_vm1, %v1987_v60, %v1988_v28  ;;  %v1989_v16 = vrot.slane %v1920_v21, 1  ;;  %v2659_v49 = vsel %vm1424_vm2, %v2649_v35, %v2650_v40 }
 0x239   : > { %v5858_v2 = vadd.f32 %v8122_v51, %v2003_v17  ;;  %v2000_v30 = vsel %vm764_vm1, %v1990_v6, %v1991_v34  ;;  %v2661_v12 = vsel %vm1424_vm2, %v2647_v38, %v2648_v29  ;;  %v8125_v29 = vld [vmem:[#allocation19_spill] sm:$0xff] }
 0x23a   : > { %v5870_v58 = vadd.f32 %v7342_v3, %v2000_v30  ;;  %v2002_v57 = vsel %vm764_vm1, %v1988_v28, %v1989_v16  ;;  %v8126_v30 = vld [vmem:[#allocation22_spill] sm:$0xff] }
 0x23b   : > { %v5876_v36 = vadd.f32 %v8123_v27, %v2002_v57  ;;  %v7601_v41 = vadd.f32 %v5858_v2, %v2662_v45  ;;  %v5497_v19 = vpop.f32.mrb[116].mxu0 }
 0x23c   : > { %v5369_v14 = vpop.f32.mrb[116].mxu1  ;;  %v7603_v24 = vadd.f32 %v5870_v58, %v2659_v49  ;;  %v2592_v11 = vpop.f32.mrb[117].mxu0  ;;  %v2653_v50 = vrot.slane %v5497_v19, 2 }
 0x23d   : > { %v1994_v31 = vrot.slane %v5369_v14, 1  ;;  %v1933_v1 = vpop.f32.mrb[117].mxu1  ;;  %v7605_v33 = vadd.f32 %v5876_v36, %v2661_v12  ;;  %v2651_v39 = vrot.slane %v2592_v11, 2  ;;  %v5498_v10 = vpop.f32.mrb[118].mxu0 }
 0x23e   : > { %v1992_v3 = vrot.slane %v1933_v1, 1  ;;  %v5370_v6 = vpop.f32.mrb[118].mxu1  ;;  %v2654_v5 = vrot.slane %v5498_v10, 2  ;;  %v2595_v38 = vpop.f32.mrb[119].mxu0 }
 0x23f   : > { %v1995_v60 = vrot.slane %v5370_v6, 1  ;;  %v1936_v28 = vpop.f32.mrb[119].mxu1  ;;  %v2658_v42 = vsel %vm1424_vm2, %v2650_v40, %v2651_v39  ;;  %v2652_v21 = vrot.slane %v2595_v38, 2 }
 0x240   : > { %v1999_v9 = vsel %vm764_vm1, %v1991_v34, %v1992_v3  ;;  %v1993_v35 = vrot.slane %v1936_v28, 1  ;;  %v2655_v16 = vsel %vm1424_vm2, %v2653_v50, %v2654_v5 }
 0x241   : > { %v5882_v17 = vadd.f32 %v8124_v7, %v1999_v9  ;;  %v1996_v45 = vsel %vm764_vm1, %v1994_v31, %v1995_v60  ;;  %v2656_v34 = vsel %vm1424_vm2, %v2652_v21, %v2653_v50 }
 0x242   : > { %v5888_v51 = vadd.f32 %v8125_v29, %v1996_v45  ;;  %v1997_v2 = vsel %vm764_vm1, %v1993_v35, %v1994_v31 }
 0x243   : > { %v5894_v40 = vadd.f32 %v8126_v30, %v1997_v2  ;;  %v7622_v49 = vadd.f32 %v5882_v17, %v2658_v42  ;;  %v5517_v58 = vpop.f32.mrb[120].mxu0 }
 0x244   : > { %v7624_v57 = vadd.f32 %v5888_v51, %v2655_v16  ;;  %v3084_v12 = vpop.f32.mrb[121].mxu0  ;;  %v3277_v19 = vrot.slane %v5517_v58, 1 }
 0x245   : > { %v7626_v27 = vadd.f32 %v5894_v40, %v2656_v34  ;;  %v5518_v36 = vpop.f32.mrb[122].mxu0  ;;  %v3275_v1 = vrot.slane %v3084_v12, 1 }
 0x246   : > { %v3087_v14 = vpop.f32.mrb[123].mxu0  ;;  %v3278_v60 = vrot.slane %v5518_v36, 1 }
 0x247   : > { %v3276_v11 = vrot.slane %v3087_v14, 1 }
 0x249   : > { %v3369_v31 = vsel %vm764_vm1, %v3275_v1, %v3276_v11  ;;  %v3368_v3 = vsel %vm764_vm1, %v3276_v11, %v3277_v19 }
 0x24a   : > { %v7633_v39 = vadd.f32 %v7384_v18, %v3369_v31  ;;  %v7636_v6 = vadd.f32 %v7386_v23, %v3368_v3 }
 0x24b   : > { %v5521_v10 = vpop.f32.mrb[124].mxu0 }
 0x24c   : > { %v3100_v50 = vpop.f32.mrb[125].mxu0  ;;  %v3281_v38 = vrot.slane %v5521_v10, 1 }
 0x24d   : > { %v3279_v5 = vrot.slane %v3100_v50, 1  ;;  %v5522_v28 = vpop.f32.mrb[126].mxu0 }
 0x24e   : > { %v3282_v9 = vrot.slane %v5522_v28, 1  ;;  %v3103_v42 = vpop.f32.mrb[127].mxu0 }
 0x24f   : > { %v3280_v35 = vrot.slane %v3103_v42, 1  ;;  %v3366_v21 = vsel %vm764_vm1, %v3278_v60, %v3279_v5 }
 0x250   : > { %v7641_v7 = vadd.f32 %v7407_v61, %v3366_v21  ;;  %v3363_v18 = vsel %vm764_vm1, %v3281_v38, %v3282_v9 }
 0x251   : > { %v7646_v23 = vadd.f32 %v7409_v52, %v3363_v18  ;;  %v3365_v17 = vsel %vm764_vm1, %v3279_v5, %v3280_v35 }
 0x252   : > { %v7651_v45 = vadd.f32 %v7411_v59, %v3365_v17 }
 0x253   : > { %v5525_v16 = vpop.f32.mrb[128].mxu0 }
 0x254   : > { %v3116_v29 = vpop.f32.mrb[129].mxu0  ;;  %v3285_v34 = vrot.slane %v5525_v16, 1 }
 0x255   : > { %v3283_v51 = vrot.slane %v3116_v29, 1  ;;  %v5526_v2 = vpop.f32.mrb[130].mxu0 }
 0x256   : > { %v3286_v30 = vrot.slane %v5526_v2, 1  ;;  %v3119_v61 = vpop.f32.mrb[131].mxu0 }
 0x257   : > { %v3284_v40 = vrot.slane %v3119_v61, 1  ;;  %v3362_v58 = vsel %vm764_vm1, %v3282_v9, %v3283_v51 }
 0x258   : > { %v7656_v52 = vadd.f32 %v7432_v20, %v3362_v58  ;;  %v3359_v12 = vsel %vm764_vm1, %v3285_v34, %v3286_v30 }
 0x259   : > { %v7661_v59 = vadd.f32 %v7434_v56, %v3359_v12  ;;  %v3360_v36 = vsel %vm764_vm1, %v3284_v40, %v3285_v34 }
 0x25a   : > { %v7666_v14 = vadd.f32 %v7436_v63, %v3360_v36 }
 0x25b   : > { %v5529_v19 = vpop.f32.mrb[132].mxu0 }
 0x25c   : > { %v3132_v1 = vpop.f32.mrb[133].mxu0  ;;  %v3289_v3 = vrot.slane %v5529_v19, 1 }
 0x25d   : > { %v5530_v11 = vpop.f32.mrb[134].mxu0  ;;  %v3287_v10 = vrot.slane %v3132_v1, 1 }
 0x25e   : > { %v3135_v31 = vpop.f32.mrb[135].mxu0  ;;  %v3290_v38 = vrot.slane %v5530_v11, 1 }
 0x25f   : > { %v3288_v20 = vrot.slane %v3135_v31, 1 }
 0x261   : > { %v3357_v50 = vsel %vm764_vm1, %v3287_v10, %v3288_v20  ;;  %v3356_v56 = vsel %vm764_vm1, %v3288_v20, %v3289_v3 }
 0x262   : > { %v7673_v60 = vadd.f32 %v7452_v15, %v3357_v50  ;;  %v7676_v5 = vadd.f32 %v7454_v62, %v3356_v56 }
 0x263   : > { %v5533_v63 = vpop.f32.mrb[136].mxu0 }
 0x264   : > { %v3148_v28 = vpop.f32.mrb[137].mxu0  ;;  %v3293_v35 = vrot.slane %v5533_v63, 1 }
 0x265   : > { %v3291_v9 = vrot.slane %v3148_v28, 1  ;;  %v5534_v42 = vpop.f32.mrb[138].mxu0 }
 0x266   : > { %v3294_v21 = vrot.slane %v5534_v42, 1  ;;  %v3151_v18 = vpop.f32.mrb[139].mxu0 }
 0x267   : > { %v3292_v17 = vrot.slane %v3151_v18, 1  ;;  %v3354_v16 = vsel %vm764_vm1, %v3290_v38, %v3291_v9 }
 0x268   : > { %v7681_v29 = vadd.f32 %v7475_v47, %v3354_v16  ;;  %v3351_v15 = vsel %vm764_vm1, %v3293_v35, %v3294_v21 }
 0x269   : > { %v7686_v62 = vadd.f32 %v7477_v22, %v3351_v15  ;;  %v3353_v51 = vsel %vm764_vm1, %v3291_v9, %v3292_v17 }
 0x26a   : > { %v7691_v2 = vadd.f32 %v7479_v13, %v3353_v51 }
 0x26b   : > { %v5537_v34 = vpop.f32.mrb[140].mxu0 }
 0x26c   : > { %v3164_v30 = vpop.f32.mrb[141].mxu0  ;;  %v3297_v58 = vrot.slane %v5537_v34, 1 }
 0x26d   : > { %v3295_v61 = vrot.slane %v3164_v30, 1  ;;  %v5538_v40 = vpop.f32.mrb[142].mxu0 }
 0x26e   : > { %v3298_v12 = vrot.slane %v5538_v40, 1  ;;  %v3167_v47 = vpop.f32.mrb[143].mxu0 }
 0x26f   : > { %v3296_v36 = vrot.slane %v3167_v47, 1  ;;  %v3350_v19 = vsel %vm764_vm1, %v3294_v21, %v3295_v61 }
 0x270   : > { %v7696_v22 = vadd.f32 %v7500_v4, %v3350_v19  ;;  %v3347_v1 = vsel %vm764_vm1, %v3297_v58, %v3298_v12 }
 0x271   : > { %v7701_v13 = vadd.f32 %v7502_v0, %v3347_v1  ;;  %v3348_v11 = vsel %vm764_vm1, %v3296_v36, %v3297_v58 }
 0x272   : > { %v7706_v31 = vadd.f32 %v7504_v44, %v3348_v11 }
 0x273   : > { %v5541_v3 = vpop.f32.mrb[144].mxu0 }
 0x274   : > { %v3180_v10 = vpop.f32.mrb[145].mxu0  ;;  %v3301_v56 = vrot.slane %v5541_v3, 1 }
 0x275   : > { %v5542_v20 = vpop.f32.mrb[146].mxu0  ;;  %v3299_v63 = vrot.slane %v3180_v10, 1 }
 0x276   : > { %v3183_v50 = vpop.f32.mrb[147].mxu0  ;;  %v3302_v35 = vrot.slane %v5542_v20, 1 }
 0x277   : > { %v3300_v4 = vrot.slane %v3183_v50, 1 }
 0x279   : > { %v3345_v28 = vsel %vm764_vm1, %v3299_v63, %v3300_v4  ;;  %v3344_v0 = vsel %vm764_vm1, %v3300_v4, %v3301_v56 }
 0x27a   : > { %v7713_v38 = vadd.f32 %v7520_v26, %v3345_v28  ;;  %v7716_v9 = vadd.f32 %v7522_v48, %v3344_v0 }
 0x27b   : > { %v5545_v44 = vpop.f32.mrb[148].mxu0 }
 0x27c   : > { %v3196_v42 = vpop.f32.mrb[149].mxu0  ;;  %v3305_v17 = vrot.slane %v5545_v44, 1 }
 0x27d   : > { %v3303_v21 = vrot.slane %v3196_v42, 1  ;;  %v5546_v18 = vpop.f32.mrb[150].mxu0 }
 0x27e   : > { %v3306_v16 = vrot.slane %v5546_v18, 1  ;;  %v3199_v15 = vpop.f32.mrb[151].mxu0 }
 0x27f   : > { %v3304_v51 = vrot.slane %v3199_v15, 1  ;;  %v3342_v34 = vsel %vm764_vm1, %v3302_v35, %v3303_v21 }
 0x280   : > { %v7721_v30 = vadd.f32 %v7543_v46, %v3342_v34  ;;  %v3339_v26 = vsel %vm764_vm1, %v3305_v17, %v3306_v16 }
 0x281   : > { %v7726_v48 = vadd.f32 %v7545_v54, %v3339_v26  ;;  %v3341_v61 = vsel %vm764_vm1, %v3303_v21, %v3304_v51 }
 0x282   : > { %v7731_v40 = vadd.f32 %v7547_v43, %v3341_v61 }
 0x283   : > { %v5549_v58 = vpop.f32.mrb[152].mxu0 }
 0x284   : > { %v3212_v12 = vpop.f32.mrb[153].mxu0  ;;  %v3309_v19 = vrot.slane %v5549_v58, 1 }
 0x285   : > { %v3307_v47 = vrot.slane %v3212_v12, 1  ;;  %v5550_v36 = vpop.f32.mrb[154].mxu0 }
 0x286   : > { %v3310_v1 = vrot.slane %v5550_v36, 1  ;;  %v3215_v46 = vpop.f32.mrb[155].mxu0 }
 0x287   : > { %v3308_v11 = vrot.slane %v3215_v46, 1  ;;  %v3338_v3 = vsel %vm764_vm1, %v3306_v16, %v3307_v47 }
 0x288   : > { %v7736_v54 = vadd.f32 %v7566_v37, %v3338_v3  ;;  %v3335_v10 = vsel %vm764_vm1, %v3309_v19, %v3310_v1 }
 0x289   : > { %v7741_v43 = vadd.f32 %v7568_v8, %v3335_v10  ;;  %v3336_v20 = vsel %vm764_vm1, %v3308_v11, %v3309_v19 }
 0x28a   : > { %v7746_v50 = vadd.f32 %v7570_v25, %v3336_v20 }
 0x28b   : > { %v5553_v56 = vpop.f32.mrb[156].mxu0 }
 0x28c   : > { %v3228_v63 = vpop.f32.mrb[157].mxu0  ;;  %v3313_v0 = vrot.slane %v5553_v56, 1 }
 0x28d   : > { %v5554_v4 = vpop.f32.mrb[158].mxu0  ;;  %v3311_v44 = vrot.slane %v3228_v63, 1 }
 0x28e   : > { %v3231_v28 = vpop.f32.mrb[159].mxu0  ;;  %v3314_v17 = vrot.slane %v5554_v4, 1 }
 0x28f   : > { %v3312_v37 = vrot.slane %v3231_v28, 1 }
 0x291   : > { %v3333_v42 = vsel %vm764_vm1, %v3311_v44, %v3312_v37  ;;  %v3332_v8 = vsel %vm764_vm1, %v3312_v37, %v3313_v0 }
 0x292   : > { %v7753_v35 = vadd.f32 %v7582_v32, %v3333_v42  ;;  %v7756_v21 = vadd.f32 %v7584_v53, %v3332_v8 }
 0x293   : > { %v5557_v25 = vpop.f32.mrb[160].mxu0 }
 0x294   : > { %v3244_v18 = vpop.f32.mrb[161].mxu0  ;;  %v3317_v51 = vrot.slane %v5557_v25, 1 }
 0x295   : > { %v3315_v16 = vrot.slane %v3244_v18, 1  ;;  %v5558_v15 = vpop.f32.mrb[162].mxu0 }
 0x296   : > { %v3318_v34 = vrot.slane %v5558_v15, 1  ;;  %v3247_v26 = vpop.f32.mrb[163].mxu0 }
 0x297   : > { %v3316_v61 = vrot.slane %v3247_v26, 1  ;;  %v3330_v58 = vsel %vm764_vm1, %v3314_v17, %v3315_v16 }
 0x298   : > { %v7761_v12 = vadd.f32 %v7601_v41, %v3330_v58  ;;  %v3327_v32 = vsel %vm764_vm1, %v3317_v51, %v3318_v34 }
 0x299   : > { %v7766_v53 = vadd.f32 %v7603_v24, %v3327_v32  ;;  %v3329_v47 = vsel %vm764_vm1, %v3315_v16, %v3316_v61 }
 0x29a   : > { %v7771_v36 = vadd.f32 %v7605_v33, %v3329_v47 }
 0x29b   : > { %v5561_v19 = vpop.f32.mrb[164].mxu0 }
 0x29c   : > { %v3260_v1 = vpop.f32.mrb[165].mxu0  ;;  %v3321_v3 = vrot.slane %v5561_v19, 1 }
 0x29d   : > { %v3319_v46 = vrot.slane %v3260_v1, 1  ;;  %v5562_v11 = vpop.f32.mrb[166].mxu0 }
 0x29e   : > { %v3322_v10 = vrot.slane %v5562_v11, 1  ;;  %v3263_v41 = vpop.f32.mrb[167].mxu0 }
 0x29f   : > { %v3320_v20 = vrot.slane %v3263_v41, 1  ;;  %v3326_v56 = vsel %vm764_vm1, %v3318_v34, %v3319_v46 }
 0x2a0   : > { %v7776_v24 = vadd.f32 %v7622_v49, %v3326_v56  ;;  %v3323_v63 = vsel %vm764_vm1, %v3321_v3, %v3322_v10 }
 0x2a1   : > { %v7781_v33 = vadd.f32 %v7624_v57, %v3323_v63  ;;  %v3324_v4 = vsel %vm764_vm1, %v3320_v20, %v3321_v3 }
 0x2a2   : > { %v7786_v28 = vadd.f32 %v7626_v27, %v3324_v4 }
 0x2a3   : > { %v5645_v44 = vpop.f32.mrb[168].mxu0 }
 0x2a4   : > { %v5581_v0 = vpop.f32.mrb[24].mxu1  ;;  %v3743_v42 = vpop.f32.mrb[169].mxu0  ;;  %v3936_v16 = vrot.slane %v5645_v44, 2 }
 0x2a5   : > { %v3453_v37 = vpop.f32.mrb[25].mxu1  ;;  %v5646_v25 = vpop.f32.mrb[170].mxu0  ;;  %v3934_v15 = vrot.slane %v3743_v42, 2 }
 0x2a6   : > { %v5711_v49 = vadd.f32 %v7633_v39, %v3453_v37  ;;  %v5582_v8 = vpop.f32.mrb[26].mxu1  ;;  %v3746_v57 = vpop.f32.mrb[171].mxu0 }
 0x2a7   : > { %v5717_v18 = vadd.f32 %v7641_v7, %v5582_v8  ;;  %v3456_v17 = vpop.f32.mrb[27].mxu1  ;;  %v3935_v34 = vrot.slane %v3746_v57, 2 }
 0x2a8   : > { %v5723_v51 = vadd.f32 %v7636_v6, %v3456_v17  ;;  %v3937_v6 = vrot.slane %v5646_v25, 2 }
 0x2a9   : > { %v4027_v27 = vsel %vm1424_vm2, %v3935_v34, %v3936_v16  ;;  %v4028_v26 = vsel %vm1424_vm2, %v3934_v15, %v3935_v34 }
 0x2aa   : > { %v5712_v61 = vadd.f32 %v5711_v49, %v4028_v26  ;;  %v5724_v39 = vadd.f32 %v5723_v51, %v4027_v27 }
 0x2ab   : > { %v5649_v32 = vpop.f32.mrb[172].mxu0 }
 0x2ac   : > { %v5585_v58 = vpop.f32.mrb[28].mxu1  ;;  %v4794_v7 = vpack.c.bf16 %v5712_v61, %v5712_v61  ;;  %v4795_v47 = vpack.c.bf16 %v5724_v39, %v5724_v39  ;;  %v4415_v19 = vadd.f32 %v5724_v39, %v5712_v61  ;;  %v4453_v1 = vmul.f32 %v5712_v61, %v5712_v61  ;;  %v3759_v11 = vpop.f32.mrb[173].mxu0 }
 0x2ad   : > { %v3469_v46 = vpop.f32.mrb[29].mxu1  ;;  %v4454_v3 = vmul.f32 %v5724_v39, %v5724_v39  ;;  %v5729_v10 = vadd.f32 %v7646_v23, %v5585_v58  ;;  %v5650_v56 = vpop.f32.mrb[174].mxu0  ;;  %v3940_v63 = vrot.slane %v5649_v32, 2  ;;  %v3938_v4 = vrot.slane %v3759_v11, 2 }
 0x2ae   : > { %v5735_v41 = vadd.f32 %v7651_v45, %v3469_v46  ;;  %v5586_v20 = vpop.f32.mrb[30].mxu1  ;;  %4383 = vst.msk [vmem:[%s7798_s20] sm:$0xf] %vm4382_vm3, %v4794_v7  ;;  %4384 = vst.msk [vmem:[%s7798_s20 + $0x4] sm:$0xf] %vm4382_vm3, %v4795_v47  ;;  %v3941_v44 = vrot.slane %v5650_v56, 2 }
 0x2af   : > { %v5741_v0 = vadd.f32 %v7656_v52, %v5586_v20  ;;  %v3472_v37 = vpop.f32.mrb[31].mxu1  ;;  %v3762_v42 = vpop.f32.mrb[175].mxu0  ;;  %v4485_v23 = vadd.f32 %v4454_v3, %v4453_v1  ;;  %v4025_v45 = vsel %vm1424_vm2, %v3937_v6, %v3938_v4 }
 0x2b0   : > { %v3939_v49 = vrot.slane %v3762_v42, 2  ;;  %v4022_v8 = vsel %vm1424_vm2, %v3940_v63, %v3941_v44  ;;  %v5718_v25 = vadd.f32 %v5717_v18, %v4025_v45 }
 0x2b1   : > { %v5730_v17 = vadd.f32 %v5729_v10, %v4022_v8 }
 0x2b2   : > { %v4024_v57 = vsel %vm1424_vm2, %v3938_v4, %v3939_v49  ;;  %v4796_v52 = vpack.c.bf16 %v5718_v25, %v5718_v25  ;;  %v4416_v15 = vadd.f32 %v5718_v25, %v4415_v19  ;;  %v4455_v51 = vmul.f32 %v5718_v25, %v5718_v25 }
 0x2b3   : > { %v5736_v16 = vadd.f32 %v5735_v41, %v4024_v57  ;;  %v4798_v34 = vpack.c.bf16 %v5730_v17, %v5730_v17  ;;  %v5653_v26 = vpop.f32.mrb[176].mxu0  ;;  %v4457_v11 = vmul.f32 %v5730_v17, %v5730_v17 }
 0x2b4   : > { %v5589_v27 = vpop.f32.mrb[32].mxu1  ;;  %v3775_v7 = vpop.f32.mrb[177].mxu0  ;;  %4385 = vst.msk [vmem:[%s7798_s20 + $0x8] sm:$0xf] %vm4382_vm3, %v4796_v52  ;;  %v4486_v18 = vadd.f32 %v4485_v23, %v4455_v51  ;;  %v3944_v6 = vrot.slane %v5653_v26, 2 }
 0x2b5   : > { %v4797_v61 = vpack.c.bf16 %v5736_v16, %v5736_v16  ;;  %v4456_v39 = vmul.f32 %v5736_v16, %v5736_v16  ;;  %v5747_v58 = vadd.f32 %v7661_v59, %v5589_v27  ;;  %v3485_v32 = vpop.f32.mrb[33].mxu1  ;;  %4387 = vst.msk [vmem:[%s7798_s20 + $0x10] sm:$0xf] %vm4382_vm3, %v4798_v34  ;;  %v4417_v47 = vadd.f32 %v5736_v16, %v4416_v15  ;;  %v5654_v19 = vpop.f32.mrb[178].mxu0 }
 0x2b6   : > { %v3942_v1 = vrot.slane %v3775_v7, 2  ;;  %v5590_v46 = vpop.f32.mrb[34].mxu1  ;;  %v3945_v3 = vrot.slane %v5654_v19, 2  ;;  %v3778_v41 = vpop.f32.mrb[179].mxu0 }
 0x2b7   : > { %4386 = vst.msk [vmem:[%s7798_s20 + $0xc] sm:$0xf] %vm4382_vm3, %v4797_v61  ;;  %v3488_v10 = vpop.f32.mrb[35].mxu1  ;;  %v4487_v20 = vadd.f32 %v4486_v18, %v4456_v39  ;;  %v4418_v56 = vadd.f32 %v5730_v17, %v4417_v47  ;;  %v3943_v42 = vrot.slane %v3778_v41, 2 }
 0x2b8   : > { %v4021_v59 = vsel %vm1424_vm2, %v3941_v44, %v3942_v1  ;;  %v5753_v63 = vadd.f32 %v7666_v14, %v3488_v10  ;;  %v4018_v37 = vsel %vm1424_vm2, %v3944_v6, %v3945_v3 }
 0x2b9   : > { %v5742_v4 = vadd.f32 %v5741_v0, %v4021_v59  ;;  %v4488_v23 = vadd.f32 %v4487_v20, %v4457_v11  ;;  %v5748_v49 = vadd.f32 %v5747_v58, %v4018_v37  ;;  %v4019_v57 = vsel %vm1424_vm2, %v3943_v42, %v3944_v6 }
 0x2ba   : > { %v5754_v44 = vadd.f32 %v5753_v63, %v4019_v57 }
 0x2bb   : > { %v4799_v45 = vpack.c.bf16 %v5742_v4, %v5742_v4  ;;  %v4419_v8 = vadd.f32 %v5742_v4, %v4418_v56  ;;  %v4458_v25 = vmul.f32 %v5742_v4, %v5742_v4  ;;  %v4801_v16 = vpack.c.bf16 %v5748_v49, %v5748_v49  ;;  %v5657_v17 = vpop.f32.mrb[180].mxu0 }
 0x2bc   : > { %v5593_v52 = vpop.f32.mrb[36].mxu1  ;;  %v3791_v15 = vpop.f32.mrb[181].mxu0  ;;  %v4800_v51 = vpack.c.bf16 %v5754_v44, %v5754_v44  ;;  %v4459_v27 = vmul.f32 %v5754_v44, %v5754_v44  ;;  %v4460_v58 = vmul.f32 %v5748_v49, %v5748_v49  ;;  %v3948_v32 = vrot.slane %v5657_v17, 2 }
 0x2bd   : > { %4388 = vst.msk [vmem:[%s7798_s20 + $0x14] sm:$0xf] %vm4382_vm3, %v4799_v45  ;;  %v4489_v14 = vadd.f32 %v4488_v23, %v4458_v25  ;;  %v3501_v0 = vpop.f32.mrb[37].mxu1  ;;  %4390 = vst.msk [vmem:[%s7798_s20 + $0x1c] sm:$0xf] %vm4382_vm3, %v4801_v16  ;;  %v4420_v34 = vadd.f32 %v5754_v44, %v4419_v8  ;;  %v5658_v39 = vpop.f32.mrb[182].mxu0 }
 0x2be   : > { %v5759_v26 = vadd.f32 %v7673_v60, %v3501_v0  ;;  %v5594_v61 = vpop.f32.mrb[38].mxu1  ;;  %v3946_v7 = vrot.slane %v3791_v15, 2  ;;  %v3794_v1 = vpop.f32.mrb[183].mxu0  ;;  %4389 = vst.msk [vmem:[%s7798_s20 + $0x18] sm:$0xf] %vm4382_vm3, %v4800_v51  ;;  %v3949_v23 = vrot.slane %v5658_v39, 2 }
 0x2bf   : > { %v5765_v18 = vadd.f32 %v7681_v29, %v5594_v61  ;;  %v3504_v47 = vpop.f32.mrb[39].mxu1  ;;  %v4490_v46 = vadd.f32 %v4489_v14, %v4459_v27  ;;  %v3947_v11 = vrot.slane %v3794_v1, 2  ;;  %v4421_v6 = vadd.f32 %v5748_v49, %v4420_v34 }
 0x2c0   : > { %v5771_v19 = vadd.f32 %v7676_v5, %v3504_v47 }
 0x2c1   : > { %v4015_v3 = vsel %vm1424_vm2, %v3947_v11, %v3948_v32  ;;  %v4016_v60 = vsel %vm1424_vm2, %v3946_v7, %v3947_v11  ;;  %v4491_v10 = vadd.f32 %v4490_v46, %v4460_v58 }
 0x2c2   : > { %v5760_v41 = vadd.f32 %v5759_v26, %v4016_v60  ;;  %v5772_v20 = vadd.f32 %v5771_v19, %v4015_v3 }
 0x2c3   : > { %v5661_v59 = vpop.f32.mrb[184].mxu0 }
 0x2c4   : > { %v5597_v29 = vpop.f32.mrb[40].mxu1  ;;  %v4802_v56 = vpack.c.bf16 %v5760_v41, %v5760_v41  ;;  %v4803_v63 = vpack.c.bf16 %v5772_v20, %v5772_v20  ;;  %v4422_v4 = vadd.f32 %v5760_v41, %v4421_v6  ;;  %v4461_v37 = vmul.f32 %v5760_v41, %v5760_v41  ;;  %v3807_v42 = vpop.f32.mrb[185].mxu0 }
 0x2c5   : > { %v3517_v5 = vpop.f32.mrb[41].mxu1  ;;  %v4462_v49 = vmul.f32 %v5772_v20, %v5772_v20  ;;  %v5777_v45 = vadd.f32 %v7686_v62, %v5597_v29  ;;  %v5662_v57 = vpop.f32.mrb[186].mxu0  ;;  %v3950_v52 = vrot.slane %v3807_v42, 2  ;;  %v3952_v15 = vrot.slane %v5661_v59, 2 }
 0x2c6   : > { %v5783_v8 = vadd.f32 %v7691_v2, %v3517_v5  ;;  %v5598_v25 = vpop.f32.mrb[42].mxu1  ;;  %4391 = vst.msk [vmem:[%s7798_s20 + $0x20] sm:$0xf] %vm4382_vm3, %v4802_v56  ;;  %4392 = vst.msk [vmem:[%s7798_s20 + $0x24] sm:$0xf] %vm4382_vm3, %v4803_v63  ;;  %v4423_v16 = vadd.f32 %v5772_v20, %v4422_v4  ;;  %v4492_v44 = vadd.f32 %v4491_v10, %v4461_v37  ;;  %v3810_v0 = vpop.f32.mrb[187].mxu0 }
 0x2c7   : > { %v5789_v17 = vadd.f32 %v7696_v22, %v5598_v25  ;;  %v3520_v14 = vpop.f32.mrb[43].mxu1  ;;  %v3953_v51 = vrot.slane %v5662_v57, 2  ;;  %v3951_v34 = vrot.slane %v3810_v0, 2  ;;  %v4013_v62 = vsel %vm1424_vm2, %v3949_v23, %v3950_v52 }
 0x2c8   : > { %v4493_v27 = vadd.f32 %v4492_v44, %v4462_v49  ;;  %v5766_v2 = vadd.f32 %v5765_v18, %v4013_v62 }
 0x2c9   : > { %v4010_v26 = vsel %vm1424_vm2, %v3952_v15, %v3953_v51  ;;  %v4012_v61 = vsel %vm1424_vm2, %v3950_v52, %v3951_v34 }
 0x2ca   : > { %v5778_v39 = vadd.f32 %v5777_v45, %v4010_v26  ;;  %v5784_v58 = vadd.f32 %v5783_v8, %v4012_v61  ;;  %v4804_v22 = vpack.c.bf16 %v5766_v2, %v5766_v2  ;;  %v4424_v32 = vadd.f32 %v5766_v2, %v4423_v16 }
 0x2cb   : > { %v4463_v7 = vmul.f32 %v5766_v2, %v5766_v2  ;;  %v5665_v1 = vpop.f32.mrb[188].mxu0 }
 0x2cc   : > { %v5601_v47 = vpop.f32.mrb[44].mxu1  ;;  %v4806_v46 = vpack.c.bf16 %v5778_v39, %v5778_v39  ;;  %v4805_v19 = vpack.c.bf16 %v5784_v58, %v5784_v58  ;;  %v4464_v11 = vmul.f32 %v5784_v58, %v5784_v58  ;;  %v3823_v18 = vpop.f32.mrb[189].mxu0  ;;  %4393 = vst.msk [vmem:[%s7798_s20 + $0x28] sm:$0xf] %vm4382_vm3, %v4804_v22  ;;  %v4425_v60 = vadd.f32 %v5784_v58, %v4424_v32 }
 0x2cd   : > { %v3533_v6 = vpop.f32.mrb[45].mxu1  ;;  %v4494_v3 = vadd.f32 %v4493_v27, %v4463_v7  ;;  %v5795_v10 = vadd.f32 %v7701_v13, %v5601_v47  ;;  %v5666_v20 = vpop.f32.mrb[190].mxu0  ;;  %v4465_v29 = vmul.f32 %v5778_v39, %v5778_v39  ;;  %v3956_v59 = vrot.slane %v5665_v1, 2 }
 0x2ce   : > { %v5602_v41 = vpop.f32.mrb[46].mxu1  ;;  %4395 = vst.msk [vmem:[%s7798_s20 + $0x30] sm:$0xf] %vm4382_vm3, %v4806_v46  ;;  %4394 = vst.msk [vmem:[%s7798_s20 + $0x2c] sm:$0xf] %vm4382_vm3, %v4805_v19  ;;  %v3954_v56 = vrot.slane %v3823_v18, 2  ;;  %v4426_v42 = vadd.f32 %v5778_v39, %v4425_v60 }
 0x2cf   : > { %v3957_v63 = vrot.slane %v5666_v20, 2  ;;  %v3536_v4 = vpop.f32.mrb[47].mxu1  ;;  %v3826_v37 = vpop.f32.mrb[191].mxu0  ;;  %v4495_v5 = vadd.f32 %v4494_v3, %v4464_v11 }
 0x2d0   : > { %v5801_v23 = vadd.f32 %v7706_v31, %v3536_v4  ;;  %v3955_v49 = vrot.slane %v3826_v37, 2  ;;  %v4009_v13 = vsel %vm1424_vm2, %v3953_v51, %v3954_v56 }
 0x2d1   : > { %v4006_v45 = vsel %vm1424_vm2, %v3956_v59, %v3957_v63  ;;  %v5790_v8 = vadd.f32 %v5789_v17, %v4009_v13  ;;  %v4496_v25 = vadd.f32 %v4495_v5, %v4465_v29 }
 0x2d2   : > { %v5796_v57 = vadd.f32 %v5795_v10, %v4006_v45  ;;  %v4007_v16 = vsel %vm1424_vm2, %v3955_v49, %v3956_v59 }
 0x2d3   : > { %v5802_v44 = vadd.f32 %v5801_v23, %v4007_v16  ;;  %v4807_v52 = vpack.c.bf16 %v5790_v8, %v5790_v8  ;;  %v4427_v14 = vadd.f32 %v5790_v8, %v4426_v42  ;;  %v4466_v0 = vmul.f32 %v5790_v8, %v5790_v8  ;;  %v5669_v34 = vpop.f32.mrb[192].mxu0 }
 0x2d4   : > { %v4809_v31 = vpack.c.bf16 %v5796_v57, %v5796_v57  ;;  %v5605_v15 = vpop.f32.mrb[48].mxu1  ;;  %v3839_v2 = vpop.f32.mrb[193].mxu0  ;;  %v4468_v22 = vmul.f32 %v5796_v57, %v5796_v57  ;;  %v3960_v32 = vrot.slane %v5669_v34, 2 }
 0x2d5   : > { %v4808_v51 = vpack.c.bf16 %v5802_v44, %v5802_v44  ;;  %v4467_v27 = vmul.f32 %v5802_v44, %v5802_v44  ;;  %v3549_v62 = vpop.f32.mrb[49].mxu1  ;;  %4396 = vst.msk [vmem:[%s7798_s20 + $0x34] sm:$0xf] %vm4382_vm3, %v4807_v52  ;;  %v4497_v17 = vadd.f32 %v4496_v25, %v4466_v0  ;;  %v4428_v26 = vadd.f32 %v5802_v44, %v4427_v14  ;;  %v5670_v58 = vpop.f32.mrb[194].mxu0 }
 0x2d6   : > { %4398 = vst.msk [vmem:[%s7798_s20 + $0x3c] sm:$0xf] %vm4382_vm3, %v4809_v31  ;;  %v5807_v61 = vadd.f32 %v7713_v38, %v3549_v62  ;;  %v5606_v39 = vpop.f32.mrb[50].mxu1  ;;  %v3958_v7 = vrot.slane %v3839_v2, 2  ;;  %v3842_v46 = vpop.f32.mrb[195].mxu0  ;;  %v3961_v37 = vrot.slane %v5670_v58, 2 }
 0x2d7   : > { %4397 = vst.msk [vmem:[%s7798_s20 + $0x38] sm:$0xf] %vm4382_vm3, %v4808_v51  ;;  %v5813_v47 = vadd.f32 %v7721_v30, %v5606_v39  ;;  %v3552_v1 = vpop.f32.mrb[51].mxu1  ;;  %v4498_v19 = vadd.f32 %v4497_v17, %v4467_v27  ;;  %v3959_v6 = vrot.slane %v3842_v46, 2  ;;  %v4429_v18 = vadd.f32 %v5796_v57, %v4428_v26 }
 0x2d8   : > { %v5819_v11 = vadd.f32 %v7716_v9, %v3552_v1 }
 0x2d9   : > { %v4003_v3 = vsel %vm1424_vm2, %v3959_v6, %v3960_v32  ;;  %v4004_v38 = vsel %vm1424_vm2, %v3958_v7, %v3959_v6  ;;  %v4499_v60 = vadd.f32 %v4498_v19, %v4468_v22 }
 0x2da   : > { %v5808_v10 = vadd.f32 %v5807_v61, %v4004_v38  ;;  %v5820_v41 = vadd.f32 %v5819_v11, %v4003_v3 }
 0x2db   : > { %v5673_v30 = vpop.f32.mrb[196].mxu0 }
 0x2dc   : > { %v5609_v20 = vpop.f32.mrb[52].mxu1  ;;  %v4810_v29 = vpack.c.bf16 %v5808_v10, %v5808_v10  ;;  %v4811_v59 = vpack.c.bf16 %v5820_v41, %v5820_v41  ;;  %v4430_v56 = vadd.f32 %v5808_v10, %v4429_v18  ;;  %v4469_v63 = vmul.f32 %v5808_v10, %v5808_v10  ;;  %v3855_v4 = vpop.f32.mrb[197].mxu0 }
 0x2dd   : > { %v3565_v9 = vpop.f32.mrb[53].mxu1  ;;  %v4470_v5 = vmul.f32 %v5820_v41, %v5820_v41  ;;  %v5825_v42 = vadd.f32 %v7726_v48, %v5609_v20  ;;  %v5674_v13 = vpop.f32.mrb[198].mxu0  ;;  %v3962_v25 = vrot.slane %v3855_v4, 2  ;;  %v3964_v52 = vrot.slane %v5673_v30, 2 }
 0x2de   : > { %v5831_v23 = vadd.f32 %v7731_v40, %v3565_v9  ;;  %v5610_v49 = vpop.f32.mrb[54].mxu1  ;;  %4399 = vst.msk [vmem:[%s7798_s20 + $0x40] sm:$0xf] %vm4382_vm3, %v4810_v29  ;;  %4400 = vst.msk [vmem:[%s7798_s20 + $0x44] sm:$0xf] %vm4382_vm3, %v4811_v59  ;;  %v4431_v45 = vadd.f32 %v5820_v41, %v4430_v56  ;;  %v4500_v8 = vadd.f32 %v4499_v60, %v4469_v63  ;;  %v3858_v44 = vpop.f32.mrb[199].mxu0 }
 0x2df   : > { %v5837_v57 = vadd.f32 %v7736_v54, %v5610_v49  ;;  %v3568_v16 = vpop.f32.mrb[55].mxu1  ;;  %v3965_v14 = vrot.slane %v5674_v13, 2  ;;  %v3963_v0 = vrot.slane %v3858_v44, 2  ;;  %v4001_v48 = vsel %vm1424_vm2, %v3961_v37, %v3962_v25 }
 0x2e0   : > { %v4501_v31 = vadd.f32 %v4500_v8, %v4470_v5  ;;  %v5814_v40 = vadd.f32 %v5813_v47, %v4001_v48 }
 0x2e1   : > { %v3998_v15 = vsel %vm1424_vm2, %v3964_v52, %v3965_v14  ;;  %v4000_v34 = vsel %vm1424_vm2, %v3962_v25, %v3963_v0 }
 0x2e2   : > { %v5826_v51 = vadd.f32 %v5825_v42, %v3998_v15  ;;  %v5832_v27 = vadd.f32 %v5831_v23, %v4000_v34  ;;  %v4812_v54 = vpack.c.bf16 %v5814_v40, %v5814_v40  ;;  %v4432_v62 = vadd.f32 %v5814_v40, %v4431_v45 }
 0x2e3   : > { %v4471_v2 = vmul.f32 %v5814_v40, %v5814_v40  ;;  %v5677_v26 = vpop.f32.mrb[200].mxu0 }
 0x2e4   : > { %v5613_v17 = vpop.f32.mrb[56].mxu1  ;;  %v4814_v61 = vpack.c.bf16 %v5826_v51, %v5826_v51  ;;  %v4813_v39 = vpack.c.bf16 %v5832_v27, %v5832_v27  ;;  %v4472_v58 = vmul.f32 %v5832_v27, %v5832_v27  ;;  %v3871_v32 = vpop.f32.mrb[201].mxu0  ;;  %4401 = vst.msk [vmem:[%s7798_s20 + $0x48] sm:$0xf] %vm4382_vm3, %v4812_v54  ;;  %v4433_v47 = vadd.f32 %v5832_v27, %v4432_v62 }
 0x2e5   : > { %v3581_v22 = vpop.f32.mrb[57].mxu1  ;;  %v4502_v7 = vadd.f32 %v4501_v31, %v4471_v2  ;;  %v5843_v1 = vadd.f32 %v7741_v43, %v5613_v17  ;;  %v5678_v19 = vpop.f32.mrb[202].mxu0  ;;  %v4473_v11 = vmul.f32 %v5826_v51, %v5826_v51  ;;  %v3968_v6 = vrot.slane %v5677_v26, 2 }
 0x2e6   : > { %v5614_v46 = vpop.f32.mrb[58].mxu1  ;;  %4403 = vst.msk [vmem:[%s7798_s20 + $0x50] sm:$0xf] %vm4382_vm3, %v4814_v61  ;;  %4402 = vst.msk [vmem:[%s7798_s20 + $0x4c] sm:$0xf] %vm4382_vm3, %v4813_v39  ;;  %v3966_v18 = vrot.slane %v3871_v32, 2  ;;  %v4434_v41 = vadd.f32 %v5826_v51, %v4433_v47 }
 0x2e7   : > { %v3969_v3 = vrot.slane %v5678_v19, 2  ;;  %v3584_v38 = vpop.f32.mrb[59].mxu1  ;;  %v3874_v60 = vpop.f32.mrb[203].mxu0  ;;  %v4503_v10 = vadd.f32 %v4502_v7, %v4472_v58 }
 0x2e8   : > { %v5849_v20 = vadd.f32 %v7746_v50, %v3584_v38  ;;  %v3967_v30 = vrot.slane %v3874_v60, 2  ;;  %v3997_v43 = vsel %vm1424_vm2, %v3965_v14, %v3966_v18 }
 0x2e9   : > { %v3994_v29 = vsel %vm1424_vm2, %v3968_v6, %v3969_v3  ;;  %v5838_v59 = vadd.f32 %v5837_v57, %v3997_v43  ;;  %v4504_v56 = vadd.f32 %v4503_v10, %v4473_v11 }
 0x2ea   : > { %v5844_v63 = vadd.f32 %v5843_v1, %v3994_v29  ;;  %v3995_v9 = vsel %vm1424_vm2, %v3967_v30, %v3968_v6 }
 0x2eb   : > { %v5850_v4 = vadd.f32 %v5849_v20, %v3995_v9  ;;  %v4815_v37 = vpack.c.bf16 %v5838_v59, %v5838_v59  ;;  %v4435_v5 = vadd.f32 %v5838_v59, %v4434_v41  ;;  %v4474_v42 = vmul.f32 %v5838_v59, %v5838_v59  ;;  %v5681_v49 = vpop.f32.mrb[204].mxu0 }
 0x2ec   : > { %v4817_v50 = vpack.c.bf16 %v5844_v63, %v5844_v63  ;;  %v5617_v23 = vpop.f32.mrb[60].mxu1  ;;  %v3887_v25 = vpop.f32.mrb[205].mxu0  ;;  %v4476_v0 = vmul.f32 %v5844_v63, %v5844_v63  ;;  %v3972_v31 = vrot.slane %v5681_v49, 2 }
 0x2ed   : > { %v4816_v13 = vpack.c.bf16 %v5850_v4, %v5850_v4  ;;  %v4475_v45 = vmul.f32 %v5850_v4, %v5850_v4  ;;  %v3597_v8 = vpop.f32.mrb[61].mxu1  ;;  %4404 = vst.msk [vmem:[%s7798_s20 + $0x54] sm:$0xf] %vm4382_vm3, %v4815_v37  ;;  %v4505_v57 = vadd.f32 %v4504_v56, %v4474_v42  ;;  %v4436_v16 = vadd.f32 %v5850_v4, %v4435_v5  ;;  %v5682_v14 = vpop.f32.mrb[206].mxu0 }
 0x2ee   : > { %4406 = vst.msk [vmem:[%s7798_s20 + $0x5c] sm:$0xf] %vm4382_vm3, %v4817_v50  ;;  %v5855_v44 = vadd.f32 %v7753_v35, %v3597_v8  ;;  %v5618_v52 = vpop.f32.mrb[62].mxu1  ;;  %v3970_v48 = vrot.slane %v3887_v25, 2  ;;  %v3890_v34 = vpop.f32.mrb[207].mxu0  ;;  %v3973_v1 = vrot.slane %v5682_v14, 2 }
 0x2ef   : > { %4405 = vst.msk [vmem:[%s7798_s20 + $0x58] sm:$0xf] %vm4382_vm3, %v4816_v13  ;;  %v5861_v40 = vadd.f32 %v7761_v12, %v5618_v52  ;;  %v3600_v15 = vpop.f32.mrb[63].mxu1  ;;  %v4506_v51 = vadd.f32 %v4505_v57, %v4475_v45  ;;  %v3971_v54 = vrot.slane %v3890_v34, 2  ;;  %v4437_v62 = vadd.f32 %v5844_v63, %v4436_v16 }
 0x2f0   : > { %v5867_v27 = vadd.f32 %v7756_v21, %v3600_v15 }
 0x2f1   : > { %v3991_v2 = vsel %vm1424_vm2, %v3971_v54, %v3972_v31  ;;  %v3992_v35 = vsel %vm1424_vm2, %v3970_v48, %v3971_v54  ;;  %v4507_v17 = vadd.f32 %v4506_v51, %v4476_v0 }
 0x2f2   : > { %v5856_v26 = vadd.f32 %v5855_v44, %v3992_v35  ;;  %v5868_v61 = vadd.f32 %v5867_v27, %v3991_v2 }
 0x2f3   : > { %v5685_v12 = vpop.f32.mrb[208].mxu0 }
 0x2f4   : > { %v5621_v39 = vpop.f32.mrb[64].mxu1  ;;  %v4818_v58 = vpack.c.bf16 %v5856_v26, %v5856_v26  ;;  %v4819_v22 = vpack.c.bf16 %v5868_v61, %v5868_v61  ;;  %v4438_v32 = vadd.f32 %v5856_v26, %v4437_v62  ;;  %v4477_v7 = vmul.f32 %v5856_v26, %v5856_v26  ;;  %v3903_v47 = vpop.f32.mrb[209].mxu0 }
 0x2f5   : > { %v3613_v21 = vpop.f32.mrb[65].mxu1  ;;  %v4478_v46 = vmul.f32 %v5868_v61, %v5868_v61  ;;  %v5873_v19 = vadd.f32 %v7766_v53, %v5621_v39  ;;  %v5686_v18 = vpop.f32.mrb[210].mxu0  ;;  %v3974_v60 = vrot.slane %v3903_v47, 2  ;;  %v3976_v30 = vrot.slane %v5685_v12, 2 }
 0x2f6   : > { %v5879_v11 = vadd.f32 %v7771_v36, %v3613_v21  ;;  %v5622_v6 = vpop.f32.mrb[66].mxu1  ;;  %4407 = vst.msk [vmem:[%s7798_s20 + $0x60] sm:$0xf] %vm4382_vm3, %v4818_v58  ;;  %4408 = vst.msk [vmem:[%s7798_s20 + $0x64] sm:$0xf] %vm4382_vm3, %v4819_v22  ;;  %v4439_v3 = vadd.f32 %v5868_v61, %v4438_v32  ;;  %v4508_v38 = vadd.f32 %v4507_v17, %v4477_v7  ;;  %v3906_v20 = vpop.f32.mrb[211].mxu0 }
 0x2f7   : > { %v5885_v10 = vadd.f32 %v7776_v24, %v5622_v6  ;;  %v3616_v41 = vpop.f32.mrb[67].mxu1  ;;  %v3977_v43 = vrot.slane %v5686_v18, 2  ;;  %v3975_v29 = vrot.slane %v3906_v20, 2  ;;  %v3989_v53 = vsel %vm1424_vm2, %v3973_v1, %v3974_v60 }
 0x2f8   : > { %v4509_v59 = vadd.f32 %v4508_v38, %v4478_v46  ;;  %v5862_v36 = vadd.f32 %v5861_v40, %v3989_v53 }
 0x2f9   : > { %v3986_v56 = vsel %vm1424_vm2, %v3976_v30, %v3977_v43  ;;  %v3988_v63 = vsel %vm1424_vm2, %v3974_v60, %v3975_v29 }
 0x2fa   : > { %v5874_v9 = vadd.f32 %v5873_v19, %v3986_v56  ;;  %v5880_v4 = vadd.f32 %v5879_v11, %v3988_v63  ;;  %v4820_v24 = vpack.c.bf16 %v5862_v36, %v5862_v36  ;;  %v4440_v37 = vadd.f32 %v5862_v36, %v4439_v3 }
 0x2fb   : > { %v4479_v5 = vmul.f32 %v5862_v36, %v5862_v36  ;;  %v5689_v50 = vpop.f32.mrb[212].mxu0 }
 0x2fc   : > { %v5625_v42 = vpop.f32.mrb[68].mxu1  ;;  %v4822_v23 = vpack.c.bf16 %v5874_v9, %v5874_v9  ;;  %v4821_v49 = vpack.c.bf16 %v5880_v4, %v5880_v4  ;;  %v4480_v13 = vmul.f32 %v5880_v4, %v5880_v4  ;;  %v3919_v8 = vpop.f32.mrb[213].mxu0  ;;  %4409 = vst.msk [vmem:[%s7798_s20 + $0x68] sm:$0xf] %vm4382_vm3, %v4820_v24  ;;  %v4441_v57 = vadd.f32 %v5880_v4, %v4440_v37 }
 0x2fd   : > { %v3629_v45 = vpop.f32.mrb[69].mxu1  ;;  %v4510_v25 = vadd.f32 %v4509_v59, %v4479_v5  ;;  %v5891_v16 = vadd.f32 %v7781_v33, %v5625_v42  ;;  %v5690_v52 = vpop.f32.mrb[214].mxu0  ;;  %v4481_v14 = vmul.f32 %v5874_v9, %v5874_v9  ;;  %v3980_v0 = vrot.slane %v5689_v50, 2 }
 0x2fe   : > { %v5626_v44 = vpop.f32.mrb[70].mxu1  ;;  %4411 = vst.msk [vmem:[%s7798_s20 + $0x70] sm:$0xf] %vm4382_vm3, %v4822_v23  ;;  %4410 = vst.msk [vmem:[%s7798_s20 + $0x6c] sm:$0xf] %vm4382_vm3, %v4821_v49  ;;  %v3978_v31 = vrot.slane %v3919_v8, 2  ;;  %v4442_v51 = vadd.f32 %v5874_v9, %v4441_v57 }
 0x2ff   : > { %v3981_v48 = vrot.slane %v5690_v52, 2  ;;  %v3632_v40 = vpop.f32.mrb[71].mxu1  ;;  %v3922_v15 = vpop.f32.mrb[215].mxu0  ;;  %v4511_v34 = vadd.f32 %v4510_v25, %v4480_v13 }
 0x300   : > { %v5897_v27 = vadd.f32 %v7786_v28, %v3632_v40  ;;  %v3979_v54 = vrot.slane %v3922_v15, 2  ;;  %v3985_v33 = vsel %vm1424_vm2, %v3977_v43, %v3978_v31 }
 0x301   : > { %v3982_v62 = vsel %vm1424_vm2, %v3980_v0, %v3981_v48  ;;  %v5886_v2 = vadd.f32 %v5885_v10, %v3985_v33  ;;  %v4512_v35 = vadd.f32 %v4511_v34, %v4481_v14 }
 0x302   : > { %v5892_v17 = vadd.f32 %v5891_v16, %v3982_v62  ;;  %v3983_v26 = vsel %vm1424_vm2, %v3979_v54, %v3980_v0 }
 0x303   : > { %v5898_v61 = vadd.f32 %v5897_v27, %v3983_v26  ;;  %v4823_v28 = vpack.c.bf16 %v5886_v2, %v5886_v2  ;;  %v4443_v39 = vadd.f32 %v5886_v2, %v4442_v51  ;;  %v4482_v12 = vmul.f32 %v5886_v2, %v5886_v2 }
 0x304   : > { %v4825_v58 = vpack.c.bf16 %v5892_v17, %v5892_v17  ;;  %v4484_v21 = vmul.f32 %v5892_v17, %v5892_v17 }
 0x305   : > { %v4824_v22 = vpack.c.bf16 %v5898_v61, %v5898_v61  ;;  %v4483_v32 = vmul.f32 %v5898_v61, %v5898_v61  ;;  %4412 = vst.msk [vmem:[%s7798_s20 + $0x74] sm:$0xf] %vm4382_vm3, %v4823_v28  ;;  %v4513_v55 = vadd.f32 %v4512_v35, %v4482_v12  ;;  %v4444_v7 = vadd.f32 %v5898_v61, %v4443_v39 }
 0x306   : > { %4414 = vst.msk [vmem:[%s7798_s20 + $0x7c] sm:$0xf] %vm4382_vm3, %v4825_v58 }
 0x307   : > { %4413 = vst.msk [vmem:[%s7798_s20 + $0x78] sm:$0xf] %vm4382_vm3, %v4824_v22  ;;  %v4445_v47 = vadd.f32 %v5892_v17, %v4444_v7  ;;  %v4514_v1 = vadd.f32 %v4513_v55, %v4483_v32 }
 0x308   : > { %6208 = shalt.err (!%p6205_p7)
}
 0x309   : > { %s6209_s30 = scalar_lea.hbm %s7950_s10, 2048  ;;  %s6213_s8 = scalar_lea.hbm %s8035_s2, 4096 }
 0x30a   : > { %p6210_p9 = scmp.ne.s32.totalorder %s7950_s10, %s6209_s30  ;;  %p6214_p5 = scmp.lt.u32.totalorder %s7950_s10, %s8035_s2 }
 0x30b   : > { %p6215_p11 = scmp.lt.u32.totalorder %s6213_s8, %s6209_s30  ;;  %p6217_p4 = scmp.lt.u32.totalorder %s6209_s30, %s7950_s10 }
 0x30c   : > { %p6211_p2 = pnand %p6210_p9, %p6422_p12 }
 0x30d   : > { %p6216_p1 = por %p6215_p11, %p6214_p5 }
 0x30e   : > { %p6212_p0 = pneg %p6211_p2 }
 0x30f   : > { %p6218_p6 = por %p6217_p4, %p6216_p1 }
 0x311   : > { %p6219_p8 = pnand %p6218_p6, %p6212_p0 }
 0x313   : > { %6222 = shalt.err (!%p6219_p8)
}
 0x314   : > { %s6308_s20 = smov 64   ;;  %s6309_s4 = smov 4   ;;  %v4446_v46 = vrot.slane %v4445_v47, 4  ;;  %v4515_v19 = vadd.f32 %v4514_v1, %v4484_v21 }
 0x315   : > { %6001 = dma.vmem_to_hbm [thread:$0]  (%p6422_p12), %s7952_s25, 2048, %s7950_s10, %s4524_s11, %s6308_s20, %s6308_s20, %s6309_s4  }
 0x316   : > { %v4447_v11 = vadd.f32 %v4446_v46, %v4445_v47  ;;  %v4516_v6 = vrot.slane %v4515_v19, 4  ;;  %s4681_s26 = sshll.u32 %s6470_s6, 1  ;;  %s4790_s5 = sshll.u32 %s6352_s16, 5 }
 0x317   : > { %s214_s27 = scalar_lea.vmem [#allocation10], %s4681_s26  ;;  %s7989_s11 = scalar_lea.hbm %s8036_s3, %s4790_s5 }
 0x318   : > { %v4448_v18 = vrot.slane %v4447_v11, 2  ;;  %v4517_v3 = vadd.f32 %v4516_v6, %v4515_v19  ;;  %s4558_s28 = sshll.u32 %s214_s27, 4  ;;  %s4529_s29 = scalar_lea.sflag [#allocation11], %s6470_s6  ;;  %s7991_s28 = int_to_ptr.vmem [resolvable:$true] %s4558_s28 }
 0x319   : > { %s6223_s23 = scalar_lea.vmem %s7991_s28, 32  ;;  %s6310_s16 = smov [#allocation10]  }
 0x31a   : > { %v4449_v38 = vadd.f32 %v4448_v18, %v4447_v11  ;;  %v4518_v60 = vrot.slane %v4517_v3, 2  ;;  %p6224_p10 = scmp.ne.s32.totalorder %s7991_s28, %s6223_s23  ;;  %s6227_s30 = sshll.u32 %s6310_s16, 4  ;;  %s6228_s30 = int_to_ptr.vmem [resolvable:$false] %s6227_s30 }
 0x31b   : > { %s6229_s22 = scalar_lea.vmem %s6228_s30, 64  ;;  %p6230_p7 = scmp.lt.s32.totalorder %s7991_s28, %s6228_s30 }
 0x31c   : > { %v4450_v10 = vrot.slane %v4449_v38, 1  ;;  %v4519_v41 = vadd.f32 %v4518_v60, %v4517_v3  ;;  %p6225_p13 = pnand %p6224_p10, %p6422_p12  ;;  %p6231_p9 = scmp.lt.s32.totalorder %s6229_s22, %s6223_s23 }
 0x31e   : > { %v4451_v20 = vadd.f32 %v4450_v10, %v4449_v38  ;;  %v4520_v30 = vrot.slane %v4519_v41, 1  ;;  %p6226_p3 = pneg %p6225_p13  ;;  %p6232_p2 = por %p6231_p9, %p6230_p7 }
 0x320   : > { %4452 = vst [vmem:[%s214_s27] sm:$0x1] %v4451_v20  ;;  %v4521_v43 = vadd.f32 %v4520_v30, %v4519_v41  ;;  %p6233_p0 = pnand %p6232_p2, %p6226_p3 }
 0x322   : > { %4522 = vst [vmem:[%s214_s27 + $0x1] sm:$0x1] %v4521_v43 }
 0x323   : > { %6236 = shalt.err (!%p6233_p0)
}
 0x324   : > { %s6237_s6 = scalar_lea.hbm %s7989_s11, 32  ;;  %s6241_s9 = scalar_lea.hbm %s8036_s3, 64 }
 0x325   : > { %p6238_p5 = scmp.ne.s32.totalorder %s7989_s11, %s6237_s6  ;;  %p6242_p4 = scmp.lt.u32.totalorder %s7989_s11, %s8036_s3 }
 0x326   : > { %p6243_p6 = scmp.lt.u32.totalorder %s6241_s9, %s6237_s6  ;;  %p6245_p10 = scmp.lt.u32.totalorder %s6237_s6, %s7989_s11 }
 0x327   : > { %p6239_p11 = pnand %p6238_p5, %p6422_p12 }
 0x328   : > { %p6244_p8 = por %p6243_p6, %p6242_p4 }
 0x329   : > { %p6240_p1 = pneg %p6239_p11 }
 0x32a   : > { %p6246_p13 = por %p6245_p10, %p6244_p8 }
 0x32c   : > { %p6247_p3 = pnand %p6246_p13, %p6240_p1 }
 0x32e   : > { %6250 = shalt.err (!%p6247_p3)
}
 0x32f   : > { %6002 = dma.vmem_to_hbm [thread:$0]  (%p6422_p12), %s7991_s28, 32, %s7989_s11, %s4529_s29  }
 0x330 PF: > { %s4570_s4 = sand.u32 1, %s6285_s12   ;;  %p8127_p7 = scmp.ne.s32.totalorder %s8060_s19, 0 }
 0x331   : > { %p8128_p9 = scmp.ge.s32.totalorder %s6297_s15, 2  ;;  %s4571_s26 = scalar_lea.sflag [#allocation6], %s4570_s4 }
 0x333   : > { %p6014_p2 = pnand %p8128_p9, %p8127_p7 }
 0x335   : > { %6276 = dma.done.wait (!%p6014_p2), %s4571_s26, 2048  }
 0x336   : > { %6278 = vsyncadd (!%p6014_p2), %s4571_s26, 4294965248  ;;  %s4580_s5 = scalar_lea.sflag [#allocation11], %s4570_s4 }
 0x337   : > { %6280 = dma.done.wait (!%p6014_p2), %s4580_s5, 32  }
 0x338   : > { %6282 = vsyncadd (!%p6014_p2), %s4580_s5, 4294967264  ;;  %p21_p12 = scmp.ge.s32.totalorder %s6387_s24, 4   ;;  %s8129_s12 = smov %s6289_s13 }
 0x339   : > { %s8130_s13 = smov %s6293_s14  ;;  %s8131_s14 = smov %s6418_s17 }
 0x33a   : > { %s8132_s15 = smov %s6387_s24  ;;  %23 = sbr.rel (!%p21_p12) target bundleno = 8 (0x8), region = 104 }
 0x341   :  { %4585 = vsyncpa [#allocation5], 1 }
 0x342   :  { %4587 = vsyncpa [#allocation5 + $0x1], 1 }
 0x343   :  { %4588 = vsyncpa [#allocation8], 1 }
 0x344   :  { %4589 = vsyncpa [#allocation6], 1 }
 0x345   :  { %4591 = vsyncpa [#allocation6 + $0x1], 1 }
 0x346   :  { %4592 = vsyncpa [#allocation11], 1 }
 0x347   :  { %4594 = vsyncpa [#allocation11 + $0x1], 1 }

// kernel: resblock_forward.4
= control target key start
LH: loop header
LB: loop body
LE: loop exit
PB: predicated region body
PF: predicated region fallthrough
CT: control target
= control target key end

     0   :  { %11 = vsyncpa [#allocation5], 0  ;;  %s8593_s0 = inlined_call_operand.hbm [shape: bf16[2,16,16,4], index: 0, kind: input, shape index: {}]   ;;  %s8594_s1 = inlined_call_operand.hbm [shape: f32[1,4], index: 1, kind: input, shape index: {}]   ;;  %s8595_s2 = inlined_call_operand.hbm [shape: f32[1,4], index: 2, kind: input, shape index: {}]   ;;  %s8596_s3 = inlined_call_operand.hbm [shape: bf16[3,3,128,128], index: 3, kind: input, shape index: {}]   ;;  %s8597_s4 = inlined_call_operand.hbm [shape: bf16[2,16,16,4], index: 4, kind: output, shape index: {0}]   ;;  %s8598_s5 = inlined_call_operand.hbm [shape: f32[2,2,128], index: 5, kind: output, shape index: {1}]  }
   0x1   :  { %13 = vsyncpa [#allocation5 + $0x1], 0 }
   0x2   :  { %14 = vsyncpa [#allocation8], 0 }
   0x3   :  { %15 = vsyncpa [#allocation11], 0 }
   0x4   :  { %16 = vsyncpa [#allocation6], 0 }
   0x5   :  { %18 = vsyncpa [#allocation6 + $0x1], 0 }
   0x6   :  { %19 = vsyncpa [#allocation14], 0 }
   0x7   :  { %21 = vsyncpa [#allocation14 + $0x1], 0  ;;  %s6746_s18 = smov 0   ;;  %s6748_s19 = smov 0  }
   0x8   :  { %s6750_s20 = smov 0   ;;  %s6752_s21 = smov 0  }
   0x9 LB: > { %s6767_s22 = sadd.s32 4294967295, %s6702_s21   ;;  %s4910_s23 = sadd.s32 4294967294, %s6702_s21   ;;  %s6702_s21 = sphi %s6752_s21, %s8691_s21   ;;  %s6698_s20 = sphi %s6750_s20, %s8690_s20   ;;  %s6694_s19 = sphi %s6748_s19, %s8689_s19   ;;  %s6690_s18 = sphi %s6746_s18, %s8688_s18  }
   0xa   : > { %p47_p0 = scmp.ne.s32.totalorder %s6694_s19, %s6690_s18  ;;  %p8599_p1 = scmp.eq.s32.totalorder %s6767_s22, 0 }
   0xb   : > { %p140_p3 = scmp.eq.s32.totalorder %s4910_s23, 1  ;;  %p4911_p5 = scmp.ge.s32.totalorder %s6702_s21, 1 }
   0xc   : > { %p6776_p4 = por %p8599_p1, %p47_p0  ;;  %p173_p7 = scmp.lt.s32.totalorder %s6702_s21, 3 }
   0xd   : > { %p6781_p6 = por %p140_p3, %p47_p0  ;;  %s6704_s27 = smov [#allocation7]  }
   0xe   : > { %s8618_s24 = scalar_select %p6776_p4, 1, 0 }
   0xf   : > { %s8619_s25 = scalar_select %p6781_p6, 1, 0 }
  0x10   : > { %p6786_p8 = pnand %p4911_p5, %p173_p7  ;;  %s186_s28 = sshll.u32 %s6704_s27, 4  ;;  %s187_s28 = int_to_ptr.vmem [resolvable:$true] %s186_s28 }
  0x11   : > { %s6705_s29 = smov [#allocation9]   ;;  %s6706_s7 = smov [#allocation10]  }
  0x12   : > { %s8620_s26 = scalar_select %p6786_p8, 1, 0 }
  0x13   : > { %p6338_p10 = pneg %p6786_p8  ;;  %s197_s30 = sshll.u32 %s6705_s29, 4  ;;  %s6799_s30 = int_to_ptr.vmem [resolvable:$true] %s197_s30 }
  0x14   : > { %s207_s8 = sshll.u32 %s6706_s7, 4  ;;  %s6482_s11 = scalar_lea.hbm %s8594_s1, 16  ;;  %s6801_s8 = int_to_ptr.vmem [resolvable:$true] %s207_s8 }
  0x15   : > { %p6795_p11 = pnand %p6338_p10, %p8599_p1  ;;  %p6483_p12 = scmp.ne.s32.totalorder %s8594_s1, %s6482_s11 }
  0x16   : > { %p6489_p5 = scmp.lt.u32.totalorder %s6482_s11, %s8594_s1 }
  0x17   : > { %p6811_p13 = pneg %p6795_p11 }
  0x19   : > { %p6485_p0 = pnand %p6811_p13, %p6483_p12 }
  0x1b   : > { %p6486_p3 = pneg %p6485_p0 }
  0x1d   : > { %p6491_p7 = pnand %p6489_p5, %p6486_p3 }
  0x1f   : > { %6494 = shalt.err (!%p6491_p7)
}
  0x20   : > { %s6495_s17 = scalar_lea.vmem %s187_s28, 16  ;;  %s6502_s23 = scalar_lea.vmem %s187_s28, 32 }
  0x21   : > { %p6496_p10 = scmp.ne.s32.totalorder %s187_s28, %s6495_s17  ;;  %p6503_p2 = scmp.lt.s32.totalorder %s187_s28, %s187_s28 }
  0x22   : > { %p6504_p6 = scmp.lt.s32.totalorder %s6502_s23, %s6495_s17 }
  0x23   : > { %p6498_p9 = pnand %p6496_p10, %p6811_p13 }
  0x24   : > { %p6505_p4 = por %p6504_p6, %p6503_p2 }
  0x25   : > { %p6499_p1 = pneg %p6498_p9 }
  0x27   : > { %p6506_p8 = pnand %p6505_p4, %p6499_p1 }
  0x29   : > { %6509 = shalt.err (!%p6506_p8)
}
  0x2a   : > { %6341 = dma.hbm_to_vmem [thread:$0]  (!%p6795_p11), %s8594_s1, 16, %s187_s28, [#allocation8]  }
  0x2b   : > { %s6510_s10 = scalar_lea.hbm %s8595_s2, 16 }
  0x2c   : > { %p6511_p9 = scmp.ne.s32.totalorder %s8595_s2, %s6510_s10  ;;  %p6517_p1 = scmp.lt.u32.totalorder %s6510_s10, %s8595_s2 }
  0x2e   : > { %p6513_p12 = pnand %p6511_p9, %p6811_p13 }
  0x30   : > { %p6514_p2 = pneg %p6513_p12 }
  0x32   : > { %p6519_p4 = pnand %p6517_p1, %p6514_p2 }
  0x34   : > { %6522 = shalt.err (!%p6519_p4)
}
  0x35   : > { %s6523_s28 = scalar_lea.vmem %s6799_s30, 16  ;;  %s6530_s16 = scalar_lea.vmem %s6799_s30, 32 }
  0x36   : > { %p6524_p6 = scmp.ne.s32.totalorder %s6799_s30, %s6523_s28  ;;  %p6531_p3 = scmp.lt.s32.totalorder %s6799_s30, %s6799_s30 }
  0x37   : > { %p6532_p5 = scmp.lt.s32.totalorder %s6530_s16, %s6523_s28 }
  0x38   : > { %p6526_p8 = pnand %p6524_p6, %p6811_p13 }
  0x39   : > { %p6533_p7 = por %p6532_p5, %p6531_p3 }
  0x3a   : > { %p6527_p0 = pneg %p6526_p8 }
  0x3c   : > { %p6534_p10 = pnand %p6533_p7, %p6527_p0 }
  0x3e   : > { %6537 = shalt.err (!%p6534_p10)
}
  0x3f   : > { %6344 = dma.hbm_to_vmem [thread:$0]  (!%p6795_p11), %s8595_s2, 16, %s6799_s30, [#allocation8]  }
  0x40   : > { %s6538_s7 = scalar_lea.hbm %s8596_s3, 9216 }
  0x41   : > { %p6539_p9 = scmp.ne.s32.totalorder %s8596_s3, %s6538_s7  ;;  %p6545_p1 = scmp.lt.u32.totalorder %s6538_s7, %s8596_s3 }
  0x43   : > { %p6541_p12 = pnand %p6539_p9, %p6811_p13 }
  0x45   : > { %p6542_p2 = pneg %p6541_p12 }
  0x47   : > { %p6547_p4 = pnand %p6545_p1, %p6542_p2 }
  0x49   : > { %6550 = shalt.err (!%p6547_p4)
}
  0x4a   : > { %s6551_s30 = scalar_lea.vmem %s6801_s8, 9216  ;;  %p6559_p3 = scmp.lt.s32.totalorder %s6801_s8, %s6801_s8 }
  0x4b   : > { %p6552_p6 = scmp.ne.s32.totalorder %s6801_s8, %s6551_s30  ;;  %p6560_p5 = scmp.lt.s32.totalorder %s6551_s30, %s6551_s30 }
  0x4d   : > { %p6554_p8 = pnand %p6552_p6, %p6811_p13  ;;  %p6561_p7 = por %p6560_p5, %p6559_p3 }
  0x4f   : > { %p6555_p0 = pneg %p6554_p8 }
  0x51   : > { %p6562_p10 = pnand %p6561_p7, %p6555_p0 }
  0x53   : > { %6565 = shalt.err (!%p6562_p10)
}
  0x54   : > { %s6707_s13 = smov 64   ;;  %s6708_s14 = smov 4  }
  0x55   : > { %6347 = dma.hbm_to_vmem [thread:$0]  (!%p6795_p11), %s8596_s3, 9216, %s6801_s8, [#allocation11], %s6707_s13, %s6707_s13, %s6708_s14  }
  0x56   : > { %s6878_s16 = sadd.s32 1, %s6702_s21   ;;  %s34_s23 = sadd.s32 1, %s6698_s20 }
  0x57   : > { %s31_s17 = ssub.s32 %s6702_s21, %s6878_s16  ;;  %p41_p9 = scmp.ne.s32.totalorder %s6698_s20, %s6694_s19 }
  0x58   : > { %p32_p13 = scmp.eq.s32.totalorder %s31_s17, 0  ;;  %p42_p12 = scmp.eq.s32.totalorder %s6702_s21, 0 }
  0x59   : > { %p6362_p2 = scmp.lt.s32.totalorder %s6702_s21, 2  ;;  %p8623_p4 = scmp.eq.s32.totalorder %s6767_s22, 1 }
  0x5a   : > { %s6888_s27 = scalar_select %p32_p13, %s6698_s20, %s34_s23  }
  0x5b   : > { %p43_p1 = por %p42_p12, %p41_p9  ;;  %p6892_p6 = por %p8623_p4, %p41_p9 }
  0x5c   : > { %s221_s29 = sand.u32 1, %s6698_s20   ;;  %s5039_s7 = sshll.u32 %s6702_s21, 11 }
  0x5d   : > { %s4916_s8 = sshll.u32 %s221_s29, 7  ;;  %s6901_s11 = scalar_lea.hbm %s8593_s0, %s5039_s7 }
  0x5e   : > { %s225_s12 = scalar_lea.vmem [#allocation4], %s4916_s8  ;;  %p6903_p11 = pnand %p6362_p2, %p43_p1 }
  0x5f   : > { %s232_s30 = sshll.u32 %s225_s12, 4  ;;  %s6909_s28 = scalar_lea.sflag [#allocation5], %s221_s29  ;;  %s6907_s30 = int_to_ptr.vmem [resolvable:$true] %s232_s30 }
  0x60   : > { %s6566_s17 = scalar_lea.hbm %s6901_s11, 2048  ;;  %p6568_p0 = pneg %p6903_p11 }
  0x61   : > { %p6567_p8 = scmp.ne.s32.totalorder %s6901_s11, %s6566_s17  ;;  %s6571_s8 = scalar_lea.hbm %s8593_s0, 4096 }
  0x62   : > { %p6572_p7 = scmp.lt.u32.totalorder %s6901_s11, %s8593_s0  ;;  %p6573_p10 = scmp.lt.u32.totalorder %s6571_s8, %s6566_s17 }
  0x63   : > { %p6569_p3 = pnand %p6568_p0, %p6567_p8  ;;  %p6575_p9 = scmp.lt.u32.totalorder %s6566_s17, %s6901_s11 }
  0x64   : > { %p6574_p13 = por %p6573_p10, %p6572_p7 }
  0x65   : > { %p6570_p5 = pneg %p6569_p3 }
  0x66   : > { %p6576_p12 = por %p6575_p9, %p6574_p13 }
  0x68   : > { %p6577_p2 = pnand %p6576_p12, %p6570_p5 }
  0x6a   : > { %6580 = shalt.err (!%p6577_p2)
}
  0x6b   : > { %s6581_s29 = scalar_lea.vmem %s6907_s30, 2048  ;;  %s6709_s12 = smov [#allocation4]  }
  0x6c   : > { %p6582_p1 = scmp.ne.s32.totalorder %s6907_s30, %s6581_s29  ;;  %s6586_s23 = sshll.u32 %s6709_s12, 4  ;;  %s6587_s23 = int_to_ptr.vmem [resolvable:$false] %s6586_s23 }
  0x6d   : > { %s6588_s7 = scalar_lea.vmem %s6587_s23, 4096  ;;  %p6589_p3 = scmp.lt.s32.totalorder %s6907_s30, %s6587_s23 }
  0x6e   : > { %p6584_p4 = pnand %p6582_p1, %p6568_p0  ;;  %p6590_p7 = scmp.lt.s32.totalorder %s6588_s7, %s6581_s29 }
  0x70   : > { %p6585_p8 = pneg %p6584_p4  ;;  %p6591_p10 = por %p6590_p7, %p6589_p3 }
  0x72   : > { %p6592_p13 = pnand %p6591_p10, %p6585_p8 }
  0x74   : > { %6595 = shalt.err (!%p6592_p13)
}
  0x75   : > { %6351 = dma.hbm_to_vmem [thread:$0]  (!%p6903_p11), %s6901_s11, 2048, %s6907_s30, %s6909_s28, %s6707_s13, %s6707_s13, %s6708_s14  }
  0x76   : > { %p8626_p0 = scmp.ne.s32.totalorder %s8620_s26, 0 }
  0x78   : > { %244 = sbr.rel (%p8626_p0) target bundleno = 862 (0x35e), region = 36 }
  0x7f   : > { %s6943_s17 = sand.u32 1, %s6694_s19   ;;  %p8627_p5 = scmp.ne.s32.totalorder %s8618_s24, 0 }
  0x80   : > { %s4920_s8 = sshll.u32 %s6943_s17, 7  ;;  %s247_s9 = scalar_lea.sflag [#allocation5], %s6943_s17 }
  0x81   : > { %s6949_s15 = scalar_lea.vmem [#allocation4], %s4920_s8 }
  0x82   : > { %6669 = dma.done.wait (%p8627_p5), %s247_s9, 2048  }
  0x83   : > { %6671 = vsyncadd (%p8627_p5), %s247_s9, 4294965248  ;;  %p8628_p11 = scmp.eq.s32.totalorder %s6767_s22, 0 }
  0x85   : > { %6673 = dma.done.wait (%p8628_p11), [#allocation8], 32   ;;  %p8629_p9 = pmov %p8628_p11 }
  0x87   : > { %6675 = vsyncadd (%p8629_p9), [#allocation8], 4294967264  ;;  %p8630_p12 = pmov %p8629_p9 }
  0x88   : > { %p8631_p2 = pmov %p8629_p9 }
  0x89   : > { %6677 = dma.done.wait (%p8630_p12), [#allocation11], 9216  }
  0x8a   : > { %6679 = vsyncadd (%p8631_p2), [#allocation11], 4294958080  ;;  %v6710_v0 = vmov 0.0   ;;  %v6711_v1 = vmov 0.0|0.0   ;;  %v6407_v2 = vld [vmem:[#allocation10 + $0x40] sm:$0xff]   ;;  %v6408_v3 = vld [vmem:[#allocation10 + $0x48] sm:$0xff]  }
  0x8b   : > { %469 = vst [vmem:[#allocation2] sm:$0xff] %v6710_v0  ;;  %472 = vst [vmem:[#allocation2 + $0x18] sm:$0xff] %v6710_v0  ;;  %5456 = vmatprep.mubr.bf16.mxu0 %v6711_v1  ;;  %5440 = vmatprep.subr.bf16.mxu0 %v6407_v2  ;;  %v6409_v4 = vld [vmem:[#allocation10 + $0x50] sm:$0xff]   ;;  %v6410_v5 = vld [vmem:[#allocation10 + $0x58] sm:$0xff]   ;;  %vm524_vm0 = vcmask 31744   ;;  %vm4603_vm3 = vcmask 27648  }
  0x8c   : > { %473 = vst [vmem:[#allocation2 + $0x20] sm:$0xff] %v6710_v0  ;;  %474 = vst [vmem:[#allocation2 + $0x28] sm:$0xff] %v6710_v0  ;;  %6016 = vmatprep.subr.bf16.mxu1 %v6407_v2  ;;  %5441 = vmatpush3.bf16.msra.mxu0 %v6407_v2  ;;  %v5143_v6 = vld [vmem:[%s6949_s15 + $0x38] sm:$0xff]   ;;  %v7014_v7 = vld [vmem:[#allocation7] ss:$0 sm:$0xff]  ;;  %s8358_s24 = scalar_lea.vmem [#allocation12], %s4920_s8 }
  0x8d   : > { %475 = vst [vmem:[#allocation2 + $0x30] sm:$0xff] %v6710_v0  ;;  %476 = vst [vmem:[#allocation2 + $0x38] sm:$0xff] %v6710_v0  ;;  %6024 = vmatpush3.bf16.msra.mxu1 %v6407_v2  ;;  %5442 = vmatprep.subr.bf16.mxu0 %v6408_v3  ;;  %v5103_v8 = vunpack.c.l.bf16 %v5143_v6  ;;  %v5104_v9 = vunpack.c.h.bf16 %v5143_v6  ;;  %v5074_v10 = vld [vmem:[%s6949_s15] sm:$0xff]   ;;  %v5137_v26 = vld [vmem:[%s6949_s15 + $0x8] sm:$0xff]   ;;  %s5072_s26 = sshll.u32 %s6767_s22, 11  ;;  %s4763_s13 = sshll.u32 %s8358_s24, 4  ;;  %s8512_s13 = int_to_ptr.vmem [resolvable:$true] %s4763_s13 }
  0x8e   : > { %477 = vst [vmem:[#allocation2 + $0x40] sm:$0xff] %v6710_v0  ;;  %478 = vst [vmem:[#allocation2 + $0x48] sm:$0xff] %v6710_v0  ;;  %6017 = vmatprep.subr.bf16.mxu1 %v6408_v3  ;;  %v5144_v11 = vld [vmem:[%s6949_s15 + $0x40] sm:$0xff]   ;;  %v5075_v13 = vunpack.c.l.bf16 %v5074_v10  ;;  %v5076_v15 = vunpack.c.h.bf16 %v5074_v10  ;;  %v5079_v30 = vunpack.c.l.bf16 %v5137_v26  ;;  %v5145_v31 = vld [vmem:[%s6949_s15 + $0x48] sm:$0xff]   ;;  %v5080_v36 = vunpack.c.h.bf16 %v5137_v26  ;;  %s8510_s30 = scalar_lea.hbm %s8597_s4, %s5072_s26  ;;  %s4745_s28 = scalar_lea.sflag [#allocation6], %s6943_s17 }
  0x8f   : > { %479 = vst [vmem:[#allocation2 + $0x50] sm:$0xff] %v6710_v0  ;;  %480 = vst [vmem:[#allocation2 + $0x58] sm:$0xff] %v6710_v0  ;;  %v7018_v12 = vld [vmem:[#allocation9] ss:$0 sm:$0xff]  ;;  %v5107_v14 = vunpack.c.l.bf16 %v5144_v11  ;;  %v5108_v16 = vunpack.c.h.bf16 %v5144_v11  ;;  %v380_v17 = vmul.f32 %v5103_v8, %v7014_v7  ;;  %v381_v18 = vmul.f32 %v5104_v9, %v7014_v7  ;;  %v6411_v19 = vld [vmem:[#allocation10 + $0x60] sm:$0xff]   ;;  %s6596_s10 = scalar_lea.vmem %s8512_s13, 2048 }
  0x90   : > { %481 = vst [vmem:[#allocation2 + $0x60] sm:$0xff] %v6710_v0  ;;  %482 = vst [vmem:[#allocation2 + $0x68] sm:$0xff] %v6710_v0  ;;  %5443 = vmatpush3.bf16.msra.mxu0 %v6408_v3  ;;  %v366_v20 = vmul.f32 %v5075_v13, %v7014_v7  ;;  %v367_v22 = vmul.f32 %v5076_v15, %v7014_v7  ;;  %v6412_v32 = vld [vmem:[#allocation10 + $0x68] sm:$0xff]   ;;  %v368_v40 = vmul.f32 %v5079_v30, %v7014_v7  ;;  %v5139_v55 = vld [vmem:[%s6949_s15 + $0x18] sm:$0xff]   ;;  %p6597_p1 = scmp.ne.s32.totalorder %s8512_s13, %s6596_s10  ;;  %s6712_s29 = smov [#allocation12]  }
  0x91   : > { %483 = vst [vmem:[#allocation2 + $0x70] sm:$0xff] %v6710_v0  ;;  %484 = vst [vmem:[#allocation2 + $0x78] sm:$0xff] %v6710_v0  ;;  %6025 = vmatpush3.bf16.msra.mxu1 %v6408_v3  ;;  %5444 = vmatprep.subr.bf16.mxu0 %v6409_v4  ;;  %v382_v21 = vmul.f32 %v5107_v14, %v7014_v7  ;;  %v419_v23 = vadd.f32 %v7018_v12, %v380_v17  ;;  %v5138_v41 = vld [vmem:[%s6949_s15 + $0x10] sm:$0xff]   ;;  %v5111_v44 = vunpack.c.l.bf16 %v5145_v31  ;;  %v5147_v8 = vld [vmem:[%s6949_s15 + $0x58] sm:$0xff]   ;;  %s6600_s12 = sshll.u32 %s6712_s29, 4  ;;  %s6601_s12 = int_to_ptr.vmem [resolvable:$false] %s6600_s12 }
  0x92   : > { %485 = vst [vmem:[#allocation2 + $0x80] sm:$0xff] %v6710_v0  ;;  %486 = vst [vmem:[#allocation2 + $0x88] sm:$0xff] %v6710_v0  ;;  %6018 = vmatprep.subr.bf16.mxu1 %v6409_v4  ;;  %v420_v24 = vadd.f32 %v7018_v12, %v381_v18  ;;  %v383_v25 = vmul.f32 %v5108_v16, %v7014_v7  ;;  %v405_v27 = vadd.f32 %v7018_v12, %v366_v20  ;;  %v5146_v46 = vld [vmem:[%s6949_s15 + $0x50] sm:$0xff]   ;;  %v6414_v9 = vld [vmem:[#allocation10 + $0x78] sm:$0xff]   ;;  %p6598_p4 = pnand %p6597_p1, %p6892_p6  ;;  %s6602_s23 = scalar_lea.vmem %s6601_s12, 4096 }
  0x93   : > { %487 = vst [vmem:[#allocation2 + $0x90] sm:$0xff] %v6710_v0  ;;  %488 = vst [vmem:[#allocation2 + $0x98] sm:$0xff] %v6710_v0  ;;  %v421_v28 = vadd.f32 %v7018_v12, %v382_v21  ;;  %v406_v29 = vadd.f32 %v7018_v12, %v367_v22  ;;  %v451_v33 = vmax.f32 %v419_v23, 0.0  ;;  %v369_v43 = vmul.f32 %v5080_v36, %v7014_v7  ;;  %v6413_v56 = vld [vmem:[#allocation10 + $0x70] sm:$0xff]   ;;  %v7063_v15 = vld [vmem:[%s6949_s15 + $0x20] sm:$0xff]   ;;  %p6603_p3 = scmp.lt.s32.totalorder %s8512_s13, %s6601_s12  ;;  %p6604_p7 = scmp.lt.s32.totalorder %s6602_s23, %s6596_s10 }
  0x94   : > { %489 = vst [vmem:[#allocation2 + $0xa0] sm:$0xff] %v6710_v0  ;;  %490 = vst [vmem:[#allocation2 + $0xa8] sm:$0xff] %v6710_v0  ;;  %5445 = vmatpush3.bf16.msra.mxu0 %v6409_v4  ;;  %v452_v34 = vmax.f32 %v420_v24, 0.0  ;;  %v422_v35 = vadd.f32 %v7018_v12, %v383_v25  ;;  %v437_v37 = vmax.f32 %v405_v27, 0.0  ;;  %v5112_v45 = vunpack.c.h.bf16 %v5145_v31  ;;  %v7074_v30 = vld [vmem:[#allocation10 + $0x80] sm:$0xff]   ;;  %p6599_p8 = pneg %p6598_p4 }
  0x95   : > { %491 = vst [vmem:[#allocation2 + $0xb0] sm:$0xff] %v6710_v0  ;;  %492 = vst [vmem:[#allocation2 + $0xb8] sm:$0xff] %v6710_v0  ;;  %6026 = vmatpush3.bf16.msra.mxu1 %v6409_v4  ;;  %5446 = vmatprep.subr.bf16.mxu0 %v6410_v5  ;;  %v453_v38 = vmax.f32 %v421_v28, 0.0  ;;  %v438_v39 = vmax.f32 %v406_v29, 0.0  ;;  %v407_v47 = vadd.f32 %v7018_v12, %v368_v40  ;;  %v5083_v48 = vunpack.c.l.bf16 %v5138_v41  ;;  %v5148_v29 = vld [vmem:[%s6949_s15 + $0x60] sm:$0xff]   ;;  %p6605_p10 = por %p6604_p7, %p6603_p3 }
  0x96   : > { %493 = vst [vmem:[#allocation2 + $0xc0] sm:$0xff] %v6710_v0  ;;  %494 = vst [vmem:[#allocation2 + $0xc8] sm:$0xff] %v6710_v0  ;;  %6019 = vmatprep.subr.bf16.mxu1 %v6410_v5  ;;  %v454_v42 = vmax.f32 %v422_v35, 0.0  ;;  %v5115_v49 = vunpack.c.l.bf16 %v5146_v46  ;;  %v5084_v50 = vunpack.c.h.bf16 %v5138_v41  ;;  %v408_v51 = vadd.f32 %v7018_v12, %v369_v43  ;;  %v7076_v31 = vld [vmem:[#allocation10] sm:$0xff]  }
  0x97   : > { %495 = vst [vmem:[#allocation2 + $0xd0] sm:$0xff] %v6710_v0  ;;  %496 = vst [vmem:[#allocation2 + $0xd8] sm:$0xff] %v6710_v0  ;;  %v384_v52 = vmul.f32 %v5111_v44, %v7014_v7  ;;  %v385_v53 = vmul.f32 %v5112_v45, %v7014_v7  ;;  %v5116_v54 = vunpack.c.h.bf16 %v5146_v46  ;;  %v439_v57 = vmax.f32 %v407_v47, 0.0  ;;  %p6606_p13 = pnand %p6605_p10, %p6599_p8 }
  0x98   : > { %497 = vst [vmem:[#allocation2 + $0xe0] sm:$0xff] %v6710_v0  ;;  %498 = vst [vmem:[#allocation2 + $0xe8] sm:$0xff] %v6710_v0  ;;  %5447 = vmatpush3.bf16.msra.mxu0 %v6410_v5  ;;  %v370_v58 = vmul.f32 %v5083_v48, %v7014_v7  ;;  %v386_v59 = vmul.f32 %v5115_v49, %v7014_v7  ;;  %v371_v60 = vmul.f32 %v5084_v50, %v7014_v7 }
  0x99   : > { %499 = vst [vmem:[#allocation2 + $0xf0] sm:$0xff] %v6710_v0  ;;  %500 = vst [vmem:[#allocation2 + $0xf8] sm:$0xff] %v6710_v0  ;;  %6027 = vmatpush3.bf16.msra.mxu1 %v6410_v5  ;;  %5448 = vmatprep.subr.bf16.mxu0 %v6411_v19  ;;  %v440_v61 = vmax.f32 %v408_v51, 0.0  ;;  %v423_v62 = vadd.f32 %v7018_v12, %v384_v52  ;;  %v424_v63 = vadd.f32 %v7018_v12, %v385_v53 }
  0x9a   : > { %501 = vst [vmem:[#allocation2 + $0x100] sm:$0xff] %v6710_v0  ;;  %502 = vst [vmem:[#allocation2 + $0x108] sm:$0xff] %v6710_v0  ;;  %6020 = vmatprep.subr.bf16.mxu1 %v6411_v19  ;;  %v387_v2 = vmul.f32 %v5116_v54, %v7014_v7  ;;  %v409_v3 = vadd.f32 %v7018_v12, %v370_v58  ;;  %v425_v4 = vadd.f32 %v7018_v12, %v386_v59  ;;  %v6417_v54 = vld [vmem:[#allocation10 + $0x88] sm:$0xff]  }
  0x9b   : > { %503 = vst [vmem:[#allocation2 + $0x110] sm:$0xff] %v6710_v0  ;;  %504 = vst [vmem:[#allocation2 + $0x118] sm:$0xff] %v6710_v0  ;;  %v410_v5 = vadd.f32 %v7018_v12, %v371_v60  ;;  %v5087_v6 = vunpack.c.l.bf16 %v5139_v55  ;;  %v455_v10 = vmax.f32 %v423_v62, 0.0  ;;  %v456_v11 = vmax.f32 %v424_v63, 0.0 }
  0x9c   : > { %505 = vst [vmem:[#allocation2 + $0x120] sm:$0xff] %v6710_v0  ;;  %506 = vst [vmem:[#allocation2 + $0x128] sm:$0xff] %v6710_v0  ;;  %5449 = vmatpush3.bf16.msra.mxu0 %v6411_v19  ;;  %v426_v13 = vadd.f32 %v7018_v12, %v387_v2  ;;  %v5088_v14 = vunpack.c.h.bf16 %v5139_v55  ;;  %v457_v20 = vmax.f32 %v425_v4, 0.0  ;;  %v5119_v28 = vunpack.c.l.bf16 %v5147_v8 }
  0x9d   : > { %507 = vst [vmem:[#allocation2 + $0x130] sm:$0xff] %v6710_v0  ;;  %508 = vst [vmem:[#allocation2 + $0x138] sm:$0xff] %v6710_v0  ;;  %6028 = vmatpush3.bf16.msra.mxu1 %v6411_v19  ;;  %5450 = vmatprep.subr.bf16.mxu0 %v6412_v32  ;;  %v441_v19 = vmax.f32 %v409_v3, 0.0  ;;  %v442_v21 = vmax.f32 %v410_v5, 0.0  ;;  %v372_v22 = vmul.f32 %v5087_v6, %v7014_v7  ;;  %v5123_v43 = vunpack.c.l.bf16 %v5148_v29 }
  0x9e   : > { %509 = vst [vmem:[#allocation2 + $0x140] sm:$0xff] %v6710_v0  ;;  %510 = vst [vmem:[#allocation2 + $0x148] sm:$0xff] %v6710_v0  ;;  %6021 = vmatprep.subr.bf16.mxu1 %v6412_v32  ;;  %v458_v26 = vmax.f32 %v426_v13, 0.0  ;;  %v373_v27 = vmul.f32 %v5088_v14, %v7014_v7  ;;  %v5092_v46 = vunpack.c.h.bf16 %v7063_v15  ;;  %v5124_v47 = vunpack.c.h.bf16 %v5148_v29  ;;  %v5149_v14 = vld [vmem:[%s6949_s15 + $0x68] sm:$0xff]  }
  0x9f   : > { %511 = vst [vmem:[#allocation2 + $0x150] sm:$0xff] %v6710_v0  ;;  %512 = vst [vmem:[#allocation2 + $0x158] sm:$0xff] %v6710_v0  ;;  %v390_v52 = vmul.f32 %v5123_v43, %v7014_v7 }
  0xa0   : > { %513 = vst [vmem:[#allocation2 + $0x160] sm:$0xff] %v6710_v0  ;;  %514 = vst [vmem:[#allocation2 + $0x168] sm:$0xff] %v6710_v0  ;;  %5451 = vmatpush3.bf16.msra.mxu0 %v6412_v32  ;;  %v375_v59 = vmul.f32 %v5092_v46, %v7014_v7  ;;  %v391_v5 = vmul.f32 %v5124_v47, %v7014_v7 }
  0xa1   : > { %515 = vst [vmem:[#allocation2 + $0x170] sm:$0xff] %v6710_v0  ;;  %516 = vst [vmem:[#allocation2 + $0x178] sm:$0xff] %v6710_v0  ;;  %6029 = vmatpush3.bf16.msra.mxu1 %v6412_v32  ;;  %5452 = vmatprep.subr.bf16.mxu0 %v6413_v56  ;;  %v429_v4 = vadd.f32 %v7018_v12, %v390_v52 }
  0xa2   : > { %517 = vst [vmem:[#allocation2 + $0x180] sm:$0xff] %v6710_v0  ;;  %518 = vst [vmem:[#allocation2 + $0x188] sm:$0xff] %v6710_v0  ;;  %6022 = vmatprep.subr.bf16.mxu1 %v6413_v56 }
  0xa3   : > { %519 = vst [vmem:[#allocation2 + $0x190] sm:$0xff] %v6710_v0  ;;  %539 = vst.msk [vmem:[#allocation2 + $0xc1] sm:$0xff] %vm524_vm0, %v451_v33  ;;  %v411_v33 = vadd.f32 %v7018_v12, %v372_v22 }
  0xa4   : > { %540 = vst.msk [vmem:[#allocation2 + $0xc9] sm:$0xff] %vm524_vm0, %v452_v34  ;;  %525 = vst.msk [vmem:[#allocation2 + $0x19] sm:$0xff] %vm524_vm0, %v437_v37  ;;  %v5120_v34 = vunpack.c.h.bf16 %v5147_v8  ;;  %5453 = vmatpush3.bf16.msra.mxu0 %v6413_v56  ;;  %v412_v37 = vadd.f32 %v7018_v12, %v373_v27  ;;  %v6418_v8 = vld [vmem:[#allocation10 + $0x8] sm:$0xff]  }
  0xa5   : > { %541 = vst.msk [vmem:[#allocation2 + $0xd9] sm:$0xff] %vm524_vm0, %v453_v38  ;;  %526 = vst.msk [vmem:[#allocation2 + $0x21] sm:$0xff] %vm524_vm0, %v438_v39  ;;  %6030 = vmatpush3.bf16.msra.mxu1 %v6413_v56  ;;  %v5091_v38 = vunpack.c.l.bf16 %v7063_v15  ;;  %v7094_v39 = vld [vmem:[%s6949_s15 + $0x28] sm:$0xff]   ;;  %5454 = vmatprep.subr.bf16.mxu0 %v6414_v9  ;;  %v443_v41 = vmax.f32 %v411_v33, 0.0  ;;  %v5127_v33 = vunpack.c.l.bf16 %v5149_v14 }
  0xa6   : > { %542 = vst.msk [vmem:[#allocation2 + $0xe1] sm:$0xff] %vm524_vm0, %v454_v42  ;;  %527 = vst.msk [vmem:[#allocation2 + $0x31] sm:$0xff] %vm524_vm0, %v439_v57  ;;  %6023 = vmatprep.subr.bf16.mxu1 %v6414_v9  ;;  %v388_v42 = vmul.f32 %v5119_v28, %v7014_v7  ;;  %v444_v44 = vmax.f32 %v412_v37, 0.0  ;;  %v5095_v53 = vunpack.c.l.bf16 %v7094_v39  ;;  %v5096_v60 = vunpack.c.h.bf16 %v7094_v39 }
  0xa7   : > { %528 = vst.msk [vmem:[#allocation2 + $0x39] sm:$0xff] %vm524_vm0, %v440_v61  ;;  %543 = vst.msk [vmem:[#allocation2 + $0xf1] sm:$0xff] %vm524_vm0, %v455_v10  ;;  %v374_v45 = vmul.f32 %v5091_v38, %v7014_v7 }
  0xa8   : > { %544 = vst.msk [vmem:[#allocation2 + $0xf9] sm:$0xff] %vm524_vm0, %v456_v11  ;;  %529 = vst.msk [vmem:[#allocation2 + $0x49] sm:$0xff] %vm524_vm0, %v441_v19  ;;  %v427_v50 = vadd.f32 %v7018_v12, %v388_v42  ;;  %5455 = vmatpush3.bf16.msra.mxu0 %v6414_v9  ;;  %v414_v11 = vadd.f32 %v7018_v12, %v375_v59  ;;  %v376_v13 = vmul.f32 %v5095_v53, %v7014_v7 }
  0xa9   : > { %545 = vst.msk [vmem:[#allocation2 + $0x109] sm:$0xff] %vm524_vm0, %v457_v20  ;;  %530 = vst.msk [vmem:[#allocation2 + $0x51] sm:$0xff] %vm524_vm0, %v442_v21  ;;  %6031 = vmatpush3.bf16.msra.mxu1 %v6414_v9  ;;  %v413_v58 = vadd.f32 %v7018_v12, %v374_v45  ;;  %5568 = vmatprep.subr.bf16.mxu0 %v7074_v30  ;;  %v430_v19 = vadd.f32 %v7018_v12, %v391_v5  ;;  %v5142_v20 = vld [vmem:[%s6949_s15 + $0x30] sm:$0xff]  }
  0xaa   : > { %v581_v16 = vld [vmem:[#allocation2 + $0xc0] sm:$0xff]  ;;  %546 = vst.msk [vmem:[#allocation2 + $0x111] sm:$0xff] %vm524_vm0, %v458_v26  ;;  %531 = vst.msk [vmem:[#allocation2 + $0x61] sm:$0xff] %vm524_vm0, %v443_v41  ;;  %5504 = vmatprep.subr.bf16.mxu1 %v7076_v31  ;;  %v459_v2 = vmax.f32 %v427_v50, 0.0  ;;  %v446_v27 = vmax.f32 %v414_v11, 0.0  ;;  %v377_v28 = vmul.f32 %v5096_v60, %v7014_v7  ;;  %v5099_v38 = vunpack.c.l.bf16 %v5142_v20  ;;  %v6422_v60 = vld [vmem:[#allocation10 + $0x18] sm:$0xff]  }
  0xab   : > { %v582_v17 = vld [vmem:[#allocation2 + $0xc8] sm:$0xff]  ;;  %v583_v18 = vld [vmem:[#allocation2 + $0xd0] sm:$0xff]  ;;  %v7068_v24 = vld [vmem:[#allocation2 + $0x18] sm:$0xff]  ;;  %532 = vst.msk [vmem:[#allocation2 + $0x69] sm:$0xff] %vm524_vm0, %v444_v44  ;;  %v445_v10 = vmax.f32 %v413_v58, 0.0  ;;  %v5100_v41 = vunpack.c.h.bf16 %v5142_v20 }
  0xac   : > { %v7066_v23 = vpack.c.bf16 %v582_v17, %v581_v16  ;;  %v584_v25 = vld [vmem:[#allocation2 + $0xd8] sm:$0xff]  ;;  %v7078_v32 = vld [vmem:[#allocation2 + $0x20] sm:$0xff]  ;;  %v7086_v35 = vpack.c.bf16 %v7068_v24, %v6710_v0  ;;  %v7096_v40 = vld [vmem:[#allocation2 + $0x28] sm:$0xff]  ;;  %v389_v0 = vmul.f32 %v5120_v34, %v7014_v7  ;;  %547 = vst.msk [vmem:[#allocation2 + $0x121] sm:$0xff] %vm524_vm0, %v459_v2  ;;  %v5128_v34 = vunpack.c.h.bf16 %v5149_v14 }
  0xad   : > { %v7088_v36 = vpack.c.bf16 %v584_v25, %v583_v18  ;;  %v7103_v48 = vld [vmem:[#allocation2 + $0xe0] sm:$0xff]  ;;  %v7105_v49 = vld [vmem:[#allocation2 + $0xe8] sm:$0xff]  ;;  %v7114_v55 = vpack.c.bf16 %v7096_v40, %v7078_v32  ;;  %v7116_v56 = vld [vmem:[#allocation2 + $0x30] sm:$0xff]  ;;  %v461_v18 = vmax.f32 %v429_v4, 0.0  ;;  %533 = vst.msk [vmem:[#allocation2 + $0x79] sm:$0xff] %vm524_vm0, %v445_v10  ;;  %v416_v37 = vadd.f32 %v7018_v12, %v377_v28 }
  0xae   : > { %5480 = vmatprep.mubr.bf16.mxu1 %v7066_v23  ;;  %v428_v51 = vadd.f32 %v7018_v12, %v389_v0  ;;  %v7118_v57 = vld [vmem:[#allocation2 + $0x38] sm:$0xff]  ;;  %v7126_v61 = vld [vmem:[#allocation2 + $0xf0] sm:$0xff]  ;;  %v7130_v63 = vld [vmem:[#allocation2 + $0x40] sm:$0xff]  ;;  %v7136_v6 = vpack.c.bf16 %v7105_v49, %v7103_v48  ;;  %5457 = vmatmul.mubr.bf16.vlgmr.msra.gmra.mrb[0].mxu0 %v7086_v35  ;;  %534 = vst.msk [vmem:[#allocation2 + $0x81] sm:$0xff] %vm524_vm0, %v446_v27 }
  0xaf   : > { %v7128_v62 = vld [vmem:[#allocation2 + $0xf8] sm:$0xff]  ;;  %v7138_v9 = vld [vmem:[#allocation2 + $0x48] sm:$0xff]  ;;  %5481 = vmatmul.mubr.bf16.vlgmr.msra.gmra.mrb[0].mxu1 %v7088_v36  ;;  %v7147_v15 = vpack.c.bf16 %v7118_v57, %v7116_v56  ;;  %v5150_v21 = vld [vmem:[%s6949_s15 + $0x70] sm:$0xff]   ;;  %5569 = vmatpush3.bf16.msra.mxu0 %v7074_v30  ;;  %549 = vst.msk [vmem:[#allocation2 + $0x139] sm:$0xff] %vm524_vm0, %v461_v18  ;;  %v462_v30 = vmax.f32 %v430_v19, 0.0  ;;  %v392_v0 = vmul.f32 %v5127_v33, %v7014_v7  ;;  %v448_v46 = vmax.f32 %v416_v37, 0.0 }
  0xb0   : > { %v460_v3 = vmax.f32 %v428_v51, 0.0  ;;  %v7149_v16 = vld [vmem:[#allocation10 + $0x90] sm:$0xff]   ;;  %5505 = vmatpush3.bf16.msra.mxu1 %v7076_v31  ;;  %v7162_v22 = vpack.c.bf16 %v7128_v62, %v7126_v61  ;;  %v7166_v25 = vpack.c.bf16 %v7138_v9, %v7130_v63  ;;  %5570 = vmatprep.subr.bf16.mxu0 %v6417_v54  ;;  %v415_v31 = vadd.f32 %v7018_v12, %v376_v13  ;;  %v6421_v51 = vld [vmem:[#allocation10 + $0x98] sm:$0xff]   ;;  %v7197_v59 = vld [vmem:[#allocation2 + $0x58] sm:$0xff] }
  0xb1   : > { %v7151_v17 = vld [vmem:[#allocation10 + $0x10] sm:$0xff]   ;;  %5460 = vmatprep.mubr.bf16.mxu0 %v7114_v55  ;;  %5484 = vmatprep.mubr.bf16.mxu1 %v7136_v6  ;;  %v5131_v39 = vunpack.c.l.bf16 %v5150_v21  ;;  %550 = vst.msk [vmem:[#allocation2 + $0x141] sm:$0xff] %vm524_vm0, %v462_v30  ;;  %v393_v43 = vmul.f32 %v5128_v34, %v7014_v7  ;;  %v5132_v44 = vunpack.c.h.bf16 %v5150_v21  ;;  %v378_v47 = vmul.f32 %v5099_v38, %v7014_v7  ;;  %v7195_v58 = vld [vmem:[#allocation2 + $0x50] sm:$0xff] }
  0xb2   : > { %548 = vst.msk [vmem:[#allocation2 + $0x129] sm:$0xff] %vm524_vm0, %v460_v3  ;;  %v7168_v26 = vld [vmem:[#allocation2 + $0x100] sm:$0xff]  ;;  %v7173_v29 = vld [vmem:[#allocation2 + $0x108] sm:$0xff]  ;;  %5506 = vmatprep.subr.bf16.mxu1 %v6418_v8  ;;  %v447_v42 = vmax.f32 %v415_v31, 0.0  ;;  %v431_v52 = vadd.f32 %v7018_v12, %v392_v0  ;;  %536 = vst.msk [vmem:[#allocation2 + $0x99] sm:$0xff] %vm524_vm0, %v448_v46  ;;  %v7237_v33 = vpack.c.bf16 %v7197_v59, %v7195_v58 }
  0xb3   : > { %5571 = vmatpush3.bf16.msra.mxu0 %v6417_v54  ;;  %v7185_v45 = vpack.c.bf16 %v7173_v29, %v7168_v26  ;;  %v394_v50 = vmul.f32 %v5131_v39, %v7014_v7  ;;  %v432_v53 = vadd.f32 %v7018_v12, %v393_v43  ;;  %v379_v54 = vmul.f32 %v5100_v41, %v7014_v7  ;;  %v7205_v5 = vld [vmem:[#allocation2 + $0x110] sm:$0xff]  ;;  %v7212_v19 = vld [vmem:[#allocation2 + $0x60] sm:$0xff] }
  0xb4   : > { %5507 = vmatpush3.bf16.msra.mxu1 %v6418_v8  ;;  %5572 = vmatprep.subr.bf16.mxu0 %v7149_v16  ;;  %535 = vst.msk [vmem:[#allocation2 + $0x91] sm:$0xff] %vm524_vm0, %v447_v42  ;;  %v417_v2 = vadd.f32 %v7018_v12, %v378_v47  ;;  %v395_v4 = vmul.f32 %v5132_v44, %v7014_v7  ;;  %v7207_v8 = vld [vmem:[#allocation2 + $0x118] sm:$0xff]  ;;  %v463_v13 = vmax.f32 %v431_v52, 0.0  ;;  %v7214_v7 = vld [vmem:[#allocation2 + $0x68] sm:$0xff]  ;;  %v7219_v28 = vld [vmem:[#allocation2 + $0x120] sm:$0xff] }
  0xb5   : > { %5508 = vmatprep.subr.bf16.mxu1 %v7151_v17  ;;  %v433_v3 = vadd.f32 %v7018_v12, %v394_v50  ;;  %v6423_v10 = vld [vmem:[#allocation10 + $0xa0] sm:$0xff]   ;;  %v464_v14 = vmax.f32 %v432_v53, 0.0  ;;  %v418_v18 = vadd.f32 %v7018_v12, %v379_v54  ;;  %v7241_v34 = vpack.c.bf16 %v7207_v8, %v7205_v5  ;;  %v573_v42 = vld [vmem:[#allocation2 + $0x80] sm:$0xff]  ;;  %v574_v0 = vld [vmem:[#allocation2 + $0x88] sm:$0xff] }
  0xb6   : > { %5461 = vmatmul.mubr.bf16.gmra.mrb[4].mxu0 %v7147_v15  ;;  %v6424_v11 = vld [vmem:[#allocation10 + $0x20] sm:$0xff]   ;;  %v449_v20 = vmax.f32 %v417_v2, 0.0  ;;  %v434_v27 = vadd.f32 %v7018_v12, %v395_v4  ;;  %551 = vst.msk [vmem:[#allocation2 + $0x151] sm:$0xff] %vm524_vm0, %v463_v13  ;;  %v7231_v12 = vpack.c.bf16 %v7116_v56, %v7096_v40  ;;  %v6425_v40 = vld [vmem:[#allocation10 + $0xa8] sm:$0xff]   ;;  %v7263_v43 = vpack.c.bf16 %v7130_v63, %v7118_v57  ;;  %v6427_v50 = vld [vmem:[#allocation10 + $0xb0] sm:$0xff]  }
  0xb7   : > { %5485 = vmatmul.mubr.bf16.gmra.mrb[4].mxu1 %v7162_v22  ;;  %5573 = vmatpush3.bf16.msra.mxu0 %v7149_v16  ;;  %v465_v21 = vmax.f32 %v433_v3, 0.0  ;;  %552 = vst.msk [vmem:[#allocation2 + $0x159] sm:$0xff] %vm524_vm0, %v464_v14  ;;  %v450_v16 = vmax.f32 %v418_v18, 0.0  ;;  %v6426_v56 = vld [vmem:[#allocation10 + $0x28] sm:$0xff]   ;;  %v571_v37 = vld [vmem:[#allocation2 + $0x70] sm:$0xff]  ;;  %v7271_v47 = vpack.c.bf16 %v7195_v58, %v7138_v9  ;;  %v7279_v63 = vpack.c.bf16 %v574_v0, %v573_v42 }
  0xb8   : > { %5509 = vmatpush3.bf16.msra.mxu1 %v7151_v17  ;;  %5464 = vmatprep.mubr.bf16.mxu0 %v7166_v25  ;;  %v7227_v17 = vpack.c.bf16 %v7078_v32, %v7068_v24  ;;  %537 = vst.msk [vmem:[#allocation2 + $0xa9] sm:$0xff] %vm524_vm0, %v449_v20  ;;  %v466_v31 = vmax.f32 %v434_v27, 0.0  ;;  %v7246_v24 = vpack.c.bf16 %v7214_v7, %v7212_v19  ;;  %v572_v39 = vld [vmem:[#allocation2 + $0x78] sm:$0xff]  ;;  %v7265_v44 = vld [vmem:[#allocation2 + $0x140] sm:$0xff]  ;;  %v7267_v46 = vld [vmem:[#allocation2 + $0x148] sm:$0xff] }
  0xb9   : > { %5488 = vmatprep.mubr.bf16.mxu1 %v7185_v45  ;;  %v7221_v30 = vld [vmem:[#allocation2 + $0x128] sm:$0xff]  ;;  %5574 = vmatprep.subr.bf16.mxu0 %v6421_v51  ;;  %553 = vst.msk [vmem:[#allocation2 + $0x169] sm:$0xff] %vm524_vm0, %v465_v21  ;;  %538 = vst.msk [vmem:[#allocation2 + $0xb1] sm:$0xff] %vm524_vm0, %v450_v16  ;;  %v7253_v38 = vld [vmem:[#allocation2 + $0x130] sm:$0xff]  ;;  %v7273_v52 = vpack.c.bf16 %v572_v39, %v571_v37  ;;  %v7283_v53 = vpack.c.bf16 %v7267_v46, %v7265_v44 }
  0xba   : > { %5510 = vmatprep.subr.bf16.mxu1 %v6422_v60  ;;  %v7250_v32 = vpack.c.bf16 %v7221_v30, %v7219_v28  ;;  %554 = vst.msk [vmem:[#allocation2 + $0x171] sm:$0xff] %vm524_vm0, %v466_v31  ;;  %v7259_v41 = vld [vmem:[#allocation2 + $0x138] sm:$0xff]  ;;  %v6429_v54 = vld [vmem:[#allocation10 + $0xb8] sm:$0xff]   ;;  %v577_v4 = vld [vmem:[#allocation2 + $0xa0] sm:$0xff]  ;;  %v7300_v18 = vpack.c.bf16 %v571_v37, %v7214_v7  ;;  %v7324_v37 = vpack.c.bf16 %v573_v42, %v572_v39 }
  0xbb   : > { %5575 = vmatpush3.bf16.msra.mxu0 %v6421_v51  ;;  %v6428_v51 = vld [vmem:[#allocation10 + $0x30] sm:$0xff]   ;;  %v7277_v57 = vpack.c.bf16 %v7259_v41, %v7253_v38  ;;  %v6430_v9 = vld [vmem:[#allocation10 + $0x38] sm:$0xff]   ;;  %v6431_v14 = vld [vmem:[#allocation10 + $0x140] sm:$0xff]  }
  0xbc   : > { %5511 = vmatpush3.bf16.msra.mxu1 %v6422_v60  ;;  %5576 = vmatprep.subr.bf16.mxu0 %v6423_v10  ;;  %v575_v58 = vld [vmem:[#allocation2 + $0x90] sm:$0xff]  ;;  %v576_v60 = vld [vmem:[#allocation2 + $0x98] sm:$0xff] }
  0xbd   : > { %5512 = vmatprep.subr.bf16.mxu1 %v6424_v11  ;;  %v7285_v2 = vld [vmem:[#allocation2 + $0x150] sm:$0xff]  ;;  %v7304_v27 = vpack.c.bf16 %v576_v60, %v575_v58  ;;  %v6433_v42 = vld [vmem:[#allocation10 + $0x148] sm:$0xff]  }
  0xbe   : > { %5465 = vmatmul.mubr.bf16.gmra.mrb[8].mxu0 %v7237_v33  ;;  %v7287_v3 = vld [vmem:[#allocation2 + $0x158] sm:$0xff] }
  0xbf   : > { %5489 = vmatmul.mubr.bf16.gmra.mrb[8].mxu1 %v7241_v34  ;;  %5468 = vmatprep.mubr.bf16.mxu0 %v7246_v24  ;;  %v578_v13 = vld [vmem:[#allocation2 + $0xa8] sm:$0xff]  ;;  %v6432_v21 = vld [vmem:[#allocation10 + $0x100] sm:$0xff]  }
  0xc0   : > { %5492 = vmatprep.mubr.bf16.mxu1 %v7250_v32  ;;  %5577 = vmatpush3.bf16.msra.mxu0 %v6423_v10  ;;  %v7291_v10 = vld [vmem:[#allocation2 + $0x160] sm:$0xff]  ;;  %v7302_v20 = vld [vmem:[#allocation2 + $0x168] sm:$0xff]  ;;  %v579_v7 = vld [vmem:[#allocation2 + $0xb0] sm:$0xff] }
  0xc1   : > { %5513 = vmatpush3.bf16.msra.mxu1 %v6424_v11  ;;  %5578 = vmatprep.subr.bf16.mxu0 %v6425_v40  ;;  %v7295_v11 = vpack.c.bf16 %v7212_v19, %v7197_v59  ;;  %v7308_v59 = vpack.c.bf16 %v7287_v3, %v7285_v2  ;;  %v7310_v19 = vpack.c.bf16 %v578_v13, %v577_v4  ;;  %v7316_v31 = vld [vmem:[#allocation2 + $0xb8] sm:$0xff] }
  0xc2   : > { %5514 = vmatprep.subr.bf16.mxu1 %v6426_v56  ;;  %v7314_v16 = vpack.c.bf16 %v7302_v20, %v7291_v10  ;;  %v7343_v39 = vpack.c.bf16 %v579_v7, %v578_v13  ;;  %v6441_v13 = vld [vmem:[#allocation10 + $0x168] sm:$0xff]  }
  0xc4   : > { %5579 = vmatpush3.bf16.msra.mxu0 %v6425_v40  ;;  %v7318_v40 = vld [vmem:[#allocation2 + $0x170] sm:$0xff] }
  0xc5   : > { %5515 = vmatpush3.bf16.msra.mxu1 %v6426_v56  ;;  %5580 = vmatprep.subr.bf16.mxu0 %v6427_v50  ;;  %v7320_v56 = vld [vmem:[#allocation2 + $0x178] sm:$0xff] }
  0xc6   : > { %5516 = vmatprep.subr.bf16.mxu1 %v6428_v51  ;;  %5469 = vmatmul.mubr.bf16.gmra.mrb[12].mxu0 %v7273_v52  ;;  %8632 = vst [vmem:[#allocation20_spill] sm:$0xff] %v7320_v56 }
  0xc7   : > { %5493 = vmatmul.mubr.bf16.gmra.mrb[12].mxu1 %v7277_v57  ;;  %5472 = vmatprep.mubr.bf16.mxu0 %v7279_v63 }
  0xc8   : > { %5496 = vmatprep.mubr.bf16.mxu1 %v7283_v53  ;;  %5581 = vmatpush3.bf16.msra.mxu0 %v6427_v50  ;;  %v7328_v50 = vpack.c.bf16 %v575_v58, %v574_v0  ;;  %v6434_v0 = vld [vmem:[#allocation10 + $0x108] sm:$0xff]   ;;  %v6435_v58 = vld [vmem:[#allocation10 + $0x150] sm:$0xff]  }
  0xc9   : > { %5517 = vmatpush3.bf16.msra.mxu1 %v6428_v51  ;;  %5582 = vmatprep.subr.bf16.mxu0 %v6429_v54  ;;  %v7331_v51 = vpack.c.bf16 %v7316_v31, %v579_v7  ;;  %v6479_v7 = vld [vmem:[#allocation7] ss:$0 sm:$0xff] }
  0xca   : > { %5518 = vmatprep.subr.bf16.mxu1 %v6430_v9 }
  0xcc   : > { %5583 = vmatpush3.bf16.msra.mxu0 %v6429_v54  ;;  %v7335_v54 = vpack.c.bf16 %v7320_v56, %v7318_v40  ;;  %v6436_v56 = vld [vmem:[#allocation10 + $0x110] sm:$0xff]  }
  0xcd   : > { %5519 = vmatpush3.bf16.msra.mxu1 %v6430_v9  ;;  %5760 = vmatprep.subr.bf16.mxu0 %v6431_v14  ;;  %v7339_v9 = vpack.c.bf16 %v577_v4, %v576_v60  ;;  %v6438_v60 = vld [vmem:[#allocation10 + $0x118] sm:$0xff]   ;;  %v6440_v4 = vld [vmem:[#allocation10 + $0x120] sm:$0xff]  }
  0xce   : > { %5632 = vmatprep.subr.bf16.mxu1 %v6432_v21  ;;  %5473 = vmatmul.mubr.bf16.gmra.mrb[16].mxu0 %v7304_v27 }
  0xcf   : > { %5497 = vmatmul.mubr.bf16.gmra.mrb[16].mxu1 %v7308_v59  ;;  %5476 = vmatprep.mubr.bf16.mxu0 %v7310_v19 }
  0xd0   : > { %5500 = vmatprep.mubr.bf16.mxu1 %v7314_v16 }
  0xd6   : > { %5477 = vmatmul.mubr.bf16.gmra.mrb[20].mxu0 %v7331_v51 }
  0xd7   : > { %5501 = vmatmul.mubr.bf16.gmra.mrb[20].mxu1 %v7335_v54  ;;  %5584 = vmatprep.mubr.bf16.mxu0 %v6711_v1 }
  0xd8   : > { %5520 = vmatprep.mubr.bf16.mxu1 %v6711_v1  ;;  %v6437_v1 = vld [vmem:[#allocation10 + $0x158] sm:$0xff]  }
  0xde   : > { %5585 = vmatmul.mubr.bf16.vlgmr.msra.gmra.mrb[24].mxu0 %v7086_v35 }
  0xdf   : > { %5521 = vmatmul.mubr.bf16.vlgmr.msra.gmra.mrb[24].mxu1 %v7086_v35  ;;  %5761 = vmatpush3.bf16.msra.mxu0 %v6431_v14  ;;  %v7355_v35 = vpack.c.bf16 %v7126_v61, %v7105_v49  ;;  %v6443_v49 = vld [vmem:[#allocation10 + $0x170] sm:$0xff]   ;;  %v6446_v14 = vld [vmem:[#allocation10 + $0x138] sm:$0xff]  }
  0xe0   : > { %5633 = vmatpush3.bf16.msra.mxu1 %v6432_v21  ;;  %5524 = vmatprep.mubr.bf16.mxu1 %v7114_v55  ;;  %v6444_v61 = vld [vmem:[#allocation10 + $0x130] sm:$0xff]  }
  0xe1   : > { %5588 = vmatprep.mubr.bf16.mxu0 %v7114_v55  ;;  %5762 = vmatprep.subr.bf16.mxu0 %v6433_v42  ;;  %v6439_v55 = vld [vmem:[#allocation10 + $0x160] sm:$0xff]  }
  0xe2   : > { %5634 = vmatprep.subr.bf16.mxu1 %v6434_v0 }
  0xe3   : > { %5763 = vmatpush3.bf16.msra.mxu0 %v6433_v42 }
  0xe4   : > { %5635 = vmatpush3.bf16.msra.mxu1 %v6434_v0  ;;  %5764 = vmatprep.subr.bf16.mxu0 %v6435_v58  ;;  %v6480_v0 = vld [vmem:[#allocation9] ss:$0 sm:$0xff] }
  0xe5   : > { %5636 = vmatprep.subr.bf16.mxu1 %v6436_v56 }
  0xe6   : > { %5589 = vmatmul.mubr.bf16.gmra.mrb[28].mxu0 %v7147_v15 }
  0xe7   : > { %5525 = vmatmul.mubr.bf16.gmra.mrb[28].mxu1 %v7147_v15  ;;  %5592 = vmatprep.mubr.bf16.mxu0 %v7166_v25  ;;  %v6442_v15 = vld [vmem:[#allocation10 + $0x128] sm:$0xff]  }
  0xe8   : > { %5528 = vmatprep.mubr.bf16.mxu1 %v7166_v25  ;;  %5765 = vmatpush3.bf16.msra.mxu0 %v6435_v58  ;;  %v6445_v25 = vld [vmem:[#allocation10 + $0x178] sm:$0xff]  }
  0xe9   : > { %5637 = vmatpush3.bf16.msra.mxu1 %v6436_v56  ;;  %5766 = vmatprep.subr.bf16.mxu0 %v6437_v1 }
  0xea   : > { %5638 = vmatprep.subr.bf16.mxu1 %v6438_v60 }
  0xec   : > { %5767 = vmatpush3.bf16.msra.mxu0 %v6437_v1 }
  0xed   : > { %5639 = vmatpush3.bf16.msra.mxu1 %v6438_v60  ;;  %5768 = vmatprep.subr.bf16.mxu0 %v6439_v55 }
  0xee   : > { %5640 = vmatprep.subr.bf16.mxu1 %v6440_v4  ;;  %5593 = vmatmul.mubr.bf16.gmra.mrb[32].mxu0 %v7237_v33 }
  0xef   : > { %5529 = vmatmul.mubr.bf16.gmra.mrb[32].mxu1 %v7237_v33  ;;  %5596 = vmatprep.mubr.bf16.mxu0 %v7246_v24  ;;  %v6447_v33 = vld [vmem:[#allocation10 + $0x1c0] sm:$0xff]  }
  0xf0   : > { %5532 = vmatprep.mubr.bf16.mxu1 %v7246_v24  ;;  %5769 = vmatpush3.bf16.msra.mxu0 %v6439_v55  ;;  %v6448_v24 = vld [vmem:[#allocation10 + $0xc0] sm:$0xff]   ;;  %v7416_v55 = vld [vmem:[#allocation2 + $0xc0] sm:$0xff] }
  0xf1   : > { %5641 = vmatpush3.bf16.msra.mxu1 %v6440_v4  ;;  %5770 = vmatprep.subr.bf16.mxu0 %v6441_v13  ;;  %v7418_v4 = vld [vmem:[#allocation10 + $0x200] sm:$0xff]  }
  0xf2   : > { %5642 = vmatprep.subr.bf16.mxu1 %v6442_v15 }
  0xf4   : > { %5771 = vmatpush3.bf16.msra.mxu0 %v6441_v13  ;;  %v7420_v13 = vld [vmem:[#allocation10 + $0x180] sm:$0xff]  }
  0xf5   : > { %5643 = vmatpush3.bf16.msra.mxu1 %v6442_v15  ;;  %5772 = vmatprep.subr.bf16.mxu0 %v6443_v49  ;;  %v7424_v15 = vpack.c.bf16 %v7416_v55, %v7316_v31  ;;  %v7436_v31 = vld [vmem:[#allocation2 + $0xd8] sm:$0xff] }
  0xf6   : > { %5644 = vmatprep.subr.bf16.mxu1 %v6444_v61  ;;  %5597 = vmatmul.mubr.bf16.gmra.mrb[36].mxu0 %v7273_v52 }
  0xf7   : > { %5533 = vmatmul.mubr.bf16.gmra.mrb[36].mxu1 %v7273_v52  ;;  %5600 = vmatprep.mubr.bf16.mxu0 %v7279_v63  ;;  %v5151_v52 = vld [vmem:[%s6949_s15 + $0x78] sm:$0xff]  }
  0xf8   : > { %5536 = vmatprep.mubr.bf16.mxu1 %v7279_v63  ;;  %5773 = vmatpush3.bf16.msra.mxu0 %v6443_v49  ;;  %v5135_v63 = vunpack.c.l.bf16 %v5151_v52  ;;  %v5136_v21 = vunpack.c.h.bf16 %v5151_v52  ;;  %v7432_v49 = vld [vmem:[#allocation2 + $0xc8] sm:$0xff] }
  0xf9   : > { %5645 = vmatpush3.bf16.msra.mxu1 %v6444_v61  ;;  %5774 = vmatprep.subr.bf16.mxu0 %v6445_v25  ;;  %v7434_v61 = vld [vmem:[#allocation2 + $0xd0] sm:$0xff] }
  0xfa   : > { %5646 = vmatprep.subr.bf16.mxu1 %v6446_v14  ;;  %v396_v56 = vmul.f32 %v6479_v7, %v5135_v63  ;;  %v397_v42 = vmul.f32 %v6479_v7, %v5136_v21  ;;  %v7490_v63 = vpack.c.bf16 %v7291_v10, %v7287_v3 }
  0xfc   : > { %5775 = vmatpush3.bf16.msra.mxu0 %v6445_v25  ;;  %v436_v58 = vadd.f32 %v6480_v0, %v397_v42  ;;  %v7440_v25 = vpack.c.bf16 %v7434_v61, %v7432_v49 }
  0xfd   : > { %5647 = vmatpush3.bf16.msra.mxu1 %v6446_v14  ;;  %5824 = vmatprep.subr.bf16.mxu0 %v6447_v33  ;;  %v7444_v14 = vpack.c.bf16 %v7103_v48, %v7436_v31  ;;  %v7460_v48 = vpack.c.bf16 %v7205_v5, %v7173_v29  ;;  %v983_v29 = vlaneseq }
  0xfe   : > { %5696 = vmatprep.subr.bf16.mxu1 %v6448_v24  ;;  %5601 = vmatmul.mubr.bf16.gmra.mrb[40].mxu0 %v7304_v27  ;;  %v468_v60 = vmax.f32 %v436_v58, 0.0 }
  0xff   : > { %5537 = vmatmul.mubr.bf16.gmra.mrb[40].mxu1 %v7304_v27  ;;  %5604 = vmatprep.mubr.bf16.mxu0 %v7310_v19  ;;  %v435_v27 = vadd.f32 %v6480_v0, %v396_v56  ;;  %v7482_v5 = vshrl.u32 %v983_v29, 7 }
 0x100   : > { %5540 = vmatprep.mubr.bf16.mxu1 %v7310_v19  ;;  %556 = vst.msk [vmem:[#allocation2 + $0x189] sm:$0xff] %vm524_vm0, %v468_v60  ;;  %v6459_v19 = vld [vmem:[#allocation10 + $0x1f0] sm:$0xff]  }
 0x101   : > { %v467_v1 = vmax.f32 %v435_v27, 0.0  ;;  %vm985_vm1 = vcmp.lt.s32.totalorder %v7482_v5, 7  ;;  %vm1645_vm2 = vcmp.lt.s32.totalorder %v7482_v5, 6 }
 0x103   : > { %555 = vst.msk [vmem:[#allocation2 + $0x181] sm:$0xff] %vm524_vm0, %v467_v1 }
 0x106   : > { %5605 = vmatmul.mubr.bf16.gmra.mrb[44].mxu0 %v7331_v51 }
 0x107   : > { %5541 = vmatmul.mubr.bf16.gmra.mrb[44].mxu1 %v7331_v51  ;;  %5608 = vmatprep.mubr.bf16.mxu0 %v7066_v23  ;;  %v6461_v51 = vld [vmem:[#allocation10 + $0x1f8] sm:$0xff]  }
 0x108   : > { %5544 = vmatprep.mubr.bf16.mxu1 %v7066_v23  ;;  %v6449_v23 = vld [vmem:[#allocation10 + $0x1c8] sm:$0xff]  }
 0x10a   : > { %v7512_v60 = vld [vmem:[#allocation2 + $0x180] sm:$0xff] }
 0x10e   : > { %5609 = vmatmul.mubr.bf16.gmra.mrb[48].mxu0 %v7088_v36 }
 0x10f   : > { %5545 = vmatmul.mubr.bf16.gmra.mrb[48].mxu1 %v7088_v36  ;;  %5612 = vmatprep.mubr.bf16.mxu0 %v7136_v6  ;;  %v6450_v36 = vld [vmem:[#allocation10 + $0xc8] sm:$0xff]  }
 0x110   : > { %5548 = vmatprep.mubr.bf16.mxu1 %v7136_v6  ;;  %v6451_v6 = vld [vmem:[#allocation10 + $0x1d0] sm:$0xff]  }
 0x116   : > { %5613 = vmatmul.mubr.bf16.gmra.mrb[52].mxu0 %v7162_v22 }
 0x117   : > { %5549 = vmatmul.mubr.bf16.gmra.mrb[52].mxu1 %v7162_v22  ;;  %5616 = vmatprep.mubr.bf16.mxu0 %v7185_v45  ;;  %v6452_v22 = vld [vmem:[#allocation10 + $0xd0] sm:$0xff]  }
 0x118   : > { %5552 = vmatprep.mubr.bf16.mxu1 %v7185_v45  ;;  %v6453_v45 = vld [vmem:[#allocation10 + $0x1d8] sm:$0xff]  }
 0x11e   : > { %5617 = vmatmul.mubr.bf16.gmra.mrb[56].mxu0 %v7241_v34 }
 0x11f   : > { %5553 = vmatmul.mubr.bf16.gmra.mrb[56].mxu1 %v7241_v34  ;;  %5620 = vmatprep.mubr.bf16.mxu0 %v7250_v32  ;;  %v6454_v34 = vld [vmem:[#allocation10 + $0xd8] sm:$0xff]  }
 0x120   : > { %5556 = vmatprep.mubr.bf16.mxu1 %v7250_v32  ;;  %v6455_v32 = vld [vmem:[#allocation10 + $0x1e0] sm:$0xff]  }
 0x126   : > { %5621 = vmatmul.mubr.bf16.gmra.mrb[60].mxu0 %v7277_v57 }
 0x127   : > { %5557 = vmatmul.mubr.bf16.gmra.mrb[60].mxu1 %v7277_v57  ;;  %5624 = vmatprep.mubr.bf16.mxu0 %v7283_v53  ;;  %v6456_v57 = vld [vmem:[#allocation10 + $0xe0] sm:$0xff]  }
 0x128   : > { %5560 = vmatprep.mubr.bf16.mxu1 %v7283_v53  ;;  %v6457_v53 = vld [vmem:[#allocation10 + $0x1e8] sm:$0xff]  }
 0x12e   : > { %5625 = vmatmul.mubr.bf16.gmra.mrb[64].mxu0 %v7308_v59 }
 0x12f   : > { %5561 = vmatmul.mubr.bf16.gmra.mrb[64].mxu1 %v7308_v59  ;;  %5628 = vmatprep.mubr.bf16.mxu0 %v7314_v16  ;;  %v6458_v59 = vld [vmem:[#allocation10 + $0xe8] sm:$0xff]  }
 0x130   : > { %5564 = vmatprep.mubr.bf16.mxu1 %v7314_v16  ;;  %v6460_v16 = vld [vmem:[#allocation10 + $0xf0] sm:$0xff]  }
 0x136   : > { %5629 = vmatmul.mubr.bf16.gmra.mrb[68].mxu0 %v7335_v54 }
 0x137   : > { %5565 = vmatmul.mubr.bf16.gmra.mrb[68].mxu1 %v7335_v54  ;;  %5776 = vmatprep.mubr.bf16.mxu0 %v7227_v17  ;;  %v6462_v54 = vld [vmem:[#allocation10 + $0xf8] sm:$0xff]  }
 0x138   : > { %5648 = vmatprep.mubr.bf16.mxu1 %v7227_v17 }
 0x13e   : > { %5777 = vmatmul.mubr.bf16.vlgmr.msra.gmra.mrb[72].mxu0 %v7231_v12 }
 0x13f   : > { %5649 = vmatmul.mubr.bf16.vlgmr.msra.gmra.mrb[72].mxu1 %v7231_v12  ;;  %5825 = vmatpush3.bf16.msra.mxu0 %v6447_v33  ;;  %v7452_v33 = vpack.c.bf16 %v7168_v26, %v7128_v62  ;;  %v7472_v62 = vpack.c.bf16 %v7253_v38, %v7221_v30  ;;  %v7476_v26 = vpack.c.bf16 %v7265_v44, %v7259_v41 }
 0x140   : > { %5697 = vmatpush3.bf16.msra.mxu1 %v6448_v24  ;;  %5652 = vmatprep.mubr.bf16.mxu1 %v7263_v43  ;;  %v7464_v24 = vpack.c.bf16 %v7219_v28, %v7207_v8  ;;  %v7486_v38 = vpack.c.bf16 %v7285_v2, %v7267_v46 }
 0x141   : > { %5780 = vmatprep.mubr.bf16.mxu0 %v7263_v43  ;;  %5826 = vmatprep.subr.bf16.mxu0 %v6449_v23 }
 0x142   : > { %5698 = vmatprep.subr.bf16.mxu1 %v6450_v36 }
 0x143   : > { %5827 = vmatpush3.bf16.msra.mxu0 %v6449_v23 }
 0x144   : > { %5699 = vmatpush3.bf16.msra.mxu1 %v6450_v36  ;;  %5828 = vmatprep.subr.bf16.mxu0 %v6451_v6 }
 0x145   : > { %5700 = vmatprep.subr.bf16.mxu1 %v6452_v22 }
 0x146   : > { %5781 = vmatmul.mubr.bf16.gmra.mrb[76].mxu0 %v7271_v47 }
 0x147   : > { %5653 = vmatmul.mubr.bf16.gmra.mrb[76].mxu1 %v7271_v47  ;;  %5784 = vmatprep.mubr.bf16.mxu0 %v7295_v11 }
 0x148   : > { %5656 = vmatprep.mubr.bf16.mxu1 %v7295_v11  ;;  %5829 = vmatpush3.bf16.msra.mxu0 %v6451_v6 }
 0x149   : > { %5701 = vmatpush3.bf16.msra.mxu1 %v6452_v22  ;;  %5830 = vmatprep.subr.bf16.mxu0 %v6453_v45 }
 0x14a   : > { %5702 = vmatprep.subr.bf16.mxu1 %v6454_v34 }
 0x14c   : > { %5831 = vmatpush3.bf16.msra.mxu0 %v6453_v45 }
 0x14d   : > { %5703 = vmatpush3.bf16.msra.mxu1 %v6454_v34  ;;  %5832 = vmatprep.subr.bf16.mxu0 %v6455_v32  ;;  %v7517_v34 = vpack.c.bf16 %v7318_v40, %v7302_v20 }
 0x14e   : > { %5704 = vmatprep.subr.bf16.mxu1 %v6456_v57  ;;  %5785 = vmatmul.mubr.bf16.gmra.mrb[80].mxu0 %v7300_v18 }
 0x14f   : > { %5657 = vmatmul.mubr.bf16.gmra.mrb[80].mxu1 %v7300_v18  ;;  %5788 = vmatprep.mubr.bf16.mxu0 %v7324_v37  ;;  %8633 = vst [vmem:[#allocation21_spill] sm:$0xff] %v7517_v34 }
 0x150   : > { %5660 = vmatprep.mubr.bf16.mxu1 %v7324_v37  ;;  %5833 = vmatpush3.bf16.msra.mxu0 %v6455_v32  ;;  %v8634_v32 = vld [vmem:[#allocation20_spill] sm:$0xff] }
 0x151   : > { %5705 = vmatpush3.bf16.msra.mxu1 %v6456_v57  ;;  %5834 = vmatprep.subr.bf16.mxu0 %v6457_v53  ;;  %v7521_v57 = vpack.c.bf16 %v7512_v60, %v8634_v32 }
 0x152   : > { %5706 = vmatprep.subr.bf16.mxu1 %v6458_v59 }
 0x153   : > { %8635 = vst [vmem:[#allocation20_spill] sm:$0xff] %v7521_v57 }
 0x154   : > { %5835 = vmatpush3.bf16.msra.mxu0 %v6457_v53 }
 0x155   : > { %5707 = vmatpush3.bf16.msra.mxu1 %v6458_v59  ;;  %5836 = vmatprep.subr.bf16.mxu0 %v6459_v19 }
 0x156   : > { %5708 = vmatprep.subr.bf16.mxu1 %v6460_v16  ;;  %5789 = vmatmul.mubr.bf16.gmra.mrb[84].mxu0 %v7328_v50 }
 0x157   : > { %5661 = vmatmul.mubr.bf16.gmra.mrb[84].mxu1 %v7328_v50  ;;  %5792 = vmatprep.mubr.bf16.mxu0 %v7339_v9 }
 0x158   : > { %5664 = vmatprep.mubr.bf16.mxu1 %v7339_v9  ;;  %5837 = vmatpush3.bf16.msra.mxu0 %v6459_v19 }
 0x159   : > { %5709 = vmatpush3.bf16.msra.mxu1 %v6460_v16  ;;  %5838 = vmatprep.subr.bf16.mxu0 %v6461_v51 }
 0x15a   : > { %5710 = vmatprep.subr.bf16.mxu1 %v6462_v54 }
 0x15c   : > { %5839 = vmatpush3.bf16.msra.mxu0 %v6461_v51 }
 0x15d   : > { %5711 = vmatpush3.bf16.msra.mxu1 %v6462_v54  ;;  %5952 = vmatprep.subr.bf16.mxu0 %v7418_v4 }
 0x15e   : > { %5888 = vmatprep.subr.bf16.mxu1 %v7420_v13  ;;  %5793 = vmatmul.mubr.bf16.gmra.mrb[88].mxu0 %v7343_v39 }
 0x15f   : > { %5665 = vmatmul.mubr.bf16.gmra.mrb[88].mxu1 %v7343_v39  ;;  %5796 = vmatprep.mubr.bf16.mxu0 %v7424_v15 }
 0x160   : > { %5668 = vmatprep.mubr.bf16.mxu1 %v7424_v15 }
 0x166   : > { %5797 = vmatmul.mubr.bf16.gmra.mrb[92].mxu0 %v7440_v25 }
 0x167   : > { %5669 = vmatmul.mubr.bf16.gmra.mrb[92].mxu1 %v7440_v25  ;;  %5800 = vmatprep.mubr.bf16.mxu0 %v7444_v14 }
 0x168   : > { %5672 = vmatprep.mubr.bf16.mxu1 %v7444_v14 }
 0x16e   : > { %5801 = vmatmul.mubr.bf16.gmra.mrb[96].mxu0 %v7355_v35 }
 0x16f   : > { %5673 = vmatmul.mubr.bf16.gmra.mrb[96].mxu1 %v7355_v35  ;;  %5804 = vmatprep.mubr.bf16.mxu0 %v7452_v33 }
 0x170   : > { %5676 = vmatprep.mubr.bf16.mxu1 %v7452_v33 }
 0x176   : > { %5805 = vmatmul.mubr.bf16.gmra.mrb[100].mxu0 %v7460_v48 }
 0x177   : > { %5677 = vmatmul.mubr.bf16.gmra.mrb[100].mxu1 %v7460_v48  ;;  %5808 = vmatprep.mubr.bf16.mxu0 %v7464_v24 }
 0x178   : > { %5680 = vmatprep.mubr.bf16.mxu1 %v7464_v24 }
 0x17e   : > { %5809 = vmatmul.mubr.bf16.gmra.mrb[104].mxu0 %v7472_v62 }
 0x17f   : > { %5681 = vmatmul.mubr.bf16.gmra.mrb[104].mxu1 %v7472_v62  ;;  %5812 = vmatprep.mubr.bf16.mxu0 %v7476_v26 }
 0x180   : > { %5684 = vmatprep.mubr.bf16.mxu1 %v7476_v26 }
 0x181   : > { %v5458_v8 = vpop.f32.mrb[0].mxu0 }
 0x182   : > { %v5482_v28 = vpop.f32.mrb[0].mxu1  ;;  %v744_v52 = vpop.f32.mrb[1].mxu0  ;;  %v937_v21 = vrot.slane %v5458_v8, 1 }
 0x183   : > { %v840_v30 = vpop.f32.mrb[1].mxu1  ;;  %v5459_v41 = vpop.f32.mrb[2].mxu0  ;;  %v961_v7 = vrot.slane %v5482_v28, 1  ;;  %v935_v0 = vrot.slane %v744_v52, 1 }
 0x184   : > { %v5483_v44 = vpop.f32.mrb[2].mxu1  ;;  %v747_v56 = vpop.f32.mrb[3].mxu0  ;;  %v959_v27 = vrot.slane %v840_v30, 1  ;;  %v938_v53 = vrot.slane %v5459_v41, 1 }
 0x185   : > { %v843_v42 = vpop.f32.mrb[3].mxu1  ;;  %v936_v58 = vrot.slane %v747_v56, 1  ;;  %v962_v59 = vrot.slane %v5483_v44, 1 }
 0x186   : > { %v960_v1 = vrot.slane %v843_v42, 1  ;;  %5813 = vmatmul.mubr.bf16.gmra.mrb[108].mxu0 %v7486_v38 }
 0x187   : > { %5685 = vmatmul.mubr.bf16.gmra.mrb[108].mxu1 %v7486_v38  ;;  %v7497_v46 = vsel %vm985_vm1, %v936_v58, %v937_v21  ;;  %v7501_v2 = vsel %vm985_vm1, %v935_v0, %v936_v58  ;;  %5816 = vmatprep.mubr.bf16.mxu0 %v7490_v63  ;;  %v7551_v0 = vld [vmem:[#allocation2 + $0x188] sm:$0xff]  ;;  %v3117_v58 = vld [vmem:[#allocation2 + $0x30] sm:$0xff] }
 0x188   : > { %v7505_v3 = vsel %vm985_vm1, %v960_v1, %v961_v7  ;;  %v7509_v10 = vsel %vm985_vm1, %v959_v27, %v960_v1  ;;  %5688 = vmatprep.mubr.bf16.mxu1 %v7490_v63  ;;  %8639 = vst [vmem:[#allocation25_spill] sm:$0xff] %v7551_v0  ;;  %v7553_v27 = vld [vmem:[#allocation2 + $0x190] sm:$0xff]  ;;  %v3118_v1 = vld [vmem:[#allocation2 + $0x38] sm:$0xff] }
 0x189   : > { %v5462_v23 = vpop.f32.mrb[4].mxu0  ;;  %8640 = vst [vmem:[#allocation26_spill] sm:$0xff] %v7553_v27  ;;  %v7557_v32 = vpack.c.bf16 %v7553_v27, %v7551_v0 }
 0x18a   : > { %v5486_v36 = vpop.f32.mrb[4].mxu1  ;;  %v760_v22 = vpop.f32.mrb[5].mxu0  ;;  %v941_v29 = vrot.slane %v5462_v23, 1 }
 0x18b   : > { %v965_v6 = vrot.slane %v5486_v36, 1  ;;  %v856_v45 = vpop.f32.mrb[5].mxu1  ;;  %v939_v19 = vrot.slane %v760_v22, 1  ;;  %v5463_v51 = vpop.f32.mrb[6].mxu0  ;;  %8641 = vst [vmem:[#allocation27_spill] sm:$0xff] %v7557_v32 }
 0x18c   : > { %v963_v16 = vrot.slane %v856_v45, 1  ;;  %v5487_v54 = vpop.f32.mrb[6].mxu1  ;;  %v942_v8 = vrot.slane %v5463_v51, 1  ;;  %v763_v52 = vpop.f32.mrb[7].mxu0  ;;  %v7559_v51 = vpack.c.bf16 %v3118_v1, %v3117_v58  ;;  %v3119_v1 = vld [vmem:[#allocation2 + $0x40] sm:$0xff] }
 0x18d   : > { %v966_v28 = vrot.slane %v5487_v54, 1  ;;  %v859_v30 = vpop.f32.mrb[7].mxu1  ;;  %v7525_v21 = vsel %vm985_vm1, %v938_v53, %v939_v19  ;;  %v940_v40 = vrot.slane %v763_v52, 1 }
 0x18e   : > { %v7529_v20 = vsel %vm985_vm1, %v962_v59, %v963_v16  ;;  %v964_v41 = vrot.slane %v859_v30, 1  ;;  %v7533_v44 = vsel %vm985_vm1, %v941_v29, %v942_v8  ;;  %5817 = vmatmul.mubr.bf16.gmra.mrb[112].mxu0 %v7517_v34  ;;  %8642 = vst [vmem:[#allocation28_spill] sm:$0xff] %v7559_v51 }
 0x18f   : > { %8636 = vst [vmem:[#allocation22_spill] sm:$0xff] %v7529_v20  ;;  %v7537_v7 = vsel %vm985_vm1, %v965_v6, %v966_v28  ;;  %5689 = vmatmul.mubr.bf16.gmra.mrb[112].mxu1 %v7517_v34  ;;  %v7543_v56 = vsel %vm985_vm1, %v939_v19, %v940_v40  ;;  %5820 = vmatprep.mubr.bf16.mxu0 %v7521_v57 }
 0x190   : > { %8637 = vst [vmem:[#allocation23_spill] sm:$0xff] %v7537_v7  ;;  %v7547_v42 = vsel %vm985_vm1, %v963_v16, %v964_v41  ;;  %5692 = vmatprep.mubr.bf16.mxu1 %v7521_v57  ;;  %v6465_v57 = vld [vmem:[#allocation10 + $0x208] sm:$0xff]  }
 0x191   : > { %8638 = vst [vmem:[#allocation24_spill] sm:$0xff] %v7547_v42  ;;  %v5466_v23 = vpop.f32.mrb[8].mxu0  ;;  %v3123_v7 = vld [vmem:[#allocation2 + $0x60] sm:$0xff] }
 0x192   : > { %v5490_v36 = vpop.f32.mrb[8].mxu1  ;;  %v776_v22 = vpop.f32.mrb[9].mxu0  ;;  %v945_v54 = vrot.slane %v5466_v23, 1  ;;  %v3120_v23 = vld [vmem:[#allocation2 + $0x48] sm:$0xff] }
 0x193   : > { %v969_v6 = vrot.slane %v5490_v36, 1  ;;  %v872_v45 = vpop.f32.mrb[9].mxu1  ;;  %v943_v53 = vrot.slane %v776_v22, 1  ;;  %v5467_v19 = vpop.f32.mrb[10].mxu0 }
 0x194   : > { %v967_v59 = vrot.slane %v872_v45, 1  ;;  %v5491_v16 = vpop.f32.mrb[10].mxu1  ;;  %v946_v29 = vrot.slane %v5467_v19, 1  ;;  %v779_v30 = vpop.f32.mrb[11].mxu0  ;;  %v3121_v19 = vld [vmem:[#allocation2 + $0x50] sm:$0xff] }
 0x195   : > { %v970_v52 = vrot.slane %v5491_v16, 1  ;;  %v875_v40 = vpop.f32.mrb[11].mxu1  ;;  %v7563_v41 = vsel %vm985_vm1, %v942_v8, %v943_v53  ;;  %v944_v42 = vrot.slane %v779_v30, 1  ;;  %v3122_v16 = vld [vmem:[#allocation2 + $0x58] sm:$0xff]  ;;  %v7589_v30 = vpack.c.bf16 %v3120_v23, %v3119_v1 }
 0x196   : > { %v7567_v36 = vsel %vm985_vm1, %v966_v28, %v967_v59  ;;  %v968_v22 = vrot.slane %v875_v40, 1  ;;  %v7571_v45 = vsel %vm985_vm1, %v945_v54, %v946_v29  ;;  %5821 = vmatmul.mubr.bf16.gmra.mrb[116].mxu0 %v7557_v32  ;;  %v6466_v1 = vld [vmem:[#allocation10 + $0x188] sm:$0xff]  }
 0x197   : > { %8643 = vst [vmem:[#allocation29_spill] sm:$0xff] %v7567_v36  ;;  %v7575_v58 = vsel %vm985_vm1, %v969_v6, %v970_v52  ;;  %5693 = vmatmul.mubr.bf16.gmra.mrb[116].mxu1 %v7557_v32  ;;  %v7581_v8 = vsel %vm985_vm1, %v944_v42, %v945_v54  ;;  %5840 = vmatprep.mubr.bf16.mxu0 %v7559_v51  ;;  %8646 = vst [vmem:[#allocation32_spill] sm:$0xff] %v7589_v30 }
 0x198   : > { %8644 = vst [vmem:[#allocation30_spill] sm:$0xff] %v7575_v58  ;;  %v7585_v28 = vsel %vm985_vm1, %v968_v22, %v969_v6  ;;  %5712 = vmatprep.mubr.bf16.mxu1 %v7227_v17 }
 0x199   : > { %8645 = vst [vmem:[#allocation31_spill] sm:$0xff] %v7585_v28  ;;  %v5470_v53 = vpop.f32.mrb[12].mxu0  ;;  %v7591_v28 = vpack.c.bf16 %v3122_v16, %v3121_v19  ;;  %v3125_v16 = vld [vmem:[#allocation2 + $0x70] sm:$0xff] }
 0x19a   : > { %v5494_v59 = vpop.f32.mrb[12].mxu1  ;;  %v792_v29 = vpop.f32.mrb[13].mxu0  ;;  %v949_v40 = vrot.slane %v5470_v53, 1 }
 0x19b   : > { %v888_v52 = vpop.f32.mrb[13].mxu1  ;;  %v5471_v42 = vpop.f32.mrb[14].mxu0  ;;  %v973_v58 = vrot.slane %v5494_v59, 1  ;;  %8647 = vst [vmem:[#allocation33_spill] sm:$0xff] %v7591_v28  ;;  %v947_v17 = vrot.slane %v792_v29, 1  ;;  %v3126_v29 = vld [vmem:[#allocation2 + $0x78] sm:$0xff] }
 0x19c   : > { %v5495_v54 = vpop.f32.mrb[14].mxu1  ;;  %v795_v6 = vpop.f32.mrb[15].mxu0  ;;  %v971_v51 = vrot.slane %v888_v52, 1  ;;  %v6467_v52 = vld [vmem:[#allocation10 + $0x210] sm:$0xff]  }
 0x19d   : > { %v891_v22 = vpop.f32.mrb[15].mxu1  ;;  %v948_v32 = vrot.slane %v795_v6, 1 }
 0x19e   : > { %v972_v36 = vrot.slane %v891_v22, 1  ;;  %5841 = vmatmul.mubr.bf16.vlgmr.msra.gmra.mrb[120].mxu0 %v7589_v30 }
 0x19f   : > { %5713 = vmatmul.mubr.bf16.vlgmr.msra.gmra.mrb[24].mxu1 %v7231_v12  ;;  %v7597_v23 = vsel %vm985_vm1, %v948_v32, %v949_v40  ;;  %v7601_v53 = vsel %vm985_vm1, %v947_v17, %v948_v32  ;;  %5953 = vmatpush3.bf16.msra.mxu0 %v7418_v4  ;;  %v3124_v12 = vld [vmem:[#allocation2 + $0x68] sm:$0xff]  ;;  %v7617_v4 = vpack.c.bf16 %v3126_v29, %v3125_v16  ;;  %v950_v17 = vrot.slane %v5471_v42, 1  ;;  %v3129_v29 = vld [vmem:[#allocation2 + $0x90] sm:$0xff] }
 0x1a0   : > { %v7605_v59 = vsel %vm985_vm1, %v972_v36, %v973_v58  ;;  %v7609_v19 = vsel %vm985_vm1, %v971_v51, %v972_v36  ;;  %5889 = vmatpush3.bf16.msra.mxu1 %v7420_v13  ;;  %5716 = vmatprep.mubr.bf16.mxu1 %v7263_v43  ;;  %v6468_v58 = vld [vmem:[#allocation10 + $0x190] sm:$0xff]   ;;  %v7615_v36 = vpack.c.bf16 %v3124_v12, %v3123_v7  ;;  %v6469_v16 = vld [vmem:[#allocation10 + $0x218] sm:$0xff]  }
 0x1a1   : > { %8648 = vst [vmem:[#allocation34_spill] sm:$0xff] %v7605_v59  ;;  %8649 = vst [vmem:[#allocation35_spill] sm:$0xff] %v7609_v19  ;;  %v5474_v32 = vpop.f32.mrb[16].mxu0  ;;  %5844 = vmatprep.mubr.bf16.mxu0 %v7591_v28  ;;  %5954 = vmatprep.subr.bf16.mxu0 %v6465_v57  ;;  %v974_v59 = vrot.slane %v5495_v54, 1 }
 0x1a2   : > { %v5498_v40 = vpop.f32.mrb[16].mxu1  ;;  %v808_v22 = vpop.f32.mrb[17].mxu0  ;;  %8650 = vst [vmem:[#allocation36_spill] sm:$0xff] %v7615_v36  ;;  %5890 = vmatprep.subr.bf16.mxu1 %v6466_v1  ;;  %8651 = vst [vmem:[#allocation37_spill] sm:$0xff] %v7617_v4  ;;  %v953_v34 = vrot.slane %v5474_v32, 1  ;;  %v3130_v32 = vld [vmem:[#allocation2 + $0x98] sm:$0xff] }
 0x1a3   : > { %v977_v6 = vrot.slane %v5498_v40, 1  ;;  %v904_v51 = vpop.f32.mrb[17].mxu1  ;;  %v951_v13 = vrot.slane %v808_v22, 1  ;;  %v5475_v43 = vpop.f32.mrb[18].mxu0  ;;  %5955 = vmatpush3.bf16.msra.mxu0 %v6465_v57  ;;  %v6470_v57 = vld [vmem:[#allocation10 + $0x198] sm:$0xff]   ;;  %v6472_v22 = vld [vmem:[#allocation10 + $0x1a0] sm:$0xff]  }
 0x1a4   : > { %v975_v19 = vrot.slane %v904_v51, 1  ;;  %v5499_v30 = vpop.f32.mrb[18].mxu1  ;;  %v954_v20 = vrot.slane %v5475_v43, 1  ;;  %v811_v27 = vpop.f32.mrb[19].mxu0  ;;  %5891 = vmatpush3.bf16.msra.mxu1 %v6466_v1  ;;  %5956 = vmatprep.subr.bf16.mxu0 %v6467_v52 }
 0x1a5   : > { %v978_v28 = vrot.slane %v5499_v30, 1  ;;  %v907_v0 = vpop.f32.mrb[19].mxu1  ;;  %v7621_v7 = vsel %vm985_vm1, %v950_v17, %v951_v13  ;;  %v952_v54 = vrot.slane %v811_v27, 1  ;;  %5892 = vmatprep.subr.bf16.mxu1 %v6468_v58  ;;  %v3128_v27 = vld [vmem:[#allocation2 + $0x88] sm:$0xff] }
 0x1a6   : > { %v7625_v42 = vsel %vm985_vm1, %v974_v59, %v975_v19  ;;  %v976_v12 = vrot.slane %v907_v0, 1  ;;  %v7629_v30 = vsel %vm985_vm1, %v953_v34, %v954_v20  ;;  %5845 = vmatmul.mubr.bf16.gmra.mrb[124].mxu0 %v7615_v36  ;;  %v3127_v34 = vld [vmem:[#allocation2 + $0x80] sm:$0xff] }
 0x1a7   : > { %v7633_v1 = vsel %vm985_vm1, %v977_v6, %v978_v28  ;;  %5717 = vmatmul.mubr.bf16.gmra.mrb[28].mxu1 %v7271_v47  ;;  %v7639_v59 = vsel %vm985_vm1, %v951_v13, %v952_v54  ;;  %5848 = vmatprep.mubr.bf16.mxu0 %v7617_v4  ;;  %v6471_v6 = vld [vmem:[#allocation10 + $0x220] sm:$0xff]   ;;  %v7647_v13 = vpack.c.bf16 %v3128_v27, %v3127_v34 }
 0x1a8   : > { %8652 = vst [vmem:[#allocation38_spill] sm:$0xff] %v7633_v1  ;;  %v7643_v0 = vsel %vm985_vm1, %v975_v19, %v976_v12  ;;  %5720 = vmatprep.mubr.bf16.mxu1 %v7295_v11  ;;  %5957 = vmatpush3.bf16.msra.mxu0 %v6467_v52 }
 0x1a9   : > { %8653 = vst [vmem:[#allocation39_spill] sm:$0xff] %v7643_v0  ;;  %5893 = vmatpush3.bf16.msra.mxu1 %v6468_v58  ;;  %v5478_v47 = vpop.f32.mrb[20].mxu0  ;;  %5958 = vmatprep.subr.bf16.mxu0 %v6469_v16  ;;  %v7649_v0 = vpack.c.bf16 %v3130_v32, %v3129_v29  ;;  %v6473_v29 = vld [vmem:[#allocation10 + $0x228] sm:$0xff]  }
 0x1aa   : > { %v5502_v40 = vpop.f32.mrb[20].mxu1  ;;  %5894 = vmatprep.subr.bf16.mxu1 %v6470_v57  ;;  %v824_v17 = vpop.f32.mrb[21].mxu0  ;;  %v957_v4 = vrot.slane %v5478_v47, 1  ;;  %v6474_v32 = vld [vmem:[#allocation10 + $0x1a8] sm:$0xff]  }
 0x1ab   : > { %v981_v51 = vrot.slane %v5502_v40, 1  ;;  %v920_v19 = vpop.f32.mrb[21].mxu1  ;;  %v955_v11 = vrot.slane %v824_v17, 1  ;;  %v5479_v54 = vpop.f32.mrb[22].mxu0 }
 0x1ac   : > { %v979_v43 = vrot.slane %v920_v19, 1  ;;  %v5503_v12 = vpop.f32.mrb[22].mxu1  ;;  %v958_v52 = vrot.slane %v5479_v54, 1  ;;  %v827_v1 = vpop.f32.mrb[23].mxu0  ;;  %5959 = vmatpush3.bf16.msra.mxu0 %v6469_v16  ;;  %v3134_v19 = vld [vmem:[#allocation2 + $0xb8] sm:$0xff] }
 0x1ad   : > { %v982_v58 = vrot.slane %v5503_v12, 1  ;;  %v923_v36 = vpop.f32.mrb[23].mxu1  ;;  %5895 = vmatpush3.bf16.msra.mxu1 %v6470_v57  ;;  %v7653_v40 = vsel %vm985_vm1, %v954_v20, %v955_v11  ;;  %v956_v27 = vrot.slane %v827_v1, 1  ;;  %5960 = vmatprep.subr.bf16.mxu0 %v6471_v6  ;;  %v3132_v57 = vld [vmem:[#allocation2 + $0xa8] sm:$0xff]  ;;  %v3133_v1 = vld [vmem:[#allocation2 + $0xb0] sm:$0xff] }
 0x1ae   : > { %v7657_v34 = vsel %vm985_vm1, %v978_v28, %v979_v43  ;;  %v980_v17 = vrot.slane %v923_v36, 1  ;;  %5896 = vmatprep.subr.bf16.mxu1 %v6472_v22  ;;  %v7661_v47 = vsel %vm985_vm1, %v957_v4, %v958_v52  ;;  %5849 = vmatmul.mubr.bf16.gmra.mrb[128].mxu0 %v7647_v13  ;;  %v3131_v36 = vld [vmem:[#allocation2 + $0xa0] sm:$0xff]  ;;  %v7681_v12 = vpack.c.bf16 %v3134_v19, %v3133_v1 }
 0x1af   : > { %v7665_v16 = vsel %vm985_vm1, %v981_v51, %v982_v58  ;;  %5721 = vmatmul.mubr.bf16.gmra.mrb[32].mxu1 %v7300_v18  ;;  %v7671_v20 = vsel %vm985_vm1, %v956_v27, %v957_v4  ;;  %5852 = vmatprep.mubr.bf16.mxu0 %v7649_v0  ;;  %v6475_v11 = vld [vmem:[#allocation10 + $0x230] sm:$0xff]   ;;  %v7679_v54 = vpack.c.bf16 %v3132_v57, %v3131_v36  ;;  %v6478_v27 = vld [vmem:[#allocation10 + $0x1b8] sm:$0xff]  }
 0x1b0   : > { %v7675_v28 = vsel %vm985_vm1, %v980_v17, %v981_v51  ;;  %5724 = vmatprep.mubr.bf16.mxu1 %v7324_v37  ;;  %5961 = vmatpush3.bf16.msra.mxu0 %v6471_v6  ;;  %v6476_v4 = vld [vmem:[#allocation10 + $0x1b0] sm:$0xff]   ;;  %v7700_v1 = vpack.c.bf16 %v7432_v49, %v7416_v55 }
 0x1b1   : > { %5897 = vmatpush3.bf16.msra.mxu1 %v6472_v22  ;;  %v5586_v18 = vpop.f32.mrb[24].mxu0  ;;  %5962 = vmatprep.subr.bf16.mxu0 %v6473_v29  ;;  %v6477_v22 = vld [vmem:[#allocation10 + $0x238] sm:$0xff]  }
 0x1b2   : > { %5898 = vmatprep.subr.bf16.mxu1 %v6474_v32  ;;  %v1406_v43 = vpop.f32.mrb[25].mxu0  ;;  %v1599_v52 = vrot.slane %v5586_v18, 2 }
 0x1b3   : > { %v5587_v51 = vpop.f32.mrb[26].mxu0  ;;  %v1597_v58 = vrot.slane %v1406_v43, 2 }
 0x1b4   : > { %v1409_v37 = vpop.f32.mrb[27].mxu0  ;;  %5963 = vmatpush3.bf16.msra.mxu0 %v6473_v29  ;;  %v1600_v19 = vrot.slane %v5587_v51, 2 }
 0x1b5   : > { %5899 = vmatpush3.bf16.msra.mxu1 %v6474_v32  ;;  %v1598_v6 = vrot.slane %v1409_v37, 2  ;;  %5964 = vmatprep.subr.bf16.mxu0 %v6475_v11 }
 0x1b6   : > { %5900 = vmatprep.subr.bf16.mxu1 %v6476_v4  ;;  %5853 = vmatmul.mubr.bf16.gmra.mrb[132].mxu0 %v7679_v54 }
 0x1b7   : > { %5725 = vmatmul.mubr.bf16.gmra.mrb[36].mxu1 %v7328_v50  ;;  %v1691_v17 = vsel %vm1645_vm2, %v1598_v6, %v1599_v52  ;;  %v1692_v36 = vsel %vm1645_vm2, %v1597_v58, %v1598_v6  ;;  %5856 = vmatprep.mubr.bf16.mxu0 %v7681_v12  ;;  %v3141_v58 = vld [vmem:[#allocation2 + $0xf0] sm:$0xff]  ;;  %v3142_v6 = vld [vmem:[#allocation2 + $0xf8] sm:$0xff] }
 0x1b8   : > { %5728 = vmatprep.mubr.bf16.mxu1 %v7339_v9  ;;  %v7693_v29 = vadd.f32 %v1692_v36, %v7501_v2  ;;  %v7696_v32 = vadd.f32 %v1691_v17, %v7497_v46  ;;  %5965 = vmatpush3.bf16.msra.mxu0 %v6475_v11  ;;  %v7704_v2 = vpack.c.bf16 %v7436_v31, %v7434_v61  ;;  %v3139_v31 = vld [vmem:[#allocation2 + $0xe0] sm:$0xff] }
 0x1b9   : > { %5901 = vmatpush3.bf16.msra.mxu1 %v6476_v4  ;;  %v5590_v50 = vpop.f32.mrb[28].mxu0  ;;  %5966 = vmatprep.subr.bf16.mxu0 %v6477_v22  ;;  %v7727_v36 = vpack.c.bf16 %v3142_v6, %v3141_v58 }
 0x1ba   : > { %5902 = vmatprep.subr.bf16.mxu1 %v6478_v27  ;;  %v1422_v57 = vpop.f32.mrb[29].mxu0  ;;  %v1603_v43 = vrot.slane %v5590_v50, 2 }
 0x1bb   : > { %v1601_v9 = vrot.slane %v1422_v57, 2  ;;  %v5591_v18 = vpop.f32.mrb[30].mxu0 }
 0x1bc   : > { %v1604_v46 = vrot.slane %v5591_v18, 2  ;;  %v1425_v37 = vpop.f32.mrb[31].mxu0  ;;  %5967 = vmatpush3.bf16.msra.mxu0 %v6477_v22 }
 0x1bd   : > { %5903 = vmatpush3.bf16.msra.mxu1 %v6478_v27  ;;  %v1689_v11 = vsel %vm1645_vm2, %v1600_v19, %v1601_v9  ;;  %v1602_v4 = vrot.slane %v1425_v37, 2 }
 0x1be   : > { %v7709_v52 = vadd.f32 %v1689_v11, %v7525_v21  ;;  %v1686_v55 = vsel %vm1645_vm2, %v1603_v43, %v1604_v46  ;;  %5857 = vmatmul.mubr.bf16.gmra.mrb[136].mxu0 %v7700_v1  ;;  %v3140_v21 = vld [vmem:[#allocation2 + $0xe8] sm:$0xff] }
 0x1bf   : > { %5729 = vmatmul.mubr.bf16.gmra.mrb[40].mxu1 %v7343_v39  ;;  %v7716_v49 = vadd.f32 %v1686_v55, %v7533_v44  ;;  %v1688_v61 = vsel %vm1645_vm2, %v1601_v9, %v1602_v4  ;;  %5860 = vmatprep.mubr.bf16.mxu0 %v7704_v2  ;;  %v7725_v27 = vpack.c.bf16 %v3140_v21, %v3139_v31  ;;  %v3145_v4 = vld [vmem:[#allocation2 + $0x110] sm:$0xff]  ;;  %v3146_v55 = vld [vmem:[#allocation2 + $0x118] sm:$0xff] }
 0x1c0   : > { %5732 = vmatprep.mubr.bf16.mxu1 %v7424_v15  ;;  %v7723_v51 = vadd.f32 %v1688_v61, %v7543_v56  ;;  %v7750_v21 = vpack.c.bf16 %v3146_v55, %v3145_v4 }
 0x1c1   : > { %v5594_v39 = vpop.f32.mrb[32].mxu0 }
 0x1c2   : > { %v1438_v22 = vpop.f32.mrb[33].mxu0  ;;  %v1607_v50 = vrot.slane %v5594_v39, 2 }
 0x1c3   : > { %v1605_v44 = vrot.slane %v1438_v22, 2  ;;  %v5595_v17 = vpop.f32.mrb[34].mxu0 }
 0x1c4   : > { %v1608_v57 = vrot.slane %v5595_v17, 2  ;;  %v1441_v15 = vpop.f32.mrb[35].mxu0  ;;  %v3148_v17 = vld [vmem:[#allocation2 + $0x128] sm:$0xff] }
 0x1c5   : > { %v1685_v19 = vsel %vm1645_vm2, %v1604_v46, %v1605_v44  ;;  %v1606_v9 = vrot.slane %v1441_v15, 2  ;;  %v3143_v46 = vld [vmem:[#allocation2 + $0x100] sm:$0xff]  ;;  %v3150_v15 = vld [vmem:[#allocation2 + $0x138] sm:$0xff] }
 0x1c6   : > { %v7732_v56 = vadd.f32 %v1685_v19, %v7563_v41  ;;  %v1682_v18 = vsel %vm1645_vm2, %v1607_v50, %v1608_v57  ;;  %5861 = vmatmul.mubr.bf16.gmra.mrb[140].mxu0 %v7725_v27  ;;  %v3144_v41 = vld [vmem:[#allocation2 + $0x108] sm:$0xff]  ;;  %v3147_v44 = vld [vmem:[#allocation2 + $0x120] sm:$0xff] }
 0x1c7   : > { %5733 = vmatmul.mubr.bf16.gmra.mrb[44].mxu1 %v7440_v25  ;;  %v7739_v43 = vadd.f32 %v1682_v18, %v7571_v45  ;;  %v1683_v37 = vsel %vm1645_vm2, %v1606_v9, %v1607_v50  ;;  %5864 = vmatprep.mubr.bf16.mxu0 %v7727_v36  ;;  %v7748_v31 = vpack.c.bf16 %v3144_v41, %v3143_v46 }
 0x1c8   : > { %5736 = vmatprep.mubr.bf16.mxu1 %v7444_v14  ;;  %v7746_v11 = vadd.f32 %v1683_v37, %v7581_v8  ;;  %v7766_v18 = vpack.c.bf16 %v3148_v17, %v3147_v44 }
 0x1c9   : > { %v5598_v25 = vpop.f32.mrb[36].mxu0 }
 0x1ca   : > { %v1454_v61 = vpop.f32.mrb[37].mxu0  ;;  %v1611_v6 = vrot.slane %v5598_v25, 2 }
 0x1cb   : > { %v5599_v45 = vpop.f32.mrb[38].mxu0  ;;  %v1609_v39 = vrot.slane %v1454_v61, 2 }
 0x1cc   : > { %v1457_v58 = vpop.f32.mrb[39].mxu0  ;;  %v1612_v37 = vrot.slane %v5599_v45, 2 }
 0x1cd   : > { %v1610_v14 = vrot.slane %v1457_v58, 2 }
 0x1ce   : > { %5865 = vmatmul.mubr.bf16.gmra.mrb[144].mxu0 %v7748_v31 }
 0x1cf   : > { %5737 = vmatmul.mubr.bf16.gmra.mrb[48].mxu1 %v7355_v35  ;;  %v1679_v8 = vsel %vm1645_vm2, %v1610_v14, %v1611_v6  ;;  %v1680_v22 = vsel %vm1645_vm2, %v1609_v39, %v1610_v14  ;;  %5868 = vmatprep.mubr.bf16.mxu0 %v7750_v21  ;;  %v3149_v35 = vld [vmem:[#allocation2 + $0x130] sm:$0xff]  ;;  %v3151_v39 = vld [vmem:[#allocation2 + $0x140] sm:$0xff] }
 0x1d0   : > { %5740 = vmatprep.mubr.bf16.mxu1 %v7452_v33  ;;  %v7761_v50 = vadd.f32 %v1680_v22, %v7601_v53  ;;  %v7764_v57 = vadd.f32 %v1679_v8, %v7597_v23  ;;  %v7768_v33 = vpack.c.bf16 %v3150_v15, %v3149_v35  ;;  %v3153_v8 = vld [vmem:[#allocation2 + $0x150] sm:$0xff]  ;;  %v3154_v22 = vld [vmem:[#allocation2 + $0x158] sm:$0xff] }
 0x1d1   : > { %v5602_v19 = vpop.f32.mrb[40].mxu0  ;;  %v7791_v15 = vpack.c.bf16 %v3154_v22, %v3153_v8 }
 0x1d2   : > { %v1470_v9 = vpop.f32.mrb[41].mxu0  ;;  %v1615_v4 = vrot.slane %v5602_v19, 2 }
 0x1d3   : > { %v1613_v46 = vrot.slane %v1470_v9, 2  ;;  %v5603_v41 = vpop.f32.mrb[42].mxu0 }
 0x1d4   : > { %v1616_v55 = vrot.slane %v5603_v41, 2  ;;  %v1473_v25 = vpop.f32.mrb[43].mxu0 }
 0x1d5   : > { %v1677_v53 = vsel %vm1645_vm2, %v1612_v37, %v1613_v46  ;;  %v1614_v61 = vrot.slane %v1473_v25, 2 }
 0x1d6   : > { %v7773_v23 = vadd.f32 %v1677_v53, %v7621_v7  ;;  %v1674_v58 = vsel %vm1645_vm2, %v1615_v4, %v1616_v55  ;;  %5869 = vmatmul.mubr.bf16.gmra.mrb[148].mxu0 %v7766_v18  ;;  %v3152_v7 = vld [vmem:[#allocation2 + $0x148] sm:$0xff] }
 0x1d7   : > { %5741 = vmatmul.mubr.bf16.gmra.mrb[52].mxu1 %v7460_v48  ;;  %v7780_v45 = vadd.f32 %v1674_v58, %v7629_v30  ;;  %v1676_v6 = vsel %vm1645_vm2, %v1613_v46, %v1614_v61  ;;  %5872 = vmatprep.mubr.bf16.mxu0 %v7768_v33  ;;  %v7789_v17 = vpack.c.bf16 %v3152_v7, %v3151_v39  ;;  %v3157_v61 = vld [vmem:[#allocation2 + $0x170] sm:$0xff]  ;;  %v3158_v58 = vld [vmem:[#allocation2 + $0x178] sm:$0xff] }
 0x1d8   : > { %5744 = vmatprep.mubr.bf16.mxu1 %v7464_v24  ;;  %v7787_v14 = vadd.f32 %v1676_v6, %v7639_v59  ;;  %v7814_v7 = vpack.c.bf16 %v3158_v58, %v3157_v61 }
 0x1d9   : > { %v5606_v48 = vpop.f32.mrb[44].mxu0 }
 0x1da   : > { %v1486_v44 = vpop.f32.mrb[45].mxu0  ;;  %v1619_v19 = vrot.slane %v5606_v48, 2 }
 0x1db   : > { %v1617_v30 = vrot.slane %v1486_v44, 2  ;;  %v5607_v35 = vpop.f32.mrb[46].mxu0 }
 0x1dc   : > { %v1620_v9 = vrot.slane %v5607_v35, 2  ;;  %v1489_v24 = vpop.f32.mrb[47].mxu0 }
 0x1dd   : > { %v1673_v37 = vsel %vm1645_vm2, %v1616_v55, %v1617_v30  ;;  %v1618_v46 = vrot.slane %v1489_v24, 2  ;;  %v3155_v55 = vld [vmem:[#allocation2 + $0x160] sm:$0xff] }
 0x1de   : > { %v7796_v59 = vadd.f32 %v1673_v37, %v7653_v40  ;;  %v1670_v41 = vsel %vm1645_vm2, %v1619_v19, %v1620_v9  ;;  %5873 = vmatmul.mubr.bf16.gmra.mrb[152].mxu0 %v7789_v17  ;;  %v3156_v40 = vld [vmem:[#allocation2 + $0x168] sm:$0xff]  ;;  %v8654_v9 = vld [vmem:[#allocation25_spill] sm:$0xff] }
 0x1df   : > { %5745 = vmatmul.mubr.bf16.gmra.mrb[56].mxu1 %v7472_v62  ;;  %v7803_v4 = vadd.f32 %v1670_v41, %v7661_v47  ;;  %v1671_v25 = vsel %vm1645_vm2, %v1618_v46, %v1619_v19  ;;  %5876 = vmatprep.mubr.bf16.mxu0 %v7791_v15  ;;  %v7812_v39 = vpack.c.bf16 %v3156_v40, %v3155_v55  ;;  %v8655_v55 = vld [vmem:[#allocation26_spill] sm:$0xff] }
 0x1e0   : > { %5748 = vmatprep.mubr.bf16.mxu1 %v7476_v26  ;;  %v7810_v53 = vadd.f32 %v1671_v25, %v7671_v20  ;;  %v7832_v24 = vpack.c.bf16 %v8654_v9, %v7512_v60  ;;  %v6481_v25 = vld [vmem:[#allocation2] sm:$0xff] }
 0x1e1   : > { %v5610_v62 = vpop.f32.mrb[48].mxu0  ;;  %v7856_v9 = vpack.c.bf16 %v6481_v25, %v6481_v25 }
 0x1e2   : > { %v1502_v6 = vpop.f32.mrb[49].mxu0  ;;  %v1623_v22 = vrot.slane %v5610_v62, 2  ;;  %v8656_v62 = vld [vmem:[#allocation22_spill] sm:$0xff] }
 0x1e3   : > { %v5611_v47 = vpop.f32.mrb[50].mxu0  ;;  %v1621_v48 = vrot.slane %v1502_v6, 2 }
 0x1e4   : > { %v1505_v8 = vpop.f32.mrb[51].mxu0  ;;  %v1624_v37 = vrot.slane %v5611_v47, 2  ;;  %v8657_v47 = vld [vmem:[#allocation21_spill] sm:$0xff] }
 0x1e5   : > { %v1622_v26 = vrot.slane %v1505_v8, 2  ;;  %v8658_v8 = vld [vmem:[#allocation23_spill] sm:$0xff] }
 0x1e6   : > { %5877 = vmatmul.mubr.bf16.gmra.mrb[156].mxu0 %v7812_v39 }
 0x1e7   : > { %5749 = vmatmul.mubr.bf16.gmra.mrb[60].mxu1 %v7486_v38  ;;  %v1667_v20 = vsel %vm1645_vm2, %v1622_v26, %v1623_v22  ;;  %v1668_v44 = vsel %vm1645_vm2, %v1621_v48, %v1622_v26  ;;  %5880 = vmatprep.mubr.bf16.mxu0 %v7814_v7  ;;  %v8659_v26 = vld [vmem:[#allocation20_spill] sm:$0xff] }
 0x1e8   : > { %5752 = vmatprep.mubr.bf16.mxu1 %v7490_v63  ;;  %v7825_v30 = vadd.f32 %v1668_v44, %v7509_v10  ;;  %v7828_v35 = vadd.f32 %v1667_v20, %v7505_v3  ;;  %v7835_v63 = vpack.c.bf16 %v6481_v25, %v8655_v55  ;;  %v8660_v20 = vld [vmem:[#allocation24_spill] sm:$0xff]  ;;  %v8663_v25 = vld [vmem:[#allocation30_spill] sm:$0xff] }
 0x1e9   : > { %v5614_v19 = vpop.f32.mrb[52].mxu0 }
 0x1ea   : > { %v1518_v38 = vpop.f32.mrb[53].mxu0  ;;  %v1627_v40 = vrot.slane %v5614_v19, 2 }
 0x1eb   : > { %v1625_v46 = vrot.slane %v1518_v38, 2  ;;  %v5615_v41 = vpop.f32.mrb[54].mxu0 }
 0x1ec   : > { %v1628_v61 = vrot.slane %v5615_v41, 2  ;;  %v1521_v10 = vpop.f32.mrb[55].mxu0 }
 0x1ed   : > { %v1665_v3 = vsel %vm1645_vm2, %v1624_v37, %v1625_v46  ;;  %v1626_v58 = vrot.slane %v1521_v10, 2 }
 0x1ee   : > { %v7840_v6 = vadd.f32 %v1665_v3, %v8656_v62  ;;  %v1662_v60 = vsel %vm1645_vm2, %v1627_v40, %v1628_v61  ;;  %5881 = vmatmul.mubr.bf16.gmra.mrb[160].mxu0 %v7832_v24 }
 0x1ef   : > { %5753 = vmatmul.mubr.bf16.gmra.mrb[64].mxu1 %v8657_v47  ;;  %v7847_v22 = vadd.f32 %v1662_v60, %v8658_v8  ;;  %v1664_v48 = vsel %vm1645_vm2, %v1625_v46, %v1626_v58  ;;  %5884 = vmatprep.mubr.bf16.mxu0 %v7835_v63  ;;  %v8661_v58 = vld [vmem:[#allocation29_spill] sm:$0xff]  ;;  %v8662_v47 = vld [vmem:[#allocation27_spill] sm:$0xff] }
 0x1f0   : > { %5756 = vmatprep.mubr.bf16.mxu1 %v8659_v26  ;;  %v7854_v44 = vadd.f32 %v1664_v48, %v8660_v20  ;;  %v8665_v26 = vld [vmem:[#allocation28_spill] sm:$0xff] }
 0x1f1   : > { %v5618_v19 = vpop.f32.mrb[56].mxu0 }
 0x1f2   : > { %v1534_v38 = vpop.f32.mrb[57].mxu0  ;;  %v1631_v55 = vrot.slane %v5618_v19, 2 }
 0x1f3   : > { %v1629_v37 = vrot.slane %v1534_v38, 2  ;;  %v5619_v41 = vpop.f32.mrb[58].mxu0 }
 0x1f4   : > { %v1632_v40 = vrot.slane %v5619_v41, 2  ;;  %v1537_v10 = vpop.f32.mrb[59].mxu0 }
 0x1f5   : > { %v1661_v3 = vsel %vm1645_vm2, %v1628_v61, %v1629_v37  ;;  %v1630_v46 = vrot.slane %v1537_v10, 2  ;;  %v8666_v61 = vld [vmem:[#allocation31_spill] sm:$0xff] }
 0x1f6   : > { %v7861_v62 = vadd.f32 %v1661_v3, %v8661_v58  ;;  %v1658_v60 = vsel %vm1645_vm2, %v1631_v55, %v1632_v40  ;;  %5885 = vmatmul.mubr.bf16.gmra.mrb[164].mxu0 %v7856_v9  ;;  %v8668_v58 = vld [vmem:[#allocation32_spill] sm:$0xff] }
 0x1f7   : > { %5757 = vmatmul.mubr.bf16.gmra.mrb[68].mxu1 %v8662_v47  ;;  %v7868_v8 = vadd.f32 %v1658_v60, %v8663_v25  ;;  %v1659_v48 = vsel %vm1645_vm2, %v1630_v46, %v1631_v55  ;;  %5968 = vmatprep.mubr.bf16.mxu0 %v8665_v26  ;;  %v8669_v60 = vld [vmem:[#allocation33_spill] sm:$0xff]  ;;  %v8670_v47 = vld [vmem:[#allocation35_spill] sm:$0xff] }
 0x1f8   : > { %5904 = vmatprep.mubr.bf16.mxu1 %v8665_v26  ;;  %v7875_v20 = vadd.f32 %v1659_v48, %v8666_v61  ;;  %v8671_v48 = vld [vmem:[#allocation34_spill] sm:$0xff] }
 0x1f9   : > { %8664 = vst [vmem:[#allocation25_spill] sm:$0xff] %v7868_v8  ;;  %v5622_v19 = vpop.f32.mrb[60].mxu0 }
 0x1fa   : > { %8667 = vst [vmem:[#allocation26_spill] sm:$0xff] %v7875_v20  ;;  %v1550_v38 = vpop.f32.mrb[61].mxu0  ;;  %v1635_v40 = vrot.slane %v5622_v19, 2 }
 0x1fb   : > { %v5623_v37 = vpop.f32.mrb[62].mxu0  ;;  %v1633_v10 = vrot.slane %v1550_v38, 2 }
 0x1fc   : > { %v1553_v41 = vpop.f32.mrb[63].mxu0  ;;  %v1636_v38 = vrot.slane %v5623_v37, 2  ;;  %v8674_v37 = vld [vmem:[#allocation38_spill] sm:$0xff] }
 0x1fd   : > { %v1634_v3 = vrot.slane %v1553_v41, 2 }
 0x1fe   : > { %5969 = vmatmul.mubr.bf16.vlgmr.msra.gmra.mrb[168].mxu0 %v8668_v58 }
 0x1ff   : > { %5905 = vmatmul.mubr.bf16.vlgmr.msra.gmra.mrb[24].mxu1 %v8668_v58  ;;  %v1655_v55 = vsel %vm1645_vm2, %v1634_v3, %v1635_v40  ;;  %v1656_v46 = vsel %vm1645_vm2, %v1633_v10, %v1634_v3  ;;  %5972 = vmatprep.mubr.bf16.mxu0 %v8669_v60 }
 0x200   : > { %5908 = vmatprep.mubr.bf16.mxu1 %v8669_v60  ;;  %v7886_v25 = vadd.f32 %v1656_v46, %v8670_v47  ;;  %v7889_v26 = vadd.f32 %v1655_v55, %v8671_v48  ;;  %v8673_v55 = vld [vmem:[#allocation36_spill] sm:$0xff] }
 0x201   : > { %v5626_v61 = vpop.f32.mrb[64].mxu0 }
 0x202   : > { %v1566_v19 = vpop.f32.mrb[65].mxu0  ;;  %v1639_v20 = vrot.slane %v5626_v61, 2  ;;  %v8675_v61 = vld [vmem:[#allocation37_spill] sm:$0xff] }
 0x203   : > { %v1637_v41 = vrot.slane %v1566_v19, 2  ;;  %v5627_v58 = vpop.f32.mrb[66].mxu0 }
 0x204   : > { %v1640_v40 = vrot.slane %v5627_v58, 2  ;;  %v1569_v8 = vpop.f32.mrb[67].mxu0 }
 0x205   : > { %v1653_v10 = vsel %vm1645_vm2, %v1636_v38, %v1637_v41  ;;  %v1638_v3 = vrot.slane %v1569_v8, 2  ;;  %v8676_v8 = vld [vmem:[#allocation39_spill] sm:$0xff] }
 0x206   : > { %v7894_v60 = vadd.f32 %v1653_v10, %v7625_v42  ;;  %v1650_v46 = vsel %vm1645_vm2, %v1639_v20, %v1640_v40  ;;  %5973 = vmatmul.mubr.bf16.gmra.mrb[172].mxu0 %v8673_v55 }
 0x207   : > { %5909 = vmatmul.mubr.bf16.gmra.mrb[28].mxu1 %v8673_v55  ;;  %v7901_v47 = vadd.f32 %v1650_v46, %v8674_v37  ;;  %v1652_v48 = vsel %vm1645_vm2, %v1637_v41, %v1638_v3  ;;  %5976 = vmatprep.mubr.bf16.mxu0 %v8675_v61 }
 0x208   : > { %8672 = vst [vmem:[#allocation22_spill] sm:$0xff] %v7894_v60  ;;  %5912 = vmatprep.mubr.bf16.mxu1 %v8675_v61  ;;  %v7908_v42 = vadd.f32 %v1652_v48, %v8676_v8 }
 0x209   : > { %v5630_v19 = vpop.f32.mrb[68].mxu0 }
 0x20a   : > { %v1582_v38 = vpop.f32.mrb[69].mxu0  ;;  %v1643_v10 = vrot.slane %v5630_v19, 2 }
 0x20b   : > { %v1641_v20 = vrot.slane %v1582_v38, 2  ;;  %v5631_v58 = vpop.f32.mrb[70].mxu0 }
 0x20c   : > { %v1644_v60 = vrot.slane %v5631_v58, 2  ;;  %v1585_v55 = vpop.f32.mrb[71].mxu0 }
 0x20d   : > { %v1649_v46 = vsel %vm1645_vm2, %v1640_v40, %v1641_v20  ;;  %v1642_v37 = vrot.slane %v1585_v55, 2 }
 0x20e   : > { %v7913_v41 = vadd.f32 %v1649_v46, %v7657_v34  ;;  %v1646_v3 = vsel %vm1645_vm2, %v1643_v10, %v1644_v60  ;;  %5977 = vmatmul.mubr.bf16.gmra.mrb[176].mxu0 %v7647_v13 }
 0x20f   : > { %5913 = vmatmul.mubr.bf16.gmra.mrb[32].mxu1 %v7647_v13  ;;  %v7920_v48 = vadd.f32 %v1646_v3, %v7665_v16  ;;  %v1647_v61 = vsel %vm1645_vm2, %v1642_v37, %v1643_v10  ;;  %5980 = vmatprep.mubr.bf16.mxu0 %v7649_v0 }
 0x210   : > { %8677 = vst [vmem:[#allocation21_spill] sm:$0xff] %v7913_v41  ;;  %5916 = vmatprep.mubr.bf16.mxu1 %v7649_v0  ;;  %v7927_v34 = vadd.f32 %v1647_v61, %v7675_v28 }
 0x211   : > { %8678 = vst [vmem:[#allocation23_spill] sm:$0xff] %v7920_v48  ;;  %v5778_v8 = vpop.f32.mrb[72].mxu0 }
 0x212   : > { %8679 = vst [vmem:[#allocation20_spill] sm:$0xff] %v7927_v34  ;;  %v5650_v40 = vpop.f32.mrb[72].mxu1  ;;  %v2637_v19 = vpop.f32.mrb[73].mxu0  ;;  %v2830_v58 = vrot.slane %v5778_v8, 2 }
 0x213   : > { %v1978_v60 = vpop.f32.mrb[73].mxu1  ;;  %v5779_v20 = vpop.f32.mrb[74].mxu0  ;;  %v2171_v13 = vrot.slane %v5650_v40, 1  ;;  %v2828_v3 = vrot.slane %v2637_v19, 2 }
 0x214   : > { %v5651_v38 = vpop.f32.mrb[74].mxu1  ;;  %v2640_v55 = vpop.f32.mrb[75].mxu0  ;;  %v2169_v46 = vrot.slane %v1978_v60, 1  ;;  %v2831_v34 = vrot.slane %v5779_v20, 2 }
 0x215   : > { %v1981_v16 = vpop.f32.mrb[75].mxu1  ;;  %v2829_v37 = vrot.slane %v2640_v55, 2 }
 0x216   : > { %v2170_v10 = vrot.slane %v1981_v16, 1  ;;  %5981 = vmatmul.mubr.bf16.gmra.mrb[180].mxu0 %v7679_v54 }
 0x217   : > { %5917 = vmatmul.mubr.bf16.gmra.mrb[36].mxu1 %v7679_v54  ;;  %v2921_v61 = vsel %vm1645_vm2, %v2829_v37, %v2830_v58  ;;  %v2922_v40 = vsel %vm1645_vm2, %v2828_v3, %v2829_v37  ;;  %5984 = vmatprep.mubr.bf16.mxu0 %v7681_v12  ;;  %v2172_v58 = vrot.slane %v5651_v38, 1 }
 0x218   : > { %v2262_v0 = vsel %vm985_vm1, %v2170_v10, %v2171_v13  ;;  %v2263_v28 = vsel %vm985_vm1, %v2169_v46, %v2170_v10  ;;  %5920 = vmatprep.mubr.bf16.mxu1 %v7681_v12 }
 0x219   : > { %v6033_v8 = vadd.f32 %v7693_v29, %v2263_v28  ;;  %v6045_v60 = vadd.f32 %v7696_v32, %v2262_v0  ;;  %v5782_v19 = vpop.f32.mrb[76].mxu0 }
 0x21a   : > { %v5654_v54 = vpop.f32.mrb[76].mxu1  ;;  %v2653_v55 = vpop.f32.mrb[77].mxu0  ;;  %v2834_v29 = vrot.slane %v5782_v19, 2 }
 0x21b   : > { %v2175_v13 = vrot.slane %v5654_v54, 1  ;;  %v1994_v16 = vpop.f32.mrb[77].mxu1  ;;  %v7943_v46 = vadd.f32 %v6033_v8, %v2922_v40  ;;  %v7945_v10 = vadd.f32 %v6045_v60, %v2921_v61  ;;  %v2832_v37 = vrot.slane %v2653_v55, 2  ;;  %v5783_v41 = vpop.f32.mrb[78].mxu0 }
 0x21c   : > { %v2173_v3 = vrot.slane %v1994_v16, 1  ;;  %v5655_v48 = vpop.f32.mrb[78].mxu1  ;;  %v2835_v32 = vrot.slane %v5783_v41, 2  ;;  %v2656_v12 = vpop.f32.mrb[79].mxu0 }
 0x21d   : > { %v2176_v28 = vrot.slane %v5655_v48, 1  ;;  %v1997_v0 = vpop.f32.mrb[79].mxu1  ;;  %v2919_v40 = vsel %vm1645_vm2, %v2831_v34, %v2832_v37  ;;  %v2833_v61 = vrot.slane %v2656_v12, 2 }
 0x21e   : > { %v2260_v54 = vsel %vm985_vm1, %v2172_v58, %v2173_v3  ;;  %v2174_v8 = vrot.slane %v1997_v0, 1  ;;  %v2916_v60 = vsel %vm1645_vm2, %v2834_v29, %v2835_v32  ;;  %5985 = vmatmul.mubr.bf16.gmra.mrb[184].mxu0 %v7700_v1 }
 0x21f   : > { %v6039_v38 = vadd.f32 %v7709_v52, %v2260_v54  ;;  %v2257_v20 = vsel %vm985_vm1, %v2175_v13, %v2176_v28  ;;  %5921 = vmatmul.mubr.bf16.gmra.mrb[40].mxu1 %v7700_v1  ;;  %v2918_v34 = vsel %vm1645_vm2, %v2832_v37, %v2833_v61  ;;  %5988 = vmatprep.mubr.bf16.mxu0 %v7704_v2 }
 0x220   : > { %v6051_v41 = vadd.f32 %v7716_v49, %v2257_v20  ;;  %v2259_v48 = vsel %vm985_vm1, %v2173_v3, %v2174_v8  ;;  %5924 = vmatprep.mubr.bf16.mxu1 %v7704_v2 }
 0x221   : > { %v6057_v52 = vadd.f32 %v7723_v51, %v2259_v48  ;;  %v7966_v19 = vadd.f32 %v6039_v38, %v2919_v40  ;;  %v5786_v16 = vpop.f32.mrb[80].mxu0 }
 0x222   : > { %v5658_v13 = vpop.f32.mrb[80].mxu1  ;;  %v7968_v55 = vadd.f32 %v6051_v41, %v2916_v60  ;;  %v2669_v58 = vpop.f32.mrb[81].mxu0  ;;  %v2838_v54 = vrot.slane %v5786_v16, 2 }
 0x223   : > { %v2179_v1 = vrot.slane %v5658_v13, 1  ;;  %v2010_v49 = vpop.f32.mrb[81].mxu1  ;;  %v7970_v29 = vadd.f32 %v6057_v52, %v2918_v34  ;;  %v2836_v0 = vrot.slane %v2669_v58, 2  ;;  %v5787_v12 = vpop.f32.mrb[82].mxu0 }
 0x224   : > { %v2177_v3 = vrot.slane %v2010_v49, 1  ;;  %v5659_v37 = vpop.f32.mrb[82].mxu1  ;;  %v2839_v2 = vrot.slane %v5787_v12, 2  ;;  %v2672_v51 = vpop.f32.mrb[83].mxu0 }
 0x225   : > { %v2180_v8 = vrot.slane %v5659_v37, 1  ;;  %v2013_v61 = vpop.f32.mrb[83].mxu1  ;;  %v2915_v38 = vsel %vm1645_vm2, %v2835_v32, %v2836_v0  ;;  %v2837_v60 = vrot.slane %v2672_v51, 2 }
 0x226   : > { %v2256_v40 = vsel %vm985_vm1, %v2176_v28, %v2177_v3  ;;  %v2178_v20 = vrot.slane %v2013_v61, 1  ;;  %v2912_v34 = vsel %vm1645_vm2, %v2838_v54, %v2839_v2  ;;  %5989 = vmatmul.mubr.bf16.gmra.mrb[188].mxu0 %v7725_v27 }
 0x227   : > { %v6063_v41 = vadd.f32 %v7732_v56, %v2256_v40  ;;  %v2253_v48 = vsel %vm985_vm1, %v2179_v1, %v2180_v8  ;;  %5925 = vmatmul.mubr.bf16.gmra.mrb[44].mxu1 %v7725_v27  ;;  %v2913_v32 = vsel %vm1645_vm2, %v2837_v60, %v2838_v54  ;;  %5992 = vmatprep.mubr.bf16.mxu0 %v7727_v36 }
 0x228   : > { %v6069_v52 = vadd.f32 %v7739_v43, %v2253_v48  ;;  %v2254_v28 = vsel %vm985_vm1, %v2178_v20, %v2179_v1  ;;  %5928 = vmatprep.mubr.bf16.mxu1 %v7727_v36 }
 0x229   : > { %v6075_v56 = vadd.f32 %v7746_v11, %v2254_v28  ;;  %v7991_v13 = vadd.f32 %v6063_v41, %v2915_v38  ;;  %v5790_v49 = vpop.f32.mrb[84].mxu0 }
 0x22a   : > { %v5662_v16 = vpop.f32.mrb[84].mxu1  ;;  %v7993_v58 = vadd.f32 %v6069_v52, %v2912_v34  ;;  %v2685_v43 = vpop.f32.mrb[85].mxu0  ;;  %v2842_v12 = vrot.slane %v5790_v49, 2 }
 0x22b   : > { %v2026_v27 = vpop.f32.mrb[85].mxu1  ;;  %v7995_v3 = vadd.f32 %v6075_v56, %v2913_v32  ;;  %v5791_v0 = vpop.f32.mrb[86].mxu0  ;;  %v2183_v37 = vrot.slane %v5662_v16, 1  ;;  %v2840_v36 = vrot.slane %v2685_v43, 2 }
 0x22c   : > { %v5663_v1 = vpop.f32.mrb[86].mxu1  ;;  %v2688_v8 = vpop.f32.mrb[87].mxu0  ;;  %v2181_v2 = vrot.slane %v2026_v27, 1  ;;  %v2843_v49 = vrot.slane %v5791_v0, 2 }
 0x22d   : > { %v2029_v54 = vpop.f32.mrb[87].mxu1  ;;  %v2841_v11 = vrot.slane %v2688_v8, 2  ;;  %v2184_v16 = vrot.slane %v5663_v1, 1 }
 0x22e   : > { %v2182_v61 = vrot.slane %v2029_v54, 1  ;;  %5993 = vmatmul.mubr.bf16.gmra.mrb[192].mxu0 %v7748_v31 }
 0x22f   : > { %5929 = vmatmul.mubr.bf16.gmra.mrb[48].mxu1 %v7748_v31  ;;  %v2909_v38 = vsel %vm1645_vm2, %v2841_v11, %v2842_v12  ;;  %v2910_v20 = vsel %vm1645_vm2, %v2840_v36, %v2841_v11  ;;  %5996 = vmatprep.mubr.bf16.mxu0 %v7750_v21 }
 0x230   : > { %v2250_v51 = vsel %vm985_vm1, %v2182_v61, %v2183_v37  ;;  %v2251_v40 = vsel %vm985_vm1, %v2181_v2, %v2182_v61  ;;  %5932 = vmatprep.mubr.bf16.mxu1 %v7750_v21 }
 0x231   : > { %v6081_v60 = vadd.f32 %v7761_v50, %v2251_v40  ;;  %v6093_v41 = vadd.f32 %v7764_v57, %v2250_v51  ;;  %v5794_v48 = vpop.f32.mrb[88].mxu0 }
 0x232   : > { %v5666_v31 = vpop.f32.mrb[88].mxu1  ;;  %v2701_v28 = vpop.f32.mrb[89].mxu0  ;;  %v2846_v50 = vrot.slane %v5794_v48, 2 }
 0x233   : > { %v2187_v34 = vrot.slane %v5666_v31, 1  ;;  %v2042_v52 = vpop.f32.mrb[89].mxu1  ;;  %v8011_v32 = vadd.f32 %v6081_v60, %v2910_v20  ;;  %v8013_v56 = vadd.f32 %v6093_v41, %v2909_v38  ;;  %v2844_v43 = vrot.slane %v2701_v28, 2  ;;  %v5795_v12 = vpop.f32.mrb[90].mxu0 }
 0x234   : > { %v2185_v27 = vrot.slane %v2042_v52, 1  ;;  %v5667_v37 = vpop.f32.mrb[90].mxu1  ;;  %v2847_v57 = vrot.slane %v5795_v12, 2  ;;  %v2704_v21 = vpop.f32.mrb[91].mxu0 }
 0x235   : > { %v2188_v54 = vrot.slane %v5667_v37, 1  ;;  %v2045_v8 = vpop.f32.mrb[91].mxu1  ;;  %v2907_v36 = vsel %vm1645_vm2, %v2843_v49, %v2844_v43  ;;  %v2845_v11 = vrot.slane %v2704_v21, 2 }
 0x236   : > { %v2248_v2 = vsel %vm985_vm1, %v2184_v16, %v2185_v27  ;;  %v2186_v61 = vrot.slane %v2045_v8, 1  ;;  %v2904_v51 = vsel %vm1645_vm2, %v2846_v50, %v2847_v57  ;;  %5997 = vmatmul.mubr.bf16.gmra.mrb[196].mxu0 %v7766_v18 }
 0x237   : > { %v6087_v1 = vadd.f32 %v7773_v23, %v2248_v2  ;;  %v2245_v0 = vsel %vm985_vm1, %v2187_v34, %v2188_v54  ;;  %5933 = vmatmul.mubr.bf16.gmra.mrb[52].mxu1 %v7766_v18  ;;  %v2906_v20 = vsel %vm1645_vm2, %v2844_v43, %v2845_v11  ;;  %6000 = vmatprep.mubr.bf16.mxu0 %v7768_v33 }
 0x238   : > { %v6099_v40 = vadd.f32 %v7780_v45, %v2245_v0  ;;  %v2247_v38 = vsel %vm985_vm1, %v2185_v27, %v2186_v61  ;;  %5936 = vmatprep.mubr.bf16.mxu1 %v7768_v33 }
 0x239   : > { %v6105_v23 = vadd.f32 %v7787_v14, %v2247_v38  ;;  %v8034_v60 = vadd.f32 %v6087_v1, %v2907_v36  ;;  %v5798_v31 = vpop.f32.mrb[92].mxu0 }
 0x23a   : > { %v5670_v41 = vpop.f32.mrb[92].mxu1  ;;  %v8036_v48 = vadd.f32 %v6099_v40, %v2904_v51  ;;  %v2717_v34 = vpop.f32.mrb[93].mxu0  ;;  %v2850_v43 = vrot.slane %v5798_v31, 2 }
 0x23b   : > { %v2191_v18 = vrot.slane %v5670_v41, 1  ;;  %v2058_v45 = vpop.f32.mrb[93].mxu1  ;;  %v8038_v52 = vadd.f32 %v6105_v23, %v2906_v20  ;;  %v2848_v16 = vrot.slane %v2717_v34, 2  ;;  %v5799_v27 = vpop.f32.mrb[94].mxu0 }
 0x23c   : > { %v2189_v28 = vrot.slane %v2058_v45, 1  ;;  %v5671_v49 = vpop.f32.mrb[94].mxu1  ;;  %v2851_v33 = vrot.slane %v5799_v27, 2  ;;  %v2720_v14 = vpop.f32.mrb[95].mxu0 }
 0x23d   : > { %v2192_v37 = vrot.slane %v5671_v49, 1  ;;  %v2061_v12 = vpop.f32.mrb[95].mxu1  ;;  %v2903_v8 = vsel %vm1645_vm2, %v2847_v57, %v2848_v16  ;;  %v2849_v2 = vrot.slane %v2720_v14, 2 }
 0x23e   : > { %v2244_v50 = vsel %vm985_vm1, %v2188_v54, %v2189_v28  ;;  %v2190_v21 = vrot.slane %v2061_v12, 1  ;;  %v2900_v11 = vsel %vm1645_vm2, %v2850_v43, %v2851_v33  ;;  %6001 = vmatmul.mubr.bf16.gmra.mrb[200].mxu0 %v7789_v17 }
 0x23f   : > { %v6111_v36 = vadd.f32 %v7796_v59, %v2244_v50  ;;  %v2241_v61 = vsel %vm985_vm1, %v2191_v18, %v2192_v37  ;;  %5937 = vmatmul.mubr.bf16.gmra.mrb[56].mxu1 %v7789_v17  ;;  %v2901_v57 = vsel %vm1645_vm2, %v2849_v2, %v2850_v43  ;;  %6004 = vmatprep.mubr.bf16.mxu0 %v7791_v15 }
 0x240   : > { %v6117_v1 = vadd.f32 %v7803_v4, %v2241_v61  ;;  %v2242_v54 = vsel %vm985_vm1, %v2190_v21, %v2191_v18  ;;  %5940 = vmatprep.mubr.bf16.mxu1 %v7791_v15 }
 0x241   : > { %v6123_v59 = vadd.f32 %v7810_v53, %v2242_v54  ;;  %v8059_v0 = vadd.f32 %v6111_v36, %v2903_v8  ;;  %v5802_v40 = vpop.f32.mrb[96].mxu0 }
 0x242   : > { %v5674_v51 = vpop.f32.mrb[96].mxu1  ;;  %v8061_v38 = vadd.f32 %v6117_v1, %v2900_v11  ;;  %v2733_v4 = vpop.f32.mrb[97].mxu0  ;;  %v2854_v18 = vrot.slane %v5802_v40, 2 }
 0x243   : > { %v2074_v17 = vpop.f32.mrb[97].mxu1  ;;  %v8063_v20 = vadd.f32 %v6123_v59, %v2901_v57  ;;  %v5803_v41 = vpop.f32.mrb[98].mxu0  ;;  %v2195_v31 = vrot.slane %v5674_v51, 1  ;;  %v2852_v15 = vrot.slane %v2733_v4, 2 }
 0x244   : > { %v5675_v23 = vpop.f32.mrb[98].mxu1  ;;  %v2736_v34 = vpop.f32.mrb[99].mxu0  ;;  %v2193_v28 = vrot.slane %v2074_v17, 1  ;;  %v2855_v11 = vrot.slane %v5803_v41, 2 }
 0x245   : > { %v2077_v45 = vpop.f32.mrb[99].mxu1  ;;  %v2853_v53 = vrot.slane %v2736_v34, 2  ;;  %v2196_v61 = vrot.slane %v5675_v23, 1 }
 0x246   : > { %v2194_v16 = vrot.slane %v2077_v45, 1  ;;  %6005 = vmatmul.mubr.bf16.gmra.mrb[204].mxu0 %v7812_v39 }
 0x247   : > { %5941 = vmatmul.mubr.bf16.gmra.mrb[60].mxu1 %v7812_v39  ;;  %v2897_v43 = vsel %vm1645_vm2, %v2853_v53, %v2854_v18  ;;  %v2898_v37 = vsel %vm1645_vm2, %v2852_v15, %v2853_v53  ;;  %6008 = vmatprep.mubr.bf16.mxu0 %v7814_v7 }
 0x248   : > { %v2238_v49 = vsel %vm985_vm1, %v2194_v16, %v2195_v31  ;;  %v2239_v27 = vsel %vm985_vm1, %v2193_v28, %v2194_v16  ;;  %5944 = vmatprep.mubr.bf16.mxu1 %v7814_v7 }
 0x249   : > { %v6129_v33 = vadd.f32 %v7825_v30, %v2239_v27  ;;  %v6141_v12 = vadd.f32 %v7828_v35, %v2238_v49  ;;  %v5806_v14 = vpop.f32.mrb[100].mxu0 }
 0x24a   : > { %v5678_v39 = vpop.f32.mrb[100].mxu1  ;;  %v2749_v21 = vpop.f32.mrb[101].mxu0  ;;  %v2858_v30 = vrot.slane %v5806_v14, 2 }
 0x24b   : > { %v2199_v50 = vrot.slane %v5678_v39, 1  ;;  %v2090_v8 = vpop.f32.mrb[101].mxu1  ;;  %v8079_v2 = vadd.f32 %v6129_v33, %v2898_v37  ;;  %v8081_v36 = vadd.f32 %v6141_v12, %v2897_v43  ;;  %v2856_v54 = vrot.slane %v2749_v21, 2  ;;  %v5807_v59 = vpop.f32.mrb[102].mxu0 }
 0x24c   : > { %v2197_v1 = vrot.slane %v2090_v8, 1  ;;  %v5679_v57 = vpop.f32.mrb[102].mxu1  ;;  %v2859_v35 = vrot.slane %v5807_v59, 2  ;;  %v2752_v7 = vpop.f32.mrb[103].mxu0 }
 0x24d   : > { %v2200_v51 = vrot.slane %v5679_v57, 1  ;;  %v2093_v40 = vpop.f32.mrb[103].mxu1  ;;  %v2895_v4 = vsel %vm1645_vm2, %v2855_v11, %v2856_v54  ;;  %v2857_v18 = vrot.slane %v2752_v7, 2 }
 0x24e   : > { %v2236_v17 = vsel %vm985_vm1, %v2196_v61, %v2197_v1  ;;  %v2198_v31 = vrot.slane %v2093_v40, 1  ;;  %v2892_v45 = vsel %vm1645_vm2, %v2858_v30, %v2859_v35  ;;  %6009 = vmatmul.mubr.bf16.gmra.mrb[208].mxu0 %v7832_v24  ;;  %v8680_v40 = vld [vmem:[#allocation25_spill] sm:$0xff] }
 0x24f   : > { %v6135_v23 = vadd.f32 %v7840_v6, %v2236_v17  ;;  %v2233_v41 = vsel %vm985_vm1, %v2199_v50, %v2200_v51  ;;  %5945 = vmatmul.mubr.bf16.gmra.mrb[64].mxu1 %v7832_v24  ;;  %v2894_v15 = vsel %vm1645_vm2, %v2856_v54, %v2857_v18  ;;  %6012 = vmatprep.mubr.bf16.mxu0 %v7835_v63  ;;  %v8681_v17 = vld [vmem:[#allocation26_spill] sm:$0xff] }
 0x250   : > { %v6147_v34 = vadd.f32 %v7847_v22, %v2233_v41  ;;  %v2235_v28 = vsel %vm985_vm1, %v2197_v1, %v2198_v31  ;;  %5948 = vmatprep.mubr.bf16.mxu1 %v7835_v63 }
 0x251   : > { %v6153_v6 = vadd.f32 %v7854_v44, %v2235_v28  ;;  %v8102_v16 = vadd.f32 %v6135_v23, %v2895_v4  ;;  %v5810_v49 = vpop.f32.mrb[104].mxu0 }
 0x252   : > { %v5682_v53 = vpop.f32.mrb[104].mxu1  ;;  %v8104_v27 = vadd.f32 %v6147_v34, %v2892_v45  ;;  %v2765_v43 = vpop.f32.mrb[105].mxu0  ;;  %v2862_v50 = vrot.slane %v5810_v49, 2 }
 0x253   : > { %v2203_v24 = vrot.slane %v5682_v53, 1  ;;  %v2106_v22 = vpop.f32.mrb[105].mxu1  ;;  %v8106_v37 = vadd.f32 %v6153_v6, %v2894_v15  ;;  %v2860_v12 = vrot.slane %v2765_v43, 2  ;;  %v5811_v14 = vpop.f32.mrb[106].mxu0 }
 0x254   : > { %v2201_v33 = vrot.slane %v2106_v22, 1  ;;  %v5683_v39 = vpop.f32.mrb[106].mxu1  ;;  %v2863_v63 = vrot.slane %v5811_v14, 2  ;;  %v2768_v44 = vpop.f32.mrb[107].mxu0 }
 0x255   : > { %v2204_v8 = vrot.slane %v5683_v39, 1  ;;  %v2109_v21 = vpop.f32.mrb[107].mxu1  ;;  %v2891_v11 = vsel %vm1645_vm2, %v2859_v35, %v2860_v12  ;;  %v2861_v54 = vrot.slane %v2768_v44, 2 }
 0x256   : > { %v2232_v61 = vsel %vm985_vm1, %v2200_v51, %v2201_v33  ;;  %v2202_v1 = vrot.slane %v2109_v21, 1  ;;  %v2888_v30 = vsel %vm1645_vm2, %v2862_v50, %v2863_v63  ;;  %6013 = vmatmul.mubr.bf16.gmra.mrb[212].mxu0 %v7856_v9 }
 0x257   : > { %v6159_v57 = vadd.f32 %v7861_v62, %v2232_v61  ;;  %v2229_v59 = vsel %vm985_vm1, %v2203_v24, %v2204_v8  ;;  %5949 = vmatmul.mubr.bf16.gmra.mrb[68].mxu1 %v7856_v9  ;;  %v2889_v35 = vsel %vm1645_vm2, %v2861_v54, %v2862_v50 }
 0x258   : > { %v6165_v7 = vadd.f32 %v8680_v40, %v2229_v59  ;;  %v2230_v51 = vsel %vm985_vm1, %v2202_v1, %v2203_v24 }
 0x259   : > { %v6171_v62 = vadd.f32 %v8681_v17, %v2230_v51  ;;  %v8125_v4 = vadd.f32 %v6159_v57, %v2891_v11  ;;  %v5814_v18 = vpop.f32.mrb[108].mxu0 }
 0x25a   : > { %v5686_v31 = vpop.f32.mrb[108].mxu1  ;;  %v8127_v23 = vadd.f32 %v6165_v7, %v2888_v30  ;;  %v2781_v45 = vpop.f32.mrb[109].mxu0  ;;  %v2866_v6 = vrot.slane %v5814_v18, 2 }
 0x25b   : > { %v2122_v41 = vpop.f32.mrb[109].mxu1  ;;  %v8129_v34 = vadd.f32 %v6171_v62, %v2889_v35  ;;  %v5815_v28 = vpop.f32.mrb[110].mxu0  ;;  %v2207_v15 = vrot.slane %v5686_v31, 1  ;;  %v2864_v22 = vrot.slane %v2781_v45, 2 }
 0x25c   : > { %v5687_v9 = vpop.f32.mrb[110].mxu1  ;;  %v2784_v49 = vpop.f32.mrb[111].mxu0  ;;  %v2205_v24 = vrot.slane %v2122_v41, 1  ;;  %v2867_v30 = vrot.slane %v5815_v28, 2 }
 0x25d   : > { %v2125_v53 = vpop.f32.mrb[111].mxu1  ;;  %v2865_v33 = vrot.slane %v2784_v49, 2  ;;  %v2208_v59 = vrot.slane %v5687_v9, 1 }
 0x25e   : > { %v2206_v43 = vrot.slane %v2125_v53, 1 }
 0x25f   : > { %v2885_v14 = vsel %vm1645_vm2, %v2865_v33, %v2866_v6  ;;  %v2886_v50 = vsel %vm1645_vm2, %v2864_v22, %v2865_v33  ;;  %v8682_v6 = vld [vmem:[#allocation22_spill] sm:$0xff] }
 0x260   : > { %v2226_v12 = vsel %vm985_vm1, %v2206_v43, %v2207_v15  ;;  %v2227_v39 = vsel %vm985_vm1, %v2205_v24, %v2206_v43 }
 0x261   : > { %v6177_v8 = vadd.f32 %v7886_v25, %v2227_v39  ;;  %v6189_v63 = vadd.f32 %v7889_v26, %v2226_v12  ;;  %v5818_v44 = vpop.f32.mrb[112].mxu0 }
 0x262   : > { %v5690_v21 = vpop.f32.mrb[112].mxu1  ;;  %v2797_v1 = vpop.f32.mrb[113].mxu0  ;;  %v2870_v17 = vrot.slane %v5818_v44, 2 }
 0x263   : > { %v2211_v61 = vrot.slane %v5690_v21, 1  ;;  %v2138_v11 = vpop.f32.mrb[113].mxu1  ;;  %v8141_v54 = vadd.f32 %v6177_v8, %v2886_v50  ;;  %v8143_v57 = vadd.f32 %v6189_v63, %v2885_v14  ;;  %v2868_v7 = vrot.slane %v2797_v1, 2  ;;  %v5819_v35 = vpop.f32.mrb[114].mxu0 }
 0x264   : > { %v2209_v40 = vrot.slane %v2138_v11, 1  ;;  %v5691_v51 = vpop.f32.mrb[114].mxu1  ;;  %v2871_v25 = vrot.slane %v5819_v35, 2  ;;  %v2800_v26 = vpop.f32.mrb[115].mxu0 }
 0x265   : > { %v2212_v62 = vrot.slane %v5691_v51, 1  ;;  %v2141_v31 = vpop.f32.mrb[115].mxu1  ;;  %v2883_v41 = vsel %vm1645_vm2, %v2867_v30, %v2868_v7  ;;  %v2869_v15 = vrot.slane %v2800_v26, 2 }
 0x266   : > { %v2224_v18 = vsel %vm985_vm1, %v2208_v59, %v2209_v40  ;;  %v2210_v45 = vrot.slane %v2141_v31, 1  ;;  %v2880_v53 = vsel %vm1645_vm2, %v2870_v17, %v2871_v25  ;;  %v8683_v31 = vld [vmem:[#allocation21_spill] sm:$0xff] }
 0x267   : > { %v6183_v9 = vadd.f32 %v8682_v6, %v2224_v18  ;;  %v2221_v28 = vsel %vm985_vm1, %v2211_v61, %v2212_v62  ;;  %v2882_v22 = vsel %vm1645_vm2, %v2868_v7, %v2869_v15 }
 0x268   : > { %v6195_v49 = vadd.f32 %v7901_v47, %v2221_v28  ;;  %v2223_v24 = vsel %vm985_vm1, %v2209_v40, %v2210_v45  ;;  %v8684_v45 = vld [vmem:[#allocation23_spill] sm:$0xff] }
 0x269   : > { %v6201_v43 = vadd.f32 %v7908_v42, %v2223_v24  ;;  %v8160_v33 = vadd.f32 %v6183_v9, %v2883_v41  ;;  %v5822_v39 = vpop.f32.mrb[116].mxu0  ;;  %v8685_v9 = vld [vmem:[#allocation20_spill] sm:$0xff] }
 0x26a   : > { %v5694_v12 = vpop.f32.mrb[116].mxu1  ;;  %v8162_v14 = vadd.f32 %v6195_v49, %v2880_v53  ;;  %v2813_v63 = vpop.f32.mrb[117].mxu0  ;;  %v2874_v1 = vrot.slane %v5822_v39, 2 }
 0x26b   : > { %v2215_v50 = vrot.slane %v5694_v12, 1  ;;  %v2154_v8 = vpop.f32.mrb[117].mxu1  ;;  %v8164_v21 = vadd.f32 %v6201_v43, %v2882_v22  ;;  %v2872_v44 = vrot.slane %v2813_v63, 2  ;;  %v5823_v11 = vpop.f32.mrb[118].mxu0 }
 0x26c   : > { %v2213_v47 = vrot.slane %v2154_v8, 1  ;;  %v5695_v61 = vpop.f32.mrb[118].mxu1  ;;  %v2875_v30 = vrot.slane %v5823_v11, 2  ;;  %v2816_v42 = vpop.f32.mrb[119].mxu0 }
 0x26d   : > { %v2216_v59 = vrot.slane %v5695_v61, 1  ;;  %v2157_v40 = vpop.f32.mrb[119].mxu1  ;;  %v2879_v51 = vsel %vm1645_vm2, %v2871_v25, %v2872_v44  ;;  %v2873_v17 = vrot.slane %v2816_v42, 2 }
 0x26e   : > { %v2220_v7 = vsel %vm985_vm1, %v2212_v62, %v2213_v47  ;;  %v2214_v35 = vrot.slane %v2157_v40, 1  ;;  %v2876_v41 = vsel %vm1645_vm2, %v2874_v1, %v2875_v30 }
 0x26f   : > { %v6207_v26 = vadd.f32 %v8683_v31, %v2220_v7  ;;  %v2217_v18 = vsel %vm985_vm1, %v2215_v50, %v2216_v59  ;;  %v2877_v62 = vsel %vm1645_vm2, %v2873_v17, %v2874_v1 }
 0x270   : > { %v6213_v15 = vadd.f32 %v8684_v45, %v2217_v18  ;;  %v2218_v6 = vsel %vm985_vm1, %v2214_v35, %v2215_v50 }
 0x271   : > { %v6219_v25 = vadd.f32 %v8685_v9, %v2218_v6  ;;  %v8181_v28 = vadd.f32 %v6207_v26, %v2879_v51  ;;  %v5842_v53 = vpop.f32.mrb[120].mxu0 }
 0x272   : > { %v8183_v49 = vadd.f32 %v6213_v15, %v2876_v41  ;;  %v3305_v24 = vpop.f32.mrb[121].mxu0  ;;  %v3498_v39 = vrot.slane %v5842_v53, 1 }
 0x273   : > { %v8185_v22 = vadd.f32 %v6219_v25, %v2877_v62  ;;  %v5843_v43 = vpop.f32.mrb[122].mxu0  ;;  %v3496_v8 = vrot.slane %v3305_v24, 1 }
 0x274   : > { %v3308_v12 = vpop.f32.mrb[123].mxu0  ;;  %v3499_v59 = vrot.slane %v5843_v43, 1 }
 0x275   : > { %v3497_v63 = vrot.slane %v3308_v12, 1 }
 0x277   : > { %v3590_v50 = vsel %vm985_vm1, %v3496_v8, %v3497_v63  ;;  %v3589_v47 = vsel %vm985_vm1, %v3497_v63, %v3498_v39 }
 0x278   : > { %v8192_v44 = vadd.f32 %v7943_v46, %v3590_v50  ;;  %v8195_v61 = vadd.f32 %v7945_v10, %v3589_v47 }
 0x279   : > { %v5846_v11 = vpop.f32.mrb[124].mxu0 }
 0x27a   : > { %v3321_v1 = vpop.f32.mrb[125].mxu0  ;;  %v3502_v42 = vrot.slane %v5846_v11, 1 }
 0x27b   : > { %v3500_v30 = vrot.slane %v3321_v1, 1  ;;  %v5847_v40 = vpop.f32.mrb[126].mxu0 }
 0x27c   : > { %v3503_v7 = vrot.slane %v5847_v40, 1  ;;  %v3324_v51 = vpop.f32.mrb[127].mxu0 }
 0x27d   : > { %v3501_v35 = vrot.slane %v3324_v51, 1  ;;  %v3587_v17 = vsel %vm985_vm1, %v3499_v59, %v3500_v30 }
 0x27e   : > { %v8200_v31 = vadd.f32 %v7966_v19, %v3587_v17  ;;  %v3584_v46 = vsel %vm985_vm1, %v3502_v42, %v3503_v7 }
 0x27f   : > { %v8205_v10 = vadd.f32 %v7968_v55, %v3584_v46  ;;  %v3586_v26 = vsel %vm985_vm1, %v3500_v30, %v3501_v35 }
 0x280   : > { %v8210_v18 = vadd.f32 %v7970_v29, %v3586_v26 }
 0x281   : > { %v5850_v41 = vpop.f32.mrb[128].mxu0 }
 0x282   : > { %v3337_v45 = vpop.f32.mrb[129].mxu0  ;;  %v3506_v62 = vrot.slane %v5850_v41, 1 }
 0x283   : > { %v3504_v15 = vrot.slane %v3337_v45, 1  ;;  %v5851_v6 = vpop.f32.mrb[130].mxu0 }
 0x284   : > { %v3507_v9 = vrot.slane %v5851_v6, 1  ;;  %v3340_v19 = vpop.f32.mrb[131].mxu0 }
 0x285   : > { %v3505_v25 = vrot.slane %v3340_v19, 1  ;;  %v3583_v53 = vsel %vm985_vm1, %v3503_v7, %v3504_v15 }
 0x286   : > { %v8215_v55 = vadd.f32 %v7991_v13, %v3583_v53  ;;  %v3580_v24 = vsel %vm985_vm1, %v3506_v62, %v3507_v9 }
 0x287   : > { %v8220_v29 = vadd.f32 %v7993_v58, %v3580_v24  ;;  %v3581_v43 = vsel %vm985_vm1, %v3505_v25, %v3506_v62 }
 0x288   : > { %v8225_v12 = vadd.f32 %v7995_v3, %v3581_v43 }
 0x289   : > { %v5854_v39 = vpop.f32.mrb[132].mxu0 }
 0x28a   : > { %v3353_v8 = vpop.f32.mrb[133].mxu0  ;;  %v3510_v47 = vrot.slane %v5854_v39, 1 }
 0x28b   : > { %v5855_v63 = vpop.f32.mrb[134].mxu0  ;;  %v3508_v11 = vrot.slane %v3353_v8, 1 }
 0x28c   : > { %v3356_v50 = vpop.f32.mrb[135].mxu0  ;;  %v3511_v42 = vrot.slane %v5855_v63, 1 }
 0x28d   : > { %v3509_v13 = vrot.slane %v3356_v50, 1 }
 0x28f   : > { %v3578_v1 = vsel %vm985_vm1, %v3508_v11, %v3509_v13  ;;  %v3577_v58 = vsel %vm985_vm1, %v3509_v13, %v3510_v47 }
 0x290   : > { %v8232_v59 = vadd.f32 %v8011_v32, %v3578_v1  ;;  %v8235_v30 = vadd.f32 %v8013_v56, %v3577_v58 }
 0x291   : > { %v5858_v3 = vpop.f32.mrb[136].mxu0 }
 0x292   : > { %v3369_v40 = vpop.f32.mrb[137].mxu0  ;;  %v3514_v35 = vrot.slane %v5858_v3, 1 }
 0x293   : > { %v3512_v7 = vrot.slane %v3369_v40, 1  ;;  %v5859_v51 = vpop.f32.mrb[138].mxu0 }
 0x294   : > { %v3515_v17 = vrot.slane %v5859_v51, 1  ;;  %v3372_v46 = vpop.f32.mrb[139].mxu0 }
 0x295   : > { %v3513_v26 = vrot.slane %v3372_v46, 1  ;;  %v3575_v41 = vsel %vm985_vm1, %v3511_v42, %v3512_v7 }
 0x296   : > { %v8240_v45 = vadd.f32 %v8034_v60, %v3575_v41  ;;  %v3572_v32 = vsel %vm985_vm1, %v3514_v35, %v3515_v17 }
 0x297   : > { %v8245_v56 = vadd.f32 %v8036_v48, %v3572_v32  ;;  %v3574_v15 = vsel %vm985_vm1, %v3512_v7, %v3513_v26 }
 0x298   : > { %v8250_v6 = vadd.f32 %v8038_v52, %v3574_v15 }
 0x299   : > { %v5862_v62 = vpop.f32.mrb[140].mxu0 }
 0x29a   : > { %v3385_v9 = vpop.f32.mrb[141].mxu0  ;;  %v3518_v53 = vrot.slane %v5862_v62, 1 }
 0x29b   : > { %v3516_v19 = vrot.slane %v3385_v9, 1  ;;  %v5863_v25 = vpop.f32.mrb[142].mxu0 }
 0x29c   : > { %v3519_v24 = vrot.slane %v5863_v25, 1  ;;  %v3388_v60 = vpop.f32.mrb[143].mxu0 }
 0x29d   : > { %v3517_v43 = vrot.slane %v3388_v60, 1  ;;  %v3571_v39 = vsel %vm985_vm1, %v3515_v17, %v3516_v19 }
 0x29e   : > { %v8255_v48 = vadd.f32 %v8059_v0, %v3571_v39  ;;  %v3568_v8 = vsel %vm985_vm1, %v3518_v53, %v3519_v24 }
 0x29f   : > { %v8260_v52 = vadd.f32 %v8061_v38, %v3568_v8  ;;  %v3569_v63 = vsel %vm985_vm1, %v3517_v43, %v3518_v53 }
 0x2a0   : > { %v8265_v50 = vadd.f32 %v8063_v20, %v3569_v63 }
 0x2a1   : > { %v5866_v47 = vpop.f32.mrb[144].mxu0 }
 0x2a2   : > { %v3401_v11 = vpop.f32.mrb[145].mxu0  ;;  %v3522_v58 = vrot.slane %v5866_v47, 1 }
 0x2a3   : > { %v5867_v13 = vpop.f32.mrb[146].mxu0  ;;  %v3520_v3 = vrot.slane %v3401_v11, 1 }
 0x2a4   : > { %v3404_v1 = vpop.f32.mrb[147].mxu0  ;;  %v3523_v35 = vrot.slane %v5867_v13, 1 }
 0x2a5   : > { %v3521_v0 = vrot.slane %v3404_v1, 1 }
 0x2a7   : > { %v3566_v40 = vsel %vm985_vm1, %v3520_v3, %v3521_v0  ;;  %v3565_v38 = vsel %vm985_vm1, %v3521_v0, %v3522_v58 }
 0x2a8   : > { %v8272_v42 = vadd.f32 %v8079_v2, %v3566_v40  ;;  %v8275_v7 = vadd.f32 %v8081_v36, %v3565_v38 }
 0x2a9   : > { %v5870_v20 = vpop.f32.mrb[148].mxu0 }
 0x2aa   : > { %v3417_v51 = vpop.f32.mrb[149].mxu0  ;;  %v3526_v26 = vrot.slane %v5870_v20, 1 }
 0x2ab   : > { %v3524_v17 = vrot.slane %v3417_v51, 1  ;;  %v5871_v46 = vpop.f32.mrb[150].mxu0 }
 0x2ac   : > { %v3527_v41 = vrot.slane %v5871_v46, 1  ;;  %v3420_v32 = vpop.f32.mrb[151].mxu0 }
 0x2ad   : > { %v3525_v15 = vrot.slane %v3420_v32, 1  ;;  %v3563_v62 = vsel %vm985_vm1, %v3523_v35, %v3524_v17 }
 0x2ae   : > { %v8280_v9 = vadd.f32 %v8102_v16, %v3563_v62  ;;  %v3560_v2 = vsel %vm985_vm1, %v3526_v26, %v3527_v41 }
 0x2af   : > { %v8285_v36 = vadd.f32 %v8104_v27, %v3560_v2  ;;  %v3562_v19 = vsel %vm985_vm1, %v3524_v17, %v3525_v15 }
 0x2b0   : > { %v8290_v25 = vadd.f32 %v8106_v37, %v3562_v19 }
 0x2b1   : > { %v5874_v53 = vpop.f32.mrb[152].mxu0 }
 0x2b2   : > { %v3433_v24 = vpop.f32.mrb[153].mxu0  ;;  %v3530_v39 = vrot.slane %v5874_v53, 1 }
 0x2b3   : > { %v3528_v60 = vrot.slane %v3433_v24, 1  ;;  %v5875_v43 = vpop.f32.mrb[154].mxu0 }
 0x2b4   : > { %v3531_v8 = vrot.slane %v5875_v43, 1  ;;  %v3436_v16 = vpop.f32.mrb[155].mxu0 }
 0x2b5   : > { %v3529_v63 = vrot.slane %v3436_v16, 1  ;;  %v3559_v47 = vsel %vm985_vm1, %v3527_v41, %v3528_v60 }
 0x2b6   : > { %v8295_v27 = vadd.f32 %v8125_v4, %v3559_v47  ;;  %v3556_v11 = vsel %vm985_vm1, %v3530_v39, %v3531_v8 }
 0x2b7   : > { %v8300_v37 = vadd.f32 %v8127_v23, %v3556_v11  ;;  %v3557_v13 = vsel %vm985_vm1, %v3529_v63, %v3530_v39 }
 0x2b8   : > { %v8305_v1 = vadd.f32 %v8129_v34, %v3557_v13 }
 0x2b9   : > { %v5878_v58 = vpop.f32.mrb[156].mxu0 }
 0x2ba   : > { %v3449_v3 = vpop.f32.mrb[157].mxu0  ;;  %v3534_v38 = vrot.slane %v5878_v58, 1 }
 0x2bb   : > { %v5879_v0 = vpop.f32.mrb[158].mxu0  ;;  %v3532_v20 = vrot.slane %v3449_v3, 1 }
 0x2bc   : > { %v3452_v40 = vpop.f32.mrb[159].mxu0  ;;  %v3535_v26 = vrot.slane %v5879_v0, 1 }
 0x2bd   : > { %v3533_v4 = vrot.slane %v3452_v40, 1 }
 0x2bf   : > { %v3554_v51 = vsel %vm985_vm1, %v3532_v20, %v3533_v4  ;;  %v3553_v23 = vsel %vm985_vm1, %v3533_v4, %v3534_v38 }
 0x2c0   : > { %v8312_v35 = vadd.f32 %v8141_v54, %v3554_v51  ;;  %v8315_v17 = vadd.f32 %v8143_v57, %v3553_v23 }
 0x2c1   : > { %v5882_v34 = vpop.f32.mrb[160].mxu0 }
 0x2c2   : > { %v3465_v46 = vpop.f32.mrb[161].mxu0  ;;  %v3538_v15 = vrot.slane %v5882_v34, 1 }
 0x2c3   : > { %v3536_v41 = vrot.slane %v3465_v46, 1  ;;  %v5883_v32 = vpop.f32.mrb[162].mxu0 }
 0x2c4   : > { %v3539_v62 = vrot.slane %v5883_v32, 1  ;;  %v3468_v2 = vpop.f32.mrb[163].mxu0 }
 0x2c5   : > { %v3537_v19 = vrot.slane %v3468_v2, 1  ;;  %v3551_v53 = vsel %vm985_vm1, %v3535_v26, %v3536_v41 }
 0x2c6   : > { %v8320_v24 = vadd.f32 %v8160_v33, %v3551_v53  ;;  %v3548_v54 = vsel %vm985_vm1, %v3538_v15, %v3539_v62 }
 0x2c7   : > { %v8325_v57 = vadd.f32 %v8162_v14, %v3548_v54  ;;  %v3550_v60 = vsel %vm985_vm1, %v3536_v41, %v3537_v19 }
 0x2c8   : > { %v8330_v43 = vadd.f32 %v8164_v21, %v3550_v60 }
 0x2c9   : > { %v5886_v39 = vpop.f32.mrb[164].mxu0 }
 0x2ca   : > { %v3481_v8 = vpop.f32.mrb[165].mxu0  ;;  %v3542_v47 = vrot.slane %v5886_v39, 1 }
 0x2cb   : > { %v3540_v16 = vrot.slane %v3481_v8, 1  ;;  %v5887_v63 = vpop.f32.mrb[166].mxu0 }
 0x2cc   : > { %v3543_v11 = vrot.slane %v5887_v63, 1  ;;  %v3484_v33 = vpop.f32.mrb[167].mxu0 }
 0x2cd   : > { %v3541_v13 = vrot.slane %v3484_v33, 1  ;;  %v3547_v58 = vsel %vm985_vm1, %v3539_v62, %v3540_v16 }
 0x2ce   : > { %v8335_v14 = vadd.f32 %v8181_v28, %v3547_v58  ;;  %v3544_v3 = vsel %vm985_vm1, %v3542_v47, %v3543_v11 }
 0x2cf   : > { %v8340_v21 = vadd.f32 %v8183_v49, %v3544_v3  ;;  %v3545_v0 = vsel %vm985_vm1, %v3541_v13, %v3542_v47 }
 0x2d0   : > { %v8345_v40 = vadd.f32 %v8185_v22, %v3545_v0 }
 0x2d1   : > { %v5970_v20 = vpop.f32.mrb[168].mxu0 }
 0x2d2   : > { %v5906_v38 = vpop.f32.mrb[24].mxu1  ;;  %v3964_v51 = vpop.f32.mrb[169].mxu0  ;;  %v4157_v49 = vrot.slane %v5970_v20, 2 }
 0x2d3   : > { %v3674_v4 = vpop.f32.mrb[25].mxu1  ;;  %v5971_v34 = vpop.f32.mrb[170].mxu0  ;;  %v4155_v32 = vrot.slane %v3964_v51, 2 }
 0x2d4   : > { %v6036_v23 = vadd.f32 %v8192_v44, %v3674_v4  ;;  %v5907_v28 = vpop.f32.mrb[26].mxu1  ;;  %v3967_v41 = vpop.f32.mrb[171].mxu0 }
 0x2d5   : > { %v6042_v46 = vadd.f32 %v8200_v31, %v5907_v28  ;;  %v3677_v26 = vpop.f32.mrb[27].mxu1  ;;  %v4156_v62 = vrot.slane %v3967_v41, 2 }
 0x2d6   : > { %v6048_v15 = vadd.f32 %v8195_v61, %v3677_v26  ;;  %v4158_v61 = vrot.slane %v5971_v34, 2 }
 0x2d7   : > { %v4248_v22 = vsel %vm1645_vm2, %v4156_v62, %v4157_v49  ;;  %v4249_v2 = vsel %vm1645_vm2, %v4155_v32, %v4156_v62 }
 0x2d8   : > { %v6037_v19 = vadd.f32 %v6036_v23, %v4249_v2  ;;  %v6049_v53 = vadd.f32 %v6048_v15, %v4248_v22 }
 0x2d9   : > { %v5974_v54 = vpop.f32.mrb[172].mxu0 }
 0x2da   : > { %v5910_v44 = vpop.f32.mrb[28].mxu1  ;;  %v5040_v31 = vpack.c.bf16 %v6037_v19, %v6037_v19  ;;  %v5041_v60 = vpack.c.bf16 %v6049_v53, %v6049_v53  ;;  %v4636_v39 = vadd.f32 %v6049_v53, %v6037_v19  ;;  %v4674_v8 = vmul.f32 %v6037_v19, %v6037_v19  ;;  %v3980_v63 = vpop.f32.mrb[173].mxu0 }
 0x2db   : > { %v3690_v16 = vpop.f32.mrb[29].mxu1  ;;  %v4675_v47 = vmul.f32 %v6049_v53, %v6049_v53  ;;  %v6054_v11 = vadd.f32 %v8205_v10, %v5910_v44  ;;  %v5975_v58 = vpop.f32.mrb[174].mxu0  ;;  %v4161_v3 = vrot.slane %v5974_v54, 2  ;;  %v4159_v0 = vrot.slane %v3980_v63, 2 }
 0x2dc   : > { %v6060_v33 = vadd.f32 %v8210_v18, %v3690_v16  ;;  %v5911_v13 = vpop.f32.mrb[30].mxu1  ;;  %4604 = vst.msk [vmem:[%s8358_s24] sm:$0xf] %vm4603_vm3, %v5040_v31  ;;  %4605 = vst.msk [vmem:[%s8358_s24 + $0x4] sm:$0xf] %vm4603_vm3, %v5041_v60  ;;  %v4162_v20 = vrot.slane %v5975_v58, 2 }
 0x2dd   : > { %v6066_v38 = vadd.f32 %v8215_v55, %v5911_v13  ;;  %v3693_v4 = vpop.f32.mrb[31].mxu1  ;;  %v3983_v10 = vpop.f32.mrb[175].mxu0  ;;  %v4706_v51 = vadd.f32 %v4675_v47, %v4674_v8  ;;  %v4246_v23 = vsel %vm1645_vm2, %v4158_v61, %v4159_v0 }
 0x2de   : > { %v4160_v18 = vrot.slane %v3983_v10, 2  ;;  %v4243_v28 = vsel %vm1645_vm2, %v4161_v3, %v4162_v20  ;;  %v6043_v34 = vadd.f32 %v6042_v46, %v4246_v23 }
 0x2df   : > { %v6055_v26 = vadd.f32 %v6054_v11, %v4243_v28 }
 0x2e0   : > { %v4245_v41 = vsel %vm1645_vm2, %v4159_v0, %v4160_v18  ;;  %v5042_v55 = vpack.c.bf16 %v6043_v34, %v6043_v34  ;;  %v4637_v32 = vadd.f32 %v6043_v34, %v4636_v39  ;;  %v4676_v15 = vmul.f32 %v6043_v34, %v6043_v34 }
 0x2e1   : > { %v6061_v49 = vadd.f32 %v6060_v33, %v4245_v41  ;;  %v5044_v62 = vpack.c.bf16 %v6055_v26, %v6055_v26  ;;  %v5978_v2 = vpop.f32.mrb[176].mxu0  ;;  %v4678_v63 = vmul.f32 %v6055_v26, %v6055_v26 }
 0x2e2   : > { %v5914_v22 = vpop.f32.mrb[32].mxu1  ;;  %v3996_v31 = vpop.f32.mrb[177].mxu0  ;;  %4606 = vst.msk [vmem:[%s8358_s24 + $0x8] sm:$0xf] %vm4603_vm3, %v5042_v55  ;;  %v4707_v46 = vadd.f32 %v4706_v51, %v4676_v15  ;;  %v4165_v61 = vrot.slane %v5978_v2, 2 }
 0x2e3   : > { %v5043_v19 = vpack.c.bf16 %v6061_v49, %v6061_v49  ;;  %v4677_v53 = vmul.f32 %v6061_v49, %v6061_v49  ;;  %v6072_v44 = vadd.f32 %v8220_v29, %v5914_v22  ;;  %v3706_v54 = vpop.f32.mrb[33].mxu1  ;;  %4608 = vst.msk [vmem:[%s8358_s24 + $0x10] sm:$0xf] %vm4603_vm3, %v5044_v62  ;;  %v4638_v60 = vadd.f32 %v6061_v49, %v4637_v32  ;;  %v5979_v39 = vpop.f32.mrb[178].mxu0 }
 0x2e4   : > { %v4163_v8 = vrot.slane %v3996_v31, 2  ;;  %v5915_v16 = vpop.f32.mrb[34].mxu1  ;;  %v4166_v47 = vrot.slane %v5979_v39, 2  ;;  %v3999_v33 = vpop.f32.mrb[179].mxu0 }
 0x2e5   : > { %4607 = vst.msk [vmem:[%s8358_s24 + $0xc] sm:$0xf] %vm4603_vm3, %v5043_v19  ;;  %v3709_v11 = vpop.f32.mrb[35].mxu1  ;;  %v4708_v13 = vadd.f32 %v4707_v46, %v4677_v53  ;;  %v4639_v58 = vadd.f32 %v6055_v26, %v4638_v60  ;;  %v4164_v10 = vrot.slane %v3999_v33, 2 }
 0x2e6   : > { %v4242_v29 = vsel %vm1645_vm2, %v4162_v20, %v4163_v8  ;;  %v6078_v3 = vadd.f32 %v8225_v12, %v3709_v11  ;;  %v4239_v4 = vsel %vm1645_vm2, %v4165_v61, %v4166_v47 }
 0x2e7   : > { %v6067_v0 = vadd.f32 %v6066_v38, %v4242_v29  ;;  %v4709_v51 = vadd.f32 %v4708_v13, %v4678_v63  ;;  %v6073_v18 = vadd.f32 %v6072_v44, %v4239_v4  ;;  %v4240_v41 = vsel %vm1645_vm2, %v4164_v10, %v4165_v61 }
 0x2e8   : > { %v6079_v20 = vadd.f32 %v6078_v3, %v4240_v41 }
 0x2e9   : > { %v5045_v23 = vpack.c.bf16 %v6067_v0, %v6067_v0  ;;  %v4640_v28 = vadd.f32 %v6067_v0, %v4639_v58  ;;  %v4679_v34 = vmul.f32 %v6067_v0, %v6067_v0  ;;  %v5047_v49 = vpack.c.bf16 %v6073_v18, %v6073_v18  ;;  %v5982_v26 = vpop.f32.mrb[180].mxu0 }
 0x2ea   : > { %v5918_v55 = vpop.f32.mrb[36].mxu1  ;;  %v4012_v32 = vpop.f32.mrb[181].mxu0  ;;  %v5046_v15 = vpack.c.bf16 %v6079_v20, %v6079_v20  ;;  %v4680_v22 = vmul.f32 %v6079_v20, %v6079_v20  ;;  %v4681_v44 = vmul.f32 %v6073_v18, %v6073_v18  ;;  %v4169_v54 = vrot.slane %v5982_v26, 2 }
 0x2eb   : > { %4609 = vst.msk [vmem:[%s8358_s24 + $0x14] sm:$0xf] %vm4603_vm3, %v5045_v23  ;;  %v4710_v12 = vadd.f32 %v4709_v51, %v4679_v34  ;;  %v3722_v38 = vpop.f32.mrb[37].mxu1  ;;  %4611 = vst.msk [vmem:[%s8358_s24 + $0x1c] sm:$0xf] %vm4603_vm3, %v5047_v49  ;;  %v4641_v62 = vadd.f32 %v6079_v20, %v4640_v28  ;;  %v5983_v53 = vpop.f32.mrb[182].mxu0 }
 0x2ec   : > { %v6084_v2 = vadd.f32 %v8232_v59, %v3722_v38  ;;  %v5919_v19 = vpop.f32.mrb[38].mxu1  ;;  %v4167_v31 = vrot.slane %v4012_v32, 2  ;;  %v4015_v8 = vpop.f32.mrb[183].mxu0  ;;  %4610 = vst.msk [vmem:[%s8358_s24 + $0x18] sm:$0xf] %vm4603_vm3, %v5046_v15  ;;  %v4170_v51 = vrot.slane %v5983_v53, 2 }
 0x2ed   : > { %v6090_v46 = vadd.f32 %v8240_v45, %v5919_v19  ;;  %v3725_v60 = vpop.f32.mrb[39].mxu1  ;;  %v4711_v16 = vadd.f32 %v4710_v12, %v4680_v22  ;;  %v4168_v63 = vrot.slane %v4015_v8, 2  ;;  %v4642_v61 = vadd.f32 %v6073_v18, %v4641_v62 }
 0x2ee   : > { %v6096_v39 = vadd.f32 %v8235_v30, %v3725_v60 }
 0x2ef   : > { %v4236_v47 = vsel %vm1645_vm2, %v4168_v63, %v4169_v54  ;;  %v4237_v59 = vsel %vm1645_vm2, %v4167_v31, %v4168_v63  ;;  %v4712_v11 = vadd.f32 %v4711_v16, %v4681_v44 }
 0x2f0   : > { %v6085_v33 = vadd.f32 %v6084_v2, %v4237_v59  ;;  %v6097_v13 = vadd.f32 %v6096_v39, %v4236_v47 }
 0x2f1   : > { %v5986_v29 = vpop.f32.mrb[184].mxu0 }
 0x2f2   : > { %v5922_v45 = vpop.f32.mrb[40].mxu1  ;;  %v5048_v58 = vpack.c.bf16 %v6085_v33, %v6085_v33  ;;  %v5049_v3 = vpack.c.bf16 %v6097_v13, %v6097_v13  ;;  %v4643_v0 = vadd.f32 %v6085_v33, %v4642_v61  ;;  %v4682_v4 = vmul.f32 %v6085_v33, %v6085_v33  ;;  %v4028_v10 = vpop.f32.mrb[185].mxu0 }
 0x2f3   : > { %v3738_v30 = vpop.f32.mrb[41].mxu1  ;;  %v4683_v18 = vmul.f32 %v6097_v13, %v6097_v13  ;;  %v6102_v23 = vadd.f32 %v8245_v56, %v5922_v45  ;;  %v5987_v41 = vpop.f32.mrb[186].mxu0  ;;  %v4171_v55 = vrot.slane %v4028_v10, 2  ;;  %v4173_v32 = vrot.slane %v5986_v29, 2 }
 0x2f4   : > { %v6108_v28 = vadd.f32 %v8250_v6, %v3738_v30  ;;  %v5923_v34 = vpop.f32.mrb[42].mxu1  ;;  %4612 = vst.msk [vmem:[%s8358_s24 + $0x20] sm:$0xf] %vm4603_vm3, %v5048_v58  ;;  %4613 = vst.msk [vmem:[%s8358_s24 + $0x24] sm:$0xf] %vm4603_vm3, %v5049_v3  ;;  %v4644_v49 = vadd.f32 %v6097_v13, %v4643_v0  ;;  %v4713_v20 = vadd.f32 %v4712_v11, %v4682_v4  ;;  %v4031_v38 = vpop.f32.mrb[187].mxu0 }
 0x2f5   : > { %v6114_v26 = vadd.f32 %v8255_v48, %v5923_v34  ;;  %v3741_v12 = vpop.f32.mrb[43].mxu1  ;;  %v4174_v15 = vrot.slane %v5987_v41, 2  ;;  %v4172_v62 = vrot.slane %v4031_v38, 2  ;;  %v4234_v56 = vsel %vm1645_vm2, %v4170_v51, %v4171_v55 }
 0x2f6   : > { %v4714_v22 = vadd.f32 %v4713_v20, %v4683_v18  ;;  %v6091_v6 = vadd.f32 %v6090_v46, %v4234_v56 }
 0x2f7   : > { %v4231_v2 = vsel %vm1645_vm2, %v4173_v32, %v4174_v15  ;;  %v4233_v19 = vsel %vm1645_vm2, %v4171_v55, %v4172_v62 }
 0x2f8   : > { %v6103_v53 = vadd.f32 %v6102_v23, %v4231_v2  ;;  %v6109_v44 = vadd.f32 %v6108_v28, %v4233_v19  ;;  %v5050_v48 = vpack.c.bf16 %v6091_v6, %v6091_v6  ;;  %v4645_v54 = vadd.f32 %v6091_v6, %v4644_v49 }
 0x2f9   : > { %v4684_v31 = vmul.f32 %v6091_v6, %v6091_v6  ;;  %v5990_v8 = vpop.f32.mrb[188].mxu0 }
 0x2fa   : > { %v5926_v60 = vpop.f32.mrb[44].mxu1  ;;  %v5052_v16 = vpack.c.bf16 %v6103_v53, %v6103_v53  ;;  %v5051_v39 = vpack.c.bf16 %v6109_v44, %v6109_v44  ;;  %v4685_v63 = vmul.f32 %v6109_v44, %v6109_v44  ;;  %v4044_v46 = vpop.f32.mrb[189].mxu0  ;;  %4614 = vst.msk [vmem:[%s8358_s24 + $0x28] sm:$0xf] %vm4603_vm3, %v5050_v48  ;;  %v4646_v59 = vadd.f32 %v6109_v44, %v4645_v54 }
 0x2fb   : > { %v3754_v61 = vpop.f32.mrb[45].mxu1  ;;  %v4715_v47 = vadd.f32 %v4714_v22, %v4684_v31  ;;  %v6120_v11 = vadd.f32 %v8260_v52, %v5926_v60  ;;  %v5991_v13 = vpop.f32.mrb[190].mxu0  ;;  %v4686_v45 = vmul.f32 %v6103_v53, %v6103_v53  ;;  %v4177_v29 = vrot.slane %v5990_v8, 2 }
 0x2fc   : > { %v5927_v33 = vpop.f32.mrb[46].mxu1  ;;  %4616 = vst.msk [vmem:[%s8358_s24 + $0x30] sm:$0xf] %vm4603_vm3, %v5052_v16  ;;  %4615 = vst.msk [vmem:[%s8358_s24 + $0x2c] sm:$0xf] %vm4603_vm3, %v5051_v39  ;;  %v4175_v58 = vrot.slane %v4044_v46, 2  ;;  %v4647_v10 = vadd.f32 %v6103_v53, %v4646_v59 }
 0x2fd   : > { %v4178_v3 = vrot.slane %v5991_v13, 2  ;;  %v3757_v0 = vpop.f32.mrb[47].mxu1  ;;  %v4047_v4 = vpop.f32.mrb[191].mxu0  ;;  %v4716_v30 = vadd.f32 %v4715_v47, %v4685_v63 }
 0x2fe   : > { %v6126_v51 = vadd.f32 %v8265_v50, %v3757_v0  ;;  %v4176_v18 = vrot.slane %v4047_v4, 2  ;;  %v4230_v52 = vsel %vm1645_vm2, %v4174_v15, %v4175_v58 }
 0x2ff   : > { %v4227_v23 = vsel %vm1645_vm2, %v4177_v29, %v4178_v3  ;;  %v6115_v28 = vadd.f32 %v6114_v26, %v4230_v52  ;;  %v4717_v34 = vadd.f32 %v4716_v30, %v4686_v45 }
 0x300   : > { %v6121_v41 = vadd.f32 %v6120_v11, %v4227_v23  ;;  %v4228_v49 = vsel %vm1645_vm2, %v4176_v18, %v4177_v29 }
 0x301   : > { %v6127_v20 = vadd.f32 %v6126_v51, %v4228_v49  ;;  %v5053_v55 = vpack.c.bf16 %v6115_v28, %v6115_v28  ;;  %v4648_v12 = vadd.f32 %v6115_v28, %v4647_v10  ;;  %v4687_v38 = vmul.f32 %v6115_v28, %v6115_v28  ;;  %v5994_v62 = vpop.f32.mrb[192].mxu0 }
 0x302   : > { %v5055_v50 = vpack.c.bf16 %v6121_v41, %v6121_v41  ;;  %v5930_v32 = vpop.f32.mrb[48].mxu1  ;;  %v4060_v6 = vpop.f32.mrb[193].mxu0  ;;  %v4689_v48 = vmul.f32 %v6121_v41, %v6121_v41  ;;  %v4181_v54 = vrot.slane %v5994_v62, 2 }
 0x303   : > { %v5054_v15 = vpack.c.bf16 %v6127_v20, %v6127_v20  ;;  %v4688_v22 = vmul.f32 %v6127_v20, %v6127_v20  ;;  %v3770_v56 = vpop.f32.mrb[49].mxu1  ;;  %4617 = vst.msk [vmem:[%s8358_s24 + $0x34] sm:$0xf] %vm4603_vm3, %v5053_v55  ;;  %v4718_v26 = vadd.f32 %v4717_v34, %v4687_v38  ;;  %v4649_v2 = vadd.f32 %v6127_v20, %v4648_v12  ;;  %v5995_v44 = vpop.f32.mrb[194].mxu0 }
 0x304   : > { %4619 = vst.msk [vmem:[%s8358_s24 + $0x3c] sm:$0xf] %vm4603_vm3, %v5055_v50  ;;  %v6132_v19 = vadd.f32 %v8272_v42, %v3770_v56  ;;  %v5931_v53 = vpop.f32.mrb[50].mxu1  ;;  %v4179_v31 = vrot.slane %v4060_v6, 2  ;;  %v4063_v16 = vpop.f32.mrb[195].mxu0  ;;  %v4182_v4 = vrot.slane %v5995_v44, 2 }
 0x305   : > { %4618 = vst.msk [vmem:[%s8358_s24 + $0x38] sm:$0xf] %vm4603_vm3, %v5054_v15  ;;  %v6138_v60 = vadd.f32 %v8280_v9, %v5931_v53  ;;  %v3773_v8 = vpop.f32.mrb[51].mxu1  ;;  %v4719_v39 = vadd.f32 %v4718_v26, %v4688_v22  ;;  %v4180_v61 = vrot.slane %v4063_v16, 2  ;;  %v4650_v46 = vadd.f32 %v6121_v41, %v4649_v2 }
 0x306   : > { %v6144_v63 = vadd.f32 %v8275_v7, %v3773_v8 }
 0x307   : > { %v4224_v47 = vsel %vm1645_vm2, %v4180_v61, %v4181_v54  ;;  %v4225_v42 = vsel %vm1645_vm2, %v4179_v31, %v4180_v61  ;;  %v4720_v59 = vadd.f32 %v4719_v39, %v4689_v48 }
 0x308   : > { %v6133_v11 = vadd.f32 %v6132_v19, %v4225_v42  ;;  %v6145_v33 = vadd.f32 %v6144_v63, %v4224_v47 }
 0x309   : > { %v5998_v9 = vpop.f32.mrb[196].mxu0 }
 0x30a   : > { %v5934_v13 = vpop.f32.mrb[52].mxu1  ;;  %v5056_v45 = vpack.c.bf16 %v6133_v11, %v6133_v11  ;;  %v5057_v29 = vpack.c.bf16 %v6145_v33, %v6145_v33  ;;  %v4651_v58 = vadd.f32 %v6133_v11, %v4650_v46  ;;  %v4690_v3 = vmul.f32 %v6133_v11, %v6133_v11  ;;  %v4076_v0 = vpop.f32.mrb[197].mxu0 }
 0x30b   : > { %v3786_v7 = vpop.f32.mrb[53].mxu1  ;;  %v4691_v30 = vmul.f32 %v6145_v33, %v6145_v33  ;;  %v6150_v10 = vadd.f32 %v8285_v36, %v5934_v13  ;;  %v5999_v52 = vpop.f32.mrb[198].mxu0  ;;  %v4183_v34 = vrot.slane %v4076_v0, 2  ;;  %v4185_v55 = vrot.slane %v5998_v9, 2 }
 0x30c   : > { %v6156_v51 = vadd.f32 %v8290_v25, %v3786_v7  ;;  %v5935_v18 = vpop.f32.mrb[54].mxu1  ;;  %4620 = vst.msk [vmem:[%s8358_s24 + $0x40] sm:$0xf] %vm4603_vm3, %v5056_v45  ;;  %4621 = vst.msk [vmem:[%s8358_s24 + $0x44] sm:$0xf] %vm4603_vm3, %v5057_v29  ;;  %v4652_v23 = vadd.f32 %v6145_v33, %v4651_v58  ;;  %v4721_v28 = vadd.f32 %v4720_v59, %v4690_v3  ;;  %v4079_v20 = vpop.f32.mrb[199].mxu0 }
 0x30d   : > { %v6162_v41 = vadd.f32 %v8295_v27, %v5935_v18  ;;  %v3789_v49 = vpop.f32.mrb[55].mxu1  ;;  %v4186_v12 = vrot.slane %v5999_v52, 2  ;;  %v4184_v38 = vrot.slane %v4079_v20, 2  ;;  %v4222_v36 = vsel %vm1645_vm2, %v4182_v4, %v4183_v34 }
 0x30e   : > { %v4722_v50 = vadd.f32 %v4721_v28, %v4691_v30  ;;  %v6139_v25 = vadd.f32 %v6138_v60, %v4222_v36 }
 0x30f   : > { %v4219_v32 = vsel %vm1645_vm2, %v4185_v55, %v4186_v12  ;;  %v4221_v62 = vsel %vm1645_vm2, %v4183_v34, %v4184_v38 }
 0x310   : > { %v6151_v15 = vadd.f32 %v6150_v10, %v4219_v32  ;;  %v6157_v22 = vadd.f32 %v6156_v51, %v4221_v62  ;;  %v5058_v27 = vpack.c.bf16 %v6139_v25, %v6139_v25  ;;  %v4653_v56 = vadd.f32 %v6139_v25, %v4652_v23 }
 0x311   : > { %v4692_v6 = vmul.f32 %v6139_v25, %v6139_v25  ;;  %v6002_v2 = vpop.f32.mrb[200].mxu0 }
 0x312   : > { %v5938_v26 = vpop.f32.mrb[56].mxu1  ;;  %v5060_v19 = vpack.c.bf16 %v6151_v15, %v6151_v15  ;;  %v5059_v53 = vpack.c.bf16 %v6157_v22, %v6157_v22  ;;  %v4693_v44 = vmul.f32 %v6157_v22, %v6157_v22  ;;  %v4092_v54 = vpop.f32.mrb[201].mxu0  ;;  %4622 = vst.msk [vmem:[%s8358_s24 + $0x48] sm:$0xf] %vm4603_vm3, %v5058_v27  ;;  %v4654_v60 = vadd.f32 %v6157_v22, %v4653_v56 }
 0x313   : > { %v3802_v48 = vpop.f32.mrb[57].mxu1  ;;  %v4723_v31 = vadd.f32 %v4722_v50, %v4692_v6  ;;  %v6168_v8 = vadd.f32 %v8300_v37, %v5938_v26  ;;  %v6003_v39 = vpop.f32.mrb[202].mxu0  ;;  %v4694_v63 = vmul.f32 %v6151_v15, %v6151_v15  ;;  %v4189_v61 = vrot.slane %v6002_v2, 2 }
 0x314   : > { %v5939_v16 = vpop.f32.mrb[58].mxu1  ;;  %4624 = vst.msk [vmem:[%s8358_s24 + $0x50] sm:$0xf] %vm4603_vm3, %v5060_v19  ;;  %4623 = vst.msk [vmem:[%s8358_s24 + $0x4c] sm:$0xf] %vm4603_vm3, %v5059_v53  ;;  %v4187_v46 = vrot.slane %v4092_v54, 2  ;;  %v4655_v33 = vadd.f32 %v6151_v15, %v4654_v60 }
 0x315   : > { %v4190_v47 = vrot.slane %v6003_v39, 2  ;;  %v3805_v42 = vpop.f32.mrb[59].mxu1  ;;  %v4095_v59 = vpop.f32.mrb[203].mxu0  ;;  %v4724_v11 = vadd.f32 %v4723_v31, %v4693_v44 }
 0x316   : > { %v6174_v13 = vadd.f32 %v8305_v1, %v3805_v42  ;;  %v4188_v9 = vrot.slane %v4095_v59, 2  ;;  %v4218_v37 = vsel %vm1645_vm2, %v4186_v12, %v4187_v46 }
 0x317   : > { %v4215_v45 = vsel %vm1645_vm2, %v4189_v61, %v4190_v47  ;;  %v6163_v29 = vadd.f32 %v6162_v41, %v4218_v37  ;;  %v4725_v58 = vadd.f32 %v4724_v11, %v4694_v63 }
 0x318   : > { %v6169_v3 = vadd.f32 %v6168_v8, %v4215_v45  ;;  %v4216_v7 = vsel %vm1645_vm2, %v4188_v9, %v4189_v61 }
 0x319   : > { %v6175_v0 = vadd.f32 %v6174_v13, %v4216_v7  ;;  %v5061_v4 = vpack.c.bf16 %v6163_v29, %v6163_v29  ;;  %v4656_v30 = vadd.f32 %v6163_v29, %v4655_v33  ;;  %v4695_v10 = vmul.f32 %v6163_v29, %v6163_v29  ;;  %v6006_v18 = vpop.f32.mrb[204].mxu0 }
 0x31a   : > { %v5063_v1 = vpack.c.bf16 %v6169_v3, %v6169_v3  ;;  %v5942_v51 = vpop.f32.mrb[60].mxu1  ;;  %v4108_v34 = vpop.f32.mrb[205].mxu0  ;;  %v4697_v38 = vmul.f32 %v6169_v3, %v6169_v3  ;;  %v4193_v50 = vrot.slane %v6006_v18, 2 }
 0x31b   : > { %v5062_v52 = vpack.c.bf16 %v6175_v0, %v6175_v0  ;;  %v4696_v23 = vmul.f32 %v6175_v0, %v6175_v0  ;;  %v3818_v28 = vpop.f32.mrb[61].mxu1  ;;  %4625 = vst.msk [vmem:[%s8358_s24 + $0x54] sm:$0xf] %vm4603_vm3, %v5061_v4  ;;  %v4726_v41 = vadd.f32 %v4725_v58, %v4695_v10  ;;  %v4657_v49 = vadd.f32 %v6175_v0, %v4656_v30  ;;  %v6007_v12 = vpop.f32.mrb[206].mxu0 }
 0x31c   : > { %4627 = vst.msk [vmem:[%s8358_s24 + $0x5c] sm:$0xf] %vm4603_vm3, %v5063_v1  ;;  %v6180_v20 = vadd.f32 %v8312_v35, %v3818_v28  ;;  %v5943_v55 = vpop.f32.mrb[62].mxu1  ;;  %v4191_v36 = vrot.slane %v4108_v34, 2  ;;  %v4111_v62 = vpop.f32.mrb[207].mxu0  ;;  %v4194_v8 = vrot.slane %v6007_v12, 2 }
 0x31d   : > { %4626 = vst.msk [vmem:[%s8358_s24 + $0x58] sm:$0xf] %vm4603_vm3, %v5062_v52  ;;  %v6186_v25 = vadd.f32 %v8320_v24, %v5943_v55  ;;  %v3821_v32 = vpop.f32.mrb[63].mxu1  ;;  %v4727_v15 = vadd.f32 %v4726_v41, %v4696_v23  ;;  %v4192_v27 = vrot.slane %v4111_v62, 2  ;;  %v4658_v56 = vadd.f32 %v6169_v3, %v4657_v49 }
 0x31e   : > { %v6192_v22 = vadd.f32 %v8315_v17, %v3821_v32 }
 0x31f   : > { %v4212_v6 = vsel %vm1645_vm2, %v4192_v27, %v4193_v50  ;;  %v4213_v35 = vsel %vm1645_vm2, %v4191_v36, %v4192_v27  ;;  %v4728_v26 = vadd.f32 %v4727_v15, %v4697_v38 }
 0x320   : > { %v6181_v2 = vadd.f32 %v6180_v20, %v4213_v35  ;;  %v6193_v19 = vadd.f32 %v6192_v22, %v4212_v6 }
 0x321   : > { %v6010_v24 = vpop.f32.mrb[208].mxu0 }
 0x322   : > { %v5946_v53 = vpop.f32.mrb[64].mxu1  ;;  %v5064_v44 = vpack.c.bf16 %v6181_v2, %v6181_v2  ;;  %v5065_v48 = vpack.c.bf16 %v6193_v19, %v6193_v19  ;;  %v4659_v54 = vadd.f32 %v6181_v2, %v4658_v56  ;;  %v4698_v31 = vmul.f32 %v6181_v2, %v6181_v2  ;;  %v4124_v60 = vpop.f32.mrb[209].mxu0 }
 0x323   : > { %v3834_v17 = vpop.f32.mrb[65].mxu1  ;;  %v4699_v16 = vmul.f32 %v6193_v19, %v6193_v19  ;;  %v6198_v39 = vadd.f32 %v8325_v57, %v5946_v53  ;;  %v6011_v46 = vpop.f32.mrb[210].mxu0  ;;  %v4195_v59 = vrot.slane %v4124_v60, 2  ;;  %v4197_v9 = vrot.slane %v6010_v24, 2 }
 0x324   : > { %v6204_v63 = vadd.f32 %v8330_v43, %v3834_v17  ;;  %v5947_v61 = vpop.f32.mrb[66].mxu1  ;;  %4628 = vst.msk [vmem:[%s8358_s24 + $0x60] sm:$0xf] %vm4603_vm3, %v5064_v44  ;;  %4629 = vst.msk [vmem:[%s8358_s24 + $0x64] sm:$0xf] %vm4603_vm3, %v5065_v48  ;;  %v4660_v47 = vadd.f32 %v6193_v19, %v4659_v54  ;;  %v4729_v42 = vadd.f32 %v4728_v26, %v4698_v31  ;;  %v4127_v13 = vpop.f32.mrb[211].mxu0 }
 0x325   : > { %v6210_v11 = vadd.f32 %v8335_v14, %v5947_v61  ;;  %v3837_v33 = vpop.f32.mrb[67].mxu1  ;;  %v4198_v37 = vrot.slane %v6011_v46, 2  ;;  %v4196_v45 = vrot.slane %v4127_v13, 2  ;;  %v4210_v57 = vsel %vm1645_vm2, %v4194_v8, %v4195_v59 }
 0x326   : > { %v4730_v29 = vadd.f32 %v4729_v42, %v4699_v16  ;;  %v6187_v43 = vadd.f32 %v6186_v25, %v4210_v57 }
 0x327   : > { %v4207_v58 = vsel %vm1645_vm2, %v4197_v9, %v4198_v37  ;;  %v4209_v3 = vsel %vm1645_vm2, %v4195_v59, %v4196_v45 }
 0x328   : > { %v6199_v7 = vadd.f32 %v6198_v39, %v4207_v58  ;;  %v6205_v0 = vadd.f32 %v6204_v63, %v4209_v3  ;;  %v5066_v14 = vpack.c.bf16 %v6187_v43, %v6187_v43  ;;  %v4661_v4 = vadd.f32 %v6187_v43, %v4660_v47 }
 0x329   : > { %v4700_v30 = vmul.f32 %v6187_v43, %v6187_v43  ;;  %v6014_v1 = vpop.f32.mrb[212].mxu0 }
 0x32a   : > { %v5950_v10 = vpop.f32.mrb[68].mxu1  ;;  %v5068_v51 = vpack.c.bf16 %v6199_v7, %v6199_v7  ;;  %v5067_v18 = vpack.c.bf16 %v6205_v0, %v6205_v0  ;;  %v4701_v52 = vmul.f32 %v6205_v0, %v6205_v0  ;;  %v4140_v28 = vpop.f32.mrb[213].mxu0  ;;  %4630 = vst.msk [vmem:[%s8358_s24 + $0x68] sm:$0xf] %vm4603_vm3, %v5066_v14  ;;  %v4662_v41 = vadd.f32 %v6205_v0, %v4661_v4 }
 0x32b   : > { %v3850_v23 = vpop.f32.mrb[69].mxu1  ;;  %v4731_v34 = vadd.f32 %v4730_v29, %v4700_v30  ;;  %v6216_v49 = vadd.f32 %v8340_v21, %v5950_v10  ;;  %v6015_v55 = vpop.f32.mrb[214].mxu0  ;;  %v4702_v12 = vmul.f32 %v6199_v7, %v6199_v7  ;;  %v4201_v38 = vrot.slane %v6014_v1, 2 }
 0x32c   : > { %v5951_v20 = vpop.f32.mrb[70].mxu1  ;;  %4632 = vst.msk [vmem:[%s8358_s24 + $0x70] sm:$0xf] %vm4603_vm3, %v5068_v51  ;;  %4631 = vst.msk [vmem:[%s8358_s24 + $0x6c] sm:$0xf] %vm4603_vm3, %v5067_v18  ;;  %v4199_v50 = vrot.slane %v4140_v28, 2  ;;  %v4663_v15 = vadd.f32 %v6199_v7, %v4662_v41 }
 0x32d   : > { %v4202_v36 = vrot.slane %v6015_v55, 2  ;;  %v3853_v25 = vpop.f32.mrb[71].mxu1  ;;  %v4143_v32 = vpop.f32.mrb[215].mxu0  ;;  %v4732_v62 = vadd.f32 %v4731_v34, %v4701_v52 }
 0x32e   : > { %v6222_v22 = vadd.f32 %v8345_v40, %v3853_v25  ;;  %v4200_v27 = vrot.slane %v4143_v32, 2  ;;  %v4206_v21 = vsel %vm1645_vm2, %v4198_v37, %v4199_v50 }
 0x32f   : > { %v4203_v56 = vsel %vm1645_vm2, %v4201_v38, %v4202_v36  ;;  %v6211_v6 = vadd.f32 %v6210_v11, %v4206_v21  ;;  %v4733_v35 = vadd.f32 %v4732_v62, %v4702_v12 }
 0x330   : > { %v6217_v26 = vadd.f32 %v6216_v49, %v4203_v56  ;;  %v4204_v2 = vsel %vm1645_vm2, %v4200_v27, %v4201_v38 }
 0x331   : > { %v6223_v19 = vadd.f32 %v6222_v22, %v4204_v2  ;;  %v5069_v40 = vpack.c.bf16 %v6211_v6, %v6211_v6  ;;  %v4664_v53 = vadd.f32 %v6211_v6, %v4663_v15  ;;  %v4703_v24 = vmul.f32 %v6211_v6, %v6211_v6 }
 0x332   : > { %v5071_v44 = vpack.c.bf16 %v6217_v26, %v6217_v26  ;;  %v4705_v17 = vmul.f32 %v6217_v26, %v6217_v26 }
 0x333   : > { %v5070_v48 = vpack.c.bf16 %v6223_v19, %v6223_v19  ;;  %v4704_v54 = vmul.f32 %v6223_v19, %v6223_v19  ;;  %4633 = vst.msk [vmem:[%s8358_s24 + $0x74] sm:$0xf] %vm4603_vm3, %v5069_v40  ;;  %v4734_v5 = vadd.f32 %v4733_v35, %v4703_v24  ;;  %v4665_v31 = vadd.f32 %v6223_v19, %v4664_v53 }
 0x334   : > { %4635 = vst.msk [vmem:[%s8358_s24 + $0x7c] sm:$0xf] %vm4603_vm3, %v5071_v44 }
 0x335   : > { %4634 = vst.msk [vmem:[%s8358_s24 + $0x78] sm:$0xf] %vm4603_vm3, %v5070_v48  ;;  %v4666_v60 = vadd.f32 %v6217_v26, %v4665_v31  ;;  %v4735_v8 = vadd.f32 %v4734_v5, %v4704_v54 }
 0x336   : > { %6609 = shalt.err (!%p6606_p13)
}
 0x337   : > { %s6610_s7 = scalar_lea.hbm %s8510_s30, 2048  ;;  %s6614_s15 = scalar_lea.hbm %s8597_s4, 4096 }
 0x338   : > { %p6611_p0 = scmp.ne.s32.totalorder %s8510_s30, %s6610_s7  ;;  %p6615_p9 = scmp.lt.u32.totalorder %s8510_s30, %s8597_s4 }
 0x339   : > { %p6616_p12 = scmp.lt.u32.totalorder %s6614_s15, %s6610_s7  ;;  %p6618_p1 = scmp.lt.u32.totalorder %s6610_s7, %s8510_s30 }
 0x33a   : > { %p6612_p5 = pnand %p6611_p0, %p6892_p6 }
 0x33b   : > { %p6617_p2 = por %p6616_p12, %p6615_p9 }
 0x33c   : > { %p6613_p11 = pneg %p6612_p5 }
 0x33d   : > { %p6619_p4 = por %p6618_p1, %p6617_p2 }
 0x33f   : > { %p6620_p8 = pnand %p6619_p4, %p6613_p11 }
 0x341   : > { %6623 = shalt.err (!%p6620_p8)
}
 0x342   : > { %s6713_s14 = smov 64   ;;  %s6714_s11 = smov 4   ;;  %v4667_v16 = vrot.slane %v4666_v60, 4  ;;  %v4736_v39 = vadd.f32 %v4735_v8, %v4705_v17 }
 0x343   : > { %6334 = dma.vmem_to_hbm [thread:$0]  (%p6892_p6), %s8512_s13, 2048, %s8510_s30, %s4745_s28, %s6713_s14, %s6713_s14, %s6714_s11  }
 0x344   : > { %v4668_v63 = vadd.f32 %v4667_v16, %v4666_v60  ;;  %v4737_v61 = vrot.slane %v4736_v39, 4  ;;  %s4925_s10 = sshll.u32 %s6943_s17, 1  ;;  %s5036_s29 = sshll.u32 %s6767_s22, 5 }
 0x345   : > { %s293_s12 = scalar_lea.vmem [#allocation13], %s4925_s10  ;;  %s8549_s28 = scalar_lea.hbm %s8598_s5, %s5036_s29 }
 0x346   : > { %v4669_v46 = vrot.slane %v4668_v63, 2  ;;  %v4738_v47 = vadd.f32 %v4737_v61, %v4736_v39  ;;  %s4779_s23 = sshll.u32 %s293_s12, 4  ;;  %s4750_s7 = scalar_lea.sflag [#allocation14], %s6943_s17  ;;  %s8551_s23 = int_to_ptr.vmem [resolvable:$true] %s4779_s23 }
 0x347   : > { %s6624_s8 = scalar_lea.vmem %s8551_s23, 32  ;;  %s6715_s22 = smov [#allocation13]  }
 0x348   : > { %v4670_v42 = vadd.f32 %v4669_v46, %v4668_v63  ;;  %v4739_v59 = vrot.slane %v4738_v47, 2  ;;  %p6625_p3 = scmp.ne.s32.totalorder %s8551_s23, %s6624_s8  ;;  %s6628_s9 = sshll.u32 %s6715_s22, 4  ;;  %s6629_s9 = int_to_ptr.vmem [resolvable:$false] %s6628_s9 }
 0x349   : > { %s6630_s15 = scalar_lea.vmem %s6629_s9, 64  ;;  %p6631_p13 = scmp.lt.s32.totalorder %s8551_s23, %s6629_s9 }
 0x34a   : > { %v4671_v11 = vrot.slane %v4670_v42, 1  ;;  %v4740_v33 = vadd.f32 %v4739_v59, %v4738_v47  ;;  %p6626_p7 = pnand %p6625_p3, %p6892_p6  ;;  %p6632_p0 = scmp.lt.s32.totalorder %s6630_s15, %s6624_s8 }
 0x34c   : > { %v4672_v13 = vadd.f32 %v4671_v11, %v4670_v42  ;;  %v4741_v9 = vrot.slane %v4740_v33, 1  ;;  %p6627_p10 = pneg %p6626_p7  ;;  %p6633_p5 = por %p6632_p0, %p6631_p13 }
 0x34e   : > { %4673 = vst [vmem:[%s293_s12] sm:$0x1] %v4672_v13  ;;  %v4742_v37 = vadd.f32 %v4741_v9, %v4740_v33  ;;  %p6634_p11 = pnand %p6633_p5, %p6627_p10 }
 0x350   : > { %4743 = vst [vmem:[%s293_s12 + $0x1] sm:$0x1] %v4742_v37 }
 0x351   : > { %6637 = shalt.err (!%p6634_p11)
}
 0x352   : > { %s6638_s17 = scalar_lea.hbm %s8549_s28, 32  ;;  %s6642_s14 = scalar_lea.hbm %s8598_s5, 64 }
 0x353   : > { %p6639_p9 = scmp.ne.s32.totalorder %s8549_s28, %s6638_s17  ;;  %p6643_p1 = scmp.lt.u32.totalorder %s8549_s28, %s8598_s5 }
 0x354   : > { %p6644_p4 = scmp.lt.u32.totalorder %s6642_s14, %s6638_s17  ;;  %p6646_p3 = scmp.lt.u32.totalorder %s6638_s17, %s8549_s28 }
 0x355   : > { %p6640_p12 = pnand %p6639_p9, %p6892_p6 }
 0x356   : > { %p6645_p8 = por %p6644_p4, %p6643_p1 }
 0x357   : > { %p6641_p2 = pneg %p6640_p12 }
 0x358   : > { %p6647_p7 = por %p6646_p3, %p6645_p8 }
 0x35a   : > { %p6648_p10 = pnand %p6647_p7, %p6641_p2 }
 0x35c   : > { %6651 = shalt.err (!%p6648_p10)
}
 0x35d   : > { %6335 = dma.vmem_to_hbm [thread:$0]  (%p6892_p6), %s8551_s23, 32, %s8549_s28, %s4750_s7  }
 0x35e PF: > { %s4791_s29 = sand.u32 1, %s6690_s18   ;;  %p8686_p13 = scmp.ne.s32.totalorder %s8619_s25, 0 }
 0x35f   : > { %p8687_p0 = scmp.ge.s32.totalorder %s6702_s21, 2  ;;  %s4792_s12 = scalar_lea.sflag [#allocation6], %s4791_s29 }
 0x361   : > { %p6353_p5 = pnand %p8687_p0, %p8686_p13 }
 0x363   : > { %6681 = dma.done.wait (!%p6353_p5), %s4792_s12, 2048  }
 0x364   : > { %6683 = vsyncadd (!%p6353_p5), %s4792_s12, 4294965248  ;;  %s4801_s13 = scalar_lea.sflag [#allocation14], %s4791_s29 }
 0x365   : > { %6685 = dma.done.wait (!%p6353_p5), %s4801_s13, 32  }
 0x366   : > { %6687 = vsyncadd (!%p6353_p5), %s4801_s13, 4294967264  ;;  %p24_p6 = scmp.ge.s32.totalorder %s6878_s16, 4   ;;  %s8688_s18 = smov %s6694_s19 }
 0x367   : > { %s8689_s19 = smov %s6698_s20  ;;  %s8690_s20 = smov %s6888_s27 }
 0x368   : > { %s8691_s21 = smov %s6878_s16  ;;  %26 = sbr.rel (!%p24_p6) target bundleno = 9 (0x9), region = 120 }
 0x36f   :  { %4806 = vsyncpa [#allocation5], 1 }
 0x370   :  { %4808 = vsyncpa [#allocation5 + $0x1], 1 }
 0x371   :  { %4809 = vsyncpa [#allocation8], 1 }
 0x372   :  { %4810 = vsyncpa [#allocation11], 1 }
 0x373   :  { %4811 = vsyncpa [#allocation6], 1 }
 0x374   :  { %4813 = vsyncpa [#allocation6 + $0x1], 1 }
 0x375   :  { %4814 = vsyncpa [#allocation14], 1 }
 0x376   :  { %4816 = vsyncpa [#allocation14 + $0x1], 1 }

</bundles_post_ra>
